<compile_context>
chip_gen: v5e
topology: v5e:2x2
jax: 0.10.0
libtpu: 0.0.40
codegen_flags: <defaults>
</compile_context>

<pallas_src>
import numpy as np
import jax
import jax.numpy as jnp
from jax.experimental import pallas as pl
from jax.experimental.pallas import tpu as pltpu

MAX_NB = 16
HIDDEN = 32
LATENT = 16
VOCAB = 24

VOCAB_PAD = 128                # lane-dense padded vocab / stats width
TVEC_PAD = HIDDEN              # tree-vec padded to 32 lanes inside the step slab
OUT_W = 4 * HIDDEN             # [new_h | x | sum_o | tvec_pad] = 128 lanes
STOP_W = 2 * HIDDEN + LATENT   # stop-head feature width (80)


def _vspec():
    # whole-array block resident in VMEM
    return pl.BlockSpec(memory_space=pltpu.MemorySpace.VMEM)


def _round_up(n, m):
    return ((n + m - 1) // m) * m


# ----------------------------------------------------------------------------
# Pallas kernels
# ----------------------------------------------------------------------------
def step_kernel(h_idx_ref, o_idx_ref, w_idx_ref,        # scalar prefetch (SMEM)
                x_ref, tvec_ref,                         # per-step (1, NP, *) blocks
                wx_ref, bx_ref, ur_ref, wg_ref,          # weights (VMEM resident)
                out_ref,                                 # per-step (1, NP, 128) block
                msg_ref):                                # (R, 1, H) persistent VMEM msg table
    """One decoding timestep: gather neighbor messages from the message table,
    run the tree-GRU + neighbor sums, emit the lane-dense stop/pred slab, and
    scatter the new messages back into the table."""
    t = pl.program_id(0)
    H = HIDDEN
    NP = x_ref.shape[1]

    @pl.when(t == 0)
    def _init():
        # row 0 of the table is the zero-padding message; zero everything once.
        msg_ref[...] = jnp.zeros_like(msg_ref)

    x = x_ref[0]                                                        # (NP, H)

    # fused x-gate matmul: one (NP,H)@(H,3H) push -> [z_x | r_x | h_x] (+biases)
    xg = jnp.dot(x, wx_ref[...], preferred_element_type=jnp.float32) + bx_ref[...]
    xz = xg[:, 0:H]
    xr = xg[:, H:2 * H]
    xh = xg[:, 2 * H:3 * H]

    # gather neighbor messages from the VMEM message table (slab-major layout:
    # slab k holds the k-th neighbor message of every node slot).
    h_slabs, o_slabs = [], []
    for k in range(MAX_NB):
        h_rows = [msg_ref[h_idx_ref[t, n * MAX_NB + k]] for n in range(NP)]
        o_rows = [msg_ref[o_idx_ref[t, n * MAX_NB + k]] for n in range(NP)]
        h_slabs.append(jnp.concatenate(h_rows, axis=0))                 # (NP, H)
        o_slabs.append(jnp.concatenate(o_rows, axis=0))                 # (NP, H)
    hf = jnp.concatenate(h_slabs, axis=0)                               # (MAX_NB*NP, H)

    # one MXU matmul for U_r over the whole flattened GRU-neighbor buffer
    r2 = jnp.dot(hf, ur_ref[...], preferred_element_type=jnp.float32)   # (MAX_NB*NP, H)

    # neighbor reductions: unrolled slab accumulation on the VPU
    sum_h = jnp.zeros((NP, H), jnp.float32)
    sum_o = jnp.zeros((NP, H), jnp.float32)
    sum_g = jnp.zeros((NP, H), jnp.float32)
    for k in range(MAX_NB):
        hk = h_slabs[k]
        r_k = jax.nn.sigmoid(xr + r2[k * NP:(k + 1) * NP, :])
        sum_h = sum_h + hk
        sum_g = sum_g + r_k * hk
        sum_o = sum_o + o_slabs[k]

    # fused (block-diagonal) h-side gate matmul: [sum_h | sum_g] @ [[Wz_h,0],[0,Wh_h]]
    zg = jnp.dot(jnp.concatenate([sum_h, sum_g], axis=1), wg_ref[...],
                 preferred_element_type=jnp.float32)                    # (NP, 2H)
    z = jax.nn.sigmoid(xz + zg[:, 0:H])
    pre_h = jnp.tanh(xh + zg[:, H:2 * H])
    new_h = (1.0 - z) * sum_h + z * pre_h

    # single lane-dense 128-wide store: [new_h | x | sum_o | tvec_pad]
    out_ref[0] = jnp.concatenate([new_h, x, sum_o, tvec_ref[0]], axis=1)

    # scatter new messages back into the table (padded slots -> trash row,
    # which is never gathered).  All gathers above happen before these stores,
    # matching the PyTorch read-then-write ordering within a step.
    for n in range(NP):
        msg_ref[w_idx_ref[t, n]] = new_h[n:n + 1, :]


def heads_kernel(pred_in_ref, pred_tgt_ref, stop_in_ref, stop_tgt_ref,
                 w_ref, bw_ref, wo_ref, bo_ref,
                 u_ref, bu_ref, us_ref, bus_ref,
                 stats_ref):
    """Merged label-prediction head + stop head.  Emits one lane-dense stats
    row: [pred_loss_sum, pred_acc, stop_loss_sum, stop_acc, 0, ...].
    NOTE: inputs must contain only real (unpadded) rows - the accuracy
    denominators are the in-kernel row counts."""
    # --- prediction head: ReLU(W x) -> W_o, sum-CE + first-argmax accuracy ---
    xp = pred_in_ref[...]                                               # (M, H+L)
    M = xp.shape[0]
    v = jnp.maximum(
        jnp.dot(xp, w_ref[...], preferred_element_type=jnp.float32) + bw_ref[...], 0.0)
    scores = jnp.dot(v, wo_ref[...], preferred_element_type=jnp.float32) + bo_ref[...]
    col = jax.lax.broadcasted_iota(jnp.int32, (M, VOCAB_PAD), 1)
    scores = jnp.where(col < VOCAB, scores, -1e30)                      # mask padded lanes
    tgt = pred_tgt_ref[...]                                             # (M, 1) int32
    onehot = (col == tgt).astype(jnp.float32)
    row_max = jnp.max(scores, axis=1, keepdims=True)
    lse = row_max + jnp.log(jnp.sum(jnp.exp(scores - row_max), axis=1, keepdims=True))
    tgt_logit = jnp.sum(scores * onehot, axis=1, keepdims=True)
    pred_loss = jnp.sum(lse - tgt_logit, keepdims=True)                 # CE(size_average=False)
    preds = jnp.min(jnp.where(scores == row_max, col, VOCAB_PAD), axis=1, keepdims=True)
    pred_acc = jnp.sum((preds == tgt).astype(jnp.float32), keepdims=True) / float(max(M, 1))

    # --- stop head: ReLU(U x) -> U_s, sum-BCE-with-logits + accuracy ---
    xs = stop_in_ref[...]                                               # (S, 2H+L)
    S = xs.shape[0]
    vs = jnp.maximum(
        jnp.dot(xs, u_ref[...], preferred_element_type=jnp.float32) + bu_ref[...], 0.0)
    # width-1 output head as a VPU mul + XLU reduce (no width-1 MXU matmul)
    s = jnp.sum(vs * us_ref[...], axis=1, keepdims=True) + bus_ref[...]
    tt = stop_tgt_ref[...]                                              # (S, 1) float32
    bce = jnp.maximum(s, 0.0) - s * tt + jnp.log(1.0 + jnp.exp(-jnp.abs(s)))
    stop_loss = jnp.sum(bce, keepdims=True)
    stops = (s >= 0.0).astype(jnp.float32)
    stop_acc = jnp.sum((stops == tt).astype(jnp.float32), keepdims=True) / float(max(S, 1))

    lane = jax.lax.broadcasted_iota(jnp.int32, (1, VOCAB_PAD), 1)
    stats_ref[...] = (jnp.where(lane == 0, pred_loss, 0.0) +
                      jnp.where(lane == 1, pred_acc, 0.0) +
                      jnp.where(lane == 2, stop_loss, 0.0) +
                      jnp.where(lane == 3, stop_acc, 0.0))


# ----------------------------------------------------------------------------
# pallas_call wrappers
# ----------------------------------------------------------------------------
def decode_steps_pallas(h_idx, o_idx, w_idx, x_emb, tvec_pad, params, n_msg_rows):
    """All decoding timesteps in ONE gridded pallas_call (grid over timesteps)."""
    T_total, NP, _ = x_emb.shape
    grid_spec = pltpu.PrefetchScalarGridSpec(
        num_scalar_prefetch=3,                      # h_idx, o_idx, w_idx -> SMEM
        grid=(T_total,),
        in_specs=[
            pl.BlockSpec((1, NP, HIDDEN), lambda t, *_: (t, 0, 0)),       # x embeddings
            pl.BlockSpec((1, NP, TVEC_PAD), lambda t, *_: (t, 0, 0)),     # tree vecs (padded)
            pl.BlockSpec((HIDDEN, 3 * HIDDEN), lambda t, *_: (0, 0)),     # fused x-gate W
            pl.BlockSpec((1, 3 * HIDDEN), lambda t, *_: (0, 0)),          # fused x-gate b
            pl.BlockSpec((HIDDEN, HIDDEN), lambda t, *_: (0, 0)),         # U_r
            pl.BlockSpec((2 * HIDDEN, 2 * HIDDEN), lambda t, *_: (0, 0)), # block-diag [Wz_h; Wh_h]
        ],
        out_specs=pl.BlockSpec((1, NP, OUT_W), lambda t, *_: (t, 0, 0)),
        scratch_shapes=[pltpu.VMEM((n_msg_rows, 1, HIDDEN), jnp.float32)],  # message table
    )
    return pl.pallas_call(
        step_kernel,
        out_shape=jax.ShapeDtypeStruct((T_total, NP, OUT_W), jnp.float32),
        grid_spec=grid_spec,
        compiler_params=pltpu.CompilerParams(
            # message table is carried sequentially across timesteps
            dimension_semantics=("arbitrary",)),
    )(h_idx, o_idx, w_idx, x_emb, tvec_pad,
      params["w_all_x"], params["b_all_x"], params["ur"], params["w_gate_h"])


def heads_pallas(pred_in, pred_tgt, stop_in, stop_tgt, p):
    ins = (pred_in, pred_tgt, stop_in, stop_tgt,
           p["w_T"], p["b_w"], p["wo_pad"], p["b_wo_pad"],
           p["u_T"], p["b_u"], p["us_row"], p["b_us"])
    return pl.pallas_call(
        heads_kernel,
        out_shape=jax.ShapeDtypeStruct((1, VOCAB_PAD), jnp.float32),
        in_specs=[_vspec() for _ in ins],
        out_specs=_vspec(),
    )(*ins)


# ----------------------------------------------------------------------------
# host-side tree machinery (mirrors the PyTorch forward())
# ----------------------------------------------------------------------------
class FragmentNode:
    def __init__(self, wid):
        self.wid = wid
        self.idx = -1
        self.neighbors = []

    def add_neighbor(self, other):
        self.neighbors.append(other)


class FragmentTree:
    def __init__(self):
        self.nodes = []


def dfs(stack, x, fa):
    for y in x.neighbors:
        if y.idx == fa.idx:
            continue
        stack.append((x, y, 1))
        dfs(stack, y, x)
        stack.append((y, x, 0))


def build_tree(wids, edges):
    t = FragmentTree()
    for i, w in enumerate(wids):
        n = FragmentNode(w)
        n.idx = i
        t.nodes.append(n)
    for a, b in edges:
        t.nodes[a].add_neighbor(t.nodes[b])
        t.nodes[b].add_neighbor(t.nodes[a])
    return t


def ftdecoder_forward(tree_batch, tree_vecs, params):
    B = len(tree_batch)
    super_root = FragmentNode(0)
    super_root.idx = -1

    traces = []
    for tree in tree_batch:
        s = []
        dfs(s, tree.nodes[0], super_root)
        traces.append(s)
        for node in tree.nodes:
            node.neighbors = []

    max_iter = max(len(tr) for tr in traces)
    T_total = max_iter + 1                       # +1: final root "stop" pass
    NP = max(_round_up(B, 8), 8)                 # node slots per step (>= widest step)

    # ---- build the int32 edge schedule (pure host bookkeeping, no device ops) ----
    E = sum(len(tr) for tr in traces)            # one message per trace entry
    TRASH = E + 1                                # dump row for padded slots (never gathered)
    n_msg_rows = E + 2                           # row 0 = zero-padding message

    h_idx = np.zeros((T_total, NP * MAX_NB), np.int32)
    o_idx = np.zeros((T_total, NP * MAX_NB), np.int32)
    w_idx = np.full((T_total, NP), TRASH, np.int32)
    x_wid = np.zeros((T_total, NP), np.int32)
    bat_id = np.zeros((T_total, NP), np.int32)

    msgs_in = [dict() for _ in range(B)]         # node idx -> [(src idx, table row id)]
    stop_rows, stop_targets = [], []
    pred_rows, pred_targets = [], []
    next_edge = 1

    for t in range(max_iter):
        slot = 0
        for b, tr in enumerate(traces):
            if len(tr) <= t:
                continue
            node_x, real_y, direction = tr[t]
            n = slot
            slot += 1
            x_wid[t, n] = node_x.wid
            bat_id[t, n] = b
            inc = msgs_in[b].get(node_x.idx, [])
            gru = [eid for src, eid in inc if src != real_y.idx]
            for k, eid in enumerate(gru[:MAX_NB]):
                h_idx[t, n * MAX_NB + k] = eid
            for k, (_, eid) in enumerate(inc[:MAX_NB]):
                o_idx[t, n * MAX_NB + k] = eid
            eid_new = next_edge
            next_edge += 1
            w_idx[t, n] = eid_new
            msgs_in[b].setdefault(real_y.idx, []).append((node_x.idx, eid_new))
            stop_rows.append(t * NP + n)
            stop_targets.append(float(direction))
            if direction == 1:
                pred_rows.append(t * NP + n)
                pred_targets.append(real_y.wid)

    # final pass: "stop" prediction at every root (new_h of this step is discarded,
    # so feeding o-messages as the GRU h-messages here is harmless).
    t = max_iter
    for b, tree in enumerate(tree_batch):
        node_x = tree.nodes[0]
        x_wid[t, b] = node_x.wid
        bat_id[t, b] = b
        inc = msgs_in[b].get(node_x.idx, [])
        for k, (_, eid) in enumerate(inc[:MAX_NB]):
            o_idx[t, b * MAX_NB + k] = eid
            h_idx[t, b * MAX_NB + k] = eid
        stop_rows.append(t * NP + b)
        stop_targets.append(0.0)

    assert next_edge - 1 == E

    # ---- one host gather each for the per-step embeddings / tree vectors ----
    emb = params["embedding"]
    x_emb = emb[jnp.asarray(x_wid.reshape(-1))].reshape(T_total, NP, HIDDEN)
    tvec = tree_vecs[jnp.asarray(bat_id.reshape(-1))].reshape(T_total, NP, LATENT)
    tvec_pad = jnp.concatenate(
        [tvec, jnp.zeros((T_total, NP, TVEC_PAD - LATENT), jnp.float32)], axis=2)

    # ---- single gridded pallas_call over all timesteps ----
    step_out = decode_steps_pallas(
        jnp.asarray(h_idx), jnp.asarray(o_idx), jnp.asarray(w_idx),
        x_emb, tvec_pad, params, n_msg_rows)

    flat = step_out.reshape(T_total * NP, OUT_W)

    # stop head inputs: [cur_x | cur_o | tree_vec] = slab columns 32..112
    stop_sel = jnp.asarray(np.asarray(stop_rows, np.int32))
    stop_in = flat[stop_sel][:, HIDDEN:HIDDEN + STOP_W]
    stop_tgt = jnp.asarray(np.asarray(stop_targets, np.float32)).reshape(-1, 1)

    # pred head inputs: roots first (zero hidden + tree_vec), then [new_h | tree_vec]
    pred_in0 = jnp.concatenate([jnp.zeros((B, HIDDEN), jnp.float32), tree_vecs], axis=1)
    root_tgts = [tree.nodes[0].wid for tree in tree_batch]
    if pred_rows:
        pred_sel = jnp.asarray(np.asarray(pred_rows, np.int32))
        pr = flat[pred_sel]
        pred_in = jnp.concatenate(
            [pred_in0,
             jnp.concatenate([pr[:, 0:HIDDEN],
                              pr[:, 3 * HIDDEN:3 * HIDDEN + LATENT]], axis=1)],
            axis=0)
    else:
        pred_in = pred_in0
    pred_tgt = jnp.asarray(np.asarray(root_tgts + pred_targets, np.int32)).reshape(-1, 1)

    # ---- merged pred + stop heads: one pallas_call, one (1,128) stats row ----
    stats = heads_pallas(pred_in, pred_tgt, stop_in, stop_tgt, params)
    pred_loss = stats[0, 0] / B
    pred_acc = stats[0, 1]
    stop_loss = stats[0, 2] / B
    stop_acc = stats[0, 3]
    return pred_loss, stop_loss, pred_acc, stop_acc


# ----------------------------------------------------------------------------
# deterministic parameter init (shapes from FTDecoder.__init__)
# ----------------------------------------------------------------------------
def init_params(key):
    ks = jax.random.split(key, 16)

    def rnd(k, shape, scale=0.1):
        return jax.random.normal(k, shape, dtype=jnp.float32) * scale

    H, L, V = HIDDEN, LATENT, VOCAB
    emb = rnd(ks[0], (V, H))                                   # nn.Embedding(V, H)
    Wz_w, Wz_b = rnd(ks[1], (H, 2 * H)), rnd(ks[2], (H,))      # W_z : Linear(2H, H)
    Ur_w = rnd(ks[3], (H, H))                                  # U_r : Linear(H, H, bias=False)
    Wr_w, Wr_b = rnd(ks[4], (H, H)), rnd(ks[5], (H,))          # W_r : Linear(H, H)
    Wh_w, Wh_b = rnd(ks[6], (H, 2 * H)), rnd(ks[7], (H,))      # W_h : Linear(2H, H)
    W_w, W_b = rnd(ks[8], (H, L + H)), rnd(ks[9], (H,))        # W   : Linear(L+H, H)
    U_w, U_b = rnd(ks[10], (H, L + 2 * H)), rnd(ks[11], (H,))  # U   : Linear(L+2H, H)
    Wo_w, Wo_b = rnd(ks[12], (V, H)), rnd(ks[13], (V,))        # W_o : Linear(H, V)
    Us_w, Us_b = rnd(ks[14], (1, H)), rnd(ks[15], (1,))        # U_s : Linear(H, 1)

    # fused x-gate weight [W_z|x, W_r, W_h|x] : (H, 3H), bias (1, 3H)
    w_all_x = jnp.concatenate([Wz_w[:, :H].T, Wr_w.T, Wh_w[:, :H].T], axis=1)
    b_all_x = jnp.concatenate([Wz_b, Wr_b, Wh_b]).reshape(1, 3 * H)

    # fused block-diagonal h-side gate weight: [sum_h | sum_g] @ [[Wz_h, 0], [0, Wh_h]]
    w_gate_h = jnp.zeros((2 * H, 2 * H), jnp.float32)
    w_gate_h = w_gate_h.at[:H, :H].set(Wz_w[:, H:].T)
    w_gate_h = w_gate_h.at[H:, H:].set(Wh_w[:, H:].T)

    # lane-dense padded vocab projection (padded lanes masked inside the kernel)
    wo_pad = jnp.concatenate([Wo_w.T, jnp.zeros((H, VOCAB_PAD - V), jnp.float32)], axis=1)
    b_wo_pad = jnp.concatenate([Wo_b, jnp.zeros((VOCAB_PAD - V,), jnp.float32)]).reshape(1, VOCAB_PAD)

    return {
        "embedding": emb,
        # GRU
        "w_all_x": w_all_x, "b_all_x": b_all_x,
        "ur": Ur_w.T, "w_gate_h": w_gate_h,
        # heads
        "w_T": W_w.T, "b_w": W_b.reshape(1, H),
        "u_T": U_w.T, "b_u": U_b.reshape(1, H),
        "wo_pad": wo_pad, "b_wo_pad": b_wo_pad,
        "us_row": Us_w, "b_us": Us_b.reshape(1, 1),
    }


if __name__ == "__main__":
    key = jax.random.PRNGKey(0)
    pkey, vkey = jax.random.split(key)
    params = init_params(pkey)

    # small synthetic fragment trees (wid < VOCAB)
    tree_batch = [
        build_tree([3, 7, 11], [(0, 1), (0, 2)]),
        build_tree([5, 2, 9, 14], [(0, 1), (1, 2), (1, 3)]),
    ]
    tree_vecs = jax.random.normal(vkey, (len(tree_batch), LATENT), dtype=jnp.float32)

    pred_loss, stop_loss, pred_acc, stop_acc = ftdecoder_forward(tree_batch, tree_vecs, params)
    jax.block_until_ready((pred_loss, stop_loss, pred_acc, stop_acc))
    print("KERNEL_OK")
</pallas_src>

<mosaic_0001>
module attributes {stable_mosaic.version = 11 : i64} {
  func.func @step_kernel(%arg0: i32, %arg1: memref<7x128xi32, #tpu.memory_space<smem>>, %arg2: memref<7x128xi32, #tpu.memory_space<smem>>, %arg3: memref<7x8xi32, #tpu.memory_space<smem>>, %arg4: memref<1x8x32xf32, #tpu.memory_space<vmem>>, %arg5: memref<1x8x32xf32, #tpu.memory_space<vmem>>, %arg6: memref<32x96xf32, #tpu.memory_space<vmem>>, %arg7: memref<1x96xf32, #tpu.memory_space<vmem>>, %arg8: memref<32x32xf32, #tpu.memory_space<vmem>>, %arg9: memref<64x64xf32, #tpu.memory_space<vmem>>, %arg10: memref<1x8x128xf32, #tpu.memory_space<vmem>>, %arg11: memref<12x1x32xf32, #tpu.memory_space<vmem>>) attributes {dimension_semantics = [#tpu.dimension_semantics<arbitrary>], iteration_bounds = array<i64: 7>, scalar_prefetch = 3 : i64, scratch_operands = 1 : i64, tpu.core_type = #tpu.core_type<tc>, window_params = [{transform_indices = @transform_0, window_bounds = array<i64: 1, 8, 32>}, {transform_indices = @transform_1, window_bounds = array<i64: 1, 8, 32>}, {pipeline_mode = #tpu.pipeline_mode<synchronous>, transform_indices = @transform_2, window_bounds = array<i64: 32, 96>}, {pipeline_mode = #tpu.pipeline_mode<synchronous>, transform_indices = @transform_3, window_bounds = array<i64: 1, 96>}, {pipeline_mode = #tpu.pipeline_mode<synchronous>, transform_indices = @transform_4, window_bounds = array<i64: 32, 32>}, {pipeline_mode = #tpu.pipeline_mode<synchronous>, transform_indices = @transform_5, window_bounds = array<i64: 64, 64>}, {transform_indices = @transform_6, window_bounds = array<i64: 1, 8, 128>}]} {
    %c0_i32 = arith.constant 0 : i32
    %0 = arith.cmpi eq, %arg0, %c0_i32 : i32
    %1 = arith.extui %0 : i1 to i32
    %c0_i32_0 = arith.constant 0 : i32
    %2 = arith.cmpi ne, %1, %c0_i32_0 : i32
    scf.if %2 {
      %cst_705 = arith.constant 0.000000e+00 : f32
      %1587 = vector.broadcast %cst_705 : f32 to vector<12x1x32xf32>
      %c0_706 = arith.constant 0 : index
      %c0_707 = arith.constant 0 : index
      %c0_708 = arith.constant 0 : index
      %1588 = vector.load %arg11[%c0_706, %c0_707, %c0_708] : memref<12x1x32xf32, #tpu.memory_space<vmem>>, vector<12x1x32xf32>
      tpu.vector_store %arg11[%c0_706, %c0_707, %c0_708], %1587 {strides = array<i32>} : memref<12x1x32xf32, #tpu.memory_space<vmem>>, vector<12x1x32xf32>,
    } else {
    }
    %c0 = arith.constant 0 : index
    %c0_1 = arith.constant 0 : index
    %c0_2 = arith.constant 0 : index
    %3 = vector.load %arg4[%c0, %c0_1, %c0_2] : memref<1x8x32xf32, #tpu.memory_space<vmem>>, vector<1x8x32xf32>
    %4 = vector.shape_cast %3 : vector<1x8x32xf32> to vector<8x32xf32>
    %c0_3 = arith.constant 0 : index
    %c0_4 = arith.constant 0 : index
    %5 = vector.load %arg6[%c0_3, %c0_4] : memref<32x96xf32, #tpu.memory_space<vmem>>, vector<32x96xf32>
    %cst = arith.constant dense<0.000000e+00> : vector<8x96xf32>
    %6 = tpu.matmul %4, %5, %cst {dimension_numbers = #tpu.dot_dimension_numbers<[1], [0], [0], [1], [0, 0, 1, 1], [], []>} : vector<8x32xf32>, vector<32x96xf32>, vector<8x96xf32> -> vector<8x96xf32>
    %c0_5 = arith.constant 0 : index
    %c0_6 = arith.constant 0 : index
    %7 = vector.load %arg7[%c0_5, %c0_6] : memref<1x96xf32, #tpu.memory_space<vmem>>, vector<1x96xf32>
    %8 = vector.broadcast %7 : vector<1x96xf32> to vector<8x96xf32>
    %9 = arith.addf %6, %8 : vector<8x96xf32>
    %10 = vector.extract_strided_slice %9 {offsets = [0, 0], sizes = [8, 32], strides = [1, 1]} : vector<8x96xf32> to vector<8x32xf32>
    %11 = vector.extract_strided_slice %9 {offsets = [0, 32], sizes = [8, 32], strides = [1, 1]} : vector<8x96xf32> to vector<8x32xf32>
    %12 = vector.extract_strided_slice %9 {offsets = [0, 64], sizes = [8, 32], strides = [1, 1]} : vector<8x96xf32> to vector<8x32xf32>
    %13 = arith.index_cast %arg0 : i32 to index
    %c0_7 = arith.constant 0 : index
    %14 = memref.load %arg1[%13, %c0_7] : memref<7x128xi32, #tpu.memory_space<smem>>
    %15 = arith.index_cast %14 : i32 to index
    %c0_8 = arith.constant 0 : index
    %c0_9 = arith.constant 0 : index
    %16 = vector.load %arg11[%15, %c0_8, %c0_9] : memref<12x1x32xf32, #tpu.memory_space<vmem>>, vector<1x1x32xf32>
    %17 = vector.shape_cast %16 : vector<1x1x32xf32> to vector<1x32xf32>
    %18 = arith.index_cast %arg0 : i32 to index
    %c16 = arith.constant 16 : index
    %19 = memref.load %arg1[%18, %c16] : memref<7x128xi32, #tpu.memory_space<smem>>
    %20 = arith.index_cast %19 : i32 to index
    %c0_10 = arith.constant 0 : index
    %c0_11 = arith.constant 0 : index
    %21 = vector.load %arg11[%20, %c0_10, %c0_11] : memref<12x1x32xf32, #tpu.memory_space<vmem>>, vector<1x1x32xf32>
    %22 = vector.shape_cast %21 : vector<1x1x32xf32> to vector<1x32xf32>
    %23 = arith.index_cast %arg0 : i32 to index
    %c32 = arith.constant 32 : index
    %24 = memref.load %arg1[%23, %c32] : memref<7x128xi32, #tpu.memory_space<smem>>
    %25 = arith.index_cast %24 : i32 to index
    %c0_12 = arith.constant 0 : index
    %c0_13 = arith.constant 0 : index
    %26 = vector.load %arg11[%25, %c0_12, %c0_13] : memref<12x1x32xf32, #tpu.memory_space<vmem>>, vector<1x1x32xf32>
    %27 = vector.shape_cast %26 : vector<1x1x32xf32> to vector<1x32xf32>
    %28 = arith.index_cast %arg0 : i32 to index
    %c48 = arith.constant 48 : index
    %29 = memref.load %arg1[%28, %c48] : memref<7x128xi32, #tpu.memory_space<smem>>
    %30 = arith.index_cast %29 : i32 to index
    %c0_14 = arith.constant 0 : index
    %c0_15 = arith.constant 0 : index
    %31 = vector.load %arg11[%30, %c0_14, %c0_15] : memref<12x1x32xf32, #tpu.memory_space<vmem>>, vector<1x1x32xf32>
    %32 = vector.shape_cast %31 : vector<1x1x32xf32> to vector<1x32xf32>
    %33 = arith.index_cast %arg0 : i32 to index
    %c64 = arith.constant 64 : index
    %34 = memref.load %arg1[%33, %c64] : memref<7x128xi32, #tpu.memory_space<smem>>
    %35 = arith.index_cast %34 : i32 to index
    %c0_16 = arith.constant 0 : index
    %c0_17 = arith.constant 0 : index
    %36 = vector.load %arg11[%35, %c0_16, %c0_17] : memref<12x1x32xf32, #tpu.memory_space<vmem>>, vector<1x1x32xf32>
    %37 = vector.shape_cast %36 : vector<1x1x32xf32> to vector<1x32xf32>
    %38 = arith.index_cast %arg0 : i32 to index
    %c80 = arith.constant 80 : index
    %39 = memref.load %arg1[%38, %c80] : memref<7x128xi32, #tpu.memory_space<smem>>
    %40 = arith.index_cast %39 : i32 to index
    %c0_18 = arith.constant 0 : index
    %c0_19 = arith.constant 0 : index
    %41 = vector.load %arg11[%40, %c0_18, %c0_19] : memref<12x1x32xf32, #tpu.memory_space<vmem>>, vector<1x1x32xf32>
    %42 = vector.shape_cast %41 : vector<1x1x32xf32> to vector<1x32xf32>
    %43 = arith.index_cast %arg0 : i32 to index
    %c96 = arith.constant 96 : index
    %44 = memref.load %arg1[%43, %c96] : memref<7x128xi32, #tpu.memory_space<smem>>
    %45 = arith.index_cast %44 : i32 to index
    %c0_20 = arith.constant 0 : index
    %c0_21 = arith.constant 0 : index
    %46 = vector.load %arg11[%45, %c0_20, %c0_21] : memref<12x1x32xf32, #tpu.memory_space<vmem>>, vector<1x1x32xf32>
    %47 = vector.shape_cast %46 : vector<1x1x32xf32> to vector<1x32xf32>
    %48 = arith.index_cast %arg0 : i32 to index
    %c112 = arith.constant 112 : index
    %49 = memref.load %arg1[%48, %c112] : memref<7x128xi32, #tpu.memory_space<smem>>
    %50 = arith.index_cast %49 : i32 to index
    %c0_22 = arith.constant 0 : index
    %c0_23 = arith.constant 0 : index
    %51 = vector.load %arg11[%50, %c0_22, %c0_23] : memref<12x1x32xf32, #tpu.memory_space<vmem>>, vector<1x1x32xf32>
    %52 = vector.shape_cast %51 : vector<1x1x32xf32> to vector<1x32xf32>
    %53 = arith.index_cast %arg0 : i32 to index
    %c0_24 = arith.constant 0 : index
    %54 = memref.load %arg2[%53, %c0_24] : memref<7x128xi32, #tpu.memory_space<smem>>
    %55 = arith.index_cast %54 : i32 to index
    %c0_25 = arith.constant 0 : index
    %c0_26 = arith.constant 0 : index
    %56 = vector.load %arg11[%55, %c0_25, %c0_26] : memref<12x1x32xf32, #tpu.memory_space<vmem>>, vector<1x1x32xf32>
    %57 = vector.shape_cast %56 : vector<1x1x32xf32> to vector<1x32xf32>
    %58 = arith.index_cast %arg0 : i32 to index
    %c16_27 = arith.constant 16 : index
    %59 = memref.load %arg2[%58, %c16_27] : memref<7x128xi32, #tpu.memory_space<smem>>
    %60 = arith.index_cast %59 : i32 to index
    %c0_28 = arith.constant 0 : index
    %c0_29 = arith.constant 0 : index
    %61 = vector.load %arg11[%60, %c0_28, %c0_29] : memref<12x1x32xf32, #tpu.memory_space<vmem>>, vector<1x1x32xf32>
    %62 = vector.shape_cast %61 : vector<1x1x32xf32> to vector<1x32xf32>
    %63 = arith.index_cast %arg0 : i32 to index
    %c32_30 = arith.constant 32 : index
    %64 = memref.load %arg2[%63, %c32_30] : memref<7x128xi32, #tpu.memory_space<smem>>
    %65 = arith.index_cast %64 : i32 to index
    %c0_31 = arith.constant 0 : index
    %c0_32 = arith.constant 0 : index
    %66 = vector.load %arg11[%65, %c0_31, %c0_32] : memref<12x1x32xf32, #tpu.memory_space<vmem>>, vector<1x1x32xf32>
    %67 = vector.shape_cast %66 : vector<1x1x32xf32> to vector<1x32xf32>
    %68 = arith.index_cast %arg0 : i32 to index
    %c48_33 = arith.constant 48 : index
    %69 = memref.load %arg2[%68, %c48_33] : memref<7x128xi32, #tpu.memory_space<smem>>
    %70 = arith.index_cast %69 : i32 to index
    %c0_34 = arith.constant 0 : index
    %c0_35 = arith.constant 0 : index
    %71 = vector.load %arg11[%70, %c0_34, %c0_35] : memref<12x1x32xf32, #tpu.memory_space<vmem>>, vector<1x1x32xf32>
    %72 = vector.shape_cast %71 : vector<1x1x32xf32> to vector<1x32xf32>
    %73 = arith.index_cast %arg0 : i32 to index
    %c64_36 = arith.constant 64 : index
    %74 = memref.load %arg2[%73, %c64_36] : memref<7x128xi32, #tpu.memory_space<smem>>
    %75 = arith.index_cast %74 : i32 to index
    %c0_37 = arith.constant 0 : index
    %c0_38 = arith.constant 0 : index
    %76 = vector.load %arg11[%75, %c0_37, %c0_38] : memref<12x1x32xf32, #tpu.memory_space<vmem>>, vector<1x1x32xf32>
    %77 = vector.shape_cast %76 : vector<1x1x32xf32> to vector<1x32xf32>
    %78 = arith.index_cast %arg0 : i32 to index
    %c80_39 = arith.constant 80 : index
    %79 = memref.load %arg2[%78, %c80_39] : memref<7x128xi32, #tpu.memory_space<smem>>
    %80 = arith.index_cast %79 : i32 to index
    %c0_40 = arith.constant 0 : index
    %c0_41 = arith.constant 0 : index
    %81 = vector.load %arg11[%80, %c0_40, %c0_41] : memref<12x1x32xf32, #tpu.memory_space<vmem>>, vector<1x1x32xf32>
    %82 = vector.shape_cast %81 : vector<1x1x32xf32> to vector<1x32xf32>
    %83 = arith.index_cast %arg0 : i32 to index
    %c96_42 = arith.constant 96 : index
    %84 = memref.load %arg2[%83, %c96_42] : memref<7x128xi32, #tpu.memory_space<smem>>
    %85 = arith.index_cast %84 : i32 to index
    %c0_43 = arith.constant 0 : index
    %c0_44 = arith.constant 0 : index
    %86 = vector.load %arg11[%85, %c0_43, %c0_44] : memref<12x1x32xf32, #tpu.memory_space<vmem>>, vector<1x1x32xf32>
    %87 = vector.shape_cast %86 : vector<1x1x32xf32> to vector<1x32xf32>
    %88 = arith.index_cast %arg0 : i32 to index
    %c112_45 = arith.constant 112 : index
    %89 = memref.load %arg2[%88, %c112_45] : memref<7x128xi32, #tpu.memory_space<smem>>
    %90 = arith.index_cast %89 : i32 to index
    %c0_46 = arith.constant 0 : index
    %c0_47 = arith.constant 0 : index
    %91 = vector.load %arg11[%90, %c0_46, %c0_47] : memref<12x1x32xf32, #tpu.memory_space<vmem>>, vector<1x1x32xf32>
    %92 = vector.shape_cast %91 : vector<1x1x32xf32> to vector<1x32xf32>
    %93 = tpu.concatenate %17, %22, %27, %32, %37, %42, %47, %52 in 0 : vector<1x32xf32>, vector<1x32xf32>, vector<1x32xf32>, vector<1x32xf32>, vector<1x32xf32>, vector<1x32xf32>, vector<1x32xf32>, vector<1x32xf32> -> vector<8x32xf32>
    %94 = tpu.concatenate %57, %62, %67, %72, %77, %82, %87, %92 in 0 : vector<1x32xf32>, vector<1x32xf32>, vector<1x32xf32>, vector<1x32xf32>, vector<1x32xf32>, vector<1x32xf32>, vector<1x32xf32>, vector<1x32xf32> -> vector<8x32xf32>
    %95 = arith.index_cast %arg0 : i32 to index
    %c1 = arith.constant 1 : index
    %96 = memref.load %arg1[%95, %c1] : memref<7x128xi32, #tpu.memory_space<smem>>
    %97 = arith.index_cast %96 : i32 to index
    %c0_48 = arith.constant 0 : index
    %c0_49 = arith.constant 0 : index
    %98 = vector.load %arg11[%97, %c0_48, %c0_49] : memref<12x1x32xf32, #tpu.memory_space<vmem>>, vector<1x1x32xf32>
    %99 = vector.shape_cast %98 : vector<1x1x32xf32> to vector<1x32xf32>
    %100 = arith.index_cast %arg0 : i32 to index
    %c17 = arith.constant 17 : index
    %101 = memref.load %arg1[%100, %c17] : memref<7x128xi32, #tpu.memory_space<smem>>
    %102 = arith.index_cast %101 : i32 to index
    %c0_50 = arith.constant 0 : index
    %c0_51 = arith.constant 0 : index
    %103 = vector.load %arg11[%102, %c0_50, %c0_51] : memref<12x1x32xf32, #tpu.memory_space<vmem>>, vector<1x1x32xf32>
    %104 = vector.shape_cast %103 : vector<1x1x32xf32> to vector<1x32xf32>
    %105 = arith.index_cast %arg0 : i32 to index
    %c33 = arith.constant 33 : index
    %106 = memref.load %arg1[%105, %c33] : memref<7x128xi32, #tpu.memory_space<smem>>
    %107 = arith.index_cast %106 : i32 to index
    %c0_52 = arith.constant 0 : index
    %c0_53 = arith.constant 0 : index
    %108 = vector.load %arg11[%107, %c0_52, %c0_53] : memref<12x1x32xf32, #tpu.memory_space<vmem>>, vector<1x1x32xf32>
    %109 = vector.shape_cast %108 : vector<1x1x32xf32> to vector<1x32xf32>
    %110 = arith.index_cast %arg0 : i32 to index
    %c49 = arith.constant 49 : index
    %111 = memref.load %arg1[%110, %c49] : memref<7x128xi32, #tpu.memory_space<smem>>
    %112 = arith.index_cast %111 : i32 to index
    %c0_54 = arith.constant 0 : index
    %c0_55 = arith.constant 0 : index
    %113 = vector.load %arg11[%112, %c0_54, %c0_55] : memref<12x1x32xf32, #tpu.memory_space<vmem>>, vector<1x1x32xf32>
    %114 = vector.shape_cast %113 : vector<1x1x32xf32> to vector<1x32xf32>
    %115 = arith.index_cast %arg0 : i32 to index
    %c65 = arith.constant 65 : index
    %116 = memref.load %arg1[%115, %c65] : memref<7x128xi32, #tpu.memory_space<smem>>
    %117 = arith.index_cast %116 : i32 to index
    %c0_56 = arith.constant 0 : index
    %c0_57 = arith.constant 0 : index
    %118 = vector.load %arg11[%117, %c0_56, %c0_57] : memref<12x1x32xf32, #tpu.memory_space<vmem>>, vector<1x1x32xf32>
    %119 = vector.shape_cast %118 : vector<1x1x32xf32> to vector<1x32xf32>
    %120 = arith.index_cast %arg0 : i32 to index
    %c81 = arith.constant 81 : index
    %121 = memref.load %arg1[%120, %c81] : memref<7x128xi32, #tpu.memory_space<smem>>
    %122 = arith.index_cast %121 : i32 to index
    %c0_58 = arith.constant 0 : index
    %c0_59 = arith.constant 0 : index
    %123 = vector.load %arg11[%122, %c0_58, %c0_59] : memref<12x1x32xf32, #tpu.memory_space<vmem>>, vector<1x1x32xf32>
    %124 = vector.shape_cast %123 : vector<1x1x32xf32> to vector<1x32xf32>
    %125 = arith.index_cast %arg0 : i32 to index
    %c97 = arith.constant 97 : index
    %126 = memref.load %arg1[%125, %c97] : memref<7x128xi32, #tpu.memory_space<smem>>
    %127 = arith.index_cast %126 : i32 to index
    %c0_60 = arith.constant 0 : index
    %c0_61 = arith.constant 0 : index
    %128 = vector.load %arg11[%127, %c0_60, %c0_61] : memref<12x1x32xf32, #tpu.memory_space<vmem>>, vector<1x1x32xf32>
    %129 = vector.shape_cast %128 : vector<1x1x32xf32> to vector<1x32xf32>
    %130 = arith.index_cast %arg0 : i32 to index
    %c113 = arith.constant 113 : index
    %131 = memref.load %arg1[%130, %c113] : memref<7x128xi32, #tpu.memory_space<smem>>
    %132 = arith.index_cast %131 : i32 to index
    %c0_62 = arith.constant 0 : index
    %c0_63 = arith.constant 0 : index
    %133 = vector.load %arg11[%132, %c0_62, %c0_63] : memref<12x1x32xf32, #tpu.memory_space<vmem>>, vector<1x1x32xf32>
    %134 = vector.shape_cast %133 : vector<1x1x32xf32> to vector<1x32xf32>
    %135 = arith.index_cast %arg0 : i32 to index
    %c1_64 = arith.constant 1 : index
    %136 = memref.load %arg2[%135, %c1_64] : memref<7x128xi32, #tpu.memory_space<smem>>
    %137 = arith.index_cast %136 : i32 to index
    %c0_65 = arith.constant 0 : index
    %c0_66 = arith.constant 0 : index
    %138 = vector.load %arg11[%137, %c0_65, %c0_66] : memref<12x1x32xf32, #tpu.memory_space<vmem>>, vector<1x1x32xf32>
    %139 = vector.shape_cast %138 : vector<1x1x32xf32> to vector<1x32xf32>
    %140 = arith.index_cast %arg0 : i32 to index
    %c17_67 = arith.constant 17 : index
    %141 = memref.load %arg2[%140, %c17_67] : memref<7x128xi32, #tpu.memory_space<smem>>
    %142 = arith.index_cast %141 : i32 to index
    %c0_68 = arith.constant 0 : index
    %c0_69 = arith.constant 0 : index
    %143 = vector.load %arg11[%142, %c0_68, %c0_69] : memref<12x1x32xf32, #tpu.memory_space<vmem>>, vector<1x1x32xf32>
    %144 = vector.shape_cast %143 : vector<1x1x32xf32> to vector<1x32xf32>
    %145 = arith.index_cast %arg0 : i32 to index
    %c33_70 = arith.constant 33 : index
    %146 = memref.load %arg2[%145, %c33_70] : memref<7x128xi32, #tpu.memory_space<smem>>
    %147 = arith.index_cast %146 : i32 to index
    %c0_71 = arith.constant 0 : index
    %c0_72 = arith.constant 0 : index
    %148 = vector.load %arg11[%147, %c0_71, %c0_72] : memref<12x1x32xf32, #tpu.memory_space<vmem>>, vector<1x1x32xf32>
    %149 = vector.shape_cast %148 : vector<1x1x32xf32> to vector<1x32xf32>
    %150 = arith.index_cast %arg0 : i32 to index
    %c49_73 = arith.constant 49 : index
    %151 = memref.load %arg2[%150, %c49_73] : memref<7x128xi32, #tpu.memory_space<smem>>
    %152 = arith.index_cast %151 : i32 to index
    %c0_74 = arith.constant 0 : index
    %c0_75 = arith.constant 0 : index
    %153 = vector.load %arg11[%152, %c0_74, %c0_75] : memref<12x1x32xf32, #tpu.memory_space<vmem>>, vector<1x1x32xf32>
    %154 = vector.shape_cast %153 : vector<1x1x32xf32> to vector<1x32xf32>
    %155 = arith.index_cast %arg0 : i32 to index
    %c65_76 = arith.constant 65 : index
    %156 = memref.load %arg2[%155, %c65_76] : memref<7x128xi32, #tpu.memory_space<smem>>
    %157 = arith.index_cast %156 : i32 to index
    %c0_77 = arith.constant 0 : index
    %c0_78 = arith.constant 0 : index
    %158 = vector.load %arg11[%157, %c0_77, %c0_78] : memref<12x1x32xf32, #tpu.memory_space<vmem>>, vector<1x1x32xf32>
    %159 = vector.shape_cast %158 : vector<1x1x32xf32> to vector<1x32xf32>
    %160 = arith.index_cast %arg0 : i32 to index
    %c81_79 = arith.constant 81 : index
    %161 = memref.load %arg2[%160, %c81_79] : memref<7x128xi32, #tpu.memory_space<smem>>
    %162 = arith.index_cast %161 : i32 to index
    %c0_80 = arith.constant 0 : index
    %c0_81 = arith.constant 0 : index
    %163 = vector.load %arg11[%162, %c0_80, %c0_81] : memref<12x1x32xf32, #tpu.memory_space<vmem>>, vector<1x1x32xf32>
    %164 = vector.shape_cast %163 : vector<1x1x32xf32> to vector<1x32xf32>
    %165 = arith.index_cast %arg0 : i32 to index
    %c97_82 = arith.constant 97 : index
    %166 = memref.load %arg2[%165, %c97_82] : memref<7x128xi32, #tpu.memory_space<smem>>
    %167 = arith.index_cast %166 : i32 to index
    %c0_83 = arith.constant 0 : index
    %c0_84 = arith.constant 0 : index
    %168 = vector.load %arg11[%167, %c0_83, %c0_84] : memref<12x1x32xf32, #tpu.memory_space<vmem>>, vector<1x1x32xf32>
    %169 = vector.shape_cast %168 : vector<1x1x32xf32> to vector<1x32xf32>
    %170 = arith.index_cast %arg0 : i32 to index
    %c113_85 = arith.constant 113 : index
    %171 = memref.load %arg2[%170, %c113_85] : memref<7x128xi32, #tpu.memory_space<smem>>
    %172 = arith.index_cast %171 : i32 to index
    %c0_86 = arith.constant 0 : index
    %c0_87 = arith.constant 0 : index
    %173 = vector.load %arg11[%172, %c0_86, %c0_87] : memref<12x1x32xf32, #tpu.memory_space<vmem>>, vector<1x1x32xf32>
    %174 = vector.shape_cast %173 : vector<1x1x32xf32> to vector<1x32xf32>
    %175 = tpu.concatenate %99, %104, %109, %114, %119, %124, %129, %134 in 0 : vector<1x32xf32>, vector<1x32xf32>, vector<1x32xf32>, vector<1x32xf32>, vector<1x32xf32>, vector<1x32xf32>, vector<1x32xf32>, vector<1x32xf32> -> vector<8x32xf32>
    %176 = tpu.concatenate %139, %144, %149, %154, %159, %164, %169, %174 in 0 : vector<1x32xf32>, vector<1x32xf32>, vector<1x32xf32>, vector<1x32xf32>, vector<1x32xf32>, vector<1x32xf32>, vector<1x32xf32>, vector<1x32xf32> -> vector<8x32xf32>
    %177 = arith.index_cast %arg0 : i32 to index
    %c2 = arith.constant 2 : index
    %178 = memref.load %arg1[%177, %c2] : memref<7x128xi32, #tpu.memory_space<smem>>
    %179 = arith.index_cast %178 : i32 to index
    %c0_88 = arith.constant 0 : index
    %c0_89 = arith.constant 0 : index
    %180 = vector.load %arg11[%179, %c0_88, %c0_89] : memref<12x1x32xf32, #tpu.memory_space<vmem>>, vector<1x1x32xf32>
    %181 = vector.shape_cast %180 : vector<1x1x32xf32> to vector<1x32xf32>
    %182 = arith.index_cast %arg0 : i32 to index
    %c18 = arith.constant 18 : index
    %183 = memref.load %arg1[%182, %c18] : memref<7x128xi32, #tpu.memory_space<smem>>
    %184 = arith.index_cast %183 : i32 to index
    %c0_90 = arith.constant 0 : index
    %c0_91 = arith.constant 0 : index
    %185 = vector.load %arg11[%184, %c0_90, %c0_91] : memref<12x1x32xf32, #tpu.memory_space<vmem>>, vector<1x1x32xf32>
    %186 = vector.shape_cast %185 : vector<1x1x32xf32> to vector<1x32xf32>
    %187 = arith.index_cast %arg0 : i32 to index
    %c34 = arith.constant 34 : index
    %188 = memref.load %arg1[%187, %c34] : memref<7x128xi32, #tpu.memory_space<smem>>
    %189 = arith.index_cast %188 : i32 to index
    %c0_92 = arith.constant 0 : index
    %c0_93 = arith.constant 0 : index
    %190 = vector.load %arg11[%189, %c0_92, %c0_93] : memref<12x1x32xf32, #tpu.memory_space<vmem>>, vector<1x1x32xf32>
    %191 = vector.shape_cast %190 : vector<1x1x32xf32> to vector<1x32xf32>
    %192 = arith.index_cast %arg0 : i32 to index
    %c50 = arith.constant 50 : index
    %193 = memref.load %arg1[%192, %c50] : memref<7x128xi32, #tpu.memory_space<smem>>
    %194 = arith.index_cast %193 : i32 to index
    %c0_94 = arith.constant 0 : index
    %c0_95 = arith.constant 0 : index
    %195 = vector.load %arg11[%194, %c0_94, %c0_95] : memref<12x1x32xf32, #tpu.memory_space<vmem>>, vector<1x1x32xf32>
    %196 = vector.shape_cast %195 : vector<1x1x32xf32> to vector<1x32xf32>
    %197 = arith.index_cast %arg0 : i32 to index
    %c66 = arith.constant 66 : index
    %198 = memref.load %arg1[%197, %c66] : memref<7x128xi32, #tpu.memory_space<smem>>
    %199 = arith.index_cast %198 : i32 to index
    %c0_96 = arith.constant 0 : index
    %c0_97 = arith.constant 0 : index
    %200 = vector.load %arg11[%199, %c0_96, %c0_97] : memref<12x1x32xf32, #tpu.memory_space<vmem>>, vector<1x1x32xf32>
    %201 = vector.shape_cast %200 : vector<1x1x32xf32> to vector<1x32xf32>
    %202 = arith.index_cast %arg0 : i32 to index
    %c82 = arith.constant 82 : index
    %203 = memref.load %arg1[%202, %c82] : memref<7x128xi32, #tpu.memory_space<smem>>
    %204 = arith.index_cast %203 : i32 to index
    %c0_98 = arith.constant 0 : index
    %c0_99 = arith.constant 0 : index
    %205 = vector.load %arg11[%204, %c0_98, %c0_99] : memref<12x1x32xf32, #tpu.memory_space<vmem>>, vector<1x1x32xf32>
    %206 = vector.shape_cast %205 : vector<1x1x32xf32> to vector<1x32xf32>
    %207 = arith.index_cast %arg0 : i32 to index
    %c98 = arith.constant 98 : index
    %208 = memref.load %arg1[%207, %c98] : memref<7x128xi32, #tpu.memory_space<smem>>
    %209 = arith.index_cast %208 : i32 to index
    %c0_100 = arith.constant 0 : index
    %c0_101 = arith.constant 0 : index
    %210 = vector.load %arg11[%209, %c0_100, %c0_101] : memref<12x1x32xf32, #tpu.memory_space<vmem>>, vector<1x1x32xf32>
    %211 = vector.shape_cast %210 : vector<1x1x32xf32> to vector<1x32xf32>
    %212 = arith.index_cast %arg0 : i32 to index
    %c114 = arith.constant 114 : index
    %213 = memref.load %arg1[%212, %c114] : memref<7x128xi32, #tpu.memory_space<smem>>
    %214 = arith.index_cast %213 : i32 to index
    %c0_102 = arith.constant 0 : index
    %c0_103 = arith.constant 0 : index
    %215 = vector.load %arg11[%214, %c0_102, %c0_103] : memref<12x1x32xf32, #tpu.memory_space<vmem>>, vector<1x1x32xf32>
    %216 = vector.shape_cast %215 : vector<1x1x32xf32> to vector<1x32xf32>
    %217 = arith.index_cast %arg0 : i32 to index
    %c2_104 = arith.constant 2 : index
    %218 = memref.load %arg2[%217, %c2_104] : memref<7x128xi32, #tpu.memory_space<smem>>
    %219 = arith.index_cast %218 : i32 to index
    %c0_105 = arith.constant 0 : index
    %c0_106 = arith.constant 0 : index
    %220 = vector.load %arg11[%219, %c0_105, %c0_106] : memref<12x1x32xf32, #tpu.memory_space<vmem>>, vector<1x1x32xf32>
    %221 = vector.shape_cast %220 : vector<1x1x32xf32> to vector<1x32xf32>
    %222 = arith.index_cast %arg0 : i32 to index
    %c18_107 = arith.constant 18 : index
    %223 = memref.load %arg2[%222, %c18_107] : memref<7x128xi32, #tpu.memory_space<smem>>
    %224 = arith.index_cast %223 : i32 to index
    %c0_108 = arith.constant 0 : index
    %c0_109 = arith.constant 0 : index
    %225 = vector.load %arg11[%224, %c0_108, %c0_109] : memref<12x1x32xf32, #tpu.memory_space<vmem>>, vector<1x1x32xf32>
    %226 = vector.shape_cast %225 : vector<1x1x32xf32> to vector<1x32xf32>
    %227 = arith.index_cast %arg0 : i32 to index
    %c34_110 = arith.constant 34 : index
    %228 = memref.load %arg2[%227, %c34_110] : memref<7x128xi32, #tpu.memory_space<smem>>
    %229 = arith.index_cast %228 : i32 to index
    %c0_111 = arith.constant 0 : index
    %c0_112 = arith.constant 0 : index
    %230 = vector.load %arg11[%229, %c0_111, %c0_112] : memref<12x1x32xf32, #tpu.memory_space<vmem>>, vector<1x1x32xf32>
    %231 = vector.shape_cast %230 : vector<1x1x32xf32> to vector<1x32xf32>
    %232 = arith.index_cast %arg0 : i32 to index
    %c50_113 = arith.constant 50 : index
    %233 = memref.load %arg2[%232, %c50_113] : memref<7x128xi32, #tpu.memory_space<smem>>
    %234 = arith.index_cast %233 : i32 to index
    %c0_114 = arith.constant 0 : index
    %c0_115 = arith.constant 0 : index
    %235 = vector.load %arg11[%234, %c0_114, %c0_115] : memref<12x1x32xf32, #tpu.memory_space<vmem>>, vector<1x1x32xf32>
    %236 = vector.shape_cast %235 : vector<1x1x32xf32> to vector<1x32xf32>
    %237 = arith.index_cast %arg0 : i32 to index
    %c66_116 = arith.constant 66 : index
    %238 = memref.load %arg2[%237, %c66_116] : memref<7x128xi32, #tpu.memory_space<smem>>
    %239 = arith.index_cast %238 : i32 to index
    %c0_117 = arith.constant 0 : index
    %c0_118 = arith.constant 0 : index
    %240 = vector.load %arg11[%239, %c0_117, %c0_118] : memref<12x1x32xf32, #tpu.memory_space<vmem>>, vector<1x1x32xf32>
    %241 = vector.shape_cast %240 : vector<1x1x32xf32> to vector<1x32xf32>
    %242 = arith.index_cast %arg0 : i32 to index
    %c82_119 = arith.constant 82 : index
    %243 = memref.load %arg2[%242, %c82_119] : memref<7x128xi32, #tpu.memory_space<smem>>
    %244 = arith.index_cast %243 : i32 to index
    %c0_120 = arith.constant 0 : index
    %c0_121 = arith.constant 0 : index
    %245 = vector.load %arg11[%244, %c0_120, %c0_121] : memref<12x1x32xf32, #tpu.memory_space<vmem>>, vector<1x1x32xf32>
    %246 = vector.shape_cast %245 : vector<1x1x32xf32> to vector<1x32xf32>
    %247 = arith.index_cast %arg0 : i32 to index
    %c98_122 = arith.constant 98 : index
    %248 = memref.load %arg2[%247, %c98_122] : memref<7x128xi32, #tpu.memory_space<smem>>
    %249 = arith.index_cast %248 : i32 to index
    %c0_123 = arith.constant 0 : index
    %c0_124 = arith.constant 0 : index
    %250 = vector.load %arg11[%249, %c0_123, %c0_124] : memref<12x1x32xf32, #tpu.memory_space<vmem>>, vector<1x1x32xf32>
    %251 = vector.shape_cast %250 : vector<1x1x32xf32> to vector<1x32xf32>
    %252 = arith.index_cast %arg0 : i32 to index
    %c114_125 = arith.constant 114 : index
    %253 = memref.load %arg2[%252, %c114_125] : memref<7x128xi32, #tpu.memory_space<smem>>
    %254 = arith.index_cast %253 : i32 to index
    %c0_126 = arith.constant 0 : index
    %c0_127 = arith.constant 0 : index
    %255 = vector.load %arg11[%254, %c0_126, %c0_127] : memref<12x1x32xf32, #tpu.memory_space<vmem>>, vector<1x1x32xf32>
    %256 = vector.shape_cast %255 : vector<1x1x32xf32> to vector<1x32xf32>
    %257 = tpu.concatenate %181, %186, %191, %196, %201, %206, %211, %216 in 0 : vector<1x32xf32>, vector<1x32xf32>, vector<1x32xf32>, vector<1x32xf32>, vector<1x32xf32>, vector<1x32xf32>, vector<1x32xf32>, vector<1x32xf32> -> vector<8x32xf32>
    %258 = tpu.concatenate %221, %226, %231, %236, %241, %246, %251, %256 in 0 : vector<1x32xf32>, vector<1x32xf32>, vector<1x32xf32>, vector<1x32xf32>, vector<1x32xf32>, vector<1x32xf32>, vector<1x32xf32>, vector<1x32xf32> -> vector<8x32xf32>
    %259 = arith.index_cast %arg0 : i32 to index
    %c3 = arith.constant 3 : index
    %260 = memref.load %arg1[%259, %c3] : memref<7x128xi32, #tpu.memory_space<smem>>
    %261 = arith.index_cast %260 : i32 to index
    %c0_128 = arith.constant 0 : index
    %c0_129 = arith.constant 0 : index
    %262 = vector.load %arg11[%261, %c0_128, %c0_129] : memref<12x1x32xf32, #tpu.memory_space<vmem>>, vector<1x1x32xf32>
    %263 = vector.shape_cast %262 : vector<1x1x32xf32> to vector<1x32xf32>
    %264 = arith.index_cast %arg0 : i32 to index
    %c19 = arith.constant 19 : index
    %265 = memref.load %arg1[%264, %c19] : memref<7x128xi32, #tpu.memory_space<smem>>
    %266 = arith.index_cast %265 : i32 to index
    %c0_130 = arith.constant 0 : index
    %c0_131 = arith.constant 0 : index
    %267 = vector.load %arg11[%266, %c0_130, %c0_131] : memref<12x1x32xf32, #tpu.memory_space<vmem>>, vector<1x1x32xf32>
    %268 = vector.shape_cast %267 : vector<1x1x32xf32> to vector<1x32xf32>
    %269 = arith.index_cast %arg0 : i32 to index
    %c35 = arith.constant 35 : index
    %270 = memref.load %arg1[%269, %c35] : memref<7x128xi32, #tpu.memory_space<smem>>
    %271 = arith.index_cast %270 : i32 to index
    %c0_132 = arith.constant 0 : index
    %c0_133 = arith.constant 0 : index
    %272 = vector.load %arg11[%271, %c0_132, %c0_133] : memref<12x1x32xf32, #tpu.memory_space<vmem>>, vector<1x1x32xf32>
    %273 = vector.shape_cast %272 : vector<1x1x32xf32> to vector<1x32xf32>
    %274 = arith.index_cast %arg0 : i32 to index
    %c51 = arith.constant 51 : index
    %275 = memref.load %arg1[%274, %c51] : memref<7x128xi32, #tpu.memory_space<smem>>
    %276 = arith.index_cast %275 : i32 to index
    %c0_134 = arith.constant 0 : index
    %c0_135 = arith.constant 0 : index
    %277 = vector.load %arg11[%276, %c0_134, %c0_135] : memref<12x1x32xf32, #tpu.memory_space<vmem>>, vector<1x1x32xf32>
    %278 = vector.shape_cast %277 : vector<1x1x32xf32> to vector<1x32xf32>
    %279 = arith.index_cast %arg0 : i32 to index
    %c67 = arith.constant 67 : index
    %280 = memref.load %arg1[%279, %c67] : memref<7x128xi32, #tpu.memory_space<smem>>
    %281 = arith.index_cast %280 : i32 to index
    %c0_136 = arith.constant 0 : index
    %c0_137 = arith.constant 0 : index
    %282 = vector.load %arg11[%281, %c0_136, %c0_137] : memref<12x1x32xf32, #tpu.memory_space<vmem>>, vector<1x1x32xf32>
    %283 = vector.shape_cast %282 : vector<1x1x32xf32> to vector<1x32xf32>
    %284 = arith.index_cast %arg0 : i32 to index
    %c83 = arith.constant 83 : index
    %285 = memref.load %arg1[%284, %c83] : memref<7x128xi32, #tpu.memory_space<smem>>
    %286 = arith.index_cast %285 : i32 to index
    %c0_138 = arith.constant 0 : index
    %c0_139 = arith.constant 0 : index
    %287 = vector.load %arg11[%286, %c0_138, %c0_139] : memref<12x1x32xf32, #tpu.memory_space<vmem>>, vector<1x1x32xf32>
    %288 = vector.shape_cast %287 : vector<1x1x32xf32> to vector<1x32xf32>
    %289 = arith.index_cast %arg0 : i32 to index
    %c99 = arith.constant 99 : index
    %290 = memref.load %arg1[%289, %c99] : memref<7x128xi32, #tpu.memory_space<smem>>
    %291 = arith.index_cast %290 : i32 to index
    %c0_140 = arith.constant 0 : index
    %c0_141 = arith.constant 0 : index
    %292 = vector.load %arg11[%291, %c0_140, %c0_141] : memref<12x1x32xf32, #tpu.memory_space<vmem>>, vector<1x1x32xf32>
    %293 = vector.shape_cast %292 : vector<1x1x32xf32> to vector<1x32xf32>
    %294 = arith.index_cast %arg0 : i32 to index
    %c115 = arith.constant 115 : index
    %295 = memref.load %arg1[%294, %c115] : memref<7x128xi32, #tpu.memory_space<smem>>
    %296 = arith.index_cast %295 : i32 to index
    %c0_142 = arith.constant 0 : index
    %c0_143 = arith.constant 0 : index
    %297 = vector.load %arg11[%296, %c0_142, %c0_143] : memref<12x1x32xf32, #tpu.memory_space<vmem>>, vector<1x1x32xf32>
    %298 = vector.shape_cast %297 : vector<1x1x32xf32> to vector<1x32xf32>
    %299 = arith.index_cast %arg0 : i32 to index
    %c3_144 = arith.constant 3 : index
    %300 = memref.load %arg2[%299, %c3_144] : memref<7x128xi32, #tpu.memory_space<smem>>
    %301 = arith.index_cast %300 : i32 to index
    %c0_145 = arith.constant 0 : index
    %c0_146 = arith.constant 0 : index
    %302 = vector.load %arg11[%301, %c0_145, %c0_146] : memref<12x1x32xf32, #tpu.memory_space<vmem>>, vector<1x1x32xf32>
    %303 = vector.shape_cast %302 : vector<1x1x32xf32> to vector<1x32xf32>
    %304 = arith.index_cast %arg0 : i32 to index
    %c19_147 = arith.constant 19 : index
    %305 = memref.load %arg2[%304, %c19_147] : memref<7x128xi32, #tpu.memory_space<smem>>
    %306 = arith.index_cast %305 : i32 to index
    %c0_148 = arith.constant 0 : index
    %c0_149 = arith.constant 0 : index
    %307 = vector.load %arg11[%306, %c0_148, %c0_149] : memref<12x1x32xf32, #tpu.memory_space<vmem>>, vector<1x1x32xf32>
    %308 = vector.shape_cast %307 : vector<1x1x32xf32> to vector<1x32xf32>
    %309 = arith.index_cast %arg0 : i32 to index
    %c35_150 = arith.constant 35 : index
    %310 = memref.load %arg2[%309, %c35_150] : memref<7x128xi32, #tpu.memory_space<smem>>
    %311 = arith.index_cast %310 : i32 to index
    %c0_151 = arith.constant 0 : index
    %c0_152 = arith.constant 0 : index
    %312 = vector.load %arg11[%311, %c0_151, %c0_152] : memref<12x1x32xf32, #tpu.memory_space<vmem>>, vector<1x1x32xf32>
    %313 = vector.shape_cast %312 : vector<1x1x32xf32> to vector<1x32xf32>
    %314 = arith.index_cast %arg0 : i32 to index
    %c51_153 = arith.constant 51 : index
    %315 = memref.load %arg2[%314, %c51_153] : memref<7x128xi32, #tpu.memory_space<smem>>
    %316 = arith.index_cast %315 : i32 to index
    %c0_154 = arith.constant 0 : index
    %c0_155 = arith.constant 0 : index
    %317 = vector.load %arg11[%316, %c0_154, %c0_155] : memref<12x1x32xf32, #tpu.memory_space<vmem>>, vector<1x1x32xf32>
    %318 = vector.shape_cast %317 : vector<1x1x32xf32> to vector<1x32xf32>
    %319 = arith.index_cast %arg0 : i32 to index
    %c67_156 = arith.constant 67 : index
    %320 = memref.load %arg2[%319, %c67_156] : memref<7x128xi32, #tpu.memory_space<smem>>
    %321 = arith.index_cast %320 : i32 to index
    %c0_157 = arith.constant 0 : index
    %c0_158 = arith.constant 0 : index
    %322 = vector.load %arg11[%321, %c0_157, %c0_158] : memref<12x1x32xf32, #tpu.memory_space<vmem>>, vector<1x1x32xf32>
    %323 = vector.shape_cast %322 : vector<1x1x32xf32> to vector<1x32xf32>
    %324 = arith.index_cast %arg0 : i32 to index
    %c83_159 = arith.constant 83 : index
    %325 = memref.load %arg2[%324, %c83_159] : memref<7x128xi32, #tpu.memory_space<smem>>
    %326 = arith.index_cast %325 : i32 to index
    %c0_160 = arith.constant 0 : index
    %c0_161 = arith.constant 0 : index
    %327 = vector.load %arg11[%326, %c0_160, %c0_161] : memref<12x1x32xf32, #tpu.memory_space<vmem>>, vector<1x1x32xf32>
    %328 = vector.shape_cast %327 : vector<1x1x32xf32> to vector<1x32xf32>
    %329 = arith.index_cast %arg0 : i32 to index
    %c99_162 = arith.constant 99 : index
    %330 = memref.load %arg2[%329, %c99_162] : memref<7x128xi32, #tpu.memory_space<smem>>
    %331 = arith.index_cast %330 : i32 to index
    %c0_163 = arith.constant 0 : index
    %c0_164 = arith.constant 0 : index
    %332 = vector.load %arg11[%331, %c0_163, %c0_164] : memref<12x1x32xf32, #tpu.memory_space<vmem>>, vector<1x1x32xf32>
    %333 = vector.shape_cast %332 : vector<1x1x32xf32> to vector<1x32xf32>
    %334 = arith.index_cast %arg0 : i32 to index
    %c115_165 = arith.constant 115 : index
    %335 = memref.load %arg2[%334, %c115_165] : memref<7x128xi32, #tpu.memory_space<smem>>
    %336 = arith.index_cast %335 : i32 to index
    %c0_166 = arith.constant 0 : index
    %c0_167 = arith.constant 0 : index
    %337 = vector.load %arg11[%336, %c0_166, %c0_167] : memref<12x1x32xf32, #tpu.memory_space<vmem>>, vector<1x1x32xf32>
    %338 = vector.shape_cast %337 : vector<1x1x32xf32> to vector<1x32xf32>
    %339 = tpu.concatenate %263, %268, %273, %278, %283, %288, %293, %298 in 0 : vector<1x32xf32>, vector<1x32xf32>, vector<1x32xf32>, vector<1x32xf32>, vector<1x32xf32>, vector<1x32xf32>, vector<1x32xf32>, vector<1x32xf32> -> vector<8x32xf32>
    %340 = tpu.concatenate %303, %308, %313, %318, %323, %328, %333, %338 in 0 : vector<1x32xf32>, vector<1x32xf32>, vector<1x32xf32>, vector<1x32xf32>, vector<1x32xf32>, vector<1x32xf32>, vector<1x32xf32>, vector<1x32xf32> -> vector<8x32xf32>
    %341 = arith.index_cast %arg0 : i32 to index
    %c4 = arith.constant 4 : index
    %342 = memref.load %arg1[%341, %c4] : memref<7x128xi32, #tpu.memory_space<smem>>
    %343 = arith.index_cast %342 : i32 to index
    %c0_168 = arith.constant 0 : index
    %c0_169 = arith.constant 0 : index
    %344 = vector.load %arg11[%343, %c0_168, %c0_169] : memref<12x1x32xf32, #tpu.memory_space<vmem>>, vector<1x1x32xf32>
    %345 = vector.shape_cast %344 : vector<1x1x32xf32> to vector<1x32xf32>
    %346 = arith.index_cast %arg0 : i32 to index
    %c20 = arith.constant 20 : index
    %347 = memref.load %arg1[%346, %c20] : memref<7x128xi32, #tpu.memory_space<smem>>
    %348 = arith.index_cast %347 : i32 to index
    %c0_170 = arith.constant 0 : index
    %c0_171 = arith.constant 0 : index
    %349 = vector.load %arg11[%348, %c0_170, %c0_171] : memref<12x1x32xf32, #tpu.memory_space<vmem>>, vector<1x1x32xf32>
    %350 = vector.shape_cast %349 : vector<1x1x32xf32> to vector<1x32xf32>
    %351 = arith.index_cast %arg0 : i32 to index
    %c36 = arith.constant 36 : index
    %352 = memref.load %arg1[%351, %c36] : memref<7x128xi32, #tpu.memory_space<smem>>
    %353 = arith.index_cast %352 : i32 to index
    %c0_172 = arith.constant 0 : index
    %c0_173 = arith.constant 0 : index
    %354 = vector.load %arg11[%353, %c0_172, %c0_173] : memref<12x1x32xf32, #tpu.memory_space<vmem>>, vector<1x1x32xf32>
    %355 = vector.shape_cast %354 : vector<1x1x32xf32> to vector<1x32xf32>
    %356 = arith.index_cast %arg0 : i32 to index
    %c52 = arith.constant 52 : index
    %357 = memref.load %arg1[%356, %c52] : memref<7x128xi32, #tpu.memory_space<smem>>
    %358 = arith.index_cast %357 : i32 to index
    %c0_174 = arith.constant 0 : index
    %c0_175 = arith.constant 0 : index
    %359 = vector.load %arg11[%358, %c0_174, %c0_175] : memref<12x1x32xf32, #tpu.memory_space<vmem>>, vector<1x1x32xf32>
    %360 = vector.shape_cast %359 : vector<1x1x32xf32> to vector<1x32xf32>
    %361 = arith.index_cast %arg0 : i32 to index
    %c68 = arith.constant 68 : index
    %362 = memref.load %arg1[%361, %c68] : memref<7x128xi32, #tpu.memory_space<smem>>
    %363 = arith.index_cast %362 : i32 to index
    %c0_176 = arith.constant 0 : index
    %c0_177 = arith.constant 0 : index
    %364 = vector.load %arg11[%363, %c0_176, %c0_177] : memref<12x1x32xf32, #tpu.memory_space<vmem>>, vector<1x1x32xf32>
    %365 = vector.shape_cast %364 : vector<1x1x32xf32> to vector<1x32xf32>
    %366 = arith.index_cast %arg0 : i32 to index
    %c84 = arith.constant 84 : index
    %367 = memref.load %arg1[%366, %c84] : memref<7x128xi32, #tpu.memory_space<smem>>
    %368 = arith.index_cast %367 : i32 to index
    %c0_178 = arith.constant 0 : index
    %c0_179 = arith.constant 0 : index
    %369 = vector.load %arg11[%368, %c0_178, %c0_179] : memref<12x1x32xf32, #tpu.memory_space<vmem>>, vector<1x1x32xf32>
    %370 = vector.shape_cast %369 : vector<1x1x32xf32> to vector<1x32xf32>
    %371 = arith.index_cast %arg0 : i32 to index
    %c100 = arith.constant 100 : index
    %372 = memref.load %arg1[%371, %c100] : memref<7x128xi32, #tpu.memory_space<smem>>
    %373 = arith.index_cast %372 : i32 to index
    %c0_180 = arith.constant 0 : index
    %c0_181 = arith.constant 0 : index
    %374 = vector.load %arg11[%373, %c0_180, %c0_181] : memref<12x1x32xf32, #tpu.memory_space<vmem>>, vector<1x1x32xf32>
    %375 = vector.shape_cast %374 : vector<1x1x32xf32> to vector<1x32xf32>
    %376 = arith.index_cast %arg0 : i32 to index
    %c116 = arith.constant 116 : index
    %377 = memref.load %arg1[%376, %c116] : memref<7x128xi32, #tpu.memory_space<smem>>
    %378 = arith.index_cast %377 : i32 to index
    %c0_182 = arith.constant 0 : index
    %c0_183 = arith.constant 0 : index
    %379 = vector.load %arg11[%378, %c0_182, %c0_183] : memref<12x1x32xf32, #tpu.memory_space<vmem>>, vector<1x1x32xf32>
    %380 = vector.shape_cast %379 : vector<1x1x32xf32> to vector<1x32xf32>
    %381 = arith.index_cast %arg0 : i32 to index
    %c4_184 = arith.constant 4 : index
    %382 = memref.load %arg2[%381, %c4_184] : memref<7x128xi32, #tpu.memory_space<smem>>
    %383 = arith.index_cast %382 : i32 to index
    %c0_185 = arith.constant 0 : index
    %c0_186 = arith.constant 0 : index
    %384 = vector.load %arg11[%383, %c0_185, %c0_186] : memref<12x1x32xf32, #tpu.memory_space<vmem>>, vector<1x1x32xf32>
    %385 = vector.shape_cast %384 : vector<1x1x32xf32> to vector<1x32xf32>
    %386 = arith.index_cast %arg0 : i32 to index
    %c20_187 = arith.constant 20 : index
    %387 = memref.load %arg2[%386, %c20_187] : memref<7x128xi32, #tpu.memory_space<smem>>
    %388 = arith.index_cast %387 : i32 to index
    %c0_188 = arith.constant 0 : index
    %c0_189 = arith.constant 0 : index
    %389 = vector.load %arg11[%388, %c0_188, %c0_189] : memref<12x1x32xf32, #tpu.memory_space<vmem>>, vector<1x1x32xf32>
    %390 = vector.shape_cast %389 : vector<1x1x32xf32> to vector<1x32xf32>
    %391 = arith.index_cast %arg0 : i32 to index
    %c36_190 = arith.constant 36 : index
    %392 = memref.load %arg2[%391, %c36_190] : memref<7x128xi32, #tpu.memory_space<smem>>
    %393 = arith.index_cast %392 : i32 to index
    %c0_191 = arith.constant 0 : index
    %c0_192 = arith.constant 0 : index
    %394 = vector.load %arg11[%393, %c0_191, %c0_192] : memref<12x1x32xf32, #tpu.memory_space<vmem>>, vector<1x1x32xf32>
    %395 = vector.shape_cast %394 : vector<1x1x32xf32> to vector<1x32xf32>
    %396 = arith.index_cast %arg0 : i32 to index
    %c52_193 = arith.constant 52 : index
    %397 = memref.load %arg2[%396, %c52_193] : memref<7x128xi32, #tpu.memory_space<smem>>
    %398 = arith.index_cast %397 : i32 to index
    %c0_194 = arith.constant 0 : index
    %c0_195 = arith.constant 0 : index
    %399 = vector.load %arg11[%398, %c0_194, %c0_195] : memref<12x1x32xf32, #tpu.memory_space<vmem>>, vector<1x1x32xf32>
    %400 = vector.shape_cast %399 : vector<1x1x32xf32> to vector<1x32xf32>
    %401 = arith.index_cast %arg0 : i32 to index
    %c68_196 = arith.constant 68 : index
    %402 = memref.load %arg2[%401, %c68_196] : memref<7x128xi32, #tpu.memory_space<smem>>
    %403 = arith.index_cast %402 : i32 to index
    %c0_197 = arith.constant 0 : index
    %c0_198 = arith.constant 0 : index
    %404 = vector.load %arg11[%403, %c0_197, %c0_198] : memref<12x1x32xf32, #tpu.memory_space<vmem>>, vector<1x1x32xf32>
    %405 = vector.shape_cast %404 : vector<1x1x32xf32> to vector<1x32xf32>
    %406 = arith.index_cast %arg0 : i32 to index
    %c84_199 = arith.constant 84 : index
    %407 = memref.load %arg2[%406, %c84_199] : memref<7x128xi32, #tpu.memory_space<smem>>
    %408 = arith.index_cast %407 : i32 to index
    %c0_200 = arith.constant 0 : index
    %c0_201 = arith.constant 0 : index
    %409 = vector.load %arg11[%408, %c0_200, %c0_201] : memref<12x1x32xf32, #tpu.memory_space<vmem>>, vector<1x1x32xf32>
    %410 = vector.shape_cast %409 : vector<1x1x32xf32> to vector<1x32xf32>
    %411 = arith.index_cast %arg0 : i32 to index
    %c100_202 = arith.constant 100 : index
    %412 = memref.load %arg2[%411, %c100_202] : memref<7x128xi32, #tpu.memory_space<smem>>
    %413 = arith.index_cast %412 : i32 to index
    %c0_203 = arith.constant 0 : index
    %c0_204 = arith.constant 0 : index
    %414 = vector.load %arg11[%413, %c0_203, %c0_204] : memref<12x1x32xf32, #tpu.memory_space<vmem>>, vector<1x1x32xf32>
    %415 = vector.shape_cast %414 : vector<1x1x32xf32> to vector<1x32xf32>
    %416 = arith.index_cast %arg0 : i32 to index
    %c116_205 = arith.constant 116 : index
    %417 = memref.load %arg2[%416, %c116_205] : memref<7x128xi32, #tpu.memory_space<smem>>
    %418 = arith.index_cast %417 : i32 to index
    %c0_206 = arith.constant 0 : index
    %c0_207 = arith.constant 0 : index
    %419 = vector.load %arg11[%418, %c0_206, %c0_207] : memref<12x1x32xf32, #tpu.memory_space<vmem>>, vector<1x1x32xf32>
    %420 = vector.shape_cast %419 : vector<1x1x32xf32> to vector<1x32xf32>
    %421 = tpu.concatenate %345, %350, %355, %360, %365, %370, %375, %380 in 0 : vector<1x32xf32>, vector<1x32xf32>, vector<1x32xf32>, vector<1x32xf32>, vector<1x32xf32>, vector<1x32xf32>, vector<1x32xf32>, vector<1x32xf32> -> vector<8x32xf32>
    %422 = tpu.concatenate %385, %390, %395, %400, %405, %410, %415, %420 in 0 : vector<1x32xf32>, vector<1x32xf32>, vector<1x32xf32>, vector<1x32xf32>, vector<1x32xf32>, vector<1x32xf32>, vector<1x32xf32>, vector<1x32xf32> -> vector<8x32xf32>
    %423 = arith.index_cast %arg0 : i32 to index
    %c5 = arith.constant 5 : index
    %424 = memref.load %arg1[%423, %c5] : memref<7x128xi32, #tpu.memory_space<smem>>
    %425 = arith.index_cast %424 : i32 to index
    %c0_208 = arith.constant 0 : index
    %c0_209 = arith.constant 0 : index
    %426 = vector.load %arg11[%425, %c0_208, %c0_209] : memref<12x1x32xf32, #tpu.memory_space<vmem>>, vector<1x1x32xf32>
    %427 = vector.shape_cast %426 : vector<1x1x32xf32> to vector<1x32xf32>
    %428 = arith.index_cast %arg0 : i32 to index
    %c21 = arith.constant 21 : index
    %429 = memref.load %arg1[%428, %c21] : memref<7x128xi32, #tpu.memory_space<smem>>
    %430 = arith.index_cast %429 : i32 to index
    %c0_210 = arith.constant 0 : index
    %c0_211 = arith.constant 0 : index
    %431 = vector.load %arg11[%430, %c0_210, %c0_211] : memref<12x1x32xf32, #tpu.memory_space<vmem>>, vector<1x1x32xf32>
    %432 = vector.shape_cast %431 : vector<1x1x32xf32> to vector<1x32xf32>
    %433 = arith.index_cast %arg0 : i32 to index
    %c37 = arith.constant 37 : index
    %434 = memref.load %arg1[%433, %c37] : memref<7x128xi32, #tpu.memory_space<smem>>
    %435 = arith.index_cast %434 : i32 to index
    %c0_212 = arith.constant 0 : index
    %c0_213 = arith.constant 0 : index
    %436 = vector.load %arg11[%435, %c0_212, %c0_213] : memref<12x1x32xf32, #tpu.memory_space<vmem>>, vector<1x1x32xf32>
    %437 = vector.shape_cast %436 : vector<1x1x32xf32> to vector<1x32xf32>
    %438 = arith.index_cast %arg0 : i32 to index
    %c53 = arith.constant 53 : index
    %439 = memref.load %arg1[%438, %c53] : memref<7x128xi32, #tpu.memory_space<smem>>
    %440 = arith.index_cast %439 : i32 to index
    %c0_214 = arith.constant 0 : index
    %c0_215 = arith.constant 0 : index
    %441 = vector.load %arg11[%440, %c0_214, %c0_215] : memref<12x1x32xf32, #tpu.memory_space<vmem>>, vector<1x1x32xf32>
    %442 = vector.shape_cast %441 : vector<1x1x32xf32> to vector<1x32xf32>
    %443 = arith.index_cast %arg0 : i32 to index
    %c69 = arith.constant 69 : index
    %444 = memref.load %arg1[%443, %c69] : memref<7x128xi32, #tpu.memory_space<smem>>
    %445 = arith.index_cast %444 : i32 to index
    %c0_216 = arith.constant 0 : index
    %c0_217 = arith.constant 0 : index
    %446 = vector.load %arg11[%445, %c0_216, %c0_217] : memref<12x1x32xf32, #tpu.memory_space<vmem>>, vector<1x1x32xf32>
    %447 = vector.shape_cast %446 : vector<1x1x32xf32> to vector<1x32xf32>
    %448 = arith.index_cast %arg0 : i32 to index
    %c85 = arith.constant 85 : index
    %449 = memref.load %arg1[%448, %c85] : memref<7x128xi32, #tpu.memory_space<smem>>
    %450 = arith.index_cast %449 : i32 to index
    %c0_218 = arith.constant 0 : index
    %c0_219 = arith.constant 0 : index
    %451 = vector.load %arg11[%450, %c0_218, %c0_219] : memref<12x1x32xf32, #tpu.memory_space<vmem>>, vector<1x1x32xf32>
    %452 = vector.shape_cast %451 : vector<1x1x32xf32> to vector<1x32xf32>
    %453 = arith.index_cast %arg0 : i32 to index
    %c101 = arith.constant 101 : index
    %454 = memref.load %arg1[%453, %c101] : memref<7x128xi32, #tpu.memory_space<smem>>
    %455 = arith.index_cast %454 : i32 to index
    %c0_220 = arith.constant 0 : index
    %c0_221 = arith.constant 0 : index
    %456 = vector.load %arg11[%455, %c0_220, %c0_221] : memref<12x1x32xf32, #tpu.memory_space<vmem>>, vector<1x1x32xf32>
    %457 = vector.shape_cast %456 : vector<1x1x32xf32> to vector<1x32xf32>
    %458 = arith.index_cast %arg0 : i32 to index
    %c117 = arith.constant 117 : index
    %459 = memref.load %arg1[%458, %c117] : memref<7x128xi32, #tpu.memory_space<smem>>
    %460 = arith.index_cast %459 : i32 to index
    %c0_222 = arith.constant 0 : index
    %c0_223 = arith.constant 0 : index
    %461 = vector.load %arg11[%460, %c0_222, %c0_223] : memref<12x1x32xf32, #tpu.memory_space<vmem>>, vector<1x1x32xf32>
    %462 = vector.shape_cast %461 : vector<1x1x32xf32> to vector<1x32xf32>
    %463 = arith.index_cast %arg0 : i32 to index
    %c5_224 = arith.constant 5 : index
    %464 = memref.load %arg2[%463, %c5_224] : memref<7x128xi32, #tpu.memory_space<smem>>
    %465 = arith.index_cast %464 : i32 to index
    %c0_225 = arith.constant 0 : index
    %c0_226 = arith.constant 0 : index
    %466 = vector.load %arg11[%465, %c0_225, %c0_226] : memref<12x1x32xf32, #tpu.memory_space<vmem>>, vector<1x1x32xf32>
    %467 = vector.shape_cast %466 : vector<1x1x32xf32> to vector<1x32xf32>
    %468 = arith.index_cast %arg0 : i32 to index
    %c21_227 = arith.constant 21 : index
    %469 = memref.load %arg2[%468, %c21_227] : memref<7x128xi32, #tpu.memory_space<smem>>
    %470 = arith.index_cast %469 : i32 to index
    %c0_228 = arith.constant 0 : index
    %c0_229 = arith.constant 0 : index
    %471 = vector.load %arg11[%470, %c0_228, %c0_229] : memref<12x1x32xf32, #tpu.memory_space<vmem>>, vector<1x1x32xf32>
    %472 = vector.shape_cast %471 : vector<1x1x32xf32> to vector<1x32xf32>
    %473 = arith.index_cast %arg0 : i32 to index
    %c37_230 = arith.constant 37 : index
    %474 = memref.load %arg2[%473, %c37_230] : memref<7x128xi32, #tpu.memory_space<smem>>
    %475 = arith.index_cast %474 : i32 to index
    %c0_231 = arith.constant 0 : index
    %c0_232 = arith.constant 0 : index
    %476 = vector.load %arg11[%475, %c0_231, %c0_232] : memref<12x1x32xf32, #tpu.memory_space<vmem>>, vector<1x1x32xf32>
    %477 = vector.shape_cast %476 : vector<1x1x32xf32> to vector<1x32xf32>
    %478 = arith.index_cast %arg0 : i32 to index
    %c53_233 = arith.constant 53 : index
    %479 = memref.load %arg2[%478, %c53_233] : memref<7x128xi32, #tpu.memory_space<smem>>
    %480 = arith.index_cast %479 : i32 to index
    %c0_234 = arith.constant 0 : index
    %c0_235 = arith.constant 0 : index
    %481 = vector.load %arg11[%480, %c0_234, %c0_235] : memref<12x1x32xf32, #tpu.memory_space<vmem>>, vector<1x1x32xf32>
    %482 = vector.shape_cast %481 : vector<1x1x32xf32> to vector<1x32xf32>
    %483 = arith.index_cast %arg0 : i32 to index
    %c69_236 = arith.constant 69 : index
    %484 = memref.load %arg2[%483, %c69_236] : memref<7x128xi32, #tpu.memory_space<smem>>
    %485 = arith.index_cast %484 : i32 to index
    %c0_237 = arith.constant 0 : index
    %c0_238 = arith.constant 0 : index
    %486 = vector.load %arg11[%485, %c0_237, %c0_238] : memref<12x1x32xf32, #tpu.memory_space<vmem>>, vector<1x1x32xf32>
    %487 = vector.shape_cast %486 : vector<1x1x32xf32> to vector<1x32xf32>
    %488 = arith.index_cast %arg0 : i32 to index
    %c85_239 = arith.constant 85 : index
    %489 = memref.load %arg2[%488, %c85_239] : memref<7x128xi32, #tpu.memory_space<smem>>
    %490 = arith.index_cast %489 : i32 to index
    %c0_240 = arith.constant 0 : index
    %c0_241 = arith.constant 0 : index
    %491 = vector.load %arg11[%490, %c0_240, %c0_241] : memref<12x1x32xf32, #tpu.memory_space<vmem>>, vector<1x1x32xf32>
    %492 = vector.shape_cast %491 : vector<1x1x32xf32> to vector<1x32xf32>
    %493 = arith.index_cast %arg0 : i32 to index
    %c101_242 = arith.constant 101 : index
    %494 = memref.load %arg2[%493, %c101_242] : memref<7x128xi32, #tpu.memory_space<smem>>
    %495 = arith.index_cast %494 : i32 to index
    %c0_243 = arith.constant 0 : index
    %c0_244 = arith.constant 0 : index
    %496 = vector.load %arg11[%495, %c0_243, %c0_244] : memref<12x1x32xf32, #tpu.memory_space<vmem>>, vector<1x1x32xf32>
    %497 = vector.shape_cast %496 : vector<1x1x32xf32> to vector<1x32xf32>
    %498 = arith.index_cast %arg0 : i32 to index
    %c117_245 = arith.constant 117 : index
    %499 = memref.load %arg2[%498, %c117_245] : memref<7x128xi32, #tpu.memory_space<smem>>
    %500 = arith.index_cast %499 : i32 to index
    %c0_246 = arith.constant 0 : index
    %c0_247 = arith.constant 0 : index
    %501 = vector.load %arg11[%500, %c0_246, %c0_247] : memref<12x1x32xf32, #tpu.memory_space<vmem>>, vector<1x1x32xf32>
    %502 = vector.shape_cast %501 : vector<1x1x32xf32> to vector<1x32xf32>
    %503 = tpu.concatenate %427, %432, %437, %442, %447, %452, %457, %462 in 0 : vector<1x32xf32>, vector<1x32xf32>, vector<1x32xf32>, vector<1x32xf32>, vector<1x32xf32>, vector<1x32xf32>, vector<1x32xf32>, vector<1x32xf32> -> vector<8x32xf32>
    %504 = tpu.concatenate %467, %472, %477, %482, %487, %492, %497, %502 in 0 : vector<1x32xf32>, vector<1x32xf32>, vector<1x32xf32>, vector<1x32xf32>, vector<1x32xf32>, vector<1x32xf32>, vector<1x32xf32>, vector<1x32xf32> -> vector<8x32xf32>
    %505 = arith.index_cast %arg0 : i32 to index
    %c6 = arith.constant 6 : index
    %506 = memref.load %arg1[%505, %c6] : memref<7x128xi32, #tpu.memory_space<smem>>
    %507 = arith.index_cast %506 : i32 to index
    %c0_248 = arith.constant 0 : index
    %c0_249 = arith.constant 0 : index
    %508 = vector.load %arg11[%507, %c0_248, %c0_249] : memref<12x1x32xf32, #tpu.memory_space<vmem>>, vector<1x1x32xf32>
    %509 = vector.shape_cast %508 : vector<1x1x32xf32> to vector<1x32xf32>
    %510 = arith.index_cast %arg0 : i32 to index
    %c22 = arith.constant 22 : index
    %511 = memref.load %arg1[%510, %c22] : memref<7x128xi32, #tpu.memory_space<smem>>
    %512 = arith.index_cast %511 : i32 to index
    %c0_250 = arith.constant 0 : index
    %c0_251 = arith.constant 0 : index
    %513 = vector.load %arg11[%512, %c0_250, %c0_251] : memref<12x1x32xf32, #tpu.memory_space<vmem>>, vector<1x1x32xf32>
    %514 = vector.shape_cast %513 : vector<1x1x32xf32> to vector<1x32xf32>
    %515 = arith.index_cast %arg0 : i32 to index
    %c38 = arith.constant 38 : index
    %516 = memref.load %arg1[%515, %c38] : memref<7x128xi32, #tpu.memory_space<smem>>
    %517 = arith.index_cast %516 : i32 to index
    %c0_252 = arith.constant 0 : index
    %c0_253 = arith.constant 0 : index
    %518 = vector.load %arg11[%517, %c0_252, %c0_253] : memref<12x1x32xf32, #tpu.memory_space<vmem>>, vector<1x1x32xf32>
    %519 = vector.shape_cast %518 : vector<1x1x32xf32> to vector<1x32xf32>
    %520 = arith.index_cast %arg0 : i32 to index
    %c54 = arith.constant 54 : index
    %521 = memref.load %arg1[%520, %c54] : memref<7x128xi32, #tpu.memory_space<smem>>
    %522 = arith.index_cast %521 : i32 to index
    %c0_254 = arith.constant 0 : index
    %c0_255 = arith.constant 0 : index
    %523 = vector.load %arg11[%522, %c0_254, %c0_255] : memref<12x1x32xf32, #tpu.memory_space<vmem>>, vector<1x1x32xf32>
    %524 = vector.shape_cast %523 : vector<1x1x32xf32> to vector<1x32xf32>
    %525 = arith.index_cast %arg0 : i32 to index
    %c70 = arith.constant 70 : index
    %526 = memref.load %arg1[%525, %c70] : memref<7x128xi32, #tpu.memory_space<smem>>
    %527 = arith.index_cast %526 : i32 to index
    %c0_256 = arith.constant 0 : index
    %c0_257 = arith.constant 0 : index
    %528 = vector.load %arg11[%527, %c0_256, %c0_257] : memref<12x1x32xf32, #tpu.memory_space<vmem>>, vector<1x1x32xf32>
    %529 = vector.shape_cast %528 : vector<1x1x32xf32> to vector<1x32xf32>
    %530 = arith.index_cast %arg0 : i32 to index
    %c86 = arith.constant 86 : index
    %531 = memref.load %arg1[%530, %c86] : memref<7x128xi32, #tpu.memory_space<smem>>
    %532 = arith.index_cast %531 : i32 to index
    %c0_258 = arith.constant 0 : index
    %c0_259 = arith.constant 0 : index
    %533 = vector.load %arg11[%532, %c0_258, %c0_259] : memref<12x1x32xf32, #tpu.memory_space<vmem>>, vector<1x1x32xf32>
    %534 = vector.shape_cast %533 : vector<1x1x32xf32> to vector<1x32xf32>
    %535 = arith.index_cast %arg0 : i32 to index
    %c102 = arith.constant 102 : index
    %536 = memref.load %arg1[%535, %c102] : memref<7x128xi32, #tpu.memory_space<smem>>
    %537 = arith.index_cast %536 : i32 to index
    %c0_260 = arith.constant 0 : index
    %c0_261 = arith.constant 0 : index
    %538 = vector.load %arg11[%537, %c0_260, %c0_261] : memref<12x1x32xf32, #tpu.memory_space<vmem>>, vector<1x1x32xf32>
    %539 = vector.shape_cast %538 : vector<1x1x32xf32> to vector<1x32xf32>
    %540 = arith.index_cast %arg0 : i32 to index
    %c118 = arith.constant 118 : index
    %541 = memref.load %arg1[%540, %c118] : memref<7x128xi32, #tpu.memory_space<smem>>
    %542 = arith.index_cast %541 : i32 to index
    %c0_262 = arith.constant 0 : index
    %c0_263 = arith.constant 0 : index
    %543 = vector.load %arg11[%542, %c0_262, %c0_263] : memref<12x1x32xf32, #tpu.memory_space<vmem>>, vector<1x1x32xf32>
    %544 = vector.shape_cast %543 : vector<1x1x32xf32> to vector<1x32xf32>
    %545 = arith.index_cast %arg0 : i32 to index
    %c6_264 = arith.constant 6 : index
    %546 = memref.load %arg2[%545, %c6_264] : memref<7x128xi32, #tpu.memory_space<smem>>
    %547 = arith.index_cast %546 : i32 to index
    %c0_265 = arith.constant 0 : index
    %c0_266 = arith.constant 0 : index
    %548 = vector.load %arg11[%547, %c0_265, %c0_266] : memref<12x1x32xf32, #tpu.memory_space<vmem>>, vector<1x1x32xf32>
    %549 = vector.shape_cast %548 : vector<1x1x32xf32> to vector<1x32xf32>
    %550 = arith.index_cast %arg0 : i32 to index
    %c22_267 = arith.constant 22 : index
    %551 = memref.load %arg2[%550, %c22_267] : memref<7x128xi32, #tpu.memory_space<smem>>
    %552 = arith.index_cast %551 : i32 to index
    %c0_268 = arith.constant 0 : index
    %c0_269 = arith.constant 0 : index
    %553 = vector.load %arg11[%552, %c0_268, %c0_269] : memref<12x1x32xf32, #tpu.memory_space<vmem>>, vector<1x1x32xf32>
    %554 = vector.shape_cast %553 : vector<1x1x32xf32> to vector<1x32xf32>
    %555 = arith.index_cast %arg0 : i32 to index
    %c38_270 = arith.constant 38 : index
    %556 = memref.load %arg2[%555, %c38_270] : memref<7x128xi32, #tpu.memory_space<smem>>
    %557 = arith.index_cast %556 : i32 to index
    %c0_271 = arith.constant 0 : index
    %c0_272 = arith.constant 0 : index
    %558 = vector.load %arg11[%557, %c0_271, %c0_272] : memref<12x1x32xf32, #tpu.memory_space<vmem>>, vector<1x1x32xf32>
    %559 = vector.shape_cast %558 : vector<1x1x32xf32> to vector<1x32xf32>
    %560 = arith.index_cast %arg0 : i32 to index
    %c54_273 = arith.constant 54 : index
    %561 = memref.load %arg2[%560, %c54_273] : memref<7x128xi32, #tpu.memory_space<smem>>
    %562 = arith.index_cast %561 : i32 to index
    %c0_274 = arith.constant 0 : index
    %c0_275 = arith.constant 0 : index
    %563 = vector.load %arg11[%562, %c0_274, %c0_275] : memref<12x1x32xf32, #tpu.memory_space<vmem>>, vector<1x1x32xf32>
    %564 = vector.shape_cast %563 : vector<1x1x32xf32> to vector<1x32xf32>
    %565 = arith.index_cast %arg0 : i32 to index
    %c70_276 = arith.constant 70 : index
    %566 = memref.load %arg2[%565, %c70_276] : memref<7x128xi32, #tpu.memory_space<smem>>
    %567 = arith.index_cast %566 : i32 to index
    %c0_277 = arith.constant 0 : index
    %c0_278 = arith.constant 0 : index
    %568 = vector.load %arg11[%567, %c0_277, %c0_278] : memref<12x1x32xf32, #tpu.memory_space<vmem>>, vector<1x1x32xf32>
    %569 = vector.shape_cast %568 : vector<1x1x32xf32> to vector<1x32xf32>
    %570 = arith.index_cast %arg0 : i32 to index
    %c86_279 = arith.constant 86 : index
    %571 = memref.load %arg2[%570, %c86_279] : memref<7x128xi32, #tpu.memory_space<smem>>
    %572 = arith.index_cast %571 : i32 to index
    %c0_280 = arith.constant 0 : index
    %c0_281 = arith.constant 0 : index
    %573 = vector.load %arg11[%572, %c0_280, %c0_281] : memref<12x1x32xf32, #tpu.memory_space<vmem>>, vector<1x1x32xf32>
    %574 = vector.shape_cast %573 : vector<1x1x32xf32> to vector<1x32xf32>
    %575 = arith.index_cast %arg0 : i32 to index
    %c102_282 = arith.constant 102 : index
    %576 = memref.load %arg2[%575, %c102_282] : memref<7x128xi32, #tpu.memory_space<smem>>
    %577 = arith.index_cast %576 : i32 to index
    %c0_283 = arith.constant 0 : index
    %c0_284 = arith.constant 0 : index
    %578 = vector.load %arg11[%577, %c0_283, %c0_284] : memref<12x1x32xf32, #tpu.memory_space<vmem>>, vector<1x1x32xf32>
    %579 = vector.shape_cast %578 : vector<1x1x32xf32> to vector<1x32xf32>
    %580 = arith.index_cast %arg0 : i32 to index
    %c118_285 = arith.constant 118 : index
    %581 = memref.load %arg2[%580, %c118_285] : memref<7x128xi32, #tpu.memory_space<smem>>
    %582 = arith.index_cast %581 : i32 to index
    %c0_286 = arith.constant 0 : index
    %c0_287 = arith.constant 0 : index
    %583 = vector.load %arg11[%582, %c0_286, %c0_287] : memref<12x1x32xf32, #tpu.memory_space<vmem>>, vector<1x1x32xf32>
    %584 = vector.shape_cast %583 : vector<1x1x32xf32> to vector<1x32xf32>
    %585 = tpu.concatenate %509, %514, %519, %524, %529, %534, %539, %544 in 0 : vector<1x32xf32>, vector<1x32xf32>, vector<1x32xf32>, vector<1x32xf32>, vector<1x32xf32>, vector<1x32xf32>, vector<1x32xf32>, vector<1x32xf32> -> vector<8x32xf32>
    %586 = tpu.concatenate %549, %554, %559, %564, %569, %574, %579, %584 in 0 : vector<1x32xf32>, vector<1x32xf32>, vector<1x32xf32>, vector<1x32xf32>, vector<1x32xf32>, vector<1x32xf32>, vector<1x32xf32>, vector<1x32xf32> -> vector<8x32xf32>
    %587 = arith.index_cast %arg0 : i32 to index
    %c7 = arith.constant 7 : index
    %588 = memref.load %arg1[%587, %c7] : memref<7x128xi32, #tpu.memory_space<smem>>
    %589 = arith.index_cast %588 : i32 to index
    %c0_288 = arith.constant 0 : index
    %c0_289 = arith.constant 0 : index
    %590 = vector.load %arg11[%589, %c0_288, %c0_289] : memref<12x1x32xf32, #tpu.memory_space<vmem>>, vector<1x1x32xf32>
    %591 = vector.shape_cast %590 : vector<1x1x32xf32> to vector<1x32xf32>
    %592 = arith.index_cast %arg0 : i32 to index
    %c23 = arith.constant 23 : index
    %593 = memref.load %arg1[%592, %c23] : memref<7x128xi32, #tpu.memory_space<smem>>
    %594 = arith.index_cast %593 : i32 to index
    %c0_290 = arith.constant 0 : index
    %c0_291 = arith.constant 0 : index
    %595 = vector.load %arg11[%594, %c0_290, %c0_291] : memref<12x1x32xf32, #tpu.memory_space<vmem>>, vector<1x1x32xf32>
    %596 = vector.shape_cast %595 : vector<1x1x32xf32> to vector<1x32xf32>
    %597 = arith.index_cast %arg0 : i32 to index
    %c39 = arith.constant 39 : index
    %598 = memref.load %arg1[%597, %c39] : memref<7x128xi32, #tpu.memory_space<smem>>
    %599 = arith.index_cast %598 : i32 to index
    %c0_292 = arith.constant 0 : index
    %c0_293 = arith.constant 0 : index
    %600 = vector.load %arg11[%599, %c0_292, %c0_293] : memref<12x1x32xf32, #tpu.memory_space<vmem>>, vector<1x1x32xf32>
    %601 = vector.shape_cast %600 : vector<1x1x32xf32> to vector<1x32xf32>
    %602 = arith.index_cast %arg0 : i32 to index
    %c55 = arith.constant 55 : index
    %603 = memref.load %arg1[%602, %c55] : memref<7x128xi32, #tpu.memory_space<smem>>
    %604 = arith.index_cast %603 : i32 to index
    %c0_294 = arith.constant 0 : index
    %c0_295 = arith.constant 0 : index
    %605 = vector.load %arg11[%604, %c0_294, %c0_295] : memref<12x1x32xf32, #tpu.memory_space<vmem>>, vector<1x1x32xf32>
    %606 = vector.shape_cast %605 : vector<1x1x32xf32> to vector<1x32xf32>
    %607 = arith.index_cast %arg0 : i32 to index
    %c71 = arith.constant 71 : index
    %608 = memref.load %arg1[%607, %c71] : memref<7x128xi32, #tpu.memory_space<smem>>
    %609 = arith.index_cast %608 : i32 to index
    %c0_296 = arith.constant 0 : index
    %c0_297 = arith.constant 0 : index
    %610 = vector.load %arg11[%609, %c0_296, %c0_297] : memref<12x1x32xf32, #tpu.memory_space<vmem>>, vector<1x1x32xf32>
    %611 = vector.shape_cast %610 : vector<1x1x32xf32> to vector<1x32xf32>
    %612 = arith.index_cast %arg0 : i32 to index
    %c87 = arith.constant 87 : index
    %613 = memref.load %arg1[%612, %c87] : memref<7x128xi32, #tpu.memory_space<smem>>
    %614 = arith.index_cast %613 : i32 to index
    %c0_298 = arith.constant 0 : index
    %c0_299 = arith.constant 0 : index
    %615 = vector.load %arg11[%614, %c0_298, %c0_299] : memref<12x1x32xf32, #tpu.memory_space<vmem>>, vector<1x1x32xf32>
    %616 = vector.shape_cast %615 : vector<1x1x32xf32> to vector<1x32xf32>
    %617 = arith.index_cast %arg0 : i32 to index
    %c103 = arith.constant 103 : index
    %618 = memref.load %arg1[%617, %c103] : memref<7x128xi32, #tpu.memory_space<smem>>
    %619 = arith.index_cast %618 : i32 to index
    %c0_300 = arith.constant 0 : index
    %c0_301 = arith.constant 0 : index
    %620 = vector.load %arg11[%619, %c0_300, %c0_301] : memref<12x1x32xf32, #tpu.memory_space<vmem>>, vector<1x1x32xf32>
    %621 = vector.shape_cast %620 : vector<1x1x32xf32> to vector<1x32xf32>
    %622 = arith.index_cast %arg0 : i32 to index
    %c119 = arith.constant 119 : index
    %623 = memref.load %arg1[%622, %c119] : memref<7x128xi32, #tpu.memory_space<smem>>
    %624 = arith.index_cast %623 : i32 to index
    %c0_302 = arith.constant 0 : index
    %c0_303 = arith.constant 0 : index
    %625 = vector.load %arg11[%624, %c0_302, %c0_303] : memref<12x1x32xf32, #tpu.memory_space<vmem>>, vector<1x1x32xf32>
    %626 = vector.shape_cast %625 : vector<1x1x32xf32> to vector<1x32xf32>
    %627 = arith.index_cast %arg0 : i32 to index
    %c7_304 = arith.constant 7 : index
    %628 = memref.load %arg2[%627, %c7_304] : memref<7x128xi32, #tpu.memory_space<smem>>
    %629 = arith.index_cast %628 : i32 to index
    %c0_305 = arith.constant 0 : index
    %c0_306 = arith.constant 0 : index
    %630 = vector.load %arg11[%629, %c0_305, %c0_306] : memref<12x1x32xf32, #tpu.memory_space<vmem>>, vector<1x1x32xf32>
    %631 = vector.shape_cast %630 : vector<1x1x32xf32> to vector<1x32xf32>
    %632 = arith.index_cast %arg0 : i32 to index
    %c23_307 = arith.constant 23 : index
    %633 = memref.load %arg2[%632, %c23_307] : memref<7x128xi32, #tpu.memory_space<smem>>
    %634 = arith.index_cast %633 : i32 to index
    %c0_308 = arith.constant 0 : index
    %c0_309 = arith.constant 0 : index
    %635 = vector.load %arg11[%634, %c0_308, %c0_309] : memref<12x1x32xf32, #tpu.memory_space<vmem>>, vector<1x1x32xf32>
    %636 = vector.shape_cast %635 : vector<1x1x32xf32> to vector<1x32xf32>
    %637 = arith.index_cast %arg0 : i32 to index
    %c39_310 = arith.constant 39 : index
    %638 = memref.load %arg2[%637, %c39_310] : memref<7x128xi32, #tpu.memory_space<smem>>
    %639 = arith.index_cast %638 : i32 to index
    %c0_311 = arith.constant 0 : index
    %c0_312 = arith.constant 0 : index
    %640 = vector.load %arg11[%639, %c0_311, %c0_312] : memref<12x1x32xf32, #tpu.memory_space<vmem>>, vector<1x1x32xf32>
    %641 = vector.shape_cast %640 : vector<1x1x32xf32> to vector<1x32xf32>
    %642 = arith.index_cast %arg0 : i32 to index
    %c55_313 = arith.constant 55 : index
    %643 = memref.load %arg2[%642, %c55_313] : memref<7x128xi32, #tpu.memory_space<smem>>
    %644 = arith.index_cast %643 : i32 to index
    %c0_314 = arith.constant 0 : index
    %c0_315 = arith.constant 0 : index
    %645 = vector.load %arg11[%644, %c0_314, %c0_315] : memref<12x1x32xf32, #tpu.memory_space<vmem>>, vector<1x1x32xf32>
    %646 = vector.shape_cast %645 : vector<1x1x32xf32> to vector<1x32xf32>
    %647 = arith.index_cast %arg0 : i32 to index
    %c71_316 = arith.constant 71 : index
    %648 = memref.load %arg2[%647, %c71_316] : memref<7x128xi32, #tpu.memory_space<smem>>
    %649 = arith.index_cast %648 : i32 to index
    %c0_317 = arith.constant 0 : index
    %c0_318 = arith.constant 0 : index
    %650 = vector.load %arg11[%649, %c0_317, %c0_318] : memref<12x1x32xf32, #tpu.memory_space<vmem>>, vector<1x1x32xf32>
    %651 = vector.shape_cast %650 : vector<1x1x32xf32> to vector<1x32xf32>
    %652 = arith.index_cast %arg0 : i32 to index
    %c87_319 = arith.constant 87 : index
    %653 = memref.load %arg2[%652, %c87_319] : memref<7x128xi32, #tpu.memory_space<smem>>
    %654 = arith.index_cast %653 : i32 to index
    %c0_320 = arith.constant 0 : index
    %c0_321 = arith.constant 0 : index
    %655 = vector.load %arg11[%654, %c0_320, %c0_321] : memref<12x1x32xf32, #tpu.memory_space<vmem>>, vector<1x1x32xf32>
    %656 = vector.shape_cast %655 : vector<1x1x32xf32> to vector<1x32xf32>
    %657 = arith.index_cast %arg0 : i32 to index
    %c103_322 = arith.constant 103 : index
    %658 = memref.load %arg2[%657, %c103_322] : memref<7x128xi32, #tpu.memory_space<smem>>
    %659 = arith.index_cast %658 : i32 to index
    %c0_323 = arith.constant 0 : index
    %c0_324 = arith.constant 0 : index
    %660 = vector.load %arg11[%659, %c0_323, %c0_324] : memref<12x1x32xf32, #tpu.memory_space<vmem>>, vector<1x1x32xf32>
    %661 = vector.shape_cast %660 : vector<1x1x32xf32> to vector<1x32xf32>
    %662 = arith.index_cast %arg0 : i32 to index
    %c119_325 = arith.constant 119 : index
    %663 = memref.load %arg2[%662, %c119_325] : memref<7x128xi32, #tpu.memory_space<smem>>
    %664 = arith.index_cast %663 : i32 to index
    %c0_326 = arith.constant 0 : index
    %c0_327 = arith.constant 0 : index
    %665 = vector.load %arg11[%664, %c0_326, %c0_327] : memref<12x1x32xf32, #tpu.memory_space<vmem>>, vector<1x1x32xf32>
    %666 = vector.shape_cast %665 : vector<1x1x32xf32> to vector<1x32xf32>
    %667 = tpu.concatenate %591, %596, %601, %606, %611, %616, %621, %626 in 0 : vector<1x32xf32>, vector<1x32xf32>, vector<1x32xf32>, vector<1x32xf32>, vector<1x32xf32>, vector<1x32xf32>, vector<1x32xf32>, vector<1x32xf32> -> vector<8x32xf32>
    %668 = tpu.concatenate %631, %636, %641, %646, %651, %656, %661, %666 in 0 : vector<1x32xf32>, vector<1x32xf32>, vector<1x32xf32>, vector<1x32xf32>, vector<1x32xf32>, vector<1x32xf32>, vector<1x32xf32>, vector<1x32xf32> -> vector<8x32xf32>
    %669 = arith.index_cast %arg0 : i32 to index
    %c8 = arith.constant 8 : index
    %670 = memref.load %arg1[%669, %c8] : memref<7x128xi32, #tpu.memory_space<smem>>
    %671 = arith.index_cast %670 : i32 to index
    %c0_328 = arith.constant 0 : index
    %c0_329 = arith.constant 0 : index
    %672 = vector.load %arg11[%671, %c0_328, %c0_329] : memref<12x1x32xf32, #tpu.memory_space<vmem>>, vector<1x1x32xf32>
    %673 = vector.shape_cast %672 : vector<1x1x32xf32> to vector<1x32xf32>
    %674 = arith.index_cast %arg0 : i32 to index
    %c24 = arith.constant 24 : index
    %675 = memref.load %arg1[%674, %c24] : memref<7x128xi32, #tpu.memory_space<smem>>
    %676 = arith.index_cast %675 : i32 to index
    %c0_330 = arith.constant 0 : index
    %c0_331 = arith.constant 0 : index
    %677 = vector.load %arg11[%676, %c0_330, %c0_331] : memref<12x1x32xf32, #tpu.memory_space<vmem>>, vector<1x1x32xf32>
    %678 = vector.shape_cast %677 : vector<1x1x32xf32> to vector<1x32xf32>
    %679 = arith.index_cast %arg0 : i32 to index
    %c40 = arith.constant 40 : index
    %680 = memref.load %arg1[%679, %c40] : memref<7x128xi32, #tpu.memory_space<smem>>
    %681 = arith.index_cast %680 : i32 to index
    %c0_332 = arith.constant 0 : index
    %c0_333 = arith.constant 0 : index
    %682 = vector.load %arg11[%681, %c0_332, %c0_333] : memref<12x1x32xf32, #tpu.memory_space<vmem>>, vector<1x1x32xf32>
    %683 = vector.shape_cast %682 : vector<1x1x32xf32> to vector<1x32xf32>
    %684 = arith.index_cast %arg0 : i32 to index
    %c56 = arith.constant 56 : index
    %685 = memref.load %arg1[%684, %c56] : memref<7x128xi32, #tpu.memory_space<smem>>
    %686 = arith.index_cast %685 : i32 to index
    %c0_334 = arith.constant 0 : index
    %c0_335 = arith.constant 0 : index
    %687 = vector.load %arg11[%686, %c0_334, %c0_335] : memref<12x1x32xf32, #tpu.memory_space<vmem>>, vector<1x1x32xf32>
    %688 = vector.shape_cast %687 : vector<1x1x32xf32> to vector<1x32xf32>
    %689 = arith.index_cast %arg0 : i32 to index
    %c72 = arith.constant 72 : index
    %690 = memref.load %arg1[%689, %c72] : memref<7x128xi32, #tpu.memory_space<smem>>
    %691 = arith.index_cast %690 : i32 to index
    %c0_336 = arith.constant 0 : index
    %c0_337 = arith.constant 0 : index
    %692 = vector.load %arg11[%691, %c0_336, %c0_337] : memref<12x1x32xf32, #tpu.memory_space<vmem>>, vector<1x1x32xf32>
    %693 = vector.shape_cast %692 : vector<1x1x32xf32> to vector<1x32xf32>
    %694 = arith.index_cast %arg0 : i32 to index
    %c88 = arith.constant 88 : index
    %695 = memref.load %arg1[%694, %c88] : memref<7x128xi32, #tpu.memory_space<smem>>
    %696 = arith.index_cast %695 : i32 to index
    %c0_338 = arith.constant 0 : index
    %c0_339 = arith.constant 0 : index
    %697 = vector.load %arg11[%696, %c0_338, %c0_339] : memref<12x1x32xf32, #tpu.memory_space<vmem>>, vector<1x1x32xf32>
    %698 = vector.shape_cast %697 : vector<1x1x32xf32> to vector<1x32xf32>
    %699 = arith.index_cast %arg0 : i32 to index
    %c104 = arith.constant 104 : index
    %700 = memref.load %arg1[%699, %c104] : memref<7x128xi32, #tpu.memory_space<smem>>
    %701 = arith.index_cast %700 : i32 to index
    %c0_340 = arith.constant 0 : index
    %c0_341 = arith.constant 0 : index
    %702 = vector.load %arg11[%701, %c0_340, %c0_341] : memref<12x1x32xf32, #tpu.memory_space<vmem>>, vector<1x1x32xf32>
    %703 = vector.shape_cast %702 : vector<1x1x32xf32> to vector<1x32xf32>
    %704 = arith.index_cast %arg0 : i32 to index
    %c120 = arith.constant 120 : index
    %705 = memref.load %arg1[%704, %c120] : memref<7x128xi32, #tpu.memory_space<smem>>
    %706 = arith.index_cast %705 : i32 to index
    %c0_342 = arith.constant 0 : index
    %c0_343 = arith.constant 0 : index
    %707 = vector.load %arg11[%706, %c0_342, %c0_343] : memref<12x1x32xf32, #tpu.memory_space<vmem>>, vector<1x1x32xf32>
    %708 = vector.shape_cast %707 : vector<1x1x32xf32> to vector<1x32xf32>
    %709 = arith.index_cast %arg0 : i32 to index
    %c8_344 = arith.constant 8 : index
    %710 = memref.load %arg2[%709, %c8_344] : memref<7x128xi32, #tpu.memory_space<smem>>
    %711 = arith.index_cast %710 : i32 to index
    %c0_345 = arith.constant 0 : index
    %c0_346 = arith.constant 0 : index
    %712 = vector.load %arg11[%711, %c0_345, %c0_346] : memref<12x1x32xf32, #tpu.memory_space<vmem>>, vector<1x1x32xf32>
    %713 = vector.shape_cast %712 : vector<1x1x32xf32> to vector<1x32xf32>
    %714 = arith.index_cast %arg0 : i32 to index
    %c24_347 = arith.constant 24 : index
    %715 = memref.load %arg2[%714, %c24_347] : memref<7x128xi32, #tpu.memory_space<smem>>
    %716 = arith.index_cast %715 : i32 to index
    %c0_348 = arith.constant 0 : index
    %c0_349 = arith.constant 0 : index
    %717 = vector.load %arg11[%716, %c0_348, %c0_349] : memref<12x1x32xf32, #tpu.memory_space<vmem>>, vector<1x1x32xf32>
    %718 = vector.shape_cast %717 : vector<1x1x32xf32> to vector<1x32xf32>
    %719 = arith.index_cast %arg0 : i32 to index
    %c40_350 = arith.constant 40 : index
    %720 = memref.load %arg2[%719, %c40_350] : memref<7x128xi32, #tpu.memory_space<smem>>
    %721 = arith.index_cast %720 : i32 to index
    %c0_351 = arith.constant 0 : index
    %c0_352 = arith.constant 0 : index
    %722 = vector.load %arg11[%721, %c0_351, %c0_352] : memref<12x1x32xf32, #tpu.memory_space<vmem>>, vector<1x1x32xf32>
    %723 = vector.shape_cast %722 : vector<1x1x32xf32> to vector<1x32xf32>
    %724 = arith.index_cast %arg0 : i32 to index
    %c56_353 = arith.constant 56 : index
    %725 = memref.load %arg2[%724, %c56_353] : memref<7x128xi32, #tpu.memory_space<smem>>
    %726 = arith.index_cast %725 : i32 to index
    %c0_354 = arith.constant 0 : index
    %c0_355 = arith.constant 0 : index
    %727 = vector.load %arg11[%726, %c0_354, %c0_355] : memref<12x1x32xf32, #tpu.memory_space<vmem>>, vector<1x1x32xf32>
    %728 = vector.shape_cast %727 : vector<1x1x32xf32> to vector<1x32xf32>
    %729 = arith.index_cast %arg0 : i32 to index
    %c72_356 = arith.constant 72 : index
    %730 = memref.load %arg2[%729, %c72_356] : memref<7x128xi32, #tpu.memory_space<smem>>
    %731 = arith.index_cast %730 : i32 to index
    %c0_357 = arith.constant 0 : index
    %c0_358 = arith.constant 0 : index
    %732 = vector.load %arg11[%731, %c0_357, %c0_358] : memref<12x1x32xf32, #tpu.memory_space<vmem>>, vector<1x1x32xf32>
    %733 = vector.shape_cast %732 : vector<1x1x32xf32> to vector<1x32xf32>
    %734 = arith.index_cast %arg0 : i32 to index
    %c88_359 = arith.constant 88 : index
    %735 = memref.load %arg2[%734, %c88_359] : memref<7x128xi32, #tpu.memory_space<smem>>
    %736 = arith.index_cast %735 : i32 to index
    %c0_360 = arith.constant 0 : index
    %c0_361 = arith.constant 0 : index
    %737 = vector.load %arg11[%736, %c0_360, %c0_361] : memref<12x1x32xf32, #tpu.memory_space<vmem>>, vector<1x1x32xf32>
    %738 = vector.shape_cast %737 : vector<1x1x32xf32> to vector<1x32xf32>
    %739 = arith.index_cast %arg0 : i32 to index
    %c104_362 = arith.constant 104 : index
    %740 = memref.load %arg2[%739, %c104_362] : memref<7x128xi32, #tpu.memory_space<smem>>
    %741 = arith.index_cast %740 : i32 to index
    %c0_363 = arith.constant 0 : index
    %c0_364 = arith.constant 0 : index
    %742 = vector.load %arg11[%741, %c0_363, %c0_364] : memref<12x1x32xf32, #tpu.memory_space<vmem>>, vector<1x1x32xf32>
    %743 = vector.shape_cast %742 : vector<1x1x32xf32> to vector<1x32xf32>
    %744 = arith.index_cast %arg0 : i32 to index
    %c120_365 = arith.constant 120 : index
    %745 = memref.load %arg2[%744, %c120_365] : memref<7x128xi32, #tpu.memory_space<smem>>
    %746 = arith.index_cast %745 : i32 to index
    %c0_366 = arith.constant 0 : index
    %c0_367 = arith.constant 0 : index
    %747 = vector.load %arg11[%746, %c0_366, %c0_367] : memref<12x1x32xf32, #tpu.memory_space<vmem>>, vector<1x1x32xf32>
    %748 = vector.shape_cast %747 : vector<1x1x32xf32> to vector<1x32xf32>
    %749 = tpu.concatenate %673, %678, %683, %688, %693, %698, %703, %708 in 0 : vector<1x32xf32>, vector<1x32xf32>, vector<1x32xf32>, vector<1x32xf32>, vector<1x32xf32>, vector<1x32xf32>, vector<1x32xf32>, vector<1x32xf32> -> vector<8x32xf32>
    %750 = tpu.concatenate %713, %718, %723, %728, %733, %738, %743, %748 in 0 : vector<1x32xf32>, vector<1x32xf32>, vector<1x32xf32>, vector<1x32xf32>, vector<1x32xf32>, vector<1x32xf32>, vector<1x32xf32>, vector<1x32xf32> -> vector<8x32xf32>
    %751 = arith.index_cast %arg0 : i32 to index
    %c9 = arith.constant 9 : index
    %752 = memref.load %arg1[%751, %c9] : memref<7x128xi32, #tpu.memory_space<smem>>
    %753 = arith.index_cast %752 : i32 to index
    %c0_368 = arith.constant 0 : index
    %c0_369 = arith.constant 0 : index
    %754 = vector.load %arg11[%753, %c0_368, %c0_369] : memref<12x1x32xf32, #tpu.memory_space<vmem>>, vector<1x1x32xf32>
    %755 = vector.shape_cast %754 : vector<1x1x32xf32> to vector<1x32xf32>
    %756 = arith.index_cast %arg0 : i32 to index
    %c25 = arith.constant 25 : index
    %757 = memref.load %arg1[%756, %c25] : memref<7x128xi32, #tpu.memory_space<smem>>
    %758 = arith.index_cast %757 : i32 to index
    %c0_370 = arith.constant 0 : index
    %c0_371 = arith.constant 0 : index
    %759 = vector.load %arg11[%758, %c0_370, %c0_371] : memref<12x1x32xf32, #tpu.memory_space<vmem>>, vector<1x1x32xf32>
    %760 = vector.shape_cast %759 : vector<1x1x32xf32> to vector<1x32xf32>
    %761 = arith.index_cast %arg0 : i32 to index
    %c41 = arith.constant 41 : index
    %762 = memref.load %arg1[%761, %c41] : memref<7x128xi32, #tpu.memory_space<smem>>
    %763 = arith.index_cast %762 : i32 to index
    %c0_372 = arith.constant 0 : index
    %c0_373 = arith.constant 0 : index
    %764 = vector.load %arg11[%763, %c0_372, %c0_373] : memref<12x1x32xf32, #tpu.memory_space<vmem>>, vector<1x1x32xf32>
    %765 = vector.shape_cast %764 : vector<1x1x32xf32> to vector<1x32xf32>
    %766 = arith.index_cast %arg0 : i32 to index
    %c57 = arith.constant 57 : index
    %767 = memref.load %arg1[%766, %c57] : memref<7x128xi32, #tpu.memory_space<smem>>
    %768 = arith.index_cast %767 : i32 to index
    %c0_374 = arith.constant 0 : index
    %c0_375 = arith.constant 0 : index
    %769 = vector.load %arg11[%768, %c0_374, %c0_375] : memref<12x1x32xf32, #tpu.memory_space<vmem>>, vector<1x1x32xf32>
    %770 = vector.shape_cast %769 : vector<1x1x32xf32> to vector<1x32xf32>
    %771 = arith.index_cast %arg0 : i32 to index
    %c73 = arith.constant 73 : index
    %772 = memref.load %arg1[%771, %c73] : memref<7x128xi32, #tpu.memory_space<smem>>
    %773 = arith.index_cast %772 : i32 to index
    %c0_376 = arith.constant 0 : index
    %c0_377 = arith.constant 0 : index
    %774 = vector.load %arg11[%773, %c0_376, %c0_377] : memref<12x1x32xf32, #tpu.memory_space<vmem>>, vector<1x1x32xf32>
    %775 = vector.shape_cast %774 : vector<1x1x32xf32> to vector<1x32xf32>
    %776 = arith.index_cast %arg0 : i32 to index
    %c89 = arith.constant 89 : index
    %777 = memref.load %arg1[%776, %c89] : memref<7x128xi32, #tpu.memory_space<smem>>
    %778 = arith.index_cast %777 : i32 to index
    %c0_378 = arith.constant 0 : index
    %c0_379 = arith.constant 0 : index
    %779 = vector.load %arg11[%778, %c0_378, %c0_379] : memref<12x1x32xf32, #tpu.memory_space<vmem>>, vector<1x1x32xf32>
    %780 = vector.shape_cast %779 : vector<1x1x32xf32> to vector<1x32xf32>
    %781 = arith.index_cast %arg0 : i32 to index
    %c105 = arith.constant 105 : index
    %782 = memref.load %arg1[%781, %c105] : memref<7x128xi32, #tpu.memory_space<smem>>
    %783 = arith.index_cast %782 : i32 to index
    %c0_380 = arith.constant 0 : index
    %c0_381 = arith.constant 0 : index
    %784 = vector.load %arg11[%783, %c0_380, %c0_381] : memref<12x1x32xf32, #tpu.memory_space<vmem>>, vector<1x1x32xf32>
    %785 = vector.shape_cast %784 : vector<1x1x32xf32> to vector<1x32xf32>
    %786 = arith.index_cast %arg0 : i32 to index
    %c121 = arith.constant 121 : index
    %787 = memref.load %arg1[%786, %c121] : memref<7x128xi32, #tpu.memory_space<smem>>
    %788 = arith.index_cast %787 : i32 to index
    %c0_382 = arith.constant 0 : index
    %c0_383 = arith.constant 0 : index
    %789 = vector.load %arg11[%788, %c0_382, %c0_383] : memref<12x1x32xf32, #tpu.memory_space<vmem>>, vector<1x1x32xf32>
    %790 = vector.shape_cast %789 : vector<1x1x32xf32> to vector<1x32xf32>
    %791 = arith.index_cast %arg0 : i32 to index
    %c9_384 = arith.constant 9 : index
    %792 = memref.load %arg2[%791, %c9_384] : memref<7x128xi32, #tpu.memory_space<smem>>
    %793 = arith.index_cast %792 : i32 to index
    %c0_385 = arith.constant 0 : index
    %c0_386 = arith.constant 0 : index
    %794 = vector.load %arg11[%793, %c0_385, %c0_386] : memref<12x1x32xf32, #tpu.memory_space<vmem>>, vector<1x1x32xf32>
    %795 = vector.shape_cast %794 : vector<1x1x32xf32> to vector<1x32xf32>
    %796 = arith.index_cast %arg0 : i32 to index
    %c25_387 = arith.constant 25 : index
    %797 = memref.load %arg2[%796, %c25_387] : memref<7x128xi32, #tpu.memory_space<smem>>
    %798 = arith.index_cast %797 : i32 to index
    %c0_388 = arith.constant 0 : index
    %c0_389 = arith.constant 0 : index
    %799 = vector.load %arg11[%798, %c0_388, %c0_389] : memref<12x1x32xf32, #tpu.memory_space<vmem>>, vector<1x1x32xf32>
    %800 = vector.shape_cast %799 : vector<1x1x32xf32> to vector<1x32xf32>
    %801 = arith.index_cast %arg0 : i32 to index
    %c41_390 = arith.constant 41 : index
    %802 = memref.load %arg2[%801, %c41_390] : memref<7x128xi32, #tpu.memory_space<smem>>
    %803 = arith.index_cast %802 : i32 to index
    %c0_391 = arith.constant 0 : index
    %c0_392 = arith.constant 0 : index
    %804 = vector.load %arg11[%803, %c0_391, %c0_392] : memref<12x1x32xf32, #tpu.memory_space<vmem>>, vector<1x1x32xf32>
    %805 = vector.shape_cast %804 : vector<1x1x32xf32> to vector<1x32xf32>
    %806 = arith.index_cast %arg0 : i32 to index
    %c57_393 = arith.constant 57 : index
    %807 = memref.load %arg2[%806, %c57_393] : memref<7x128xi32, #tpu.memory_space<smem>>
    %808 = arith.index_cast %807 : i32 to index
    %c0_394 = arith.constant 0 : index
    %c0_395 = arith.constant 0 : index
    %809 = vector.load %arg11[%808, %c0_394, %c0_395] : memref<12x1x32xf32, #tpu.memory_space<vmem>>, vector<1x1x32xf32>
    %810 = vector.shape_cast %809 : vector<1x1x32xf32> to vector<1x32xf32>
    %811 = arith.index_cast %arg0 : i32 to index
    %c73_396 = arith.constant 73 : index
    %812 = memref.load %arg2[%811, %c73_396] : memref<7x128xi32, #tpu.memory_space<smem>>
    %813 = arith.index_cast %812 : i32 to index
    %c0_397 = arith.constant 0 : index
    %c0_398 = arith.constant 0 : index
    %814 = vector.load %arg11[%813, %c0_397, %c0_398] : memref<12x1x32xf32, #tpu.memory_space<vmem>>, vector<1x1x32xf32>
    %815 = vector.shape_cast %814 : vector<1x1x32xf32> to vector<1x32xf32>
    %816 = arith.index_cast %arg0 : i32 to index
    %c89_399 = arith.constant 89 : index
    %817 = memref.load %arg2[%816, %c89_399] : memref<7x128xi32, #tpu.memory_space<smem>>
    %818 = arith.index_cast %817 : i32 to index
    %c0_400 = arith.constant 0 : index
    %c0_401 = arith.constant 0 : index
    %819 = vector.load %arg11[%818, %c0_400, %c0_401] : memref<12x1x32xf32, #tpu.memory_space<vmem>>, vector<1x1x32xf32>
    %820 = vector.shape_cast %819 : vector<1x1x32xf32> to vector<1x32xf32>
    %821 = arith.index_cast %arg0 : i32 to index
    %c105_402 = arith.constant 105 : index
    %822 = memref.load %arg2[%821, %c105_402] : memref<7x128xi32, #tpu.memory_space<smem>>
    %823 = arith.index_cast %822 : i32 to index
    %c0_403 = arith.constant 0 : index
    %c0_404 = arith.constant 0 : index
    %824 = vector.load %arg11[%823, %c0_403, %c0_404] : memref<12x1x32xf32, #tpu.memory_space<vmem>>, vector<1x1x32xf32>
    %825 = vector.shape_cast %824 : vector<1x1x32xf32> to vector<1x32xf32>
    %826 = arith.index_cast %arg0 : i32 to index
    %c121_405 = arith.constant 121 : index
    %827 = memref.load %arg2[%826, %c121_405] : memref<7x128xi32, #tpu.memory_space<smem>>
    %828 = arith.index_cast %827 : i32 to index
    %c0_406 = arith.constant 0 : index
    %c0_407 = arith.constant 0 : index
    %829 = vector.load %arg11[%828, %c0_406, %c0_407] : memref<12x1x32xf32, #tpu.memory_space<vmem>>, vector<1x1x32xf32>
    %830 = vector.shape_cast %829 : vector<1x1x32xf32> to vector<1x32xf32>
    %831 = tpu.concatenate %755, %760, %765, %770, %775, %780, %785, %790 in 0 : vector<1x32xf32>, vector<1x32xf32>, vector<1x32xf32>, vector<1x32xf32>, vector<1x32xf32>, vector<1x32xf32>, vector<1x32xf32>, vector<1x32xf32> -> vector<8x32xf32>
    %832 = tpu.concatenate %795, %800, %805, %810, %815, %820, %825, %830 in 0 : vector<1x32xf32>, vector<1x32xf32>, vector<1x32xf32>, vector<1x32xf32>, vector<1x32xf32>, vector<1x32xf32>, vector<1x32xf32>, vector<1x32xf32> -> vector<8x32xf32>
    %833 = arith.index_cast %arg0 : i32 to index
    %c10 = arith.constant 10 : index
    %834 = memref.load %arg1[%833, %c10] : memref<7x128xi32, #tpu.memory_space<smem>>
    %835 = arith.index_cast %834 : i32 to index
    %c0_408 = arith.constant 0 : index
    %c0_409 = arith.constant 0 : index
    %836 = vector.load %arg11[%835, %c0_408, %c0_409] : memref<12x1x32xf32, #tpu.memory_space<vmem>>, vector<1x1x32xf32>
    %837 = vector.shape_cast %836 : vector<1x1x32xf32> to vector<1x32xf32>
    %838 = arith.index_cast %arg0 : i32 to index
    %c26 = arith.constant 26 : index
    %839 = memref.load %arg1[%838, %c26] : memref<7x128xi32, #tpu.memory_space<smem>>
    %840 = arith.index_cast %839 : i32 to index
    %c0_410 = arith.constant 0 : index
    %c0_411 = arith.constant 0 : index
    %841 = vector.load %arg11[%840, %c0_410, %c0_411] : memref<12x1x32xf32, #tpu.memory_space<vmem>>, vector<1x1x32xf32>
    %842 = vector.shape_cast %841 : vector<1x1x32xf32> to vector<1x32xf32>
    %843 = arith.index_cast %arg0 : i32 to index
    %c42 = arith.constant 42 : index
    %844 = memref.load %arg1[%843, %c42] : memref<7x128xi32, #tpu.memory_space<smem>>
    %845 = arith.index_cast %844 : i32 to index
    %c0_412 = arith.constant 0 : index
    %c0_413 = arith.constant 0 : index
    %846 = vector.load %arg11[%845, %c0_412, %c0_413] : memref<12x1x32xf32, #tpu.memory_space<vmem>>, vector<1x1x32xf32>
    %847 = vector.shape_cast %846 : vector<1x1x32xf32> to vector<1x32xf32>
    %848 = arith.index_cast %arg0 : i32 to index
    %c58 = arith.constant 58 : index
    %849 = memref.load %arg1[%848, %c58] : memref<7x128xi32, #tpu.memory_space<smem>>
    %850 = arith.index_cast %849 : i32 to index
    %c0_414 = arith.constant 0 : index
    %c0_415 = arith.constant 0 : index
    %851 = vector.load %arg11[%850, %c0_414, %c0_415] : memref<12x1x32xf32, #tpu.memory_space<vmem>>, vector<1x1x32xf32>
    %852 = vector.shape_cast %851 : vector<1x1x32xf32> to vector<1x32xf32>
    %853 = arith.index_cast %arg0 : i32 to index
    %c74 = arith.constant 74 : index
    %854 = memref.load %arg1[%853, %c74] : memref<7x128xi32, #tpu.memory_space<smem>>
    %855 = arith.index_cast %854 : i32 to index
    %c0_416 = arith.constant 0 : index
    %c0_417 = arith.constant 0 : index
    %856 = vector.load %arg11[%855, %c0_416, %c0_417] : memref<12x1x32xf32, #tpu.memory_space<vmem>>, vector<1x1x32xf32>
    %857 = vector.shape_cast %856 : vector<1x1x32xf32> to vector<1x32xf32>
    %858 = arith.index_cast %arg0 : i32 to index
    %c90 = arith.constant 90 : index
    %859 = memref.load %arg1[%858, %c90] : memref<7x128xi32, #tpu.memory_space<smem>>
    %860 = arith.index_cast %859 : i32 to index
    %c0_418 = arith.constant 0 : index
    %c0_419 = arith.constant 0 : index
    %861 = vector.load %arg11[%860, %c0_418, %c0_419] : memref<12x1x32xf32, #tpu.memory_space<vmem>>, vector<1x1x32xf32>
    %862 = vector.shape_cast %861 : vector<1x1x32xf32> to vector<1x32xf32>
    %863 = arith.index_cast %arg0 : i32 to index
    %c106 = arith.constant 106 : index
    %864 = memref.load %arg1[%863, %c106] : memref<7x128xi32, #tpu.memory_space<smem>>
    %865 = arith.index_cast %864 : i32 to index
    %c0_420 = arith.constant 0 : index
    %c0_421 = arith.constant 0 : index
    %866 = vector.load %arg11[%865, %c0_420, %c0_421] : memref<12x1x32xf32, #tpu.memory_space<vmem>>, vector<1x1x32xf32>
    %867 = vector.shape_cast %866 : vector<1x1x32xf32> to vector<1x32xf32>
    %868 = arith.index_cast %arg0 : i32 to index
    %c122 = arith.constant 122 : index
    %869 = memref.load %arg1[%868, %c122] : memref<7x128xi32, #tpu.memory_space<smem>>
    %870 = arith.index_cast %869 : i32 to index
    %c0_422 = arith.constant 0 : index
    %c0_423 = arith.constant 0 : index
    %871 = vector.load %arg11[%870, %c0_422, %c0_423] : memref<12x1x32xf32, #tpu.memory_space<vmem>>, vector<1x1x32xf32>
    %872 = vector.shape_cast %871 : vector<1x1x32xf32> to vector<1x32xf32>
    %873 = arith.index_cast %arg0 : i32 to index
    %c10_424 = arith.constant 10 : index
    %874 = memref.load %arg2[%873, %c10_424] : memref<7x128xi32, #tpu.memory_space<smem>>
    %875 = arith.index_cast %874 : i32 to index
    %c0_425 = arith.constant 0 : index
    %c0_426 = arith.constant 0 : index
    %876 = vector.load %arg11[%875, %c0_425, %c0_426] : memref<12x1x32xf32, #tpu.memory_space<vmem>>, vector<1x1x32xf32>
    %877 = vector.shape_cast %876 : vector<1x1x32xf32> to vector<1x32xf32>
    %878 = arith.index_cast %arg0 : i32 to index
    %c26_427 = arith.constant 26 : index
    %879 = memref.load %arg2[%878, %c26_427] : memref<7x128xi32, #tpu.memory_space<smem>>
    %880 = arith.index_cast %879 : i32 to index
    %c0_428 = arith.constant 0 : index
    %c0_429 = arith.constant 0 : index
    %881 = vector.load %arg11[%880, %c0_428, %c0_429] : memref<12x1x32xf32, #tpu.memory_space<vmem>>, vector<1x1x32xf32>
    %882 = vector.shape_cast %881 : vector<1x1x32xf32> to vector<1x32xf32>
    %883 = arith.index_cast %arg0 : i32 to index
    %c42_430 = arith.constant 42 : index
    %884 = memref.load %arg2[%883, %c42_430] : memref<7x128xi32, #tpu.memory_space<smem>>
    %885 = arith.index_cast %884 : i32 to index
    %c0_431 = arith.constant 0 : index
    %c0_432 = arith.constant 0 : index
    %886 = vector.load %arg11[%885, %c0_431, %c0_432] : memref<12x1x32xf32, #tpu.memory_space<vmem>>, vector<1x1x32xf32>
    %887 = vector.shape_cast %886 : vector<1x1x32xf32> to vector<1x32xf32>
    %888 = arith.index_cast %arg0 : i32 to index
    %c58_433 = arith.constant 58 : index
    %889 = memref.load %arg2[%888, %c58_433] : memref<7x128xi32, #tpu.memory_space<smem>>
    %890 = arith.index_cast %889 : i32 to index
    %c0_434 = arith.constant 0 : index
    %c0_435 = arith.constant 0 : index
    %891 = vector.load %arg11[%890, %c0_434, %c0_435] : memref<12x1x32xf32, #tpu.memory_space<vmem>>, vector<1x1x32xf32>
    %892 = vector.shape_cast %891 : vector<1x1x32xf32> to vector<1x32xf32>
    %893 = arith.index_cast %arg0 : i32 to index
    %c74_436 = arith.constant 74 : index
    %894 = memref.load %arg2[%893, %c74_436] : memref<7x128xi32, #tpu.memory_space<smem>>
    %895 = arith.index_cast %894 : i32 to index
    %c0_437 = arith.constant 0 : index
    %c0_438 = arith.constant 0 : index
    %896 = vector.load %arg11[%895, %c0_437, %c0_438] : memref<12x1x32xf32, #tpu.memory_space<vmem>>, vector<1x1x32xf32>
    %897 = vector.shape_cast %896 : vector<1x1x32xf32> to vector<1x32xf32>
    %898 = arith.index_cast %arg0 : i32 to index
    %c90_439 = arith.constant 90 : index
    %899 = memref.load %arg2[%898, %c90_439] : memref<7x128xi32, #tpu.memory_space<smem>>
    %900 = arith.index_cast %899 : i32 to index
    %c0_440 = arith.constant 0 : index
    %c0_441 = arith.constant 0 : index
    %901 = vector.load %arg11[%900, %c0_440, %c0_441] : memref<12x1x32xf32, #tpu.memory_space<vmem>>, vector<1x1x32xf32>
    %902 = vector.shape_cast %901 : vector<1x1x32xf32> to vector<1x32xf32>
    %903 = arith.index_cast %arg0 : i32 to index
    %c106_442 = arith.constant 106 : index
    %904 = memref.load %arg2[%903, %c106_442] : memref<7x128xi32, #tpu.memory_space<smem>>
    %905 = arith.index_cast %904 : i32 to index
    %c0_443 = arith.constant 0 : index
    %c0_444 = arith.constant 0 : index
    %906 = vector.load %arg11[%905, %c0_443, %c0_444] : memref<12x1x32xf32, #tpu.memory_space<vmem>>, vector<1x1x32xf32>
    %907 = vector.shape_cast %906 : vector<1x1x32xf32> to vector<1x32xf32>
    %908 = arith.index_cast %arg0 : i32 to index
    %c122_445 = arith.constant 122 : index
    %909 = memref.load %arg2[%908, %c122_445] : memref<7x128xi32, #tpu.memory_space<smem>>
    %910 = arith.index_cast %909 : i32 to index
    %c0_446 = arith.constant 0 : index
    %c0_447 = arith.constant 0 : index
    %911 = vector.load %arg11[%910, %c0_446, %c0_447] : memref<12x1x32xf32, #tpu.memory_space<vmem>>, vector<1x1x32xf32>
    %912 = vector.shape_cast %911 : vector<1x1x32xf32> to vector<1x32xf32>
    %913 = tpu.concatenate %837, %842, %847, %852, %857, %862, %867, %872 in 0 : vector<1x32xf32>, vector<1x32xf32>, vector<1x32xf32>, vector<1x32xf32>, vector<1x32xf32>, vector<1x32xf32>, vector<1x32xf32>, vector<1x32xf32> -> vector<8x32xf32>
    %914 = tpu.concatenate %877, %882, %887, %892, %897, %902, %907, %912 in 0 : vector<1x32xf32>, vector<1x32xf32>, vector<1x32xf32>, vector<1x32xf32>, vector<1x32xf32>, vector<1x32xf32>, vector<1x32xf32>, vector<1x32xf32> -> vector<8x32xf32>
    %915 = arith.index_cast %arg0 : i32 to index
    %c11 = arith.constant 11 : index
    %916 = memref.load %arg1[%915, %c11] : memref<7x128xi32, #tpu.memory_space<smem>>
    %917 = arith.index_cast %916 : i32 to index
    %c0_448 = arith.constant 0 : index
    %c0_449 = arith.constant 0 : index
    %918 = vector.load %arg11[%917, %c0_448, %c0_449] : memref<12x1x32xf32, #tpu.memory_space<vmem>>, vector<1x1x32xf32>
    %919 = vector.shape_cast %918 : vector<1x1x32xf32> to vector<1x32xf32>
    %920 = arith.index_cast %arg0 : i32 to index
    %c27 = arith.constant 27 : index
    %921 = memref.load %arg1[%920, %c27] : memref<7x128xi32, #tpu.memory_space<smem>>
    %922 = arith.index_cast %921 : i32 to index
    %c0_450 = arith.constant 0 : index
    %c0_451 = arith.constant 0 : index
    %923 = vector.load %arg11[%922, %c0_450, %c0_451] : memref<12x1x32xf32, #tpu.memory_space<vmem>>, vector<1x1x32xf32>
    %924 = vector.shape_cast %923 : vector<1x1x32xf32> to vector<1x32xf32>
    %925 = arith.index_cast %arg0 : i32 to index
    %c43 = arith.constant 43 : index
    %926 = memref.load %arg1[%925, %c43] : memref<7x128xi32, #tpu.memory_space<smem>>
    %927 = arith.index_cast %926 : i32 to index
    %c0_452 = arith.constant 0 : index
    %c0_453 = arith.constant 0 : index
    %928 = vector.load %arg11[%927, %c0_452, %c0_453] : memref<12x1x32xf32, #tpu.memory_space<vmem>>, vector<1x1x32xf32>
    %929 = vector.shape_cast %928 : vector<1x1x32xf32> to vector<1x32xf32>
    %930 = arith.index_cast %arg0 : i32 to index
    %c59 = arith.constant 59 : index
    %931 = memref.load %arg1[%930, %c59] : memref<7x128xi32, #tpu.memory_space<smem>>
    %932 = arith.index_cast %931 : i32 to index
    %c0_454 = arith.constant 0 : index
    %c0_455 = arith.constant 0 : index
    %933 = vector.load %arg11[%932, %c0_454, %c0_455] : memref<12x1x32xf32, #tpu.memory_space<vmem>>, vector<1x1x32xf32>
    %934 = vector.shape_cast %933 : vector<1x1x32xf32> to vector<1x32xf32>
    %935 = arith.index_cast %arg0 : i32 to index
    %c75 = arith.constant 75 : index
    %936 = memref.load %arg1[%935, %c75] : memref<7x128xi32, #tpu.memory_space<smem>>
    %937 = arith.index_cast %936 : i32 to index
    %c0_456 = arith.constant 0 : index
    %c0_457 = arith.constant 0 : index
    %938 = vector.load %arg11[%937, %c0_456, %c0_457] : memref<12x1x32xf32, #tpu.memory_space<vmem>>, vector<1x1x32xf32>
    %939 = vector.shape_cast %938 : vector<1x1x32xf32> to vector<1x32xf32>
    %940 = arith.index_cast %arg0 : i32 to index
    %c91 = arith.constant 91 : index
    %941 = memref.load %arg1[%940, %c91] : memref<7x128xi32, #tpu.memory_space<smem>>
    %942 = arith.index_cast %941 : i32 to index
    %c0_458 = arith.constant 0 : index
    %c0_459 = arith.constant 0 : index
    %943 = vector.load %arg11[%942, %c0_458, %c0_459] : memref<12x1x32xf32, #tpu.memory_space<vmem>>, vector<1x1x32xf32>
    %944 = vector.shape_cast %943 : vector<1x1x32xf32> to vector<1x32xf32>
    %945 = arith.index_cast %arg0 : i32 to index
    %c107 = arith.constant 107 : index
    %946 = memref.load %arg1[%945, %c107] : memref<7x128xi32, #tpu.memory_space<smem>>
    %947 = arith.index_cast %946 : i32 to index
    %c0_460 = arith.constant 0 : index
    %c0_461 = arith.constant 0 : index
    %948 = vector.load %arg11[%947, %c0_460, %c0_461] : memref<12x1x32xf32, #tpu.memory_space<vmem>>, vector<1x1x32xf32>
    %949 = vector.shape_cast %948 : vector<1x1x32xf32> to vector<1x32xf32>
    %950 = arith.index_cast %arg0 : i32 to index
    %c123 = arith.constant 123 : index
    %951 = memref.load %arg1[%950, %c123] : memref<7x128xi32, #tpu.memory_space<smem>>
    %952 = arith.index_cast %951 : i32 to index
    %c0_462 = arith.constant 0 : index
    %c0_463 = arith.constant 0 : index
    %953 = vector.load %arg11[%952, %c0_462, %c0_463] : memref<12x1x32xf32, #tpu.memory_space<vmem>>, vector<1x1x32xf32>
    %954 = vector.shape_cast %953 : vector<1x1x32xf32> to vector<1x32xf32>
    %955 = arith.index_cast %arg0 : i32 to index
    %c11_464 = arith.constant 11 : index
    %956 = memref.load %arg2[%955, %c11_464] : memref<7x128xi32, #tpu.memory_space<smem>>
    %957 = arith.index_cast %956 : i32 to index
    %c0_465 = arith.constant 0 : index
    %c0_466 = arith.constant 0 : index
    %958 = vector.load %arg11[%957, %c0_465, %c0_466] : memref<12x1x32xf32, #tpu.memory_space<vmem>>, vector<1x1x32xf32>
    %959 = vector.shape_cast %958 : vector<1x1x32xf32> to vector<1x32xf32>
    %960 = arith.index_cast %arg0 : i32 to index
    %c27_467 = arith.constant 27 : index
    %961 = memref.load %arg2[%960, %c27_467] : memref<7x128xi32, #tpu.memory_space<smem>>
    %962 = arith.index_cast %961 : i32 to index
    %c0_468 = arith.constant 0 : index
    %c0_469 = arith.constant 0 : index
    %963 = vector.load %arg11[%962, %c0_468, %c0_469] : memref<12x1x32xf32, #tpu.memory_space<vmem>>, vector<1x1x32xf32>
    %964 = vector.shape_cast %963 : vector<1x1x32xf32> to vector<1x32xf32>
    %965 = arith.index_cast %arg0 : i32 to index
    %c43_470 = arith.constant 43 : index
    %966 = memref.load %arg2[%965, %c43_470] : memref<7x128xi32, #tpu.memory_space<smem>>
    %967 = arith.index_cast %966 : i32 to index
    %c0_471 = arith.constant 0 : index
    %c0_472 = arith.constant 0 : index
    %968 = vector.load %arg11[%967, %c0_471, %c0_472] : memref<12x1x32xf32, #tpu.memory_space<vmem>>, vector<1x1x32xf32>
    %969 = vector.shape_cast %968 : vector<1x1x32xf32> to vector<1x32xf32>
    %970 = arith.index_cast %arg0 : i32 to index
    %c59_473 = arith.constant 59 : index
    %971 = memref.load %arg2[%970, %c59_473] : memref<7x128xi32, #tpu.memory_space<smem>>
    %972 = arith.index_cast %971 : i32 to index
    %c0_474 = arith.constant 0 : index
    %c0_475 = arith.constant 0 : index
    %973 = vector.load %arg11[%972, %c0_474, %c0_475] : memref<12x1x32xf32, #tpu.memory_space<vmem>>, vector<1x1x32xf32>
    %974 = vector.shape_cast %973 : vector<1x1x32xf32> to vector<1x32xf32>
    %975 = arith.index_cast %arg0 : i32 to index
    %c75_476 = arith.constant 75 : index
    %976 = memref.load %arg2[%975, %c75_476] : memref<7x128xi32, #tpu.memory_space<smem>>
    %977 = arith.index_cast %976 : i32 to index
    %c0_477 = arith.constant 0 : index
    %c0_478 = arith.constant 0 : index
    %978 = vector.load %arg11[%977, %c0_477, %c0_478] : memref<12x1x32xf32, #tpu.memory_space<vmem>>, vector<1x1x32xf32>
    %979 = vector.shape_cast %978 : vector<1x1x32xf32> to vector<1x32xf32>
    %980 = arith.index_cast %arg0 : i32 to index
    %c91_479 = arith.constant 91 : index
    %981 = memref.load %arg2[%980, %c91_479] : memref<7x128xi32, #tpu.memory_space<smem>>
    %982 = arith.index_cast %981 : i32 to index
    %c0_480 = arith.constant 0 : index
    %c0_481 = arith.constant 0 : index
    %983 = vector.load %arg11[%982, %c0_480, %c0_481] : memref<12x1x32xf32, #tpu.memory_space<vmem>>, vector<1x1x32xf32>
    %984 = vector.shape_cast %983 : vector<1x1x32xf32> to vector<1x32xf32>
    %985 = arith.index_cast %arg0 : i32 to index
    %c107_482 = arith.constant 107 : index
    %986 = memref.load %arg2[%985, %c107_482] : memref<7x128xi32, #tpu.memory_space<smem>>
    %987 = arith.index_cast %986 : i32 to index
    %c0_483 = arith.constant 0 : index
    %c0_484 = arith.constant 0 : index
    %988 = vector.load %arg11[%987, %c0_483, %c0_484] : memref<12x1x32xf32, #tpu.memory_space<vmem>>, vector<1x1x32xf32>
    %989 = vector.shape_cast %988 : vector<1x1x32xf32> to vector<1x32xf32>
    %990 = arith.index_cast %arg0 : i32 to index
    %c123_485 = arith.constant 123 : index
    %991 = memref.load %arg2[%990, %c123_485] : memref<7x128xi32, #tpu.memory_space<smem>>
    %992 = arith.index_cast %991 : i32 to index
    %c0_486 = arith.constant 0 : index
    %c0_487 = arith.constant 0 : index
    %993 = vector.load %arg11[%992, %c0_486, %c0_487] : memref<12x1x32xf32, #tpu.memory_space<vmem>>, vector<1x1x32xf32>
    %994 = vector.shape_cast %993 : vector<1x1x32xf32> to vector<1x32xf32>
    %995 = tpu.concatenate %919, %924, %929, %934, %939, %944, %949, %954 in 0 : vector<1x32xf32>, vector<1x32xf32>, vector<1x32xf32>, vector<1x32xf32>, vector<1x32xf32>, vector<1x32xf32>, vector<1x32xf32>, vector<1x32xf32> -> vector<8x32xf32>
    %996 = tpu.concatenate %959, %964, %969, %974, %979, %984, %989, %994 in 0 : vector<1x32xf32>, vector<1x32xf32>, vector<1x32xf32>, vector<1x32xf32>, vector<1x32xf32>, vector<1x32xf32>, vector<1x32xf32>, vector<1x32xf32> -> vector<8x32xf32>
    %997 = arith.index_cast %arg0 : i32 to index
    %c12 = arith.constant 12 : index
    %998 = memref.load %arg1[%997, %c12] : memref<7x128xi32, #tpu.memory_space<smem>>
    %999 = arith.index_cast %998 : i32 to index
    %c0_488 = arith.constant 0 : index
    %c0_489 = arith.constant 0 : index
    %1000 = vector.load %arg11[%999, %c0_488, %c0_489] : memref<12x1x32xf32, #tpu.memory_space<vmem>>, vector<1x1x32xf32>
    %1001 = vector.shape_cast %1000 : vector<1x1x32xf32> to vector<1x32xf32>
    %1002 = arith.index_cast %arg0 : i32 to index
    %c28 = arith.constant 28 : index
    %1003 = memref.load %arg1[%1002, %c28] : memref<7x128xi32, #tpu.memory_space<smem>>
    %1004 = arith.index_cast %1003 : i32 to index
    %c0_490 = arith.constant 0 : index
    %c0_491 = arith.constant 0 : index
    %1005 = vector.load %arg11[%1004, %c0_490, %c0_491] : memref<12x1x32xf32, #tpu.memory_space<vmem>>, vector<1x1x32xf32>
    %1006 = vector.shape_cast %1005 : vector<1x1x32xf32> to vector<1x32xf32>
    %1007 = arith.index_cast %arg0 : i32 to index
    %c44 = arith.constant 44 : index
    %1008 = memref.load %arg1[%1007, %c44] : memref<7x128xi32, #tpu.memory_space<smem>>
    %1009 = arith.index_cast %1008 : i32 to index
    %c0_492 = arith.constant 0 : index
    %c0_493 = arith.constant 0 : index
    %1010 = vector.load %arg11[%1009, %c0_492, %c0_493] : memref<12x1x32xf32, #tpu.memory_space<vmem>>, vector<1x1x32xf32>
    %1011 = vector.shape_cast %1010 : vector<1x1x32xf32> to vector<1x32xf32>
    %1012 = arith.index_cast %arg0 : i32 to index
    %c60 = arith.constant 60 : index
    %1013 = memref.load %arg1[%1012, %c60] : memref<7x128xi32, #tpu.memory_space<smem>>
    %1014 = arith.index_cast %1013 : i32 to index
    %c0_494 = arith.constant 0 : index
    %c0_495 = arith.constant 0 : index
    %1015 = vector.load %arg11[%1014, %c0_494, %c0_495] : memref<12x1x32xf32, #tpu.memory_space<vmem>>, vector<1x1x32xf32>
    %1016 = vector.shape_cast %1015 : vector<1x1x32xf32> to vector<1x32xf32>
    %1017 = arith.index_cast %arg0 : i32 to index
    %c76 = arith.constant 76 : index
    %1018 = memref.load %arg1[%1017, %c76] : memref<7x128xi32, #tpu.memory_space<smem>>
    %1019 = arith.index_cast %1018 : i32 to index
    %c0_496 = arith.constant 0 : index
    %c0_497 = arith.constant 0 : index
    %1020 = vector.load %arg11[%1019, %c0_496, %c0_497] : memref<12x1x32xf32, #tpu.memory_space<vmem>>, vector<1x1x32xf32>
    %1021 = vector.shape_cast %1020 : vector<1x1x32xf32> to vector<1x32xf32>
    %1022 = arith.index_cast %arg0 : i32 to index
    %c92 = arith.constant 92 : index
    %1023 = memref.load %arg1[%1022, %c92] : memref<7x128xi32, #tpu.memory_space<smem>>
    %1024 = arith.index_cast %1023 : i32 to index
    %c0_498 = arith.constant 0 : index
    %c0_499 = arith.constant 0 : index
    %1025 = vector.load %arg11[%1024, %c0_498, %c0_499] : memref<12x1x32xf32, #tpu.memory_space<vmem>>, vector<1x1x32xf32>
    %1026 = vector.shape_cast %1025 : vector<1x1x32xf32> to vector<1x32xf32>
    %1027 = arith.index_cast %arg0 : i32 to index
    %c108 = arith.constant 108 : index
    %1028 = memref.load %arg1[%1027, %c108] : memref<7x128xi32, #tpu.memory_space<smem>>
    %1029 = arith.index_cast %1028 : i32 to index
    %c0_500 = arith.constant 0 : index
    %c0_501 = arith.constant 0 : index
    %1030 = vector.load %arg11[%1029, %c0_500, %c0_501] : memref<12x1x32xf32, #tpu.memory_space<vmem>>, vector<1x1x32xf32>
    %1031 = vector.shape_cast %1030 : vector<1x1x32xf32> to vector<1x32xf32>
    %1032 = arith.index_cast %arg0 : i32 to index
    %c124 = arith.constant 124 : index
    %1033 = memref.load %arg1[%1032, %c124] : memref<7x128xi32, #tpu.memory_space<smem>>
    %1034 = arith.index_cast %1033 : i32 to index
    %c0_502 = arith.constant 0 : index
    %c0_503 = arith.constant 0 : index
    %1035 = vector.load %arg11[%1034, %c0_502, %c0_503] : memref<12x1x32xf32, #tpu.memory_space<vmem>>, vector<1x1x32xf32>
    %1036 = vector.shape_cast %1035 : vector<1x1x32xf32> to vector<1x32xf32>
    %1037 = arith.index_cast %arg0 : i32 to index
    %c12_504 = arith.constant 12 : index
    %1038 = memref.load %arg2[%1037, %c12_504] : memref<7x128xi32, #tpu.memory_space<smem>>
    %1039 = arith.index_cast %1038 : i32 to index
    %c0_505 = arith.constant 0 : index
    %c0_506 = arith.constant 0 : index
    %1040 = vector.load %arg11[%1039, %c0_505, %c0_506] : memref<12x1x32xf32, #tpu.memory_space<vmem>>, vector<1x1x32xf32>
    %1041 = vector.shape_cast %1040 : vector<1x1x32xf32> to vector<1x32xf32>
    %1042 = arith.index_cast %arg0 : i32 to index
    %c28_507 = arith.constant 28 : index
    %1043 = memref.load %arg2[%1042, %c28_507] : memref<7x128xi32, #tpu.memory_space<smem>>
    %1044 = arith.index_cast %1043 : i32 to index
    %c0_508 = arith.constant 0 : index
    %c0_509 = arith.constant 0 : index
    %1045 = vector.load %arg11[%1044, %c0_508, %c0_509] : memref<12x1x32xf32, #tpu.memory_space<vmem>>, vector<1x1x32xf32>
    %1046 = vector.shape_cast %1045 : vector<1x1x32xf32> to vector<1x32xf32>
    %1047 = arith.index_cast %arg0 : i32 to index
    %c44_510 = arith.constant 44 : index
    %1048 = memref.load %arg2[%1047, %c44_510] : memref<7x128xi32, #tpu.memory_space<smem>>
    %1049 = arith.index_cast %1048 : i32 to index
    %c0_511 = arith.constant 0 : index
    %c0_512 = arith.constant 0 : index
    %1050 = vector.load %arg11[%1049, %c0_511, %c0_512] : memref<12x1x32xf32, #tpu.memory_space<vmem>>, vector<1x1x32xf32>
    %1051 = vector.shape_cast %1050 : vector<1x1x32xf32> to vector<1x32xf32>
    %1052 = arith.index_cast %arg0 : i32 to index
    %c60_513 = arith.constant 60 : index
    %1053 = memref.load %arg2[%1052, %c60_513] : memref<7x128xi32, #tpu.memory_space<smem>>
    %1054 = arith.index_cast %1053 : i32 to index
    %c0_514 = arith.constant 0 : index
    %c0_515 = arith.constant 0 : index
    %1055 = vector.load %arg11[%1054, %c0_514, %c0_515] : memref<12x1x32xf32, #tpu.memory_space<vmem>>, vector<1x1x32xf32>
    %1056 = vector.shape_cast %1055 : vector<1x1x32xf32> to vector<1x32xf32>
    %1057 = arith.index_cast %arg0 : i32 to index
    %c76_516 = arith.constant 76 : index
    %1058 = memref.load %arg2[%1057, %c76_516] : memref<7x128xi32, #tpu.memory_space<smem>>
    %1059 = arith.index_cast %1058 : i32 to index
    %c0_517 = arith.constant 0 : index
    %c0_518 = arith.constant 0 : index
    %1060 = vector.load %arg11[%1059, %c0_517, %c0_518] : memref<12x1x32xf32, #tpu.memory_space<vmem>>, vector<1x1x32xf32>
    %1061 = vector.shape_cast %1060 : vector<1x1x32xf32> to vector<1x32xf32>
    %1062 = arith.index_cast %arg0 : i32 to index
    %c92_519 = arith.constant 92 : index
    %1063 = memref.load %arg2[%1062, %c92_519] : memref<7x128xi32, #tpu.memory_space<smem>>
    %1064 = arith.index_cast %1063 : i32 to index
    %c0_520 = arith.constant 0 : index
    %c0_521 = arith.constant 0 : index
    %1065 = vector.load %arg11[%1064, %c0_520, %c0_521] : memref<12x1x32xf32, #tpu.memory_space<vmem>>, vector<1x1x32xf32>
    %1066 = vector.shape_cast %1065 : vector<1x1x32xf32> to vector<1x32xf32>
    %1067 = arith.index_cast %arg0 : i32 to index
    %c108_522 = arith.constant 108 : index
    %1068 = memref.load %arg2[%1067, %c108_522] : memref<7x128xi32, #tpu.memory_space<smem>>
    %1069 = arith.index_cast %1068 : i32 to index
    %c0_523 = arith.constant 0 : index
    %c0_524 = arith.constant 0 : index
    %1070 = vector.load %arg11[%1069, %c0_523, %c0_524] : memref<12x1x32xf32, #tpu.memory_space<vmem>>, vector<1x1x32xf32>
    %1071 = vector.shape_cast %1070 : vector<1x1x32xf32> to vector<1x32xf32>
    %1072 = arith.index_cast %arg0 : i32 to index
    %c124_525 = arith.constant 124 : index
    %1073 = memref.load %arg2[%1072, %c124_525] : memref<7x128xi32, #tpu.memory_space<smem>>
    %1074 = arith.index_cast %1073 : i32 to index
    %c0_526 = arith.constant 0 : index
    %c0_527 = arith.constant 0 : index
    %1075 = vector.load %arg11[%1074, %c0_526, %c0_527] : memref<12x1x32xf32, #tpu.memory_space<vmem>>, vector<1x1x32xf32>
    %1076 = vector.shape_cast %1075 : vector<1x1x32xf32> to vector<1x32xf32>
    %1077 = tpu.concatenate %1001, %1006, %1011, %1016, %1021, %1026, %1031, %1036 in 0 : vector<1x32xf32>, vector<1x32xf32>, vector<1x32xf32>, vector<1x32xf32>, vector<1x32xf32>, vector<1x32xf32>, vector<1x32xf32>, vector<1x32xf32> -> vector<8x32xf32>
    %1078 = tpu.concatenate %1041, %1046, %1051, %1056, %1061, %1066, %1071, %1076 in 0 : vector<1x32xf32>, vector<1x32xf32>, vector<1x32xf32>, vector<1x32xf32>, vector<1x32xf32>, vector<1x32xf32>, vector<1x32xf32>, vector<1x32xf32> -> vector<8x32xf32>
    %1079 = arith.index_cast %arg0 : i32 to index
    %c13 = arith.constant 13 : index
    %1080 = memref.load %arg1[%1079, %c13] : memref<7x128xi32, #tpu.memory_space<smem>>
    %1081 = arith.index_cast %1080 : i32 to index
    %c0_528 = arith.constant 0 : index
    %c0_529 = arith.constant 0 : index
    %1082 = vector.load %arg11[%1081, %c0_528, %c0_529] : memref<12x1x32xf32, #tpu.memory_space<vmem>>, vector<1x1x32xf32>
    %1083 = vector.shape_cast %1082 : vector<1x1x32xf32> to vector<1x32xf32>
    %1084 = arith.index_cast %arg0 : i32 to index
    %c29 = arith.constant 29 : index
    %1085 = memref.load %arg1[%1084, %c29] : memref<7x128xi32, #tpu.memory_space<smem>>
    %1086 = arith.index_cast %1085 : i32 to index
    %c0_530 = arith.constant 0 : index
    %c0_531 = arith.constant 0 : index
    %1087 = vector.load %arg11[%1086, %c0_530, %c0_531] : memref<12x1x32xf32, #tpu.memory_space<vmem>>, vector<1x1x32xf32>
    %1088 = vector.shape_cast %1087 : vector<1x1x32xf32> to vector<1x32xf32>
    %1089 = arith.index_cast %arg0 : i32 to index
    %c45 = arith.constant 45 : index
    %1090 = memref.load %arg1[%1089, %c45] : memref<7x128xi32, #tpu.memory_space<smem>>
    %1091 = arith.index_cast %1090 : i32 to index
    %c0_532 = arith.constant 0 : index
    %c0_533 = arith.constant 0 : index
    %1092 = vector.load %arg11[%1091, %c0_532, %c0_533] : memref<12x1x32xf32, #tpu.memory_space<vmem>>, vector<1x1x32xf32>
    %1093 = vector.shape_cast %1092 : vector<1x1x32xf32> to vector<1x32xf32>
    %1094 = arith.index_cast %arg0 : i32 to index
    %c61 = arith.constant 61 : index
    %1095 = memref.load %arg1[%1094, %c61] : memref<7x128xi32, #tpu.memory_space<smem>>
    %1096 = arith.index_cast %1095 : i32 to index
    %c0_534 = arith.constant 0 : index
    %c0_535 = arith.constant 0 : index
    %1097 = vector.load %arg11[%1096, %c0_534, %c0_535] : memref<12x1x32xf32, #tpu.memory_space<vmem>>, vector<1x1x32xf32>
    %1098 = vector.shape_cast %1097 : vector<1x1x32xf32> to vector<1x32xf32>
    %1099 = arith.index_cast %arg0 : i32 to index
    %c77 = arith.constant 77 : index
    %1100 = memref.load %arg1[%1099, %c77] : memref<7x128xi32, #tpu.memory_space<smem>>
    %1101 = arith.index_cast %1100 : i32 to index
    %c0_536 = arith.constant 0 : index
    %c0_537 = arith.constant 0 : index
    %1102 = vector.load %arg11[%1101, %c0_536, %c0_537] : memref<12x1x32xf32, #tpu.memory_space<vmem>>, vector<1x1x32xf32>
    %1103 = vector.shape_cast %1102 : vector<1x1x32xf32> to vector<1x32xf32>
    %1104 = arith.index_cast %arg0 : i32 to index
    %c93 = arith.constant 93 : index
    %1105 = memref.load %arg1[%1104, %c93] : memref<7x128xi32, #tpu.memory_space<smem>>
    %1106 = arith.index_cast %1105 : i32 to index
    %c0_538 = arith.constant 0 : index
    %c0_539 = arith.constant 0 : index
    %1107 = vector.load %arg11[%1106, %c0_538, %c0_539] : memref<12x1x32xf32, #tpu.memory_space<vmem>>, vector<1x1x32xf32>
    %1108 = vector.shape_cast %1107 : vector<1x1x32xf32> to vector<1x32xf32>
    %1109 = arith.index_cast %arg0 : i32 to index
    %c109 = arith.constant 109 : index
    %1110 = memref.load %arg1[%1109, %c109] : memref<7x128xi32, #tpu.memory_space<smem>>
    %1111 = arith.index_cast %1110 : i32 to index
    %c0_540 = arith.constant 0 : index
    %c0_541 = arith.constant 0 : index
    %1112 = vector.load %arg11[%1111, %c0_540, %c0_541] : memref<12x1x32xf32, #tpu.memory_space<vmem>>, vector<1x1x32xf32>
    %1113 = vector.shape_cast %1112 : vector<1x1x32xf32> to vector<1x32xf32>
    %1114 = arith.index_cast %arg0 : i32 to index
    %c125 = arith.constant 125 : index
    %1115 = memref.load %arg1[%1114, %c125] : memref<7x128xi32, #tpu.memory_space<smem>>
    %1116 = arith.index_cast %1115 : i32 to index
    %c0_542 = arith.constant 0 : index
    %c0_543 = arith.constant 0 : index
    %1117 = vector.load %arg11[%1116, %c0_542, %c0_543] : memref<12x1x32xf32, #tpu.memory_space<vmem>>, vector<1x1x32xf32>
    %1118 = vector.shape_cast %1117 : vector<1x1x32xf32> to vector<1x32xf32>
    %1119 = arith.index_cast %arg0 : i32 to index
    %c13_544 = arith.constant 13 : index
    %1120 = memref.load %arg2[%1119, %c13_544] : memref<7x128xi32, #tpu.memory_space<smem>>
    %1121 = arith.index_cast %1120 : i32 to index
    %c0_545 = arith.constant 0 : index
    %c0_546 = arith.constant 0 : index
    %1122 = vector.load %arg11[%1121, %c0_545, %c0_546] : memref<12x1x32xf32, #tpu.memory_space<vmem>>, vector<1x1x32xf32>
    %1123 = vector.shape_cast %1122 : vector<1x1x32xf32> to vector<1x32xf32>
    %1124 = arith.index_cast %arg0 : i32 to index
    %c29_547 = arith.constant 29 : index
    %1125 = memref.load %arg2[%1124, %c29_547] : memref<7x128xi32, #tpu.memory_space<smem>>
    %1126 = arith.index_cast %1125 : i32 to index
    %c0_548 = arith.constant 0 : index
    %c0_549 = arith.constant 0 : index
    %1127 = vector.load %arg11[%1126, %c0_548, %c0_549] : memref<12x1x32xf32, #tpu.memory_space<vmem>>, vector<1x1x32xf32>
    %1128 = vector.shape_cast %1127 : vector<1x1x32xf32> to vector<1x32xf32>
    %1129 = arith.index_cast %arg0 : i32 to index
    %c45_550 = arith.constant 45 : index
    %1130 = memref.load %arg2[%1129, %c45_550] : memref<7x128xi32, #tpu.memory_space<smem>>
    %1131 = arith.index_cast %1130 : i32 to index
    %c0_551 = arith.constant 0 : index
    %c0_552 = arith.constant 0 : index
    %1132 = vector.load %arg11[%1131, %c0_551, %c0_552] : memref<12x1x32xf32, #tpu.memory_space<vmem>>, vector<1x1x32xf32>
    %1133 = vector.shape_cast %1132 : vector<1x1x32xf32> to vector<1x32xf32>
    %1134 = arith.index_cast %arg0 : i32 to index
    %c61_553 = arith.constant 61 : index
    %1135 = memref.load %arg2[%1134, %c61_553] : memref<7x128xi32, #tpu.memory_space<smem>>
    %1136 = arith.index_cast %1135 : i32 to index
    %c0_554 = arith.constant 0 : index
    %c0_555 = arith.constant 0 : index
    %1137 = vector.load %arg11[%1136, %c0_554, %c0_555] : memref<12x1x32xf32, #tpu.memory_space<vmem>>, vector<1x1x32xf32>
    %1138 = vector.shape_cast %1137 : vector<1x1x32xf32> to vector<1x32xf32>
    %1139 = arith.index_cast %arg0 : i32 to index
    %c77_556 = arith.constant 77 : index
    %1140 = memref.load %arg2[%1139, %c77_556] : memref<7x128xi32, #tpu.memory_space<smem>>
    %1141 = arith.index_cast %1140 : i32 to index
    %c0_557 = arith.constant 0 : index
    %c0_558 = arith.constant 0 : index
    %1142 = vector.load %arg11[%1141, %c0_557, %c0_558] : memref<12x1x32xf32, #tpu.memory_space<vmem>>, vector<1x1x32xf32>
    %1143 = vector.shape_cast %1142 : vector<1x1x32xf32> to vector<1x32xf32>
    %1144 = arith.index_cast %arg0 : i32 to index
    %c93_559 = arith.constant 93 : index
    %1145 = memref.load %arg2[%1144, %c93_559] : memref<7x128xi32, #tpu.memory_space<smem>>
    %1146 = arith.index_cast %1145 : i32 to index
    %c0_560 = arith.constant 0 : index
    %c0_561 = arith.constant 0 : index
    %1147 = vector.load %arg11[%1146, %c0_560, %c0_561] : memref<12x1x32xf32, #tpu.memory_space<vmem>>, vector<1x1x32xf32>
    %1148 = vector.shape_cast %1147 : vector<1x1x32xf32> to vector<1x32xf32>
    %1149 = arith.index_cast %arg0 : i32 to index
    %c109_562 = arith.constant 109 : index
    %1150 = memref.load %arg2[%1149, %c109_562] : memref<7x128xi32, #tpu.memory_space<smem>>
    %1151 = arith.index_cast %1150 : i32 to index
    %c0_563 = arith.constant 0 : index
    %c0_564 = arith.constant 0 : index
    %1152 = vector.load %arg11[%1151, %c0_563, %c0_564] : memref<12x1x32xf32, #tpu.memory_space<vmem>>, vector<1x1x32xf32>
    %1153 = vector.shape_cast %1152 : vector<1x1x32xf32> to vector<1x32xf32>
    %1154 = arith.index_cast %arg0 : i32 to index
    %c125_565 = arith.constant 125 : index
    %1155 = memref.load %arg2[%1154, %c125_565] : memref<7x128xi32, #tpu.memory_space<smem>>
    %1156 = arith.index_cast %1155 : i32 to index
    %c0_566 = arith.constant 0 : index
    %c0_567 = arith.constant 0 : index
    %1157 = vector.load %arg11[%1156, %c0_566, %c0_567] : memref<12x1x32xf32, #tpu.memory_space<vmem>>, vector<1x1x32xf32>
    %1158 = vector.shape_cast %1157 : vector<1x1x32xf32> to vector<1x32xf32>
    %1159 = tpu.concatenate %1083, %1088, %1093, %1098, %1103, %1108, %1113, %1118 in 0 : vector<1x32xf32>, vector<1x32xf32>, vector<1x32xf32>, vector<1x32xf32>, vector<1x32xf32>, vector<1x32xf32>, vector<1x32xf32>, vector<1x32xf32> -> vector<8x32xf32>
    %1160 = tpu.concatenate %1123, %1128, %1133, %1138, %1143, %1148, %1153, %1158 in 0 : vector<1x32xf32>, vector<1x32xf32>, vector<1x32xf32>, vector<1x32xf32>, vector<1x32xf32>, vector<1x32xf32>, vector<1x32xf32>, vector<1x32xf32> -> vector<8x32xf32>
    %1161 = arith.index_cast %arg0 : i32 to index
    %c14 = arith.constant 14 : index
    %1162 = memref.load %arg1[%1161, %c14] : memref<7x128xi32, #tpu.memory_space<smem>>
    %1163 = arith.index_cast %1162 : i32 to index
    %c0_568 = arith.constant 0 : index
    %c0_569 = arith.constant 0 : index
    %1164 = vector.load %arg11[%1163, %c0_568, %c0_569] : memref<12x1x32xf32, #tpu.memory_space<vmem>>, vector<1x1x32xf32>
    %1165 = vector.shape_cast %1164 : vector<1x1x32xf32> to vector<1x32xf32>
    %1166 = arith.index_cast %arg0 : i32 to index
    %c30 = arith.constant 30 : index
    %1167 = memref.load %arg1[%1166, %c30] : memref<7x128xi32, #tpu.memory_space<smem>>
    %1168 = arith.index_cast %1167 : i32 to index
    %c0_570 = arith.constant 0 : index
    %c0_571 = arith.constant 0 : index
    %1169 = vector.load %arg11[%1168, %c0_570, %c0_571] : memref<12x1x32xf32, #tpu.memory_space<vmem>>, vector<1x1x32xf32>
    %1170 = vector.shape_cast %1169 : vector<1x1x32xf32> to vector<1x32xf32>
    %1171 = arith.index_cast %arg0 : i32 to index
    %c46 = arith.constant 46 : index
    %1172 = memref.load %arg1[%1171, %c46] : memref<7x128xi32, #tpu.memory_space<smem>>
    %1173 = arith.index_cast %1172 : i32 to index
    %c0_572 = arith.constant 0 : index
    %c0_573 = arith.constant 0 : index
    %1174 = vector.load %arg11[%1173, %c0_572, %c0_573] : memref<12x1x32xf32, #tpu.memory_space<vmem>>, vector<1x1x32xf32>
    %1175 = vector.shape_cast %1174 : vector<1x1x32xf32> to vector<1x32xf32>
    %1176 = arith.index_cast %arg0 : i32 to index
    %c62 = arith.constant 62 : index
    %1177 = memref.load %arg1[%1176, %c62] : memref<7x128xi32, #tpu.memory_space<smem>>
    %1178 = arith.index_cast %1177 : i32 to index
    %c0_574 = arith.constant 0 : index
    %c0_575 = arith.constant 0 : index
    %1179 = vector.load %arg11[%1178, %c0_574, %c0_575] : memref<12x1x32xf32, #tpu.memory_space<vmem>>, vector<1x1x32xf32>
    %1180 = vector.shape_cast %1179 : vector<1x1x32xf32> to vector<1x32xf32>
    %1181 = arith.index_cast %arg0 : i32 to index
    %c78 = arith.constant 78 : index
    %1182 = memref.load %arg1[%1181, %c78] : memref<7x128xi32, #tpu.memory_space<smem>>
    %1183 = arith.index_cast %1182 : i32 to index
    %c0_576 = arith.constant 0 : index
    %c0_577 = arith.constant 0 : index
    %1184 = vector.load %arg11[%1183, %c0_576, %c0_577] : memref<12x1x32xf32, #tpu.memory_space<vmem>>, vector<1x1x32xf32>
    %1185 = vector.shape_cast %1184 : vector<1x1x32xf32> to vector<1x32xf32>
    %1186 = arith.index_cast %arg0 : i32 to index
    %c94 = arith.constant 94 : index
    %1187 = memref.load %arg1[%1186, %c94] : memref<7x128xi32, #tpu.memory_space<smem>>
    %1188 = arith.index_cast %1187 : i32 to index
    %c0_578 = arith.constant 0 : index
    %c0_579 = arith.constant 0 : index
    %1189 = vector.load %arg11[%1188, %c0_578, %c0_579] : memref<12x1x32xf32, #tpu.memory_space<vmem>>, vector<1x1x32xf32>
    %1190 = vector.shape_cast %1189 : vector<1x1x32xf32> to vector<1x32xf32>
    %1191 = arith.index_cast %arg0 : i32 to index
    %c110 = arith.constant 110 : index
    %1192 = memref.load %arg1[%1191, %c110] : memref<7x128xi32, #tpu.memory_space<smem>>
    %1193 = arith.index_cast %1192 : i32 to index
    %c0_580 = arith.constant 0 : index
    %c0_581 = arith.constant 0 : index
    %1194 = vector.load %arg11[%1193, %c0_580, %c0_581] : memref<12x1x32xf32, #tpu.memory_space<vmem>>, vector<1x1x32xf32>
    %1195 = vector.shape_cast %1194 : vector<1x1x32xf32> to vector<1x32xf32>
    %1196 = arith.index_cast %arg0 : i32 to index
    %c126 = arith.constant 126 : index
    %1197 = memref.load %arg1[%1196, %c126] : memref<7x128xi32, #tpu.memory_space<smem>>
    %1198 = arith.index_cast %1197 : i32 to index
    %c0_582 = arith.constant 0 : index
    %c0_583 = arith.constant 0 : index
    %1199 = vector.load %arg11[%1198, %c0_582, %c0_583] : memref<12x1x32xf32, #tpu.memory_space<vmem>>, vector<1x1x32xf32>
    %1200 = vector.shape_cast %1199 : vector<1x1x32xf32> to vector<1x32xf32>
    %1201 = arith.index_cast %arg0 : i32 to index
    %c14_584 = arith.constant 14 : index
    %1202 = memref.load %arg2[%1201, %c14_584] : memref<7x128xi32, #tpu.memory_space<smem>>
    %1203 = arith.index_cast %1202 : i32 to index
    %c0_585 = arith.constant 0 : index
    %c0_586 = arith.constant 0 : index
    %1204 = vector.load %arg11[%1203, %c0_585, %c0_586] : memref<12x1x32xf32, #tpu.memory_space<vmem>>, vector<1x1x32xf32>
    %1205 = vector.shape_cast %1204 : vector<1x1x32xf32> to vector<1x32xf32>
    %1206 = arith.index_cast %arg0 : i32 to index
    %c30_587 = arith.constant 30 : index
    %1207 = memref.load %arg2[%1206, %c30_587] : memref<7x128xi32, #tpu.memory_space<smem>>
    %1208 = arith.index_cast %1207 : i32 to index
    %c0_588 = arith.constant 0 : index
    %c0_589 = arith.constant 0 : index
    %1209 = vector.load %arg11[%1208, %c0_588, %c0_589] : memref<12x1x32xf32, #tpu.memory_space<vmem>>, vector<1x1x32xf32>
    %1210 = vector.shape_cast %1209 : vector<1x1x32xf32> to vector<1x32xf32>
    %1211 = arith.index_cast %arg0 : i32 to index
    %c46_590 = arith.constant 46 : index
    %1212 = memref.load %arg2[%1211, %c46_590] : memref<7x128xi32, #tpu.memory_space<smem>>
    %1213 = arith.index_cast %1212 : i32 to index
    %c0_591 = arith.constant 0 : index
    %c0_592 = arith.constant 0 : index
    %1214 = vector.load %arg11[%1213, %c0_591, %c0_592] : memref<12x1x32xf32, #tpu.memory_space<vmem>>, vector<1x1x32xf32>
    %1215 = vector.shape_cast %1214 : vector<1x1x32xf32> to vector<1x32xf32>
    %1216 = arith.index_cast %arg0 : i32 to index
    %c62_593 = arith.constant 62 : index
    %1217 = memref.load %arg2[%1216, %c62_593] : memref<7x128xi32, #tpu.memory_space<smem>>
    %1218 = arith.index_cast %1217 : i32 to index
    %c0_594 = arith.constant 0 : index
    %c0_595 = arith.constant 0 : index
    %1219 = vector.load %arg11[%1218, %c0_594, %c0_595] : memref<12x1x32xf32, #tpu.memory_space<vmem>>, vector<1x1x32xf32>
    %1220 = vector.shape_cast %1219 : vector<1x1x32xf32> to vector<1x32xf32>
    %1221 = arith.index_cast %arg0 : i32 to index
    %c78_596 = arith.constant 78 : index
    %1222 = memref.load %arg2[%1221, %c78_596] : memref<7x128xi32, #tpu.memory_space<smem>>
    %1223 = arith.index_cast %1222 : i32 to index
    %c0_597 = arith.constant 0 : index
    %c0_598 = arith.constant 0 : index
    %1224 = vector.load %arg11[%1223, %c0_597, %c0_598] : memref<12x1x32xf32, #tpu.memory_space<vmem>>, vector<1x1x32xf32>
    %1225 = vector.shape_cast %1224 : vector<1x1x32xf32> to vector<1x32xf32>
    %1226 = arith.index_cast %arg0 : i32 to index
    %c94_599 = arith.constant 94 : index
    %1227 = memref.load %arg2[%1226, %c94_599] : memref<7x128xi32, #tpu.memory_space<smem>>
    %1228 = arith.index_cast %1227 : i32 to index
    %c0_600 = arith.constant 0 : index
    %c0_601 = arith.constant 0 : index
    %1229 = vector.load %arg11[%1228, %c0_600, %c0_601] : memref<12x1x32xf32, #tpu.memory_space<vmem>>, vector<1x1x32xf32>
    %1230 = vector.shape_cast %1229 : vector<1x1x32xf32> to vector<1x32xf32>
    %1231 = arith.index_cast %arg0 : i32 to index
    %c110_602 = arith.constant 110 : index
    %1232 = memref.load %arg2[%1231, %c110_602] : memref<7x128xi32, #tpu.memory_space<smem>>
    %1233 = arith.index_cast %1232 : i32 to index
    %c0_603 = arith.constant 0 : index
    %c0_604 = arith.constant 0 : index
    %1234 = vector.load %arg11[%1233, %c0_603, %c0_604] : memref<12x1x32xf32, #tpu.memory_space<vmem>>, vector<1x1x32xf32>
    %1235 = vector.shape_cast %1234 : vector<1x1x32xf32> to vector<1x32xf32>
    %1236 = arith.index_cast %arg0 : i32 to index
    %c126_605 = arith.constant 126 : index
    %1237 = memref.load %arg2[%1236, %c126_605] : memref<7x128xi32, #tpu.memory_space<smem>>
    %1238 = arith.index_cast %1237 : i32 to index
    %c0_606 = arith.constant 0 : index
    %c0_607 = arith.constant 0 : index
    %1239 = vector.load %arg11[%1238, %c0_606, %c0_607] : memref<12x1x32xf32, #tpu.memory_space<vmem>>, vector<1x1x32xf32>
    %1240 = vector.shape_cast %1239 : vector<1x1x32xf32> to vector<1x32xf32>
    %1241 = tpu.concatenate %1165, %1170, %1175, %1180, %1185, %1190, %1195, %1200 in 0 : vector<1x32xf32>, vector<1x32xf32>, vector<1x32xf32>, vector<1x32xf32>, vector<1x32xf32>, vector<1x32xf32>, vector<1x32xf32>, vector<1x32xf32> -> vector<8x32xf32>
    %1242 = tpu.concatenate %1205, %1210, %1215, %1220, %1225, %1230, %1235, %1240 in 0 : vector<1x32xf32>, vector<1x32xf32>, vector<1x32xf32>, vector<1x32xf32>, vector<1x32xf32>, vector<1x32xf32>, vector<1x32xf32>, vector<1x32xf32> -> vector<8x32xf32>
    %1243 = arith.index_cast %arg0 : i32 to index
    %c15 = arith.constant 15 : index
    %1244 = memref.load %arg1[%1243, %c15] : memref<7x128xi32, #tpu.memory_space<smem>>
    %1245 = arith.index_cast %1244 : i32 to index
    %c0_608 = arith.constant 0 : index
    %c0_609 = arith.constant 0 : index
    %1246 = vector.load %arg11[%1245, %c0_608, %c0_609] : memref<12x1x32xf32, #tpu.memory_space<vmem>>, vector<1x1x32xf32>
    %1247 = vector.shape_cast %1246 : vector<1x1x32xf32> to vector<1x32xf32>
    %1248 = arith.index_cast %arg0 : i32 to index
    %c31 = arith.constant 31 : index
    %1249 = memref.load %arg1[%1248, %c31] : memref<7x128xi32, #tpu.memory_space<smem>>
    %1250 = arith.index_cast %1249 : i32 to index
    %c0_610 = arith.constant 0 : index
    %c0_611 = arith.constant 0 : index
    %1251 = vector.load %arg11[%1250, %c0_610, %c0_611] : memref<12x1x32xf32, #tpu.memory_space<vmem>>, vector<1x1x32xf32>
    %1252 = vector.shape_cast %1251 : vector<1x1x32xf32> to vector<1x32xf32>
    %1253 = arith.index_cast %arg0 : i32 to index
    %c47 = arith.constant 47 : index
    %1254 = memref.load %arg1[%1253, %c47] : memref<7x128xi32, #tpu.memory_space<smem>>
    %1255 = arith.index_cast %1254 : i32 to index
    %c0_612 = arith.constant 0 : index
    %c0_613 = arith.constant 0 : index
    %1256 = vector.load %arg11[%1255, %c0_612, %c0_613] : memref<12x1x32xf32, #tpu.memory_space<vmem>>, vector<1x1x32xf32>
    %1257 = vector.shape_cast %1256 : vector<1x1x32xf32> to vector<1x32xf32>
    %1258 = arith.index_cast %arg0 : i32 to index
    %c63 = arith.constant 63 : index
    %1259 = memref.load %arg1[%1258, %c63] : memref<7x128xi32, #tpu.memory_space<smem>>
    %1260 = arith.index_cast %1259 : i32 to index
    %c0_614 = arith.constant 0 : index
    %c0_615 = arith.constant 0 : index
    %1261 = vector.load %arg11[%1260, %c0_614, %c0_615] : memref<12x1x32xf32, #tpu.memory_space<vmem>>, vector<1x1x32xf32>
    %1262 = vector.shape_cast %1261 : vector<1x1x32xf32> to vector<1x32xf32>
    %1263 = arith.index_cast %arg0 : i32 to index
    %c79 = arith.constant 79 : index
    %1264 = memref.load %arg1[%1263, %c79] : memref<7x128xi32, #tpu.memory_space<smem>>
    %1265 = arith.index_cast %1264 : i32 to index
    %c0_616 = arith.constant 0 : index
    %c0_617 = arith.constant 0 : index
    %1266 = vector.load %arg11[%1265, %c0_616, %c0_617] : memref<12x1x32xf32, #tpu.memory_space<vmem>>, vector<1x1x32xf32>
    %1267 = vector.shape_cast %1266 : vector<1x1x32xf32> to vector<1x32xf32>
    %1268 = arith.index_cast %arg0 : i32 to index
    %c95 = arith.constant 95 : index
    %1269 = memref.load %arg1[%1268, %c95] : memref<7x128xi32, #tpu.memory_space<smem>>
    %1270 = arith.index_cast %1269 : i32 to index
    %c0_618 = arith.constant 0 : index
    %c0_619 = arith.constant 0 : index
    %1271 = vector.load %arg11[%1270, %c0_618, %c0_619] : memref<12x1x32xf32, #tpu.memory_space<vmem>>, vector<1x1x32xf32>
    %1272 = vector.shape_cast %1271 : vector<1x1x32xf32> to vector<1x32xf32>
    %1273 = arith.index_cast %arg0 : i32 to index
    %c111 = arith.constant 111 : index
    %1274 = memref.load %arg1[%1273, %c111] : memref<7x128xi32, #tpu.memory_space<smem>>
    %1275 = arith.index_cast %1274 : i32 to index
    %c0_620 = arith.constant 0 : index
    %c0_621 = arith.constant 0 : index
    %1276 = vector.load %arg11[%1275, %c0_620, %c0_621] : memref<12x1x32xf32, #tpu.memory_space<vmem>>, vector<1x1x32xf32>
    %1277 = vector.shape_cast %1276 : vector<1x1x32xf32> to vector<1x32xf32>
    %1278 = arith.index_cast %arg0 : i32 to index
    %c127 = arith.constant 127 : index
    %1279 = memref.load %arg1[%1278, %c127] : memref<7x128xi32, #tpu.memory_space<smem>>
    %1280 = arith.index_cast %1279 : i32 to index
    %c0_622 = arith.constant 0 : index
    %c0_623 = arith.constant 0 : index
    %1281 = vector.load %arg11[%1280, %c0_622, %c0_623] : memref<12x1x32xf32, #tpu.memory_space<vmem>>, vector<1x1x32xf32>
    %1282 = vector.shape_cast %1281 : vector<1x1x32xf32> to vector<1x32xf32>
    %1283 = arith.index_cast %arg0 : i32 to index
    %c15_624 = arith.constant 15 : index
    %1284 = memref.load %arg2[%1283, %c15_624] : memref<7x128xi32, #tpu.memory_space<smem>>
    %1285 = arith.index_cast %1284 : i32 to index
    %c0_625 = arith.constant 0 : index
    %c0_626 = arith.constant 0 : index
    %1286 = vector.load %arg11[%1285, %c0_625, %c0_626] : memref<12x1x32xf32, #tpu.memory_space<vmem>>, vector<1x1x32xf32>
    %1287 = vector.shape_cast %1286 : vector<1x1x32xf32> to vector<1x32xf32>
    %1288 = arith.index_cast %arg0 : i32 to index
    %c31_627 = arith.constant 31 : index
    %1289 = memref.load %arg2[%1288, %c31_627] : memref<7x128xi32, #tpu.memory_space<smem>>
    %1290 = arith.index_cast %1289 : i32 to index
    %c0_628 = arith.constant 0 : index
    %c0_629 = arith.constant 0 : index
    %1291 = vector.load %arg11[%1290, %c0_628, %c0_629] : memref<12x1x32xf32, #tpu.memory_space<vmem>>, vector<1x1x32xf32>
    %1292 = vector.shape_cast %1291 : vector<1x1x32xf32> to vector<1x32xf32>
    %1293 = arith.index_cast %arg0 : i32 to index
    %c47_630 = arith.constant 47 : index
    %1294 = memref.load %arg2[%1293, %c47_630] : memref<7x128xi32, #tpu.memory_space<smem>>
    %1295 = arith.index_cast %1294 : i32 to index
    %c0_631 = arith.constant 0 : index
    %c0_632 = arith.constant 0 : index
    %1296 = vector.load %arg11[%1295, %c0_631, %c0_632] : memref<12x1x32xf32, #tpu.memory_space<vmem>>, vector<1x1x32xf32>
    %1297 = vector.shape_cast %1296 : vector<1x1x32xf32> to vector<1x32xf32>
    %1298 = arith.index_cast %arg0 : i32 to index
    %c63_633 = arith.constant 63 : index
    %1299 = memref.load %arg2[%1298, %c63_633] : memref<7x128xi32, #tpu.memory_space<smem>>
    %1300 = arith.index_cast %1299 : i32 to index
    %c0_634 = arith.constant 0 : index
    %c0_635 = arith.constant 0 : index
    %1301 = vector.load %arg11[%1300, %c0_634, %c0_635] : memref<12x1x32xf32, #tpu.memory_space<vmem>>, vector<1x1x32xf32>
    %1302 = vector.shape_cast %1301 : vector<1x1x32xf32> to vector<1x32xf32>
    %1303 = arith.index_cast %arg0 : i32 to index
    %c79_636 = arith.constant 79 : index
    %1304 = memref.load %arg2[%1303, %c79_636] : memref<7x128xi32, #tpu.memory_space<smem>>
    %1305 = arith.index_cast %1304 : i32 to index
    %c0_637 = arith.constant 0 : index
    %c0_638 = arith.constant 0 : index
    %1306 = vector.load %arg11[%1305, %c0_637, %c0_638] : memref<12x1x32xf32, #tpu.memory_space<vmem>>, vector<1x1x32xf32>
    %1307 = vector.shape_cast %1306 : vector<1x1x32xf32> to vector<1x32xf32>
    %1308 = arith.index_cast %arg0 : i32 to index
    %c95_639 = arith.constant 95 : index
    %1309 = memref.load %arg2[%1308, %c95_639] : memref<7x128xi32, #tpu.memory_space<smem>>
    %1310 = arith.index_cast %1309 : i32 to index
    %c0_640 = arith.constant 0 : index
    %c0_641 = arith.constant 0 : index
    %1311 = vector.load %arg11[%1310, %c0_640, %c0_641] : memref<12x1x32xf32, #tpu.memory_space<vmem>>, vector<1x1x32xf32>
    %1312 = vector.shape_cast %1311 : vector<1x1x32xf32> to vector<1x32xf32>
    %1313 = arith.index_cast %arg0 : i32 to index
    %c111_642 = arith.constant 111 : index
    %1314 = memref.load %arg2[%1313, %c111_642] : memref<7x128xi32, #tpu.memory_space<smem>>
    %1315 = arith.index_cast %1314 : i32 to index
    %c0_643 = arith.constant 0 : index
    %c0_644 = arith.constant 0 : index
    %1316 = vector.load %arg11[%1315, %c0_643, %c0_644] : memref<12x1x32xf32, #tpu.memory_space<vmem>>, vector<1x1x32xf32>
    %1317 = vector.shape_cast %1316 : vector<1x1x32xf32> to vector<1x32xf32>
    %1318 = arith.index_cast %arg0 : i32 to index
    %c127_645 = arith.constant 127 : index
    %1319 = memref.load %arg2[%1318, %c127_645] : memref<7x128xi32, #tpu.memory_space<smem>>
    %1320 = arith.index_cast %1319 : i32 to index
    %c0_646 = arith.constant 0 : index
    %c0_647 = arith.constant 0 : index
    %1321 = vector.load %arg11[%1320, %c0_646, %c0_647] : memref<12x1x32xf32, #tpu.memory_space<vmem>>, vector<1x1x32xf32>
    %1322 = vector.shape_cast %1321 : vector<1x1x32xf32> to vector<1x32xf32>
    %1323 = tpu.concatenate %1247, %1252, %1257, %1262, %1267, %1272, %1277, %1282 in 0 : vector<1x32xf32>, vector<1x32xf32>, vector<1x32xf32>, vector<1x32xf32>, vector<1x32xf32>, vector<1x32xf32>, vector<1x32xf32>, vector<1x32xf32> -> vector<8x32xf32>
    %1324 = tpu.concatenate %1287, %1292, %1297, %1302, %1307, %1312, %1317, %1322 in 0 : vector<1x32xf32>, vector<1x32xf32>, vector<1x32xf32>, vector<1x32xf32>, vector<1x32xf32>, vector<1x32xf32>, vector<1x32xf32>, vector<1x32xf32> -> vector<8x32xf32>
    %1325 = tpu.concatenate %93, %175, %257, %339, %421, %503, %585, %667, %749, %831, %913, %995, %1077, %1159, %1241, %1323 in 0 : vector<8x32xf32>, vector<8x32xf32>, vector<8x32xf32>, vector<8x32xf32>, vector<8x32xf32>, vector<8x32xf32>, vector<8x32xf32>, vector<8x32xf32>, vector<8x32xf32>, vector<8x32xf32>, vector<8x32xf32>, vector<8x32xf32>, vector<8x32xf32>, vector<8x32xf32>, vector<8x32xf32>, vector<8x32xf32> -> vector<128x32xf32>
    %c0_648 = arith.constant 0 : index
    %c0_649 = arith.constant 0 : index
    %1326 = vector.load %arg8[%c0_648, %c0_649] : memref<32x32xf32, #tpu.memory_space<vmem>>, vector<32x32xf32>
    %cst_650 = arith.constant dense<0.000000e+00> : vector<128x32xf32>
    %1327 = tpu.matmul %1325, %1326, %cst_650 {dimension_numbers = #tpu.dot_dimension_numbers<[1], [0], [0], [1], [0, 0, 1, 1], [], []>} : vector<128x32xf32>, vector<32x32xf32>, vector<128x32xf32> -> vector<128x32xf32>
    %cst_651 = arith.constant 0.000000e+00 : f32
    %1328 = vector.broadcast %cst_651 : f32 to vector<8x32xf32>
    %cst_652 = arith.constant 0.000000e+00 : f32
    %1329 = vector.broadcast %cst_652 : f32 to vector<8x32xf32>
    %cst_653 = arith.constant 0.000000e+00 : f32
    %1330 = vector.broadcast %cst_653 : f32 to vector<8x32xf32>
    %1331 = vector.extract_strided_slice %1327 {offsets = [0, 0], sizes = [8, 32], strides = [1, 1]} : vector<128x32xf32> to vector<8x32xf32>
    %1332 = arith.addf %11, %1331 : vector<8x32xf32>
    %1333 = arith.negf %1332 : vector<8x32xf32>
    %1334 = math.exp %1333 : vector<8x32xf32>
    %cst_654 = arith.constant 1.000000e+00 : f32
    %1335 = vector.broadcast %cst_654 : f32 to vector<8x32xf32>
    %1336 = arith.addf %1335, %1334 : vector<8x32xf32>
    %1337 = arith.divf %1335, %1336 : vector<8x32xf32>
    %1338 = arith.addf %1328, %93 : vector<8x32xf32>
    %1339 = arith.mulf %1337, %93 : vector<8x32xf32>
    %1340 = arith.addf %1330, %1339 : vector<8x32xf32>
    %1341 = arith.addf %1329, %94 : vector<8x32xf32>
    %1342 = vector.extract_strided_slice %1327 {offsets = [8, 0], sizes = [8, 32], strides = [1, 1]} : vector<128x32xf32> to vector<8x32xf32>
    %1343 = arith.addf %11, %1342 : vector<8x32xf32>
    %1344 = arith.negf %1343 : vector<8x32xf32>
    %1345 = math.exp %1344 : vector<8x32xf32>
    %cst_655 = arith.constant 1.000000e+00 : f32
    %1346 = vector.broadcast %cst_655 : f32 to vector<8x32xf32>
    %1347 = arith.addf %1346, %1345 : vector<8x32xf32>
    %1348 = arith.divf %1346, %1347 : vector<8x32xf32>
    %1349 = arith.addf %1338, %175 : vector<8x32xf32>
    %1350 = arith.mulf %1348, %175 : vector<8x32xf32>
    %1351 = arith.addf %1340, %1350 : vector<8x32xf32>
    %1352 = arith.addf %1341, %176 : vector<8x32xf32>
    %1353 = vector.extract_strided_slice %1327 {offsets = [16, 0], sizes = [8, 32], strides = [1, 1]} : vector<128x32xf32> to vector<8x32xf32>
    %1354 = arith.addf %11, %1353 : vector<8x32xf32>
    %1355 = arith.negf %1354 : vector<8x32xf32>
    %1356 = math.exp %1355 : vector<8x32xf32>
    %cst_656 = arith.constant 1.000000e+00 : f32
    %1357 = vector.broadcast %cst_656 : f32 to vector<8x32xf32>
    %1358 = arith.addf %1357, %1356 : vector<8x32xf32>
    %1359 = arith.divf %1357, %1358 : vector<8x32xf32>
    %1360 = arith.addf %1349, %257 : vector<8x32xf32>
    %1361 = arith.mulf %1359, %257 : vector<8x32xf32>
    %1362 = arith.addf %1351, %1361 : vector<8x32xf32>
    %1363 = arith.addf %1352, %258 : vector<8x32xf32>
    %1364 = vector.extract_strided_slice %1327 {offsets = [24, 0], sizes = [8, 32], strides = [1, 1]} : vector<128x32xf32> to vector<8x32xf32>
    %1365 = arith.addf %11, %1364 : vector<8x32xf32>
    %1366 = arith.negf %1365 : vector<8x32xf32>
    %1367 = math.exp %1366 : vector<8x32xf32>
    %cst_657 = arith.constant 1.000000e+00 : f32
    %1368 = vector.broadcast %cst_657 : f32 to vector<8x32xf32>
    %1369 = arith.addf %1368, %1367 : vector<8x32xf32>
    %1370 = arith.divf %1368, %1369 : vector<8x32xf32>
    %1371 = arith.addf %1360, %339 : vector<8x32xf32>
    %1372 = arith.mulf %1370, %339 : vector<8x32xf32>
    %1373 = arith.addf %1362, %1372 : vector<8x32xf32>
    %1374 = arith.addf %1363, %340 : vector<8x32xf32>
    %1375 = vector.extract_strided_slice %1327 {offsets = [32, 0], sizes = [8, 32], strides = [1, 1]} : vector<128x32xf32> to vector<8x32xf32>
    %1376 = arith.addf %11, %1375 : vector<8x32xf32>
    %1377 = arith.negf %1376 : vector<8x32xf32>
    %1378 = math.exp %1377 : vector<8x32xf32>
    %cst_658 = arith.constant 1.000000e+00 : f32
    %1379 = vector.broadcast %cst_658 : f32 to vector<8x32xf32>
    %1380 = arith.addf %1379, %1378 : vector<8x32xf32>
    %1381 = arith.divf %1379, %1380 : vector<8x32xf32>
    %1382 = arith.addf %1371, %421 : vector<8x32xf32>
    %1383 = arith.mulf %1381, %421 : vector<8x32xf32>
    %1384 = arith.addf %1373, %1383 : vector<8x32xf32>
    %1385 = arith.addf %1374, %422 : vector<8x32xf32>
    %1386 = vector.extract_strided_slice %1327 {offsets = [40, 0], sizes = [8, 32], strides = [1, 1]} : vector<128x32xf32> to vector<8x32xf32>
    %1387 = arith.addf %11, %1386 : vector<8x32xf32>
    %1388 = arith.negf %1387 : vector<8x32xf32>
    %1389 = math.exp %1388 : vector<8x32xf32>
    %cst_659 = arith.constant 1.000000e+00 : f32
    %1390 = vector.broadcast %cst_659 : f32 to vector<8x32xf32>
    %1391 = arith.addf %1390, %1389 : vector<8x32xf32>
    %1392 = arith.divf %1390, %1391 : vector<8x32xf32>
    %1393 = arith.addf %1382, %503 : vector<8x32xf32>
    %1394 = arith.mulf %1392, %503 : vector<8x32xf32>
    %1395 = arith.addf %1384, %1394 : vector<8x32xf32>
    %1396 = arith.addf %1385, %504 : vector<8x32xf32>
    %1397 = vector.extract_strided_slice %1327 {offsets = [48, 0], sizes = [8, 32], strides = [1, 1]} : vector<128x32xf32> to vector<8x32xf32>
    %1398 = arith.addf %11, %1397 : vector<8x32xf32>
    %1399 = arith.negf %1398 : vector<8x32xf32>
    %1400 = math.exp %1399 : vector<8x32xf32>
    %cst_660 = arith.constant 1.000000e+00 : f32
    %1401 = vector.broadcast %cst_660 : f32 to vector<8x32xf32>
    %1402 = arith.addf %1401, %1400 : vector<8x32xf32>
    %1403 = arith.divf %1401, %1402 : vector<8x32xf32>
    %1404 = arith.addf %1393, %585 : vector<8x32xf32>
    %1405 = arith.mulf %1403, %585 : vector<8x32xf32>
    %1406 = arith.addf %1395, %1405 : vector<8x32xf32>
    %1407 = arith.addf %1396, %586 : vector<8x32xf32>
    %1408 = vector.extract_strided_slice %1327 {offsets = [56, 0], sizes = [8, 32], strides = [1, 1]} : vector<128x32xf32> to vector<8x32xf32>
    %1409 = arith.addf %11, %1408 : vector<8x32xf32>
    %1410 = arith.negf %1409 : vector<8x32xf32>
    %1411 = math.exp %1410 : vector<8x32xf32>
    %cst_661 = arith.constant 1.000000e+00 : f32
    %1412 = vector.broadcast %cst_661 : f32 to vector<8x32xf32>
    %1413 = arith.addf %1412, %1411 : vector<8x32xf32>
    %1414 = arith.divf %1412, %1413 : vector<8x32xf32>
    %1415 = arith.addf %1404, %667 : vector<8x32xf32>
    %1416 = arith.mulf %1414, %667 : vector<8x32xf32>
    %1417 = arith.addf %1406, %1416 : vector<8x32xf32>
    %1418 = arith.addf %1407, %668 : vector<8x32xf32>
    %1419 = vector.extract_strided_slice %1327 {offsets = [64, 0], sizes = [8, 32], strides = [1, 1]} : vector<128x32xf32> to vector<8x32xf32>
    %1420 = arith.addf %11, %1419 : vector<8x32xf32>
    %1421 = arith.negf %1420 : vector<8x32xf32>
    %1422 = math.exp %1421 : vector<8x32xf32>
    %cst_662 = arith.constant 1.000000e+00 : f32
    %1423 = vector.broadcast %cst_662 : f32 to vector<8x32xf32>
    %1424 = arith.addf %1423, %1422 : vector<8x32xf32>
    %1425 = arith.divf %1423, %1424 : vector<8x32xf32>
    %1426 = arith.addf %1415, %749 : vector<8x32xf32>
    %1427 = arith.mulf %1425, %749 : vector<8x32xf32>
    %1428 = arith.addf %1417, %1427 : vector<8x32xf32>
    %1429 = arith.addf %1418, %750 : vector<8x32xf32>
    %1430 = vector.extract_strided_slice %1327 {offsets = [72, 0], sizes = [8, 32], strides = [1, 1]} : vector<128x32xf32> to vector<8x32xf32>
    %1431 = arith.addf %11, %1430 : vector<8x32xf32>
    %1432 = arith.negf %1431 : vector<8x32xf32>
    %1433 = math.exp %1432 : vector<8x32xf32>
    %cst_663 = arith.constant 1.000000e+00 : f32
    %1434 = vector.broadcast %cst_663 : f32 to vector<8x32xf32>
    %1435 = arith.addf %1434, %1433 : vector<8x32xf32>
    %1436 = arith.divf %1434, %1435 : vector<8x32xf32>
    %1437 = arith.addf %1426, %831 : vector<8x32xf32>
    %1438 = arith.mulf %1436, %831 : vector<8x32xf32>
    %1439 = arith.addf %1428, %1438 : vector<8x32xf32>
    %1440 = arith.addf %1429, %832 : vector<8x32xf32>
    %1441 = vector.extract_strided_slice %1327 {offsets = [80, 0], sizes = [8, 32], strides = [1, 1]} : vector<128x32xf32> to vector<8x32xf32>
    %1442 = arith.addf %11, %1441 : vector<8x32xf32>
    %1443 = arith.negf %1442 : vector<8x32xf32>
    %1444 = math.exp %1443 : vector<8x32xf32>
    %cst_664 = arith.constant 1.000000e+00 : f32
    %1445 = vector.broadcast %cst_664 : f32 to vector<8x32xf32>
    %1446 = arith.addf %1445, %1444 : vector<8x32xf32>
    %1447 = arith.divf %1445, %1446 : vector<8x32xf32>
    %1448 = arith.addf %1437, %913 : vector<8x32xf32>
    %1449 = arith.mulf %1447, %913 : vector<8x32xf32>
    %1450 = arith.addf %1439, %1449 : vector<8x32xf32>
    %1451 = arith.addf %1440, %914 : vector<8x32xf32>
    %1452 = vector.extract_strided_slice %1327 {offsets = [88, 0], sizes = [8, 32], strides = [1, 1]} : vector<128x32xf32> to vector<8x32xf32>
    %1453 = arith.addf %11, %1452 : vector<8x32xf32>
    %1454 = arith.negf %1453 : vector<8x32xf32>
    %1455 = math.exp %1454 : vector<8x32xf32>
    %cst_665 = arith.constant 1.000000e+00 : f32
    %1456 = vector.broadcast %cst_665 : f32 to vector<8x32xf32>
    %1457 = arith.addf %1456, %1455 : vector<8x32xf32>
    %1458 = arith.divf %1456, %1457 : vector<8x32xf32>
    %1459 = arith.addf %1448, %995 : vector<8x32xf32>
    %1460 = arith.mulf %1458, %995 : vector<8x32xf32>
    %1461 = arith.addf %1450, %1460 : vector<8x32xf32>
    %1462 = arith.addf %1451, %996 : vector<8x32xf32>
    %1463 = vector.extract_strided_slice %1327 {offsets = [96, 0], sizes = [8, 32], strides = [1, 1]} : vector<128x32xf32> to vector<8x32xf32>
    %1464 = arith.addf %11, %1463 : vector<8x32xf32>
    %1465 = arith.negf %1464 : vector<8x32xf32>
    %1466 = math.exp %1465 : vector<8x32xf32>
    %cst_666 = arith.constant 1.000000e+00 : f32
    %1467 = vector.broadcast %cst_666 : f32 to vector<8x32xf32>
    %1468 = arith.addf %1467, %1466 : vector<8x32xf32>
    %1469 = arith.divf %1467, %1468 : vector<8x32xf32>
    %1470 = arith.addf %1459, %1077 : vector<8x32xf32>
    %1471 = arith.mulf %1469, %1077 : vector<8x32xf32>
    %1472 = arith.addf %1461, %1471 : vector<8x32xf32>
    %1473 = arith.addf %1462, %1078 : vector<8x32xf32>
    %1474 = vector.extract_strided_slice %1327 {offsets = [104, 0], sizes = [8, 32], strides = [1, 1]} : vector<128x32xf32> to vector<8x32xf32>
    %1475 = arith.addf %11, %1474 : vector<8x32xf32>
    %1476 = arith.negf %1475 : vector<8x32xf32>
    %1477 = math.exp %1476 : vector<8x32xf32>
    %cst_667 = arith.constant 1.000000e+00 : f32
    %1478 = vector.broadcast %cst_667 : f32 to vector<8x32xf32>
    %1479 = arith.addf %1478, %1477 : vector<8x32xf32>
    %1480 = arith.divf %1478, %1479 : vector<8x32xf32>
    %1481 = arith.addf %1470, %1159 : vector<8x32xf32>
    %1482 = arith.mulf %1480, %1159 : vector<8x32xf32>
    %1483 = arith.addf %1472, %1482 : vector<8x32xf32>
    %1484 = arith.addf %1473, %1160 : vector<8x32xf32>
    %1485 = vector.extract_strided_slice %1327 {offsets = [112, 0], sizes = [8, 32], strides = [1, 1]} : vector<128x32xf32> to vector<8x32xf32>
    %1486 = arith.addf %11, %1485 : vector<8x32xf32>
    %1487 = arith.negf %1486 : vector<8x32xf32>
    %1488 = math.exp %1487 : vector<8x32xf32>
    %cst_668 = arith.constant 1.000000e+00 : f32
    %1489 = vector.broadcast %cst_668 : f32 to vector<8x32xf32>
    %1490 = arith.addf %1489, %1488 : vector<8x32xf32>
    %1491 = arith.divf %1489, %1490 : vector<8x32xf32>
    %1492 = arith.addf %1481, %1241 : vector<8x32xf32>
    %1493 = arith.mulf %1491, %1241 : vector<8x32xf32>
    %1494 = arith.addf %1483, %1493 : vector<8x32xf32>
    %1495 = arith.addf %1484, %1242 : vector<8x32xf32>
    %1496 = vector.extract_strided_slice %1327 {offsets = [120, 0], sizes = [8, 32], strides = [1, 1]} : vector<128x32xf32> to vector<8x32xf32>
    %1497 = arith.addf %11, %1496 : vector<8x32xf32>
    %1498 = arith.negf %1497 : vector<8x32xf32>
    %1499 = math.exp %1498 : vector<8x32xf32>
    %cst_669 = arith.constant 1.000000e+00 : f32
    %1500 = vector.broadcast %cst_669 : f32 to vector<8x32xf32>
    %1501 = arith.addf %1500, %1499 : vector<8x32xf32>
    %1502 = arith.divf %1500, %1501 : vector<8x32xf32>
    %1503 = arith.addf %1492, %1323 : vector<8x32xf32>
    %1504 = arith.mulf %1502, %1323 : vector<8x32xf32>
    %1505 = arith.addf %1494, %1504 : vector<8x32xf32>
    %1506 = arith.addf %1495, %1324 : vector<8x32xf32>
    %1507 = tpu.concatenate %1503, %1505 in 1 : vector<8x32xf32>, vector<8x32xf32> -> vector<8x64xf32>
    %c0_670 = arith.constant 0 : index
    %c0_671 = arith.constant 0 : index
    %1508 = vector.load %arg9[%c0_670, %c0_671] : memref<64x64xf32, #tpu.memory_space<vmem>>, vector<64x64xf32>
    %cst_672 = arith.constant dense<0.000000e+00> : vector<8x64xf32>
    %1509 = tpu.matmul %1507, %1508, %cst_672 {dimension_numbers = #tpu.dot_dimension_numbers<[1], [0], [0], [1], [0, 0, 1, 1], [], []>} : vector<8x64xf32>, vector<64x64xf32>, vector<8x64xf32> -> vector<8x64xf32>
    %1510 = vector.extract_strided_slice %1509 {offsets = [0, 0], sizes = [8, 32], strides = [1, 1]} : vector<8x64xf32> to vector<8x32xf32>
    %1511 = arith.addf %10, %1510 : vector<8x32xf32>
    %1512 = arith.negf %1511 : vector<8x32xf32>
    %1513 = math.exp %1512 : vector<8x32xf32>
    %cst_673 = arith.constant 1.000000e+00 : f32
    %1514 = vector.broadcast %cst_673 : f32 to vector<8x32xf32>
    %1515 = arith.addf %1514, %1513 : vector<8x32xf32>
    %1516 = arith.divf %1514, %1515 : vector<8x32xf32>
    %1517 = vector.extract_strided_slice %1509 {offsets = [0, 32], sizes = [8, 32], strides = [1, 1]} : vector<8x64xf32> to vector<8x32xf32>
    %1518 = arith.addf %12, %1517 : vector<8x32xf32>
    %1519 = math.tanh %1518 : vector<8x32xf32>
    %cst_674 = arith.constant 1.000000e+00 : f32
    %1520 = vector.broadcast %cst_674 : f32 to vector<8x32xf32>
    %1521 = arith.subf %1520, %1516 : vector<8x32xf32>
    %1522 = arith.mulf %1521, %1503 : vector<8x32xf32>
    %1523 = arith.mulf %1516, %1519 : vector<8x32xf32>
    %1524 = arith.addf %1522, %1523 : vector<8x32xf32>
    %c0_675 = arith.constant 0 : index
    %c0_676 = arith.constant 0 : index
    %c0_677 = arith.constant 0 : index
    %1525 = vector.load %arg5[%c0_675, %c0_676, %c0_677] : memref<1x8x32xf32, #tpu.memory_space<vmem>>, vector<1x8x32xf32>
    %1526 = vector.shape_cast %1525 : vector<1x8x32xf32> to vector<8x32xf32>
    %1527 = tpu.concatenate %1524, %4, %1506, %1526 in 1 : vector<8x32xf32>, vector<8x32xf32>, vector<8x32xf32>, vector<8x32xf32> -> vector<8x128xf32>
    %c0_678 = arith.constant 0 : index
    %c0_679 = arith.constant 0 : index
    %c0_680 = arith.constant 0 : index
    %1528 = vector.load %arg10[%c0_678, %c0_679, %c0_680] : memref<1x8x128xf32, #tpu.memory_space<vmem>>, vector<1x8x128xf32>
    %1529 = vector.shape_cast %1528 : vector<1x8x128xf32> to vector<8x128xf32>
    %1530 = vector.shape_cast %1527 : vector<8x128xf32> to vector<1x8x128xf32>
    tpu.vector_store %arg10[%c0_678, %c0_679, %c0_680], %1530 {strides = array<i32>} : memref<1x8x128xf32, #tpu.memory_space<vmem>>, vector<1x8x128xf32>,
    %1531 = vector.extract_strided_slice %1524 {offsets = [0, 0], sizes = [1, 32], strides = [1, 1]} : vector<8x32xf32> to vector<1x32xf32>
    %1532 = arith.index_cast %arg0 : i32 to index
    %c0_681 = arith.constant 0 : index
    %1533 = memref.load %arg3[%1532, %c0_681] : memref<7x8xi32, #tpu.memory_space<smem>>
    %1534 = arith.index_cast %1533 : i32 to index
    %c0_682 = arith.constant 0 : index
    %c0_683 = arith.constant 0 : index
    %1535 = vector.load %arg11[%1534, %c0_682, %c0_683] : memref<12x1x32xf32, #tpu.memory_space<vmem>>, vector<1x1x32xf32>
    %1536 = vector.shape_cast %1535 : vector<1x1x32xf32> to vector<1x32xf32>
    %1537 = vector.shape_cast %1531 : vector<1x32xf32> to vector<1x1x32xf32>
    tpu.vector_store %arg11[%1534, %c0_682, %c0_683], %1537 {strides = array<i32>} : memref<12x1x32xf32, #tpu.memory_space<vmem>>, vector<1x1x32xf32>,
    %1538 = vector.extract_strided_slice %1524 {offsets = [1, 0], sizes = [1, 32], strides = [1, 1]} : vector<8x32xf32> to vector<1x32xf32>
    %1539 = arith.index_cast %arg0 : i32 to index
    %c1_684 = arith.constant 1 : index
    %1540 = memref.load %arg3[%1539, %c1_684] : memref<7x8xi32, #tpu.memory_space<smem>>
    %1541 = arith.index_cast %1540 : i32 to index
    %c0_685 = arith.constant 0 : index
    %c0_686 = arith.constant 0 : index
    %1542 = vector.load %arg11[%1541, %c0_685, %c0_686] : memref<12x1x32xf32, #tpu.memory_space<vmem>>, vector<1x1x32xf32>
    %1543 = vector.shape_cast %1542 : vector<1x1x32xf32> to vector<1x32xf32>
    %1544 = vector.shape_cast %1538 : vector<1x32xf32> to vector<1x1x32xf32>
    tpu.vector_store %arg11[%1541, %c0_685, %c0_686], %1544 {strides = array<i32>} : memref<12x1x32xf32, #tpu.memory_space<vmem>>, vector<1x1x32xf32>,
    %1545 = vector.extract_strided_slice %1524 {offsets = [2, 0], sizes = [1, 32], strides = [1, 1]} : vector<8x32xf32> to vector<1x32xf32>
    %1546 = arith.index_cast %arg0 : i32 to index
    %c2_687 = arith.constant 2 : index
    %1547 = memref.load %arg3[%1546, %c2_687] : memref<7x8xi32, #tpu.memory_space<smem>>
    %1548 = arith.index_cast %1547 : i32 to index
    %c0_688 = arith.constant 0 : index
    %c0_689 = arith.constant 0 : index
    %1549 = vector.load %arg11[%1548, %c0_688, %c0_689] : memref<12x1x32xf32, #tpu.memory_space<vmem>>, vector<1x1x32xf32>
    %1550 = vector.shape_cast %1549 : vector<1x1x32xf32> to vector<1x32xf32>
    %1551 = vector.shape_cast %1545 : vector<1x32xf32> to vector<1x1x32xf32>
    tpu.vector_store %arg11[%1548, %c0_688, %c0_689], %1551 {strides = array<i32>} : memref<12x1x32xf32, #tpu.memory_space<vmem>>, vector<1x1x32xf32>,
    %1552 = vector.extract_strided_slice %1524 {offsets = [3, 0], sizes = [1, 32], strides = [1, 1]} : vector<8x32xf32> to vector<1x32xf32>
    %1553 = arith.index_cast %arg0 : i32 to index
    %c3_690 = arith.constant 3 : index
    %1554 = memref.load %arg3[%1553, %c3_690] : memref<7x8xi32, #tpu.memory_space<smem>>
    %1555 = arith.index_cast %1554 : i32 to index
    %c0_691 = arith.constant 0 : index
    %c0_692 = arith.constant 0 : index
    %1556 = vector.load %arg11[%1555, %c0_691, %c0_692] : memref<12x1x32xf32, #tpu.memory_space<vmem>>, vector<1x1x32xf32>
    %1557 = vector.shape_cast %1556 : vector<1x1x32xf32> to vector<1x32xf32>
    %1558 = vector.shape_cast %1552 : vector<1x32xf32> to vector<1x1x32xf32>
    tpu.vector_store %arg11[%1555, %c0_691, %c0_692], %1558 {strides = array<i32>} : memref<12x1x32xf32, #tpu.memory_space<vmem>>, vector<1x1x32xf32>,
    %1559 = vector.extract_strided_slice %1524 {offsets = [4, 0], sizes = [1, 32], strides = [1, 1]} : vector<8x32xf32> to vector<1x32xf32>
    %1560 = arith.index_cast %arg0 : i32 to index
    %c4_693 = arith.constant 4 : index
    %1561 = memref.load %arg3[%1560, %c4_693] : memref<7x8xi32, #tpu.memory_space<smem>>
    %1562 = arith.index_cast %1561 : i32 to index
    %c0_694 = arith.constant 0 : index
    %c0_695 = arith.constant 0 : index
    %1563 = vector.load %arg11[%1562, %c0_694, %c0_695] : memref<12x1x32xf32, #tpu.memory_space<vmem>>, vector<1x1x32xf32>
    %1564 = vector.shape_cast %1563 : vector<1x1x32xf32> to vector<1x32xf32>
    %1565 = vector.shape_cast %1559 : vector<1x32xf32> to vector<1x1x32xf32>
    tpu.vector_store %arg11[%1562, %c0_694, %c0_695], %1565 {strides = array<i32>} : memref<12x1x32xf32, #tpu.memory_space<vmem>>, vector<1x1x32xf32>,
    %1566 = vector.extract_strided_slice %1524 {offsets = [5, 0], sizes = [1, 32], strides = [1, 1]} : vector<8x32xf32> to vector<1x32xf32>
    %1567 = arith.index_cast %arg0 : i32 to index
    %c5_696 = arith.constant 5 : index
    %1568 = memref.load %arg3[%1567, %c5_696] : memref<7x8xi32, #tpu.memory_space<smem>>
    %1569 = arith.index_cast %1568 : i32 to index
    %c0_697 = arith.constant 0 : index
    %c0_698 = arith.constant 0 : index
    %1570 = vector.load %arg11[%1569, %c0_697, %c0_698] : memref<12x1x32xf32, #tpu.memory_space<vmem>>, vector<1x1x32xf32>
    %1571 = vector.shape_cast %1570 : vector<1x1x32xf32> to vector<1x32xf32>
    %1572 = vector.shape_cast %1566 : vector<1x32xf32> to vector<1x1x32xf32>
    tpu.vector_store %arg11[%1569, %c0_697, %c0_698], %1572 {strides = array<i32>} : memref<12x1x32xf32, #tpu.memory_space<vmem>>, vector<1x1x32xf32>,
    %1573 = vector.extract_strided_slice %1524 {offsets = [6, 0], sizes = [1, 32], strides = [1, 1]} : vector<8x32xf32> to vector<1x32xf32>
    %1574 = arith.index_cast %arg0 : i32 to index
    %c6_699 = arith.constant 6 : index
    %1575 = memref.load %arg3[%1574, %c6_699] : memref<7x8xi32, #tpu.memory_space<smem>>
    %1576 = arith.index_cast %1575 : i32 to index
    %c0_700 = arith.constant 0 : index
    %c0_701 = arith.constant 0 : index
    %1577 = vector.load %arg11[%1576, %c0_700, %c0_701] : memref<12x1x32xf32, #tpu.memory_space<vmem>>, vector<1x1x32xf32>
    %1578 = vector.shape_cast %1577 : vector<1x1x32xf32> to vector<1x32xf32>
    %1579 = vector.shape_cast %1573 : vector<1x32xf32> to vector<1x1x32xf32>
    tpu.vector_store %arg11[%1576, %c0_700, %c0_701], %1579 {strides = array<i32>} : memref<12x1x32xf32, #tpu.memory_space<vmem>>, vector<1x1x32xf32>,
    %1580 = vector.extract_strided_slice %1524 {offsets = [7, 0], sizes = [1, 32], strides = [1, 1]} : vector<8x32xf32> to vector<1x32xf32>
    %1581 = arith.index_cast %arg0 : i32 to index
    %c7_702 = arith.constant 7 : index
    %1582 = memref.load %arg3[%1581, %c7_702] : memref<7x8xi32, #tpu.memory_space<smem>>
    %1583 = arith.index_cast %1582 : i32 to index
    %c0_703 = arith.constant 0 : index
    %c0_704 = arith.constant 0 : index
    %1584 = vector.load %arg11[%1583, %c0_703, %c0_704] : memref<12x1x32xf32, #tpu.memory_space<vmem>>, vector<1x1x32xf32>
    %1585 = vector.shape_cast %1584 : vector<1x1x32xf32> to vector<1x32xf32>
    %1586 = vector.shape_cast %1580 : vector<1x32xf32> to vector<1x1x32xf32>
    tpu.vector_store %arg11[%1583, %c0_703, %c0_704], %1586 {strides = array<i32>} : memref<12x1x32xf32, #tpu.memory_space<vmem>>, vector<1x1x32xf32>,
    return
  }
  func.func @transform_0(%arg0: i32, %arg1: memref<7x128xi32, #tpu.memory_space<smem>>, %arg2: memref<7x128xi32, #tpu.memory_space<smem>>, %arg3: memref<7x8xi32, #tpu.memory_space<smem>>) -> (i32, i32, i32) {
    %c0_i32 = arith.constant 0 : i32
    %c0_i32_0 = arith.constant 0 : i32
    %c0_i32_1 = arith.constant 0 : i32
    return %arg0, %c0_i32, %c0_i32_0 : i32, i32, i32
  }
  func.func @transform_1(%arg0: i32, %arg1: memref<7x128xi32, #tpu.memory_space<smem>>, %arg2: memref<7x128xi32, #tpu.memory_space<smem>>, %arg3: memref<7x8xi32, #tpu.memory_space<smem>>) -> (i32, i32, i32) {
    %c0_i32 = arith.constant 0 : i32
    %c0_i32_0 = arith.constant 0 : i32
    %c0_i32_1 = arith.constant 0 : i32
    return %arg0, %c0_i32, %c0_i32_0 : i32, i32, i32
  }
  func.func @transform_2(%arg0: i32, %arg1: memref<7x128xi32, #tpu.memory_space<smem>>, %arg2: memref<7x128xi32, #tpu.memory_space<smem>>, %arg3: memref<7x8xi32, #tpu.memory_space<smem>>) -> (i32, i32) {
    %c0_i32 = arith.constant 0 : i32
    %c0_i32_0 = arith.constant 0 : i32
    %c0_i32_1 = arith.constant 0 : i32
    return %c0_i32, %c0_i32_0 : i32, i32
  }
  func.func @transform_3(%arg0: i32, %arg1: memref<7x128xi32, #tpu.memory_space<smem>>, %arg2: memref<7x128xi32, #tpu.memory_space<smem>>, %arg3: memref<7x8xi32, #tpu.memory_space<smem>>) -> (i32, i32) {
    %c0_i32 = arith.constant 0 : i32
    %c0_i32_0 = arith.constant 0 : i32
    %c0_i32_1 = arith.constant 0 : i32
    return %c0_i32, %c0_i32_0 : i32, i32
  }
  func.func @transform_4(%arg0: i32, %arg1: memref<7x128xi32, #tpu.memory_space<smem>>, %arg2: memref<7x128xi32, #tpu.memory_space<smem>>, %arg3: memref<7x8xi32, #tpu.memory_space<smem>>) -> (i32, i32) {
    %c0_i32 = arith.constant 0 : i32
    %c0_i32_0 = arith.constant 0 : i32
    %c0_i32_1 = arith.constant 0 : i32
    return %c0_i32, %c0_i32_0 : i32, i32
  }
  func.func @transform_5(%arg0: i32, %arg1: memref<7x128xi32, #tpu.memory_space<smem>>, %arg2: memref<7x128xi32, #tpu.memory_space<smem>>, %arg3: memref<7x8xi32, #tpu.memory_space<smem>>) -> (i32, i32) {
    %c0_i32 = arith.constant 0 : i32
    %c0_i32_0 = arith.constant 0 : i32
    %c0_i32_1 = arith.constant 0 : i32
    return %c0_i32, %c0_i32_0 : i32, i32
  }
  func.func @transform_6(%arg0: i32, %arg1: memref<7x128xi32, #tpu.memory_space<smem>>, %arg2: memref<7x128xi32, #tpu.memory_space<smem>>, %arg3: memref<7x8xi32, #tpu.memory_space<smem>>) -> (i32, i32, i32) {
    %c0_i32 = arith.constant 0 : i32
    %c0_i32_0 = arith.constant 0 : i32
    %c0_i32_1 = arith.constant 0 : i32
    return %arg0, %c0_i32, %c0_i32_0 : i32, i32, i32
  }
}

</mosaic_0001>

<bundles_post_ra>
// kernel: tpu_custom_call.1
= control target key start
LH: loop header
LB: loop body
LE: loop exit
PB: predicated region body
PF: predicated region fallthrough
CT: control target
= control target key end

     0   :  { %s4082_s15 = smov [#allocation4]   ;;  %s4083_s16 = smov [#allocation5]   ;;  %s6060_s0 = inlined_call_operand.hbm [shape: s32[7,128], index: 0, kind: input, shape index: {}]   ;;  %s6061_s3 = inlined_call_operand.hbm [shape: f32[7,8,32], index: 3, kind: input, shape index: {}]   ;;  %s6062_s4 = inlined_call_operand.hbm [shape: f32[7,8,32], index: 4, kind: input, shape index: {}]   ;;  %s6063_s5 = inlined_call_operand.hbm [shape: f32[32,96], index: 5, kind: input, shape index: {}]   ;;  %s6064_s6 = inlined_call_operand.vmem [shape: f32[1,96], index: 6, kind: input, shape index: {}]   ;;  %s6065_s7 = inlined_call_operand.hbm [shape: f32[32,32], index: 7, kind: input, shape index: {}]   ;;  %s6066_s8 = inlined_call_operand.hbm [shape: f32[64,64], index: 8, kind: input, shape index: {}]   ;;  %s6067_s9 = inlined_call_operand.hbm [shape: f32[7,8,128], index: 9, kind: output, shape index: {}]   ;;  %s6068_s1 = inlined_call_operand.hbm [shape: s32[7,128], index: 1, kind: input, shape index: {}]   ;;  %s6069_s2 = inlined_call_operand.hbm [shape: s32[7,8], index: 2, kind: input, shape index: {}]  }
   0x1   :  { %6216 = sst [smem:[#allocation145_spill]] %s6061_s3  ;;  %s15_s11 = sshll.u32 %s6060_s0, 4  ;;  %s16_s11 = int_to_ptr.hbm [resolvable:$true] %s15_s11 }
   0x2   :  { %6217 = sst [smem:[#allocation146_spill]] %s6062_s4  ;;  %s20_s14 = sshll.u32 %s6068_s1, 4  ;;  %s21_s14 = int_to_ptr.hbm [resolvable:$true] %s20_s14 }
   0x3   :  { %6218 = sst [smem:[#allocation147_spill]] %s6063_s5  ;;  %s25_s19 = sshll.u32 %s6069_s2, 4  ;;  %s26_s19 = int_to_ptr.hbm [resolvable:$true] %s25_s19 }
   0x4   :  { %6219 = sst [smem:[#allocation148_spill]] %s6064_s6  ;;  %s4084_s20 = smov [#allocation6]  }
   0x5   :  { %6220 = sst [smem:[#allocation149_spill]] %s6065_s7 }
   0x6   :  { %6221 = sst [smem:[#allocation150_spill]] %s6066_s8 }
   0x7   :  { %6222 = sst [smem:[#allocation151_spill]] %s6067_s9 }
   0x8   :  { %18 = dma.hbm_to_smem %s16_s11, 128, %s4082_s15, [#allocation3] }
   0x9   :  { %23 = dma.hbm_to_smem %s21_s14, 128, %s4083_s16, [#allocation3] }
   0xa   :  { %28 = dma.hbm_to_smem %s26_s19, 128, %s4084_s20, [#allocation3] }
   0xb   :  { %4044 = dma.done.wait [#allocation3], 384 }
   0xc   :  { %4045 = vsyncadd [#allocation3], 4294966912 }
   0xd   :  { %31 = sfence }
   0xe   :  { %32 = vsyncpa [#allocation8], 0 }
   0xf   :  { %34 = vsyncpa [#allocation8 + $0x1], 0 }
  0x10   :  { %35 = vsyncpa [#allocation11], 0 }
  0x11   :  { %37 = vsyncpa [#allocation11 + $0x1], 0 }
  0x12   :  { %38 = vsyncpa [#allocation14], 0 }
  0x13   :  { %39 = vsyncpa [#allocation9], 0 }
  0x14   :  { %41 = vsyncpa [#allocation9 + $0x1], 0  ;;  %s4153_s0 = smov 0   ;;  %s4155_s1 = smov 0  }
  0x15   :  { %s4157_s21 = smov 0   ;;  %s4159_s2 = smov 0  }
  0x16 LB: > { %6223 = sst [smem:[#allocation23_spill]] %s4068_s0  ;;  %s4177_s25 = sadd.s32 4294967295, %s4080_s2   ;;  %s4080_s2 = sphi %s4159_s2, %s6694_s2   ;;  %s4076_s21 = sphi %s4157_s21, %s6697_s21   ;;  %s4072_s1 = sphi %s4155_s1, %s6696_s1   ;;  %s4068_s0 = sphi %s4153_s0, %s6695_s0  }
  0x17   : > { %6224 = sst [smem:[#allocation24_spill]] %s4072_s1  ;;  %p3358_p0 = scmp.ge.s32.totalorder %s4080_s2, 1 }
  0x18   : > { %6225 = sst [smem:[#allocation25_spill]] %s4076_s21  ;;  %p68_p1 = scmp.eq.s32.totalorder %s4177_s25, 0 }
  0x19   : > { %6226 = sst [smem:[#allocation26_spill]] %s4080_s2  ;;  %p214_p2 = scmp.lt.s32.totalorder %s4080_s2, 8 }
  0x1a   : > { %s6227_s5 = sld [smem:[#allocation147_spill]]  ;;  %s4085_s27 = smov [#allocation12]  }
  0x1b   : > { %6228 = sst [smem:[#allocation27_spill]] %s4177_s25  ;;  %p4183_p4 = pnand %p3358_p0, %p214_p2 }
  0x1c   : > { %s227_s28 = sshll.u32 %s4085_s27, 4  ;;  %s6230_s7 = sld [smem:[#allocation149_spill]]  ;;  %s228_s28 = int_to_ptr.vmem [resolvable:$true] %s227_s28 }
  0x1d   : > { %p3445_p5 = pneg %p4183_p4  ;;  %s6232_s8 = sld [smem:[#allocation150_spill]] }
  0x1e   : > { %s4086_s15 = smov [#allocation13]   ;;  %s4087_s17 = smov 128  }
  0x1f   : > { %p4194_p6 = pnand %p3445_p5, %p68_p1  ;;  %s244_s16 = sshll.u32 %s4086_s15, 4  ;;  %s245_s16 = int_to_ptr.vmem [resolvable:$true] %s244_s16 }
  0x20   : > { %s225_s24 = sshll.u32 %s6227_s5, 4  ;;  %s4088_s18 = smov 8   ;;  %s226_s24 = int_to_ptr.hbm [resolvable:$true] %s225_s24 }
  0x21   : > { %3448 = dma.hbm_to_vmem [thread:$0]  (!%p4194_p6), %s226_s24, 512, %s228_s28, [#allocation11], %s4087_s17, %s4087_s17, %s4088_s18  }
  0x22   : > { %s242_s10 = sshll.u32 %s6230_s7, 4  ;;  %s4089_s19 = smov [#allocation15]   ;;  %s243_s10 = int_to_ptr.hbm [resolvable:$true] %s242_s10 }
  0x23   : > { %s256_s14 = sshll.u32 %s6232_s8, 4  ;;  %s258_s20 = sshll.u32 %s4089_s19, 4  ;;  %s257_s14 = int_to_ptr.hbm [resolvable:$true] %s256_s14  ;;  %s259_s20 = int_to_ptr.vmem [resolvable:$true] %s258_s20 }
  0x24   : > { %3451 = dma.hbm_to_vmem [thread:$0]  (!%p4194_p6), %s243_s10, 512, %s245_s16, [#allocation14], %s4087_s17, %s4087_s17, %s4088_s18  }
  0x25   : > { %3454 = dma.hbm_to_vmem [thread:$0]  (!%p4194_p6), %s257_s14, 1024, %s259_s20, [#allocation14], %s4087_s17, %s4087_s17, %s4088_s18  }
  0x26   : > { %s3357_s22 = sadd.s32 4294967294, %s4080_s2   ;;  %s4209_s23 = sadd.s32 1, %s4080_s2  }
  0x27   : > { %6233 = sst [smem:[#allocation28_spill]] %s4209_s23  ;;  %s54_s27 = sadd.s32 1, %s4076_s21 }
  0x28   : > { %s51_s24 = ssub.s32 %s4080_s2, %s4209_s23  ;;  %p61_p7 = scmp.ne.s32.totalorder %s4076_s21, %s4072_s1 }
  0x29   : > { %p52_p8 = scmp.eq.s32.totalorder %s51_s24, 0  ;;  %p62_p9 = scmp.eq.s32.totalorder %s4080_s2, 0 }
  0x2a   : > { %p67_p10 = scmp.ne.s32.totalorder %s4072_s1, %s4068_s0  ;;  %p201_p11 = scmp.eq.s32.totalorder %s4177_s25, 6 }
  0x2b   : > { %s4221_s28 = scalar_select %p52_p8, %s4076_s21, %s54_s27  }
  0x2c   : > { %p4223_p12 = por %p62_p9, %p61_p7  ;;  %p4229_p13 = por %p68_p1, %p67_p10 }
  0x2d   : > { %6234 = sst [smem:[#allocation29_spill]] %s4221_s28  ;;  %p4233_p0 = por %p201_p11, %p61_p7 }
  0x2e   : > { %p207_p2 = scmp.eq.s32.totalorder %s3357_s22, 6  ;;  %p3469_p5 = scmp.lt.s32.totalorder %s4080_s2, 7 }
  0x2f   : > { %s6237_s10 = scalar_select %p4233_p0, 1, 0 }
  0x30   : > { %s272_s11 = sand.u32 1, %s4076_s21   ;;  %p4239_p6 = por %p207_p2, %p67_p10 }
  0x31   : > { %6238 = sst [smem:[#allocation30_spill]] %s6237_s10  ;;  %s3363_s13 = sshll.u32 %s272_s11, 3 }
  0x32   : > { %s6239_s12 = scalar_select %p4239_p6, 1, 0 }
  0x33   : > { %s3364_s14 = sshll.u32 %s4080_s2, 3  ;;  %s6241_s3 = sld [smem:[#allocation145_spill]] }
  0x34   : > { %6240 = sst [smem:[#allocation31_spill]] %s6239_s12  ;;  %s276_s19 = scalar_lea.vmem [#allocation7], %s3363_s13 }
  0x35   : > { %s284_s20 = sshll.u32 %s276_s19, 4  ;;  %p4249_p7 = pnand %p3469_p5, %p4223_p12  ;;  %s285_s20 = int_to_ptr.vmem [resolvable:$true] %s284_s20 }
  0x36   : > { %s6243_s4 = sld [smem:[#allocation146_spill]]  ;;  %s291_s7 = sand.u32 1, %s4080_s2  }
  0x37   : > { %s273_s8 = scalar_lea.sflag [#allocation8], %s272_s11  ;;  %p3944_p9 = pneg %p4249_p7 }
  0x39   : > { %s280_s17 = scalar_lea.hbm %s6241_s3, %s3364_s14  ;;  %s3947_s19 = scalar_lea.hbm %s6241_s3, 56 }
  0x3a   : > { %s282_s18 = sshll.u32 %s280_s17, 4  ;;  %s283_s18 = int_to_ptr.hbm [resolvable:$true] %s282_s18 }
  0x3b   : > { %s3940_s15 = sshra.s32 %s283_s18, 4  ;;  %s3941_s15 = int_to_ptr.hbm [resolvable:$true] %s3940_s15 }
  0x3c   : > { %s299_s5 = scalar_lea.hbm %s6243_s4, %s3364_s14  ;;  %s3942_s16 = scalar_lea.hbm %s3941_s15, 8 }
  0x3d   : > { %p3943_p8 = scmp.ne.s32.totalorder %s3941_s15, %s3942_s16  ;;  %p3948_p12 = scmp.lt.s32.totalorder %s3941_s15, %s6241_s3 }
  0x3e   : > { %p3949_p2 = scmp.lt.s32.totalorder %s3947_s19, %s3942_s16 }
  0x3f   : > { %p3945_p10 = pnand %p3944_p9, %p3943_p8 }
  0x40   : > { %p3950_p5 = por %p3949_p2, %p3948_p12 }
  0x41   : > { %p3946_p11 = pneg %p3945_p10 }
  0x43   : > { %p3951_p3 = pnand %p3950_p5, %p3946_p11 }
  0x45   : > { %3954 = shalt.err (!%p3951_p3)
}
  0x46   : > { %3458 = dma.hbm_to_vmem [thread:$0]  (!%p4249_p7), %s283_s18, 128, %s285_s20, %s273_s8  }
  0x47   : > { %s301_s11 = sshll.u32 %s299_s5, 4  ;;  %s295_s14 = scalar_lea.vmem [#allocation10], %s3363_s13  ;;  %s302_s11 = int_to_ptr.hbm [resolvable:$true] %s301_s11 }
  0x48   : > { %s303_s28 = sshll.u32 %s295_s14, 4  ;;  %s292_s21 = scalar_lea.sflag [#allocation11], %s291_s7  ;;  %s304_s28 = int_to_ptr.vmem [resolvable:$true] %s303_s28 }
  0x49   : > { %s3970_s29 = sshra.s32 %s302_s11, 4  ;;  %s3977_s19 = scalar_lea.hbm %s6243_s4, 56  ;;  %s3971_s29 = int_to_ptr.hbm [resolvable:$true] %s3970_s29 }
  0x4a   : > { %s3972_s17 = scalar_lea.hbm %s3971_s29, 8  ;;  %p3978_p3 = scmp.lt.s32.totalorder %s3971_s29, %s6243_s4 }
  0x4b   : > { %p3973_p8 = scmp.ne.s32.totalorder %s3971_s29, %s3972_s17  ;;  %p3979_p11 = scmp.lt.s32.totalorder %s3977_s19, %s3972_s17 }
  0x4d   : > { %p3975_p10 = pnand %p3973_p8, %p3944_p9  ;;  %p3980_p2 = por %p3979_p11, %p3978_p3 }
  0x4f   : > { %p3976_p12 = pneg %p3975_p10 }
  0x51   : > { %p3981_p5 = pnand %p3980_p2, %p3976_p12 }
  0x53   : > { %3984 = shalt.err (!%p3981_p5)
}
  0x54   : > { %3461 = dma.hbm_to_vmem [thread:$0]  (!%p4249_p7), %s302_s11, 128, %s304_s28, %s292_s21  }
  0x55   : > { %312 = sbr.rel (%p4183_p4) target bundleno = 1122 (0x462), region = 44 }
  0x5a   : > { %s4284_s5 = sand.u32 1, %s4072_s1  }
  0x5b   : > { %6244 = sst [smem:[#allocation32_spill]] %s4284_s5  ;;  %s4287_s7 = sshll.u32 %s4284_s5, 3 }
  0x5c   : > { %6245 = sst [smem:[#allocation33_spill]] %s4287_s7  ;;  %s315_s13 = scalar_lea.sflag [#allocation8], %s4284_s5 }
  0x5d   : > { %s6071_s18 = scalar_lea.vmem [#allocation7], %s4287_s7 }
  0x5e   : > { %4047 = dma.done.wait (%p4229_p13), %s315_s13, 128  }
  0x5f   : > { %4049 = vsyncadd (%p4229_p13), %s315_s13, 4294967168  ;;  %s324_s21 = sand.u32 1, %s4177_s25  }
  0x60   : > { %s325_s26 = scalar_lea.sflag [#allocation11], %s324_s21 }
  0x61   : > { %4051 = dma.done.wait (%p4229_p13), %s325_s26, 128  }
  0x62   : > { %4053 = vsyncadd (%p4229_p13), %s325_s26, 4294967168 }
  0x63   : > { %4055 = dma.done.wait (%p68_p1), [#allocation11], 512  }
  0x64   : > { %4057 = vsyncadd (%p68_p1), [#allocation11], 4294966784 }
  0x65   : > { %4059 = dma.done.wait (%p68_p1), [#allocation14], 1536  }
  0x66   : > { %4061 = vsyncadd (%p68_p1), [#allocation14], 4294965760  ;;  %p6246_p4 = scmp.ne.s32.totalorder %s4177_s25, 0 }
  0x68   : > { %381 = sbr.rel (%p6246_p4) target bundleno = 122 (0x7a), region = 68 }
  0x6d   : > { %vm382_vm0 = vcmask 253952   ;;  %v4090_v0 = vmov 0.0  }
  0x6e   : > { %383 = vst.msk [vmem:[#allocation2] sm:$0x1] %vm382_vm0, %v4090_v0 }
  0x6f   : > { %384 = vst.msk [vmem:[#allocation2 + $0x1] sm:$0x1] %vm382_vm0, %v4090_v0 }
  0x70   : > { %385 = vst.msk [vmem:[#allocation2 + $0x2] sm:$0x1] %vm382_vm0, %v4090_v0 }
  0x71   : > { %386 = vst.msk [vmem:[#allocation2 + $0x3] sm:$0x1] %vm382_vm0, %v4090_v0 }
  0x72   : > { %387 = vst.msk [vmem:[#allocation2 + $0x4] sm:$0x1] %vm382_vm0, %v4090_v0 }
  0x73   : > { %388 = vst.msk [vmem:[#allocation2 + $0x5] sm:$0x1] %vm382_vm0, %v4090_v0 }
  0x74   : > { %389 = vst.msk [vmem:[#allocation2 + $0x6] sm:$0x1] %vm382_vm0, %v4090_v0 }
  0x75   : > { %390 = vst.msk [vmem:[#allocation2 + $0x7] sm:$0x1] %vm382_vm0, %v4090_v0 }
  0x76   : > { %391 = vst.msk [vmem:[#allocation2 + $0x8] sm:$0x1] %vm382_vm0, %v4090_v0 }
  0x77   : > { %392 = vst.msk [vmem:[#allocation2 + $0x9] sm:$0x1] %vm382_vm0, %v4090_v0 }
  0x78   : > { %393 = vst.msk [vmem:[#allocation2 + $0xa] sm:$0x1] %vm382_vm0, %v4090_v0 }
  0x79   : > { %394 = vst.msk [vmem:[#allocation2 + $0xb] sm:$0x1] %vm382_vm0, %v4090_v0 }
  0x7a PF: > { %v399_v1 = vld [vmem:[#allocation12 + $0x18] sm:$0xff]  ;;  %v398_v2 = vld [vmem:[#allocation12 + $0x10] sm:$0xff]  ;;  %s4313_s30 = sshll.u32 %s4177_s25, 7  ;;  %v397_v4 = vld [vmem:[#allocation12 + $0x8] sm:$0xff]  ;;  %vm404_vm1 = vcmask 261120   ;;  %vm505_vm2 = vcmask 1040384  }
  0x7b   : > { %420 = vmatpush.msra.mxu2 %v399_v1  ;;  %v2230_v3 = vld [vmem:[#allocation13 + $0x18] sm:$0xff]  ;;  %s4316_s22 = sld [smem:[#allocation4 + %s4313_s30]]  ;;  %s432_s24 = sadd.s32 16, %s4313_s30  ;;  %v2229_v5 = vld [vmem:[#allocation13 + $0x10] sm:$0xff]  ;;  %v2228_v6 = vld [vmem:[#allocation13 + $0x8] sm:$0xff]  ;;  %vm507_vm3 = vcmask 1041408  }
  0x7c   : > { %2291 = vmatpush.msra.mxu0 %v2230_v3  ;;  %3415 = vmatpush.msra.mxu1 %v2230_v3  ;;  %s4321_s11 = sld [smem:[#allocation4 + %s432_s24]]  ;;  %s436_s14 = sadd.s32 32, %s4313_s30  ;;  %v396_v7 = vld [vmem:[#allocation12] sm:$0xff]  ;;  %vm509_vm4 = vcmask 1042432   ;;  %vm511_vm5 = vcmask 1043456   ;;  %vm6200_vm6 = vcmask 1044480  }
  0x7d   : > { %421 = vmatpush.msra.mxu2 %v398_v2  ;;  %3417 = vmatpush.msra.mxu3 %v2230_v3  ;;  %s4326_s29 = sld [smem:[#allocation4 + %s436_s14]]  ;;  %s440_s17 = sadd.s32 48, %s4313_s30  ;;  %v395_v8 = vld [vmem:[%s6071_s18] sm:$0xff]  ;;  %vm6199_vm7 = vcmask 1045504   ;;  %vm6198_vm8 = vcmask 1046528  }
  0x7e   : > { %2292 = vmatpush.msra.mxu0 %v2229_v5  ;;  %3418 = vmatpush.msra.mxu1 %v2229_v5  ;;  %s4331_s15 = sld [smem:[#allocation4 + %s440_s17]]  ;;  %s444_s16 = sadd.s32 64, %s4313_s30  ;;  %v2227_v9 = vld [vmem:[#allocation13] sm:$0xff] }
  0x7f   : > { %422 = vmatpush.msra.mxu2 %v397_v4  ;;  %3420 = vmatpush.msra.mxu3 %v2229_v5  ;;  %s4338_s19 = sld [smem:[#allocation4 + %s444_s16]]  ;;  %s448_s27 = sadd.s32 80, %s4313_s30 }
  0x80   : > { %2293 = vmatpush.msra.mxu0 %v2228_v6  ;;  %3421 = vmatpush.msra.mxu1 %v2228_v6  ;;  %s4343_s8 = sld [smem:[#allocation4 + %s448_s27]]  ;;  %s6072_s13 = sadd.s32 96, %s4313_s30 }
  0x81   : > { %423 = vmatpush.msra.mxu2 %v396_v7  ;;  %3423 = vmatpush.msra.mxu3 %v2228_v6  ;;  %s4348_s21 = sld [smem:[#allocation4 + %s6072_s13]]  ;;  %s430_s26 = scalar_lea.vmem [#allocation2], %s4316_s22 }
  0x82   : > { %3375 = vmatmul.msk.f32.vlgmr.msra.gmra.mxu2 %vm404_vm1, %v395_v8  ;;  %2294 = vmatpush.msra.mxu0 %v2227_v9  ;;  %v431_v10 = vld [vmem:[%s430_s26] sm:$0x1]  ;;  %s456_s20 = sadd.s32 112, %s4313_s30  ;;  %s434_s28 = scalar_lea.vmem [#allocation2], %s4321_s11 }
  0x83   : > { %3416 = vmatpush.msrb.mxu2 %v2230_v3  ;;  %3424 = vmatpush.msra.mxu1 %v2227_v9  ;;  %s4356_s18 = sld [smem:[#allocation4 + %s456_s20]]  ;;  %v3518_v11 = vld [vmem:[%s434_s28] ss:$0 sm:$0xff]  ;;  %s438_s13 = scalar_lea.vmem [#allocation2], %s4326_s29 }
  0x84   : > { %3426 = vmatpush.msra.mxu3 %v2227_v9  ;;  %v3519_v12 = vld [vmem:[%s438_s13] ss:$0 sm:$0xff]  ;;  %s442_s22 = scalar_lea.vmem [#allocation2], %s4331_s15  ;;  %s4362_s26 = sld [smem:[#allocation5 + %s432_s24]]  ;;  %v506_v14 = vsel %vm505_vm2, %v431_v10, %v3518_v11 }
  0x85   : > { %3419 = vmatpush.msrb.mxu2 %v2229_v5  ;;  %v3520_v13 = vld [vmem:[%s442_s22] ss:$0 sm:$0xff]  ;;  %s446_s11 = scalar_lea.vmem [#allocation2], %s4338_s19  ;;  %s4368_s28 = sld [smem:[#allocation5 + %s436_s14]]  ;;  %v508_v16 = vsel %vm507_vm3, %v506_v14, %v3519_v12 }
  0x86   : > { %v3521_v15 = vld [vmem:[%s446_s11] ss:$0 sm:$0xff]  ;;  %s450_s29 = scalar_lea.vmem [#allocation2], %s4343_s8  ;;  %s4374_s15 = sld [smem:[#allocation5 + %s440_s17]]  ;;  %v510_v18 = vsel %vm509_vm4, %v508_v16, %v3520_v13 }
  0x87   : > { %3422 = vmatpush.msrb.mxu2 %v2228_v6  ;;  %v3522_v17 = vld [vmem:[%s450_s29] ss:$0 sm:$0xff]  ;;  %s454_s24 = scalar_lea.vmem [#allocation2], %s4348_s21  ;;  %s4380_s19 = sld [smem:[#allocation5 + %s444_s16]]  ;;  %v512_v20 = vsel %vm511_vm5, %v510_v18, %v3521_v15 }
  0x88   : > { %v3523_v19 = vld [vmem:[%s454_s24] ss:$0 sm:$0xff]  ;;  %s4384_s14 = sadd.s32 4, %s4313_s30  ;;  %s4388_s17 = sld [smem:[#allocation5 + %s448_s27]]  ;;  %v514_v21 = vsel %vm6200_vm6, %v512_v20, %v3522_v17 }
  0x89   : > { %6250 = sst [smem:[#allocation37_spill]] %s4384_s14  ;;  %3425 = vmatpush.msrb.mxu2 %v2227_v9  ;;  %s458_s16 = scalar_lea.vmem [#allocation2], %s4356_s18  ;;  %v516_v23 = vsel %vm6199_vm7, %v514_v21, %v3523_v19 }
  0x8a   : > { %s6252_s8 = sadd.s32 96, %s4313_s30  ;;  %v3524_v22 = vld [vmem:[%s458_s16] ss:$0 sm:$0xff]  ;;  %s4399_s21 = sld [smem:[#allocation5 + %s456_s20]] }
  0x8b   : > { %6247 = sst [smem:[#allocation34_spill]] %s4368_s28  ;;  %v4403_v24 = vsel %vm6198_vm8, %v516_v23, %v3524_v22  ;;  %s887_s11 = sadd.s32 20, %s4313_s30 }
  0x8c   : > { %6248 = sst [smem:[#allocation35_spill]] %s4374_s15  ;;  %3377 = vmatmul.msk.f32.vlgmr.msra.gmra.mxu0 %vm404_vm1, %v4403_v24  ;;  %s895_s4 = sadd.s32 52, %s4313_s30 }
  0x8d   : > { %6249 = sst [smem:[#allocation36_spill]] %s4380_s19  ;;  %s899_s12 = sadd.s32 68, %s4313_s30 }
  0x8e   : > { %6251 = sst [smem:[#allocation38_spill]] %s4388_s17  ;;  %s903_s0 = sadd.s32 84, %s4313_s30 }
  0x8f   : > { %s4394_s13 = sld [smem:[#allocation5 + %s6252_s8]]  ;;  %s891_s8 = sadd.s32 36, %s4313_s30 }
  0x90   : > { %6254 = sst [smem:[#allocation40_spill]] %s4399_s21  ;;  %s907_s9 = sadd.s32 100, %s4313_s30 }
  0x91   : > { %s884_s22 = sld [smem:[#allocation4 + %s4384_s14]]  ;;  %s911_s16 = sadd.s32 116, %s4313_s30 }
  0x92   : > { %s888_s24 = sld [smem:[#allocation4 + %s887_s11]]  ;;  %s1459_s21 = sadd.s32 73, %s4313_s30 }
  0x93   : > { %s892_s3 = sld [smem:[#allocation4 + %s891_s8]]  ;;  %s1471_s17 = sadd.s32 121, %s4313_s30 }
  0x94   : > { %s896_s23 = sld [smem:[#allocation4 + %s895_s4]] }
  0x95   : > { %6253 = sst [smem:[#allocation39_spill]] %s4394_s13 }
  0x96   : > { %s900_s18 = sld [smem:[#allocation4 + %s899_s12]] }
  0x97   : > { %s885_s2 = scalar_lea.vmem [#allocation2], %s884_s22  ;;  %s904_s5 = sld [smem:[#allocation4 + %s903_s0]] }
  0x98   : > { %v886_v25 = vld [vmem:[%s885_s2] sm:$0x1]  ;;  %s889_s10 = scalar_lea.vmem [#allocation2], %s888_s24  ;;  %s908_s29 = sld [smem:[#allocation4 + %s907_s9]] }
  0x99   : > { %v3532_v26 = vld [vmem:[%s889_s10] ss:$0 sm:$0xff]  ;;  %s893_s25 = scalar_lea.vmem [#allocation2], %s892_s3  ;;  %s912_s20 = sld [smem:[#allocation4 + %s911_s16]] }
  0x9a   : > { %v3533_v27 = vld [vmem:[%s893_s25] ss:$0 sm:$0xff]  ;;  %v960_v28 = vsel %vm505_vm2, %v886_v25, %v3532_v26  ;;  %s897_s27 = scalar_lea.vmem [#allocation2], %s896_s23  ;;  %s4422_s1 = sld [smem:[#allocation5 + %s887_s11]] }
  0x9b   : > { %v3534_v29 = vld [vmem:[%s897_s27] ss:$0 sm:$0xff]  ;;  %v961_v30 = vsel %vm507_vm3, %v960_v28, %v3533_v27  ;;  %s4425_s2 = sld [smem:[#allocation5 + %s891_s8]] }
  0x9c   : > { %s901_s22 = scalar_lea.vmem [#allocation2], %s900_s18  ;;  %s4427_s24 = sld [smem:[#allocation5 + %s895_s4]]  ;;  %v962_v32 = vsel %vm509_vm4, %v961_v30, %v3534_v29 }
  0x9d   : > { %v3535_v31 = vld [vmem:[%s901_s22] ss:$0 sm:$0xff]  ;;  %s905_s3 = scalar_lea.vmem [#allocation2], %s904_s5  ;;  %s4430_s25 = sld [smem:[#allocation5 + %s899_s12]] }
  0x9e   : > { %v3536_v33 = vld [vmem:[%s905_s3] ss:$0 sm:$0xff]  ;;  %s909_s23 = scalar_lea.vmem [#allocation2], %s908_s29  ;;  %s4432_s10 = sld [smem:[#allocation5 + %s903_s0]]  ;;  %v963_v35 = vsel %vm511_vm5, %v962_v32, %v3535_v31 }
  0x9f   : > { %v3537_v34 = vld [vmem:[%s909_s23] ss:$0 sm:$0xff]  ;;  %s6087_s4 = sadd.s32 9, %s4313_s30  ;;  %s4436_s27 = sld [smem:[#allocation5 + %s907_s9]]  ;;  %v964_v36 = vsel %vm6200_vm6, %v963_v35, %v3536_v33 }
  0xa0   : > { %6255 = sst [smem:[#allocation41_spill]] %s4422_s1  ;;  %s913_s12 = scalar_lea.vmem [#allocation2], %s912_s20  ;;  %v965_v38 = vsel %vm6199_vm7, %v964_v36, %v3537_v34 }
  0xa1   : > { %6256 = sst [smem:[#allocation42_spill]] %s4425_s2  ;;  %v3538_v37 = vld [vmem:[%s913_s12] ss:$0 sm:$0xff]  ;;  %s1447_s29 = sadd.s32 25, %s4313_s30 }
  0xa2   : > { %6257 = sst [smem:[#allocation43_spill]] %s4427_s24  ;;  %v4445_v39 = vsel %vm6198_vm8, %v965_v38, %v3538_v37  ;;  %s1451_s22 = sadd.s32 41, %s4313_s30 }
  0xa3   : > { %6258 = sst [smem:[#allocation44_spill]] %s4430_s25  ;;  %3381 = vmatmul.msk.f32.vlgmr.msra.gmra.mxu1 %vm404_vm1, %v4445_v39  ;;  %s1455_s18 = sadd.s32 57, %s4313_s30 }
  0xa4   : > { %6259 = sst [smem:[#allocation45_spill]] %s4432_s10  ;;  %s1463_s2 = sadd.s32 89, %s4313_s30 }
  0xa5   : > { %6260 = sst [smem:[#allocation46_spill]] %s4436_s27  ;;  %s1467_s1 = sadd.s32 105, %s4313_s30 }
  0xa6   : > { %s4439_s5 = sld [smem:[#allocation5 + %s911_s16]]  ;;  %s1691_s27 = sadd.s32 107, %s4313_s30 }
  0xa7   : > { %s1444_s9 = sld [smem:[#allocation4 + %s6087_s4]] }
  0xa8   : > { %s1448_s8 = sld [smem:[#allocation4 + %s1447_s29]] }
  0xa9   : > { %s1452_s23 = sld [smem:[#allocation4 + %s1451_s22]] }
  0xaa   : > { %s1456_s0 = sld [smem:[#allocation4 + %s1455_s18]] }
  0xab   : > { %s1460_s4 = sld [smem:[#allocation4 + %s1459_s21]] }
  0xac   : > { %6261 = sst [smem:[#allocation47_spill]] %s4439_s5 }
  0xad   : > { %s1445_s13 = scalar_lea.vmem [#allocation2], %s1444_s9  ;;  %s1464_s24 = sld [smem:[#allocation4 + %s1463_s2]] }
  0xae   : > { %v1446_v40 = vld [vmem:[%s1445_s13] sm:$0x1]  ;;  %s1449_s11 = scalar_lea.vmem [#allocation2], %s1448_s8  ;;  %s1468_s16 = sld [smem:[#allocation4 + %s1467_s1]] }
  0xaf   : > { %v3546_v41 = vld [vmem:[%s1449_s11] ss:$0 sm:$0xff]  ;;  %s1453_s25 = scalar_lea.vmem [#allocation2], %s1452_s23  ;;  %s1472_s3 = sld [smem:[#allocation4 + %s1471_s17]] }
  0xb0   : > { %v3547_v42 = vld [vmem:[%s1453_s25] ss:$0 sm:$0xff]  ;;  %v1520_v43 = vsel %vm505_vm2, %v1446_v40, %v3546_v41  ;;  %s1457_s20 = scalar_lea.vmem [#allocation2], %s1456_s0  ;;  %s4464_s12 = sld [smem:[#allocation5 + %s1447_s29]] }
  0xb1   : > { %v3548_v44 = vld [vmem:[%s1457_s20] ss:$0 sm:$0xff]  ;;  %v1521_v45 = vsel %vm507_vm3, %v1520_v43, %v3547_v42  ;;  %s4467_s13 = sld [smem:[#allocation5 + %s1451_s22]]  ;;  %s1461_s9 = scalar_lea.vmem [#allocation2], %s1460_s4 }
  0xb2   : > { %s4469_s8 = sld [smem:[#allocation5 + %s1455_s18]]  ;;  %v3549_v46 = vld [vmem:[%s1461_s9] ss:$0 sm:$0xff]  ;;  %v1522_v47 = vsel %vm509_vm4, %v1521_v45, %v3548_v44  ;;  %s6092_s4 = sadd.s32 11, %s4313_s30 }
  0xb3   : > { %s1465_s25 = scalar_lea.vmem [#allocation2], %s1464_s24  ;;  %s4472_s11 = sld [smem:[#allocation5 + %s1459_s21]]  ;;  %v1523_v50 = vsel %vm511_vm5, %v1522_v47, %v3549_v46 }
  0xb4   : > { %v3550_v48 = vld [vmem:[%s1465_s25] ss:$0 sm:$0xff]  ;;  %s1469_s0 = scalar_lea.vmem [#allocation2], %s1468_s16  ;;  %s4474_s29 = sld [smem:[#allocation5 + %s1463_s2]] }
  0xb5   : > { %v3551_v49 = vld [vmem:[%s1469_s0] ss:$0 sm:$0xff]  ;;  %s4478_s18 = sld [smem:[#allocation5 + %s1467_s1]]  ;;  %v1524_v51 = vsel %vm6200_vm6, %v1523_v50, %v3550_v48  ;;  %s1473_s24 = scalar_lea.vmem [#allocation2], %s1472_s3 }
  0xb6   : > { %6262 = sst [smem:[#allocation48_spill]] %s4464_s12  ;;  %v3552_v52 = vld [vmem:[%s1473_s24] ss:$0 sm:$0xff]  ;;  %v1525_v53 = vsel %vm6199_vm7, %v1524_v51, %v3551_v49  ;;  %s1671_s1 = sadd.s32 27, %s4313_s30 }
  0xb7   : > { %6263 = sst [smem:[#allocation49_spill]] %s4467_s13  ;;  %v4489_v54 = vsel %vm6198_vm8, %v1525_v53, %v3552_v52  ;;  %s1675_s23 = sadd.s32 43, %s4313_s30 }
  0xb8   : > { %6264 = sst [smem:[#allocation50_spill]] %s4469_s8  ;;  %3386 = vmatmul.msk.f32.vlgmr.msrb.gmra.mxu2 %vm404_vm1, %v4489_v54  ;;  %s1679_s24 = sadd.s32 59, %s4313_s30 }
  0xb9   : > { %6265 = sst [smem:[#allocation51_spill]] %s4472_s11  ;;  %s1683_s20 = sadd.s32 75, %s4313_s30 }
  0xba   : > { %6266 = sst [smem:[#allocation52_spill]] %s4474_s29  ;;  %s1687_s13 = sadd.s32 91, %s4313_s30 }
  0xbb   : > { %6267 = sst [smem:[#allocation53_spill]] %s4478_s18  ;;  %s1695_s3 = sadd.s32 123, %s4313_s30 }
  0xbc   : > { %s4481_s21 = sld [smem:[#allocation5 + %s1471_s17]] }
  0xbd   : > { %s1668_s16 = sld [smem:[#allocation4 + %s6092_s4]] }
  0xbe   : > { %s1672_s17 = sld [smem:[#allocation4 + %s1671_s1]] }
  0xbf   : > { %s1676_s25 = sld [smem:[#allocation4 + %s1675_s23]] }
  0xc0   : > { %s1680_s4 = sld [smem:[#allocation4 + %s1679_s24]] }
  0xc1   : > { %s1684_s5 = sld [smem:[#allocation4 + %s1683_s20]] }
  0xc2   : > { %6268 = sst [smem:[#allocation54_spill]] %s4481_s21  ;;  %s1575_s21 = sadd.s32 90, %s4313_s30 }
  0xc3   : > { %s1669_s12 = scalar_lea.vmem [#allocation2], %s1668_s16  ;;  %s1688_s8 = sld [smem:[#allocation4 + %s1687_s13]] }
  0xc4   : > { %v1670_v55 = vld [vmem:[%s1669_s12] sm:$0x1]  ;;  %s1673_s22 = scalar_lea.vmem [#allocation2], %s1672_s17  ;;  %s1692_s10 = sld [smem:[#allocation4 + %s1691_s27]] }
  0xc5   : > { %v3560_v56 = vld [vmem:[%s1673_s22] ss:$0 sm:$0xff]  ;;  %s1677_s19 = scalar_lea.vmem [#allocation2], %s1676_s25  ;;  %s1696_s9 = sld [smem:[#allocation4 + %s1695_s3]] }
  0xc6   : > { %v3561_v57 = vld [vmem:[%s1677_s19] ss:$0 sm:$0xff]  ;;  %v1744_v58 = vsel %vm505_vm2, %v1670_v55, %v3560_v56  ;;  %s1681_s0 = scalar_lea.vmem [#allocation2], %s1680_s4  ;;  %s4506_s2 = sld [smem:[#allocation5 + %s1671_s1]] }
  0xc7   : > { %v3562_v59 = vld [vmem:[%s1681_s0] ss:$0 sm:$0xff]  ;;  %v1745_v60 = vsel %vm507_vm3, %v1744_v58, %v3561_v57  ;;  %s4509_s12 = sld [smem:[#allocation5 + %s1675_s23]]  ;;  %s1685_s16 = scalar_lea.vmem [#allocation2], %s1684_s5 }
  0xc8   : > { %s4511_s17 = sld [smem:[#allocation5 + %s1679_s24]]  ;;  %v3563_v61 = vld [vmem:[%s1685_s16] ss:$0 sm:$0xff]  ;;  %v1746_v62 = vsel %vm509_vm4, %v1745_v60, %v3562_v59  ;;  %s6100_s5 = sadd.s32 10, %s4313_s30 }
  0xc9   : > { %s1689_s19 = scalar_lea.vmem [#allocation2], %s1688_s8  ;;  %s4514_s22 = sld [smem:[#allocation5 + %s1683_s20]]  ;;  %v1747_v1 = vsel %vm511_vm5, %v1746_v62, %v3563_v61 }
  0xca   : > { %v3564_v63 = vld [vmem:[%s1689_s19] ss:$0 sm:$0xff]  ;;  %s1693_s4 = scalar_lea.vmem [#allocation2], %s1692_s10  ;;  %s4516_s1 = sld [smem:[#allocation5 + %s1687_s13]] }
  0xcb   : > { %v3565_v0 = vld [vmem:[%s1693_s4] ss:$0 sm:$0xff]  ;;  %s4520_s23 = sld [smem:[#allocation5 + %s1691_s27]]  ;;  %v1748_v2 = vsel %vm6200_vm6, %v1747_v1, %v3564_v63  ;;  %s1697_s8 = scalar_lea.vmem [#allocation2], %s1696_s9 }
  0xcc   : > { %6269 = sst [smem:[#allocation55_spill]] %s4506_s2  ;;  %v3566_v3 = vld [vmem:[%s1697_s8] ss:$0 sm:$0xff]  ;;  %v1749_v4 = vsel %vm6199_vm7, %v1748_v2, %v3565_v0  ;;  %s1559_s27 = sadd.s32 26, %s4313_s30 }
  0xcd   : > { %6270 = sst [smem:[#allocation56_spill]] %s4509_s12  ;;  %v4531_v5 = vsel %vm6198_vm8, %v1749_v4, %v3566_v3  ;;  %s1563_s24 = sadd.s32 42, %s4313_s30 }
  0xce   : > { %6271 = sst [smem:[#allocation57_spill]] %s4511_s17  ;;  %3388 = vmatmul.msk.f32.vlgmr.msra.gmra.mxu3 %vm404_vm1, %v4531_v5  ;;  %s1567_s8 = sadd.s32 58, %s4313_s30 }
  0xcf   : > { %6272 = sst [smem:[#allocation58_spill]] %s4514_s22  ;;  %s1571_s25 = sadd.s32 74, %s4313_s30 }
  0xd0   : > { %6273 = sst [smem:[#allocation59_spill]] %s4516_s1  ;;  %s1579_s17 = sadd.s32 106, %s4313_s30 }
  0xd1   : > { %6274 = sst [smem:[#allocation60_spill]] %s4520_s23  ;;  %s1583_s9 = sadd.s32 122, %s4313_s30 }
  0xd2   : > { %s4523_s20 = sld [smem:[#allocation5 + %s1695_s3]] }
  0xd3   : > { %s1556_s13 = sld [smem:[#allocation4 + %s6100_s5]] }
  0xd4   : > { %s1560_s3 = sld [smem:[#allocation4 + %s1559_s27]] }
  0xd5   : > { %s1564_s19 = sld [smem:[#allocation4 + %s1563_s24]] }
  0xd6   : > { %s1568_s5 = sld [smem:[#allocation4 + %s1567_s8]] }
  0xd7   : > { %s1572_s29 = sld [smem:[#allocation4 + %s1571_s25]] }
  0xd8   : > { %6275 = sst [smem:[#allocation61_spill]] %s4523_s20  ;;  %s1799_s20 = sadd.s32 92, %s4313_s30 }
  0xd9   : > { %s1557_s18 = scalar_lea.vmem [#allocation2], %s1556_s13  ;;  %s1576_s11 = sld [smem:[#allocation4 + %s1575_s21]] }
  0xda   : > { %v1558_v6 = vld [vmem:[%s1557_s18] sm:$0x1]  ;;  %s1561_s0 = scalar_lea.vmem [#allocation2], %s1560_s3  ;;  %s1580_s12 = sld [smem:[#allocation4 + %s1579_s17]] }
  0xdb   : > { %v3574_v7 = vld [vmem:[%s1561_s0] ss:$0 sm:$0xff]  ;;  %s1565_s2 = scalar_lea.vmem [#allocation2], %s1564_s19  ;;  %s1584_s16 = sld [smem:[#allocation4 + %s1583_s9]] }
  0xdc   : > { %v3575_v8 = vld [vmem:[%s1565_s2] ss:$0 sm:$0xff]  ;;  %v1632_v9 = vsel %vm505_vm2, %v1558_v6, %v3574_v7  ;;  %s1569_s4 = scalar_lea.vmem [#allocation2], %s1568_s5  ;;  %s4548_s10 = sld [smem:[#allocation5 + %s1559_s27]] }
  0xdd   : > { %v3576_v10 = vld [vmem:[%s1569_s4] ss:$0 sm:$0xff]  ;;  %v1633_v11 = vsel %vm507_vm3, %v1632_v9, %v3575_v8  ;;  %s4551_s18 = sld [smem:[#allocation5 + %s1563_s24]]  ;;  %s1573_s13 = scalar_lea.vmem [#allocation2], %s1572_s29 }
  0xde   : > { %s4553_s3 = sld [smem:[#allocation5 + %s1567_s8]]  ;;  %v3577_v12 = vld [vmem:[%s1573_s13] ss:$0 sm:$0xff]  ;;  %v1634_v13 = vsel %vm509_vm4, %v1633_v11, %v3576_v10  ;;  %s6108_s29 = sadd.s32 12, %s4313_s30 }
  0xdf   : > { %s1577_s2 = scalar_lea.vmem [#allocation2], %s1576_s11  ;;  %s4556_s0 = sld [smem:[#allocation5 + %s1571_s25]]  ;;  %v1635_v16 = vsel %vm511_vm5, %v1634_v13, %v3577_v12 }
  0xe0   : > { %v3578_v14 = vld [vmem:[%s1577_s2] ss:$0 sm:$0xff]  ;;  %s1581_s5 = scalar_lea.vmem [#allocation2], %s1580_s12  ;;  %s4558_s27 = sld [smem:[#allocation5 + %s1575_s21]] }
  0xe1   : > { %v3579_v15 = vld [vmem:[%s1581_s5] ss:$0 sm:$0xff]  ;;  %s4562_s24 = sld [smem:[#allocation5 + %s1579_s17]]  ;;  %v1636_v17 = vsel %vm6200_vm6, %v1635_v16, %v3578_v14  ;;  %s1585_s11 = scalar_lea.vmem [#allocation2], %s1584_s16 }
  0xe2   : > { %6276 = sst [smem:[#allocation62_spill]] %s4548_s10  ;;  %v3580_v18 = vld [vmem:[%s1585_s11] ss:$0 sm:$0xff]  ;;  %v1637_v19 = vsel %vm6199_vm7, %v1636_v17, %v3579_v15  ;;  %s1783_s17 = sadd.s32 28, %s4313_s30 }
  0xe3   : > { %6277 = sst [smem:[#allocation63_spill]] %s4551_s18  ;;  %v4573_v20 = vsel %vm6198_vm8, %v1637_v19, %v3580_v18  ;;  %s1787_s8 = sadd.s32 44, %s4313_s30 }
  0xe4   : > { %6278 = sst [smem:[#allocation64_spill]] %s4553_s3  ;;  %3387 = vmatmul.msk.f32.gmra.mxu2 %vm404_vm1, %v4573_v20  ;;  %s1791_s11 = sadd.s32 60, %s4313_s30 }
  0xe5   : > { %6279 = sst [smem:[#allocation65_spill]] %s4556_s0  ;;  %s1795_s19 = sadd.s32 76, %s4313_s30 }
  0xe6   : > { %6280 = sst [smem:[#allocation66_spill]] %s4558_s27  ;;  %s1803_s18 = sadd.s32 108, %s4313_s30 }
  0xe7   : > { %6281 = sst [smem:[#allocation67_spill]] %s4562_s24  ;;  %s1807_s16 = sadd.s32 124, %s4313_s30 }
  0xe8   : > { %s4565_s25 = sld [smem:[#allocation5 + %s1583_s9]]  ;;  %s567_s24 = sadd.s32 81, %s4313_s30 }
  0xe9   : > { %s1780_s12 = sld [smem:[#allocation4 + %s6108_s29]] }
  0xea   : > { %s1784_s9 = sld [smem:[#allocation4 + %s1783_s17]] }
  0xeb   : > { %s1788_s2 = sld [smem:[#allocation4 + %s1787_s8]] }
  0xec   : > { %s1792_s29 = sld [smem:[#allocation4 + %s1791_s11]] }
  0xed   : > { %s1796_s1 = sld [smem:[#allocation4 + %s1795_s19]] }
  0xee   : > { %6282 = sst [smem:[#allocation68_spill]] %s4565_s25 }
  0xef   : > { %s1781_s23 = scalar_lea.vmem [#allocation2], %s1780_s12  ;;  %s1800_s3 = sld [smem:[#allocation4 + %s1799_s20]] }
  0xf0   : > { %v1782_v21 = vld [vmem:[%s1781_s23] sm:$0x1]  ;;  %s1785_s4 = scalar_lea.vmem [#allocation2], %s1784_s9  ;;  %s1804_s22 = sld [smem:[#allocation4 + %s1803_s18]] }
  0xf1   : > { %v3588_v22 = vld [vmem:[%s1785_s4] ss:$0 sm:$0xff]  ;;  %s1789_s10 = scalar_lea.vmem [#allocation2], %s1788_s2  ;;  %s1808_s13 = sld [smem:[#allocation4 + %s1807_s16]] }
  0xf2   : > { %v3589_v23 = vld [vmem:[%s1789_s10] ss:$0 sm:$0xff]  ;;  %v1856_v25 = vsel %vm505_vm2, %v1782_v21, %v3588_v22  ;;  %s1793_s5 = scalar_lea.vmem [#allocation2], %s1792_s29  ;;  %s4590_s21 = sld [smem:[#allocation5 + %s1783_s17]] }
  0xf3   : > { %v3590_v26 = vld [vmem:[%s1793_s5] ss:$0 sm:$0xff]  ;;  %v1857_v27 = vsel %vm507_vm3, %v1856_v25, %v3589_v23  ;;  %s4593_s23 = sld [smem:[#allocation5 + %s1787_s8]]  ;;  %s1797_s12 = scalar_lea.vmem [#allocation2], %s1796_s1 }
  0xf4   : > { %s4595_s9 = sld [smem:[#allocation5 + %s1791_s11]]  ;;  %v3591_v28 = vld [vmem:[%s1797_s12] ss:$0 sm:$0xff]  ;;  %v1858_v29 = vsel %vm509_vm4, %v1857_v27, %v3590_v26  ;;  %s4604_s1 = sadd.s32 1, %s4313_s30 }
  0xf5   : > { %s1801_s10 = scalar_lea.vmem [#allocation2], %s1800_s3  ;;  %s4598_s4 = sld [smem:[#allocation5 + %s1795_s19]]  ;;  %v1859_v32 = vsel %vm511_vm5, %v1858_v29, %v3591_v28 }
  0xf6   : > { %v3592_v30 = vld [vmem:[%s1801_s10] ss:$0 sm:$0xff]  ;;  %s1805_s29 = scalar_lea.vmem [#allocation2], %s1804_s22  ;;  %s4600_s17 = sld [smem:[#allocation5 + %s1799_s20]] }
  0xf7   : > { %v3593_v31 = vld [vmem:[%s1805_s29] ss:$0 sm:$0xff]  ;;  %6288 = sst [smem:[#allocation74_spill]] %s4604_s1  ;;  %v1860_v33 = vsel %vm6200_vm6, %v1859_v32, %v3592_v30  ;;  %s1809_s3 = scalar_lea.vmem [#allocation2], %s1808_s13 }
  0xf8   : > { %6283 = sst [smem:[#allocation69_spill]] %s4590_s21  ;;  %v3594_v34 = vld [vmem:[%s1809_s3] ss:$0 sm:$0xff]  ;;  %v1861_v35 = vsel %vm6199_vm7, %v1860_v33, %v3593_v31  ;;  %s555_s11 = sadd.s32 33, %s4313_s30 }
  0xf9   : > { %6284 = sst [smem:[#allocation70_spill]] %s4593_s23  ;;  %v4616_v36 = vsel %vm6198_vm8, %v1861_v35, %v3594_v34  ;;  %s559_s3 = sadd.s32 49, %s4313_s30 }
  0xfa   : > { %6285 = sst [smem:[#allocation71_spill]] %s4595_s9  ;;  %3389 = vmatmul.msk.f32.gmra.mxu3 %vm404_vm1, %v4616_v36  ;;  %s563_s2 = sadd.s32 65, %s4313_s30 }
  0xfb   : > { %6286 = sst [smem:[#allocation72_spill]] %s4598_s4  ;;  %s571_s23 = sadd.s32 97, %s4313_s30 }
  0xfc   : > { %6287 = sst [smem:[#allocation73_spill]] %s4600_s17  ;;  %s575_s13 = sadd.s32 113, %s4313_s30 }
  0xfd   : > { %s4606_s8 = sld [smem:[#allocation5 + %s1803_s18]]  ;;  %s551_s18 = sadd.s32 17, %s4313_s30 }
  0xfe   : > { %s4609_s19 = sld [smem:[#allocation5 + %s1807_s16]] }
  0xff   : > { %s548_s20 = sld [smem:[#allocation4 + %s4604_s1]] }
 0x100   : > { %s552_s16 = sld [smem:[#allocation4 + %s551_s18]] }
 0x101   : > { %s556_s10 = sld [smem:[#allocation4 + %s555_s11]] }
 0x102   : > { %s560_s25 = sld [smem:[#allocation4 + %s559_s3]] }
 0x103   : > { %6289 = sst [smem:[#allocation75_spill]] %s4606_s8  ;;  %s1015_s8 = sadd.s32 85, %s4313_s30 }
 0x104   : > { %6290 = sst [smem:[#allocation76_spill]] %s4609_s19  ;;  %s1011_s19 = sadd.s32 69, %s4313_s30 }
 0x105   : > { %s549_s27 = scalar_lea.vmem [#allocation2], %s548_s20  ;;  %s564_s0 = sld [smem:[#allocation4 + %s563_s2]] }
 0x106   : > { %v550_v37 = vld [vmem:[%s549_s27] sm:$0x1]  ;;  %s553_s5 = scalar_lea.vmem [#allocation2], %s552_s16  ;;  %s568_s9 = sld [smem:[#allocation4 + %s567_s24]] }
 0x107   : > { %v3602_v38 = vld [vmem:[%s553_s5] ss:$0 sm:$0xff]  ;;  %s572_s21 = sld [smem:[#allocation4 + %s571_s23]]  ;;  %s557_s15 = scalar_lea.vmem [#allocation2], %s556_s10 }
 0x108   : > { %v3603_v40 = vld [vmem:[%s557_s15] ss:$0 sm:$0xff]  ;;  %v624_v41 = vsel %vm505_vm2, %v550_v37, %v3602_v38  ;;  %s576_s12 = sld [smem:[#allocation4 + %s575_s13]]  ;;  %s561_s29 = scalar_lea.vmem [#allocation2], %s560_s25 }
 0x109   : > { %s4633_s22 = sld [smem:[#allocation5 + %s551_s18]]  ;;  %v3604_v42 = vld [vmem:[%s561_s29] ss:$0 sm:$0xff]  ;;  %v625_v43 = vsel %vm507_vm3, %v624_v41, %v3603_v40 }
 0x10a   : > { %s4636_s27 = sld [smem:[#allocation5 + %s555_s11]]  ;;  %v626_v45 = vsel %vm509_vm4, %v625_v43, %v3604_v42 }
 0x10b   : > { %s565_s20 = scalar_lea.vmem [#allocation2], %s564_s0  ;;  %s4638_s16 = sld [smem:[#allocation5 + %s559_s3]] }
 0x10c   : > { %v3605_v44 = vld [vmem:[%s565_s20] ss:$0 sm:$0xff]  ;;  %s569_s15 = scalar_lea.vmem [#allocation2], %s568_s9  ;;  %s4641_s5 = sld [smem:[#allocation5 + %s563_s2]] }
 0x10d   : > { %v3606_v46 = vld [vmem:[%s569_s15] ss:$0 sm:$0xff]  ;;  %s573_s25 = scalar_lea.vmem [#allocation2], %s572_s21  ;;  %s4643_s18 = sld [smem:[#allocation5 + %s567_s24]]  ;;  %v627_v48 = vsel %vm511_vm5, %v626_v45, %v3605_v44 }
 0x10e   : > { %v3607_v47 = vld [vmem:[%s573_s25] ss:$0 sm:$0xff]  ;;  %s4647_s0 = sadd.s32 5, %s4313_s30  ;;  %s4649_s11 = sld [smem:[#allocation5 + %s571_s23]]  ;;  %v628_v49 = vsel %vm6200_vm6, %v627_v48, %v3606_v46 }
 0x10f   : > { %6291 = sst [smem:[#allocation77_spill]] %s4633_s22  ;;  %s577_s9 = scalar_lea.vmem [#allocation2], %s576_s12  ;;  %v629_v51 = vsel %vm6199_vm7, %v628_v49, %v3607_v47 }
 0x110   : > { %6292 = sst [smem:[#allocation78_spill]] %s4636_s27  ;;  %v3608_v50 = vld [vmem:[%s577_s9] ss:$0 sm:$0xff]  ;;  %s999_s12 = sadd.s32 21, %s4313_s30 }
 0x111   : > { %6293 = sst [smem:[#allocation79_spill]] %s4638_s16  ;;  %v4658_v52 = vsel %vm6198_vm8, %v629_v51, %v3608_v50  ;;  %s1003_s20 = sadd.s32 37, %s4313_s30 }
 0x112   : > { %6294 = sst [smem:[#allocation80_spill]] %s4641_s5  ;;  %3378 = vmatmul.msk.f32.gmra.mxu0 %vm404_vm1, %v4658_v52  ;;  %s1007_s21 = sadd.s32 53, %s4313_s30 }
 0x113   : > { %6295 = sst [smem:[#allocation81_spill]] %s4643_s18  ;;  %s1023_s27 = sadd.s32 117, %s4313_s30 }
 0x114   : > { %6296 = sst [smem:[#allocation82_spill]] %s4647_s0  ;;  %s1919_s18 = sadd.s32 125, %s4313_s30 }
 0x115   : > { %6297 = sst [smem:[#allocation83_spill]] %s4649_s11  ;;  %s1915_s11 = sadd.s32 109, %s4313_s30 }
 0x116   : > { %s4652_s2 = sld [smem:[#allocation5 + %s575_s13]]  ;;  %s1247_s22 = sadd.s32 119, %s4313_s30 }
 0x117   : > { %s996_s23 = sld [smem:[#allocation4 + %s4647_s0]]  ;;  %s1019_s0 = sadd.s32 101, %s4313_s30 }
 0x118   : > { %s1000_s29 = sld [smem:[#allocation4 + %s999_s12]] }
 0x119   : > { %s1004_s25 = sld [smem:[#allocation4 + %s1003_s20]] }
 0x11a   : > { %s1008_s24 = sld [smem:[#allocation4 + %s1007_s21]] }
 0x11b   : > { %s1012_s10 = sld [smem:[#allocation4 + %s1011_s19]] }
 0x11c   : > { %6298 = sst [smem:[#allocation84_spill]] %s4652_s2  ;;  %s1911_s2 = sadd.s32 93, %s4313_s30 }
 0x11d   : > { %s997_s17 = scalar_lea.vmem [#allocation2], %s996_s23  ;;  %s1016_s16 = sld [smem:[#allocation4 + %s1015_s8]] }
 0x11e   : > { %v998_v53 = vld [vmem:[%s997_s17] sm:$0x1]  ;;  %s1001_s4 = scalar_lea.vmem [#allocation2], %s1000_s29  ;;  %s1020_s13 = sld [smem:[#allocation4 + %s1019_s0]] }
 0x11f   : > { %v3616_v55 = vld [vmem:[%s1001_s4] ss:$0 sm:$0xff]  ;;  %s1005_s5 = scalar_lea.vmem [#allocation2], %s1004_s25  ;;  %s1024_s15 = sld [smem:[#allocation4 + %s1023_s27]] }
 0x120   : > { %v3617_v56 = vld [vmem:[%s1005_s5] ss:$0 sm:$0xff]  ;;  %v1072_v57 = vsel %vm505_vm2, %v998_v53, %v3616_v55  ;;  %s1009_s3 = scalar_lea.vmem [#allocation2], %s1008_s24  ;;  %s4676_s9 = sld [smem:[#allocation5 + %s999_s12]] }
 0x121   : > { %v3618_v58 = vld [vmem:[%s1009_s3] ss:$0 sm:$0xff]  ;;  %v1073_v59 = vsel %vm507_vm3, %v1072_v57, %v3617_v56  ;;  %s4679_s17 = sld [smem:[#allocation5 + %s1003_s20]]  ;;  %s1013_s23 = scalar_lea.vmem [#allocation2], %s1012_s10 }
 0x122   : > { %s4681_s29 = sld [smem:[#allocation5 + %s1007_s21]]  ;;  %v3619_v60 = vld [vmem:[%s1013_s23] ss:$0 sm:$0xff]  ;;  %v1074_v61 = vsel %vm509_vm4, %v1073_v59, %v3618_v58  ;;  %s6136_s21 = sadd.s32 13, %s4313_s30 }
 0x123   : > { %s1017_s4 = scalar_lea.vmem [#allocation2], %s1016_s16  ;;  %s4684_s5 = sld [smem:[#allocation5 + %s1011_s19]]  ;;  %v1075_v0 = vsel %vm511_vm5, %v1074_v61, %v3619_v60 }
 0x124   : > { %v3620_v62 = vld [vmem:[%s1017_s4] ss:$0 sm:$0xff]  ;;  %s1021_s24 = scalar_lea.vmem [#allocation2], %s1020_s13  ;;  %s4686_s12 = sld [smem:[#allocation5 + %s1015_s8]] }
 0x125   : > { %v3621_v63 = vld [vmem:[%s1021_s24] ss:$0 sm:$0xff]  ;;  %s4690_s10 = sld [smem:[#allocation5 + %s1019_s0]]  ;;  %v1076_v1 = vsel %vm6200_vm6, %v1075_v0, %v3620_v62  ;;  %s1025_s19 = scalar_lea.vmem [#allocation2], %s1024_s15 }
 0x126   : > { %6299 = sst [smem:[#allocation85_spill]] %s4676_s9  ;;  %v3622_v2 = vld [vmem:[%s1025_s19] ss:$0 sm:$0xff]  ;;  %v1077_v3 = vsel %vm6199_vm7, %v1076_v1, %v3621_v63  ;;  %s1899_s23 = sadd.s32 45, %s4313_s30 }
 0x127   : > { %6300 = sst [smem:[#allocation86_spill]] %s4679_s17  ;;  %v4699_v4 = vsel %vm6198_vm8, %v1077_v3, %v3622_v2  ;;  %s1903_s13 = sadd.s32 61, %s4313_s30 }
 0x128   : > { %6301 = sst [smem:[#allocation87_spill]] %s4681_s29  ;;  %3382 = vmatmul.msk.f32.gmra.mxu1 %vm404_vm1, %v4699_v4  ;;  %s1907_s17 = sadd.s32 77, %s4313_s30 }
 0x129   : > { %6302 = sst [smem:[#allocation88_spill]] %s4684_s5 }
 0x12a   : > { %6303 = sst [smem:[#allocation89_spill]] %s4686_s12  ;;  %s683_s12 = sadd.s32 98, %s4313_s30 }
 0x12b   : > { %6304 = sst [smem:[#allocation90_spill]] %s4690_s10 }
 0x12c   : > { %s4693_s16 = sld [smem:[#allocation5 + %s1023_s27]]  ;;  %s1895_s27 = sadd.s32 29, %s4313_s30 }
 0x12d   : > { %s1892_s0 = sld [smem:[#allocation4 + %s6136_s21]] }
 0x12e   : > { %s1896_s15 = sld [smem:[#allocation4 + %s1895_s27]] }
 0x12f   : > { %s1900_s24 = sld [smem:[#allocation4 + %s1899_s23]] }
 0x130   : > { %s1904_s8 = sld [smem:[#allocation4 + %s1903_s13]] }
 0x131   : > { %s1908_s21 = sld [smem:[#allocation4 + %s1907_s17]] }
 0x132   : > { %6305 = sst [smem:[#allocation91_spill]] %s4693_s16 }
 0x133   : > { %s1893_s9 = scalar_lea.vmem [#allocation2], %s1892_s0  ;;  %s1912_s29 = sld [smem:[#allocation4 + %s1911_s2]] }
 0x134   : > { %v1894_v6 = vld [vmem:[%s1893_s9] sm:$0x1]  ;;  %s1897_s3 = scalar_lea.vmem [#allocation2], %s1896_s15  ;;  %s1916_s20 = sld [smem:[#allocation4 + %s1915_s11]] }
 0x135   : > { %v3630_v7 = vld [vmem:[%s1897_s3] ss:$0 sm:$0xff]  ;;  %s1901_s5 = scalar_lea.vmem [#allocation2], %s1900_s24  ;;  %s1920_s4 = sld [smem:[#allocation4 + %s1919_s18]] }
 0x136   : > { %v3631_v8 = vld [vmem:[%s1901_s5] ss:$0 sm:$0xff]  ;;  %v1968_v9 = vsel %vm505_vm2, %v1894_v6, %v3630_v7  ;;  %s1905_s25 = scalar_lea.vmem [#allocation2], %s1904_s8  ;;  %s4718_s19 = sld [smem:[#allocation5 + %s1895_s27]] }
 0x137   : > { %v3632_v10 = vld [vmem:[%s1905_s25] ss:$0 sm:$0xff]  ;;  %v1969_v11 = vsel %vm507_vm3, %v1968_v9, %v3631_v8  ;;  %s4721_s9 = sld [smem:[#allocation5 + %s1899_s23]]  ;;  %s1909_s0 = scalar_lea.vmem [#allocation2], %s1908_s21 }
 0x138   : > { %s4723_s15 = sld [smem:[#allocation5 + %s1903_s13]]  ;;  %v3633_v12 = vld [vmem:[%s1909_s0] ss:$0 sm:$0xff]  ;;  %v1970_v13 = vsel %vm509_vm4, %v1969_v11, %v3632_v10  ;;  %s4732_s21 = sadd.s32 2, %s4313_s30 }
 0x139   : > { %s1913_s5 = scalar_lea.vmem [#allocation2], %s1912_s29  ;;  %s4726_s3 = sld [smem:[#allocation5 + %s1907_s17]]  ;;  %v1971_v16 = vsel %vm511_vm5, %v1970_v13, %v3633_v12 }
 0x13a   : > { %v3634_v14 = vld [vmem:[%s1913_s5] ss:$0 sm:$0xff]  ;;  %s1917_s8 = scalar_lea.vmem [#allocation2], %s1916_s20  ;;  %s4728_s27 = sld [smem:[#allocation5 + %s1911_s2]] }
 0x13b   : > { %v3635_v15 = vld [vmem:[%s1917_s8] ss:$0 sm:$0xff]  ;;  %6311 = sst [smem:[#allocation97_spill]] %s4732_s21  ;;  %v1972_v17 = vsel %vm6200_vm6, %v1971_v16, %v3634_v14  ;;  %s1921_s17 = scalar_lea.vmem [#allocation2], %s1920_s4 }
 0x13c   : > { %6306 = sst [smem:[#allocation92_spill]] %s4718_s19  ;;  %v3636_v18 = vld [vmem:[%s1921_s17] ss:$0 sm:$0xff]  ;;  %v1973_v19 = vsel %vm6199_vm7, %v1972_v17, %v3635_v15  ;;  %s667_s24 = sadd.s32 34, %s4313_s30 }
 0x13d   : > { %6307 = sst [smem:[#allocation93_spill]] %s4721_s9  ;;  %v4744_v21 = vsel %vm6198_vm8, %v1973_v19, %v3636_v18  ;;  %s671_s17 = sadd.s32 50, %s4313_s30 }
 0x13e   : > { %6308 = sst [smem:[#allocation94_spill]] %s4723_s15  ;;  %3390 = vmatmul.msk.f32.gmra.mxu3 %vm404_vm1, %v4744_v21  ;;  %s675_s25 = sadd.s32 66, %s4313_s30 }
 0x13f   : > { %6309 = sst [smem:[#allocation95_spill]] %s4726_s3  ;;  %s679_s9 = sadd.s32 82, %s4313_s30 }
 0x140   : > { %6310 = sst [smem:[#allocation96_spill]] %s4728_s27  ;;  %s687_s4 = sadd.s32 114, %s4313_s30 }
 0x141   : > { %s4734_s13 = sld [smem:[#allocation5 + %s1915_s11]]  ;;  %s663_s11 = sadd.s32 18, %s4313_s30 }
 0x142   : > { %s4737_s29 = sld [smem:[#allocation5 + %s1919_s18]] }
 0x143   : > { %s660_s20 = sld [smem:[#allocation4 + %s4732_s21]] }
 0x144   : > { %s664_s18 = sld [smem:[#allocation4 + %s663_s11]] }
 0x145   : > { %s668_s5 = sld [smem:[#allocation4 + %s667_s24]] }
 0x146   : > { %s672_s19 = sld [smem:[#allocation4 + %s671_s17]] }
 0x147   : > { %6312 = sst [smem:[#allocation98_spill]] %s4734_s13  ;;  %s1127_s13 = sadd.s32 86, %s4313_s30 }
 0x148   : > { %6313 = sst [smem:[#allocation99_spill]] %s4737_s29  ;;  %s1123_s29 = sadd.s32 70, %s4313_s30 }
 0x149   : > { %s661_s16 = scalar_lea.vmem [#allocation2], %s660_s20  ;;  %s676_s10 = sld [smem:[#allocation4 + %s675_s25]] }
 0x14a   : > { %v662_v22 = vld [vmem:[%s661_s16] sm:$0x1]  ;;  %s665_s23 = scalar_lea.vmem [#allocation2], %s664_s18  ;;  %s680_s15 = sld [smem:[#allocation4 + %s679_s9]] }
 0x14b   : > { %v3637_v23 = vld [vmem:[%s665_s23] ss:$0 sm:$0xff]  ;;  %s684_s28 = sld [smem:[#allocation4 + %s683_s12]]  ;;  %s669_s14 = scalar_lea.vmem [#allocation2], %s668_s5 }
 0x14c   : > { %v3638_v25 = vld [vmem:[%s669_s14] ss:$0 sm:$0xff]  ;;  %v736_v26 = vsel %vm505_vm2, %v662_v22, %v3637_v23  ;;  %s688_s0 = sld [smem:[#allocation4 + %s687_s4]]  ;;  %s673_s8 = scalar_lea.vmem [#allocation2], %s672_s19 }
 0x14d   : > { %s4761_s2 = sld [smem:[#allocation5 + %s663_s11]]  ;;  %v3639_v27 = vld [vmem:[%s673_s8] ss:$0 sm:$0xff]  ;;  %v737_v28 = vsel %vm507_vm3, %v736_v26, %v3638_v25 }
 0x14e   : > { %s4764_s16 = sld [smem:[#allocation5 + %s667_s24]]  ;;  %v738_v30 = vsel %vm509_vm4, %v737_v28, %v3639_v27 }
 0x14f   : > { %s677_s20 = scalar_lea.vmem [#allocation2], %s676_s10  ;;  %s4766_s18 = sld [smem:[#allocation5 + %s671_s17]] }
 0x150   : > { %v3640_v29 = vld [vmem:[%s677_s20] ss:$0 sm:$0xff]  ;;  %s681_s14 = scalar_lea.vmem [#allocation2], %s680_s15  ;;  %s4769_s23 = sld [smem:[#allocation5 + %s675_s25]] }
 0x151   : > { %v3641_v31 = vld [vmem:[%s681_s14] ss:$0 sm:$0xff]  ;;  %s685_s19 = scalar_lea.vmem [#allocation2], %s684_s28  ;;  %s4771_s11 = sld [smem:[#allocation5 + %s679_s9]]  ;;  %v739_v33 = vsel %vm511_vm5, %v738_v30, %v3640_v29 }
 0x152   : > { %v3642_v32 = vld [vmem:[%s685_s19] ss:$0 sm:$0xff]  ;;  %s4775_s10 = sadd.s32 6, %s4313_s30  ;;  %s4777_s24 = sld [smem:[#allocation5 + %s683_s12]]  ;;  %v740_v34 = vsel %vm6200_vm6, %v739_v33, %v3641_v31 }
 0x153   : > { %6314 = sst [smem:[#allocation100_spill]] %s4761_s2  ;;  %s689_s15 = scalar_lea.vmem [#allocation2], %s688_s0  ;;  %v741_v37 = vsel %vm6199_vm7, %v740_v34, %v3642_v32 }
 0x154   : > { %6315 = sst [smem:[#allocation101_spill]] %s4764_s16  ;;  %v3643_v35 = vld [vmem:[%s689_s15] ss:$0 sm:$0xff]  ;;  %s1111_s0 = sadd.s32 22, %s4313_s30 }
 0x155   : > { %6316 = sst [smem:[#allocation102_spill]] %s4766_s18  ;;  %v4786_v38 = vsel %vm6198_vm8, %v741_v37, %v3643_v35  ;;  %s1115_s20 = sadd.s32 38, %s4313_s30 }
 0x156   : > { %6317 = sst [smem:[#allocation103_spill]] %s4769_s23  ;;  %3379 = vmatmul.msk.f32.gmra.mxu0 %vm404_vm1, %v4786_v38  ;;  %s1119_s9 = sadd.s32 54, %s4313_s30 }
 0x157   : > { %6318 = sst [smem:[#allocation104_spill]] %s4771_s11  ;;  %s1131_s18 = sadd.s32 102, %s4313_s30 }
 0x158   : > { %6319 = sst [smem:[#allocation105_spill]] %s4775_s10  ;;  %s1135_s16 = sadd.s32 118, %s4313_s30 }
 0x159   : > { %6320 = sst [smem:[#allocation106_spill]] %s4777_s24  ;;  %s2027_s24 = sadd.s32 110, %s4313_s30 }
 0x15a   : > { %s4780_s25 = sld [smem:[#allocation5 + %s687_s4]]  ;;  %s2031_s11 = sadd.s32 126, %s4313_s30 }
 0x15b   : > { %s1108_s12 = sld [smem:[#allocation4 + %s4775_s10]]  ;;  %s1243_s2 = sadd.s32 103, %s4313_s30 }
 0x15c   : > { %s1112_s8 = sld [smem:[#allocation4 + %s1111_s0]] }
 0x15d   : > { %s1116_s19 = sld [smem:[#allocation4 + %s1115_s20]] }
 0x15e   : > { %s1120_s28 = sld [smem:[#allocation4 + %s1119_s9]] }
 0x15f   : > { %s1124_s5 = sld [smem:[#allocation4 + %s1123_s29]] }
 0x160   : > { %6321 = sst [smem:[#allocation107_spill]] %s4780_s25 }
 0x161   : > { %s1109_s27 = scalar_lea.vmem [#allocation2], %s1108_s12  ;;  %s1128_s10 = sld [smem:[#allocation4 + %s1127_s13]] }
 0x162   : > { %v1110_v40 = vld [vmem:[%s1109_s27] sm:$0x1]  ;;  %s1113_s3 = scalar_lea.vmem [#allocation2], %s1112_s8  ;;  %s1132_s4 = sld [smem:[#allocation4 + %s1131_s18]] }
 0x163   : > { %v3651_v41 = vld [vmem:[%s1113_s3] ss:$0 sm:$0xff]  ;;  %s1117_s23 = scalar_lea.vmem [#allocation2], %s1116_s19  ;;  %s1136_s14 = sld [smem:[#allocation4 + %s1135_s16]] }
 0x164   : > { %v3652_v42 = vld [vmem:[%s1117_s23] ss:$0 sm:$0xff]  ;;  %v1184_v43 = vsel %vm505_vm2, %v1110_v40, %v3651_v41  ;;  %s1121_s17 = scalar_lea.vmem [#allocation2], %s1120_s28  ;;  %s4804_s15 = sld [smem:[#allocation5 + %s1111_s0]] }
 0x165   : > { %v3653_v44 = vld [vmem:[%s1121_s17] ss:$0 sm:$0xff]  ;;  %v1185_v45 = vsel %vm507_vm3, %v1184_v43, %v3652_v42  ;;  %s4807_s27 = sld [smem:[#allocation5 + %s1115_s20]]  ;;  %s1125_s12 = scalar_lea.vmem [#allocation2], %s1124_s5 }
 0x166   : > { %s4809_s8 = sld [smem:[#allocation5 + %s1119_s9]]  ;;  %v3654_v46 = vld [vmem:[%s1125_s12] ss:$0 sm:$0xff]  ;;  %v1186_v47 = vsel %vm509_vm4, %v1185_v45, %v3653_v44  ;;  %s6162_s9 = sadd.s32 14, %s4313_s30 }
 0x167   : > { %s1129_s3 = scalar_lea.vmem [#allocation2], %s1128_s10  ;;  %s4812_s23 = sld [smem:[#allocation5 + %s1123_s29]]  ;;  %v1187_v50 = vsel %vm511_vm5, %v1186_v47, %v3654_v46 }
 0x168   : > { %v3655_v48 = vld [vmem:[%s1129_s3] ss:$0 sm:$0xff]  ;;  %s1133_s28 = scalar_lea.vmem [#allocation2], %s1132_s4  ;;  %s4814_s0 = sld [smem:[#allocation5 + %s1127_s13]] }
 0x169   : > { %v3656_v49 = vld [vmem:[%s1133_s28] ss:$0 sm:$0xff]  ;;  %s4818_s5 = sld [smem:[#allocation5 + %s1131_s18]]  ;;  %v1188_v51 = vsel %vm6200_vm6, %v1187_v50, %v3655_v48  ;;  %s1137_s29 = scalar_lea.vmem [#allocation2], %s1136_s14  ;;  %v4974_v50 = vpop.f32.mrf.mxu2 }
 0x16a   : > { %6322 = sst [smem:[#allocation108_spill]] %s4804_s15  ;;  %v3657_v53 = vld [vmem:[%s1137_s29] ss:$0 sm:$0xff]  ;;  %v1189_v55 = vsel %vm6199_vm7, %v1188_v51, %v3656_v49  ;;  %s2011_s12 = sadd.s32 46, %s4313_s30 }
 0x16b   : > { %6323 = sst [smem:[#allocation109_spill]] %s4807_s27  ;;  %v4827_v56 = vsel %vm6198_vm8, %v1189_v55, %v3657_v53  ;;  %s2015_s4 = sadd.s32 62, %s4313_s30 }
 0x16c   : > { %6324 = sst [smem:[#allocation110_spill]] %s4809_s8  ;;  %3383 = vmatmul.msk.f32.gmra.mxu1 %vm404_vm1, %v4827_v56  ;;  %s2019_s27 = sadd.s32 78, %s4313_s30 }
 0x16d   : > { %6325 = sst [smem:[#allocation111_spill]] %s4812_s23  ;;  %s2023_s15 = sadd.s32 94, %s4313_s30 }
 0x16e   : > { %6326 = sst [smem:[#allocation112_spill]] %s4814_s0 }
 0x16f   : > { %6327 = sst [smem:[#allocation113_spill]] %s4818_s5  ;;  %s1239_s5 = sadd.s32 87, %s4313_s30 }
 0x170   : > { %s4821_s10 = sld [smem:[#allocation5 + %s1135_s16]]  ;;  %s2007_s16 = sadd.s32 30, %s4313_s30 }
 0x171   : > { %s2004_s18 = sld [smem:[#allocation4 + %s6162_s9]] }
 0x172   : > { %s2008_s14 = sld [smem:[#allocation4 + %s2007_s16]] }
 0x173   : > { %s2012_s28 = sld [smem:[#allocation4 + %s2011_s12]] }
 0x174   : > { %s2016_s13 = sld [smem:[#allocation4 + %s2015_s4]] }
 0x175   : > { %s2020_s9 = sld [smem:[#allocation4 + %s2019_s27]] }
 0x176   : > { %6328 = sst [smem:[#allocation114_spill]] %s4821_s10  ;;  %s1235_s10 = sadd.s32 71, %s4313_s30 }
 0x177   : > { %s2005_s25 = scalar_lea.vmem [#allocation2], %s2004_s18  ;;  %s2024_s8 = sld [smem:[#allocation4 + %s2023_s15]] }
 0x178   : > { %v2006_v57 = vld [vmem:[%s2005_s25] sm:$0x1]  ;;  %s2009_s17 = scalar_lea.vmem [#allocation2], %s2008_s14  ;;  %s2028_s20 = sld [smem:[#allocation4 + %s2027_s24]] }
 0x179   : > { %v3665_v58 = vld [vmem:[%s2009_s17] ss:$0 sm:$0xff]  ;;  %s2013_s23 = scalar_lea.vmem [#allocation2], %s2012_s28  ;;  %s2032_s3 = sld [smem:[#allocation4 + %s2031_s11]] }
 0x17a   : > { %v3666_v59 = vld [vmem:[%s2013_s23] ss:$0 sm:$0xff]  ;;  %v2080_v60 = vsel %vm505_vm2, %v2006_v57, %v3665_v58  ;;  %s2017_s19 = scalar_lea.vmem [#allocation2], %s2016_s13  ;;  %s4846_s29 = sld [smem:[#allocation5 + %s2007_s16]] }
 0x17b   : > { %v3667_v61 = vld [vmem:[%s2017_s19] ss:$0 sm:$0xff]  ;;  %v2081_v62 = vsel %vm507_vm3, %v2080_v60, %v3666_v59  ;;  %s4849_s25 = sld [smem:[#allocation5 + %s2011_s12]]  ;;  %s2021_s18 = scalar_lea.vmem [#allocation2], %s2020_s9 }
 0x17c   : > { %s4851_s14 = sld [smem:[#allocation5 + %s2015_s4]]  ;;  %v3668_v63 = vld [vmem:[%s2021_s18] ss:$0 sm:$0xff]  ;;  %v2082_v0 = vsel %vm509_vm4, %v2081_v62, %v3667_v61  ;;  %s4860_s9 = sadd.s32 7, %s4313_s30 }
 0x17d   : > { %s2025_s23 = scalar_lea.vmem [#allocation2], %s2024_s8  ;;  %s4854_s17 = sld [smem:[#allocation5 + %s2019_s27]]  ;;  %v2083_v3 = vsel %vm511_vm5, %v2082_v0, %v3668_v63 }
 0x17e   : > { %v3669_v1 = vld [vmem:[%s2025_s23] ss:$0 sm:$0xff]  ;;  %s2029_s13 = scalar_lea.vmem [#allocation2], %s2028_s20  ;;  %s4856_s16 = sld [smem:[#allocation5 + %s2023_s15]] }
 0x17f   : > { %v3670_v2 = vld [vmem:[%s2029_s13] ss:$0 sm:$0xff]  ;;  %6334 = sst [smem:[#allocation120_spill]] %s4860_s9  ;;  %v2084_v6 = vsel %vm6200_vm6, %v2083_v3, %v3669_v1  ;;  %s2033_s27 = scalar_lea.vmem [#allocation2], %s2032_s3  ;;  %v2323_v1 = vpop.f32.mrf.mxu2 }
 0x180   : > { %6329 = sst [smem:[#allocation115_spill]] %s4846_s29  ;;  %v3671_v7 = vld [vmem:[%s2033_s27] ss:$0 sm:$0xff]  ;;  %v2085_v8 = vsel %vm6199_vm7, %v2084_v6, %v3670_v2  ;;  %s1227_s3 = sadd.s32 39, %s4313_s30  ;;  %v2296_v2 = vpop.f32.mrf.mxu0 }
 0x181   : > { %6330 = sst [smem:[#allocation116_spill]] %s4849_s25  ;;  %v4871_v9 = vsel %vm6198_vm8, %v2085_v8, %v3671_v7  ;;  %s1231_s13 = sadd.s32 55, %s4313_s30 }
 0x182   : > { %6331 = sst [smem:[#allocation117_spill]] %s4851_s14  ;;  %3391 = vmatmul.msk.f32.gmra.mxu3 %vm404_vm1, %v4871_v9  ;;  %s783_s29 = sadd.s32 51, %s4313_s30 }
 0x183   : > { %6332 = sst [smem:[#allocation118_spill]] %s4854_s17 }
 0x184   : > { %6333 = sst [smem:[#allocation119_spill]] %s4856_s16 }
 0x185   : > { %s4862_s4 = sld [smem:[#allocation5 + %s2027_s24]]  ;;  %s1223_s24 = sadd.s32 23, %s4313_s30 }
 0x186   : > { %s4865_s8 = sld [smem:[#allocation5 + %s2031_s11]] }
 0x187   : > { %s1220_s15 = sld [smem:[#allocation4 + %s4860_s9]] }
 0x188   : > { %s1224_s12 = sld [smem:[#allocation4 + %s1223_s24]] }
 0x189   : > { %s1228_s18 = sld [smem:[#allocation4 + %s1227_s3]] }
 0x18a   : > { %s1232_s20 = sld [smem:[#allocation4 + %s1231_s13]] }
 0x18b   : > { %6335 = sst [smem:[#allocation121_spill]] %s4862_s4 }
 0x18c   : > { %6336 = sst [smem:[#allocation122_spill]] %s4865_s8  ;;  %s791_s8 = sadd.s32 83, %s4313_s30 }
 0x18d   : > { %s1221_s0 = scalar_lea.vmem [#allocation2], %s1220_s15  ;;  %s1236_s19 = sld [smem:[#allocation4 + %s1235_s10]] }
 0x18e   : > { %v1222_v10 = vld [vmem:[%s1221_s0] sm:$0x1]  ;;  %s1225_s25 = scalar_lea.vmem [#allocation2], %s1224_s12  ;;  %s1240_s9 = sld [smem:[#allocation4 + %s1239_s5]] }
 0x18f   : > { %v3672_v11 = vld [vmem:[%s1225_s25] ss:$0 sm:$0xff]  ;;  %s1244_s11 = sld [smem:[#allocation4 + %s1243_s2]]  ;;  %s1229_s14 = scalar_lea.vmem [#allocation2], %s1228_s18 }
 0x190   : > { %v3673_v12 = vld [vmem:[%s1229_s14] ss:$0 sm:$0xff]  ;;  %v1296_v13 = vsel %vm505_vm2, %v1222_v10, %v3672_v11  ;;  %s1248_s23 = sld [smem:[#allocation4 + %s1247_s22]]  ;;  %s1233_s28 = scalar_lea.vmem [#allocation2], %s1232_s20  ;;  %v2308_v10 = vpop.f32.mrf.mxu1  ;;  %v2329_v11 = vpop.f32.mrf.mxu3 }
 0x191   : > { %s4889_s27 = sld [smem:[#allocation5 + %s1223_s24]]  ;;  %v3674_v14 = vld [vmem:[%s1233_s28] ss:$0 sm:$0xff]  ;;  %v1297_v15 = vsel %vm507_vm3, %v1296_v13, %v3673_v12  ;;  %s775_s18 = sadd.s32 19, %s4313_s30  ;;  %v2326_v12 = vpop.f32.mrf.mxu2 }
 0x192   : > { %s4892_s0 = sld [smem:[#allocation5 + %s1227_s3]]  ;;  %v1298_v17 = vsel %vm509_vm4, %v1297_v15, %v3674_v14  ;;  %v2299_v15 = vpop.f32.mrf.mxu0 }
 0x193   : > { %s1237_s15 = scalar_lea.vmem [#allocation2], %s1236_s19  ;;  %s4894_s12 = sld [smem:[#allocation5 + %s1231_s13]] }
 0x194   : > { %v3675_v16 = vld [vmem:[%s1237_s15] ss:$0 sm:$0xff]  ;;  %s1241_s25 = scalar_lea.vmem [#allocation2], %s1240_s9  ;;  %s4897_s14 = sld [smem:[#allocation5 + %s1235_s10]] }
 0x195   : > { %v3676_v18 = vld [vmem:[%s1241_s25] ss:$0 sm:$0xff]  ;;  %s1245_s20 = scalar_lea.vmem [#allocation2], %s1244_s11  ;;  %s4899_s24 = sld [smem:[#allocation5 + %s1239_s5]]  ;;  %v1299_v22 = vsel %vm511_vm5, %v1298_v17, %v3675_v16 }
 0x196   : > { %v3677_v19 = vld [vmem:[%s1245_s20] ss:$0 sm:$0xff]  ;;  %s4903_s19 = sadd.s32 3, %s4313_s30  ;;  %s4905_s3 = sld [smem:[#allocation5 + %s1243_s2]]  ;;  %v1300_v23 = vsel %vm6200_vm6, %v1299_v22, %v3676_v18 }
 0x197   : > { %6337 = sst [smem:[#allocation123_spill]] %s4889_s27  ;;  %s1249_s10 = scalar_lea.vmem [#allocation2], %s1248_s23  ;;  %v1301_v26 = vsel %vm6199_vm7, %v1300_v23, %v3677_v19 }
 0x198   : > { %6338 = sst [smem:[#allocation124_spill]] %s4892_s0  ;;  %v3678_v25 = vld [vmem:[%s1249_s10] ss:$0 sm:$0xff]  ;;  %s779_s15 = sadd.s32 35, %s4313_s30 }
 0x199   : > { %6339 = sst [smem:[#allocation125_spill]] %s4894_s12  ;;  %v4914_v27 = vsel %vm6198_vm8, %v1301_v26, %v3678_v25  ;;  %s787_s5 = sadd.s32 67, %s4313_s30 }
 0x19a   : > { %6340 = sst [smem:[#allocation126_spill]] %s4897_s14  ;;  %3384 = vmatmul.msk.f32.gmra.mxu1 %vm404_vm1, %v4914_v27  ;;  %s795_s12 = sadd.s32 99, %s4313_s30 }
 0x19b   : > { %6341 = sst [smem:[#allocation127_spill]] %s4899_s24  ;;  %s799_s0 = sadd.s32 115, %s4313_s30 }
 0x19c   : > { %6342 = sst [smem:[#allocation128_spill]] %s4903_s19 }
 0x19d   : > { %6343 = sst [smem:[#allocation129_spill]] %s4905_s3  ;;  %s1351_s3 = sadd.s32 88, %s4313_s30 }
 0x19e   : > { %s4908_s9 = sld [smem:[#allocation5 + %s1247_s22]] }
 0x19f   : > { %s772_s2 = sld [smem:[#allocation4 + %s4903_s19]] }
 0x1a0   : > { %s776_s23 = sld [smem:[#allocation4 + %s775_s18]] }
 0x1a1   : > { %s780_s20 = sld [smem:[#allocation4 + %s779_s15]] }
 0x1a2   : > { %s784_s11 = sld [smem:[#allocation4 + %s783_s29]] }
 0x1a3   : > { %s788_s28 = sld [smem:[#allocation4 + %s787_s5]] }
 0x1a4   : > { %6344 = sst [smem:[#allocation130_spill]] %s4908_s9  ;;  %s1347_s9 = sadd.s32 72, %s4313_s30 }
 0x1a5   : > { %s773_s4 = scalar_lea.vmem [#allocation2], %s772_s2  ;;  %s792_s17 = sld [smem:[#allocation4 + %s791_s8]] }
 0x1a6   : > { %v774_v28 = vld [vmem:[%s773_s4] sm:$0x1]  ;;  %s777_s16 = scalar_lea.vmem [#allocation2], %s776_s23  ;;  %s796_s22 = sld [smem:[#allocation4 + %s795_s12]] }
 0x1a7   : > { %v3686_v29 = vld [vmem:[%s777_s16] ss:$0 sm:$0xff]  ;;  %s781_s14 = scalar_lea.vmem [#allocation2], %s780_s20  ;;  %s800_s25 = sld [smem:[#allocation4 + %s799_s0]] }
 0x1a8   : > { %v3687_v30 = vld [vmem:[%s781_s14] ss:$0 sm:$0xff]  ;;  %v848_v31 = vsel %vm505_vm2, %v774_v28, %v3686_v29  ;;  %s785_s13 = scalar_lea.vmem [#allocation2], %s784_s11  ;;  %s4932_s10 = sld [smem:[#allocation5 + %s775_s18]]  ;;  %v2332_v29 = vpop.f32.mrf.mxu3 }
 0x1a9   : > { %v3688_v32 = vld [vmem:[%s785_s13] ss:$0 sm:$0xff]  ;;  %v849_v33 = vsel %vm507_vm3, %v848_v31, %v3687_v30  ;;  %s4935_s4 = sld [smem:[#allocation5 + %s779_s15]]  ;;  %s789_s2 = scalar_lea.vmem [#allocation2], %s788_s28  ;;  %v2311_v31 = vpop.f32.mrf.mxu1 }
 0x1aa   : > { %s4937_s23 = sld [smem:[#allocation5 + %s783_s29]]  ;;  %v3689_v34 = vld [vmem:[%s789_s2] ss:$0 sm:$0xff]  ;;  %v850_v35 = vsel %vm509_vm4, %v849_v33, %v3688_v32  ;;  %s6187_s29 = sadd.s32 8, %s4313_s30 }
 0x1ab   : > { %s793_s16 = scalar_lea.vmem [#allocation2], %s792_s17  ;;  %s4940_s14 = sld [smem:[#allocation5 + %s787_s5]]  ;;  %v851_v41 = vsel %vm511_vm5, %v850_v35, %v3689_v34 }
 0x1ac   : > { %v3690_v37 = vld [vmem:[%s793_s16] ss:$0 sm:$0xff]  ;;  %s797_s11 = scalar_lea.vmem [#allocation2], %s796_s22  ;;  %s4942_s18 = sld [smem:[#allocation5 + %s791_s8]] }
 0x1ad   : > { %v3691_v40 = vld [vmem:[%s797_s11] ss:$0 sm:$0xff]  ;;  %s4946_s28 = sld [smem:[#allocation5 + %s795_s12]]  ;;  %v852_v42 = vsel %vm6200_vm6, %v851_v41, %v3690_v37  ;;  %s801_s17 = scalar_lea.vmem [#allocation2], %s800_s25 }
 0x1ae   : > { %s4949_s5 = sld [smem:[#allocation5 + %s799_s0]]  ;;  %v3692_v43 = vld [vmem:[%s801_s17] ss:$0 sm:$0xff]  ;;  %v853_v44 = vsel %vm6199_vm7, %v852_v42, %v3691_v40  ;;  %s1335_s0 = sadd.s32 24, %s4313_s30 }
 0x1af   : > { %6345 = sst [smem:[#allocation131_spill]] %s4935_s4  ;;  %v4955_v45 = vsel %vm6198_vm8, %v853_v44, %v3692_v43  ;;  %s1339_s2 = sadd.s32 40, %s4313_s30 }
 0x1b0   : > { %6346 = sst [smem:[#allocation132_spill]] %s4937_s23  ;;  %3380 = vmatmul.msk.f32.gmra.mxu0 %vm404_vm1, %v4955_v45  ;;  %s1343_s22 = sadd.s32 56, %s4313_s30 }
 0x1b1   : > { %6347 = sst [smem:[#allocation133_spill]] %s4940_s14  ;;  %s1355_s23 = sadd.s32 104, %s4313_s30 }
 0x1b2   : > { %s1332_s12 = sld [smem:[#allocation4 + %s6187_s29]]  ;;  %s1359_s4 = sadd.s32 120, %s4313_s30 }
 0x1b3   : > { %6348 = sst [smem:[#allocation134_spill]] %s4946_s28 }
 0x1b4   : > { %6349 = sst [smem:[#allocation135_spill]] %s4949_s5 }
 0x1b5   : > { %s1336_s25 = sld [smem:[#allocation4 + %s1335_s0]] }
 0x1b6   : > { %s1340_s11 = sld [smem:[#allocation4 + %s1339_s2]] }
 0x1b7   : > { %s1344_s8 = sld [smem:[#allocation4 + %s1343_s22]] }
 0x1b8   : > { %s1333_s24 = scalar_lea.vmem [#allocation2], %s1332_s12  ;;  %s1348_s13 = sld [smem:[#allocation4 + %s1347_s9]] }
 0x1b9   : > { %v1334_v46 = vld [vmem:[%s1333_s24] sm:$0x1]  ;;  %s1352_s27 = sld [smem:[#allocation4 + %s1351_s3]] }
 0x1ba   : > { %s1356_s15 = sld [smem:[#allocation4 + %s1355_s23]] }
 0x1bb   : > { %s1337_s29 = scalar_lea.vmem [#allocation2], %s1336_s25  ;;  %s1360_s16 = sld [smem:[#allocation4 + %s1359_s4]] }
 0x1bc   : > { %v3700_v47 = vld [vmem:[%s1337_s29] ss:$0 sm:$0xff]  ;;  %s1341_s14 = scalar_lea.vmem [#allocation2], %s1340_s11  ;;  %s4976_s20 = sld [smem:[#allocation5 + %s1335_s0]] }
 0x1bd   : > { %v3701_v48 = vld [vmem:[%s1341_s14] ss:$0 sm:$0xff]  ;;  %v1408_v49 = vsel %vm505_vm2, %v1334_v46, %v3700_v47  ;;  %s1345_s17 = scalar_lea.vmem [#allocation2], %s1344_s8  ;;  %s4979_s24 = sld [smem:[#allocation5 + %s1339_s2]]  ;;  %v2399_v47 = vadd.f32 %v4658_v52, %v4403_v24 }
 0x1be   : > { %v3702_v51 = vld [vmem:[%s1345_s17] ss:$0 sm:$0xff]  ;;  %v1409_v53 = vsel %vm507_vm3, %v1408_v49, %v3701_v48  ;;  %s1349_s12 = scalar_lea.vmem [#allocation2], %s1348_s13  ;;  %s4981_s29 = sld [smem:[#allocation5 + %s1343_s22]] }
 0x1bf   : > { %v3703_v55 = vld [vmem:[%s1349_s12] ss:$0 sm:$0xff]  ;;  %v1410_v57 = vsel %vm509_vm4, %v1409_v53, %v3702_v51  ;;  %s1353_s14 = scalar_lea.vmem [#allocation2], %s1352_s27  ;;  %s4984_s25 = sld [smem:[#allocation5 + %s1347_s9]]  ;;  %v2430_v53 = vadd.f32 %v2399_v47, %v4786_v38 }
 0x1c0   : > { %v3704_v58 = vld [vmem:[%s1353_s14] ss:$0 sm:$0xff]  ;;  %s1357_s8 = scalar_lea.vmem [#allocation2], %s1356_s15  ;;  %s4986_s0 = sld [smem:[#allocation5 + %s1351_s3]]  ;;  %v1411_v60 = vsel %vm511_vm5, %v1410_v57, %v3703_v55 }
 0x1c1   : > { %v3705_v59 = vld [vmem:[%s1357_s8] ss:$0 sm:$0xff]  ;;  %s6192_s22 = sadd.s32 15, %s4313_s30  ;;  %s4990_s13 = sld [smem:[#allocation5 + %s1355_s23]]  ;;  %v1412_v61 = vsel %vm6200_vm6, %v1411_v60, %v3704_v58  ;;  %v2335_v32 = vpop.f32.mrf.mxu3 }
 0x1c2   : > { %6350 = sst [smem:[#allocation136_spill]] %s4976_s20  ;;  %s1361_s27 = scalar_lea.vmem [#allocation2], %s1360_s16  ;;  %v1413_v63 = vsel %vm6199_vm7, %v1412_v61, %v3705_v59  ;;  %v2461_v59 = vadd.f32 %v2430_v53, %v4955_v45 }
 0x1c3   : > { %6351 = sst [smem:[#allocation137_spill]] %s4979_s24  ;;  %v3706_v62 = vld [vmem:[%s1361_s27] ss:$0 sm:$0xff]  ;;  %s6193_s2 = sadd.s32 31, %s4313_s30 }
 0x1c4   : > { %6352 = sst [smem:[#allocation138_spill]] %s4981_s29  ;;  %v5001_v0 = vsel %vm6198_vm8, %v1413_v63, %v3706_v62  ;;  %s6196_s17 = sadd.s32 47, %s4313_s30  ;;  %v2492_v60 = vadd.f32 %v2461_v59, %v4445_v39 }
 0x1c5   : > { %6353 = sst [smem:[#allocation139_spill]] %s4984_s25  ;;  %3385 = vmatmul.msk.f32.gmra.mxu1 %vm404_vm1, %v5001_v0  ;;  %s2127_s27 = sadd.s32 63, %s4313_s30 }
 0x1c6   : > { %6354 = sst [smem:[#allocation140_spill]] %s4986_s0  ;;  %s2131_s23 = sadd.s32 79, %s4313_s30  ;;  %v2523_v62 = vadd.f32 %v2492_v60, %v4699_v4 }
 0x1c7   : > { %6355 = sst [smem:[#allocation141_spill]] %s4990_s13  ;;  %s2135_s3 = sadd.s32 95, %s4313_s30 }
 0x1c8   : > { %s4993_s9 = sld [smem:[#allocation5 + %s1359_s4]]  ;;  %s2139_s0 = sadd.s32 111, %s4313_s30 }
 0x1c9   : > { %s2116_s15 = sld [smem:[#allocation4 + %s6192_s22]]  ;;  %s2143_s13 = sadd.s32 127, %s4313_s30 }
 0x1ca   : > { %s2120_s4 = sld [smem:[#allocation4 + %s6193_s2]] }
 0x1cb   : > { %s2124_s14 = sld [smem:[#allocation4 + %s6196_s17]] }
 0x1cc   : > { %s2128_s16 = sld [smem:[#allocation4 + %s2127_s27]] }
 0x1cd   : > { %s2132_s11 = sld [smem:[#allocation4 + %s2131_s23]] }
 0x1ce   : > { %6356 = sst [smem:[#allocation142_spill]] %s4993_s9 }
 0x1cf   : > { %s2117_s2 = scalar_lea.vmem [#allocation2], %s2116_s15  ;;  %s2136_s12 = sld [smem:[#allocation4 + %s2135_s3]] }
 0x1d0   : > { %v2118_v3 = vld [vmem:[%s2117_s2] sm:$0x1]  ;;  %s2121_s25 = scalar_lea.vmem [#allocation2], %s2120_s4  ;;  %s2140_s8 = sld [smem:[#allocation4 + %s2139_s0]] }
 0x1d1   : > { %v3714_v6 = vld [vmem:[%s2121_s25] ss:$0 sm:$0xff]  ;;  %s2125_s17 = scalar_lea.vmem [#allocation2], %s2124_s14  ;;  %s2144_s22 = sld [smem:[#allocation4 + %s2143_s13]] }
 0x1d2   : > { %v3715_v7 = vld [vmem:[%s2125_s17] ss:$0 sm:$0xff]  ;;  %v2192_v8 = vsel %vm505_vm2, %v2118_v3, %v3714_v6  ;;  %s2129_s15 = scalar_lea.vmem [#allocation2], %s2128_s16  ;;  %s6201_s2 = smov 32   ;;  %v2554_v6 = vadd.f32 %v2523_v62, %v4827_v56 }
 0x1d3   : > { %v3716_v13 = vld [vmem:[%s2129_s15] ss:$0 sm:$0xff]  ;;  %v2193_v14 = vsel %vm507_vm3, %v2192_v8, %v3715_v7  ;;  %2469 = vrot.lane.b32.xlu2 %v2308_v10, %s6201_s2  ;;  %2345 = vrot.lane.b32.xlu0 %v2296_v2, %s6201_s2  ;;  %s2133_s25 = scalar_lea.vmem [#allocation2], %s2132_s11  ;;  %v2302_v30 = vpop.f32.mrf.mxu0  ;;  %s6358_s6 = sld [smem:[#allocation148_spill]] }
 0x1d4   : > { %v3717_v16 = vld [vmem:[%s2133_s25] ss:$0 sm:$0xff]  ;;  %v2194_v17 = vsel %vm509_vm4, %v2193_v14, %v3716_v13  ;;  %2655 = vrot.lane.b32.xlu1 %v2326_v12, %s6201_s2  ;;  %s6397_s14 = sadd.s32 31, %s4313_s30  ;;  %s6398_s15 = sadd.s32 47, %s4313_s30 }
 0x1d5   : > { %s2137_s4 = scalar_lea.vmem [#allocation2], %s2136_s12  ;;  %v2195_v22 = vsel %vm511_vm5, %v2194_v17, %v3717_v16  ;;  %s5560_s25 = sld [smem:[#allocation5 + %s6398_s15]] }
 0x1d6   : > { %v3718_v18 = vld [vmem:[%s2137_s4] ss:$0 sm:$0xff]  ;;  %s2141_s17 = scalar_lea.vmem [#allocation2], %s2140_s8  ;;  %s5556_s8 = sld [smem:[#allocation5 + %s6397_s14]] }
 0x1d7   : > { %v3719_v19 = vld [vmem:[%s2141_s17] ss:$0 sm:$0xff]  ;;  %v2196_v23 = vsel %vm6200_vm6, %v2195_v22, %v3718_v18  ;;  %s2145_s16 = scalar_lea.vmem [#allocation2], %s2144_s22  ;;  %s6357_s22 = scalar_lea.vmem [#allocation7], %s4287_s7 }
 0x1d8   : > { %v3720_v25 = vld [vmem:[%s2145_s16] ss:$0 sm:$0xff]  ;;  %v2197_v26 = vsel %vm6199_vm7, %v2196_v23, %v3719_v19  ;;  %v3813_v42 = vld [vmem:[%s6357_s22] sm:$0xff]  ;;  %s5564_s4 = sld [smem:[#allocation5 + %s2127_s27]]  ;;  %s6409_s14 = scalar_lea.vmem [#allocation2], %s4362_s26 }
 0x1d9   : > { %v5041_v28 = vsel %vm6198_vm8, %v2197_v26, %v3720_v25  ;;  %v3721_v44 = vld [vmem:[%s6358_s6] ss:$0 sm:$0xff]  ;;  %s5568_s17 = sld [smem:[#allocation5 + %s2131_s23]] }
 0x1da   : > { %3392 = vmatmul.msk.f32.gmra.mxu3 %vm404_vm1, %v5041_v28  ;;  %v5099_v48 = vadd.f32 %v3721_v44, %v4974_v50  ;;  %s5572_s16 = sld [smem:[#allocation5 + %s2135_s3]] }
 0x1db   : > { %2686 = vrot.lane.b32.xlu2 %v2329_v11, %s6201_s2  ;;  %2624 = vrot.lane.b32.xlu0 %v2323_v1, %s6201_s2  ;;  %v2585_v11 = vadd.f32 %v2554_v6, %v4914_v27  ;;  %s5576_s22 = sld [smem:[#allocation5 + %s2139_s0]]  ;;  %s6406_s0 = smov 32  }
 0x1dc   : > { %2407 = vrot.lane.b32.xlu1 %v2302_v30, %s6201_s2  ;;  %s6401_s11 = sld [smem:[#allocation77_spill]] }
 0x1dd   : > { %s5580_s27 = sld [smem:[#allocation5 + %s2143_s13]] }
 0x1de   : > { %s6404_s7 = sld [smem:[#allocation34_spill]] }
 0x1df   : > { %s6405_s9 = sld [smem:[#allocation78_spill]] }
 0x1e0   : > { %6399 = sst [smem:[#allocation143_spill]] %s5572_s16 }
 0x1e1   : > { %6400 = sst [smem:[#allocation144_spill]] %s5576_s22 }
 0x1e2   : > { %s6407_s5 = sld [smem:[#allocation100_spill]]  ;;  %s6411_s15 = scalar_lea.vmem [#allocation2], %s6401_s11 }
 0x1e3   : > { %2500 = vrot.lane.b32.xlu2 %v2311_v31, %s6201_s2  ;;  %2376 = vrot.lane.b32.xlu0 %v2299_v15, %s6201_s2  ;;  %v2616_v15 = vadd.f32 %v2585_v11, %v5001_v0  ;;  %6402 = sst [smem:[#allocation77_spill]] %s5580_s27 }
 0x1e4   : > { %2748 = vrot.lane.b32.xlu1 %v2335_v32, %s6201_s2  ;;  %s460_s24 = sld [smem:[#allocation5 + %s4313_s30]] }
 0x1e5   : > { %v2647_v25 = vadd.f32 %v2616_v15, %v4489_v54  ;;  %s6408_s13 = sld [smem:[#allocation82_spill]] }
 0x1e6   : > { %s579_s28 = sld [smem:[#allocation5 + %s4604_s1]]  ;;  %s6416_s1 = scalar_lea.vmem [#allocation2], %s6405_s9 }
 0x1e7   : > { %s691_s20 = sld [smem:[#allocation5 + %s4732_s21]] }
 0x1e8   : > { %s803_s12 = sld [smem:[#allocation5 + %s4903_s19]]  ;;  %s6418_s26 = scalar_lea.vmem [#allocation2], %s6407_s5 }
 0x1e9   : > { %v2314_v33 = vpop.f32.mrf.mxu1  ;;  %s6410_s23 = sld [smem:[#allocation35_spill]] }
 0x1ea   : > { %s6412_s6 = sld [smem:[#allocation79_spill]]  ;;  %s461_s3 = scalar_lea.vmem [#allocation2], %s460_s24 }
 0x1eb   : > { %2717 = vrot.lane.b32.xlu0 %v2332_v29, %s6201_s2  ;;  %s6413_s29 = sld [smem:[#allocation101_spill]] }
 0x1ec   : > { %s580_s27 = scalar_lea.vmem [#allocation2], %s579_s28  ;;  %s6415_s16 = sld [smem:[#allocation36_spill]] }
 0x1ed   : > { %s6417_s21 = sld [smem:[#allocation80_spill]]  ;;  %s692_s28 = scalar_lea.vmem [#allocation2], %s691_s20 }
 0x1ee   : > { %s5613_s24 = sld [smem:[#allocation5 + %s6408_s13]]  ;;  %s6429_s20 = scalar_lea.vmem [#allocation2], %s4932_s10 }
 0x1ef   : > { %s6419_s11 = sld [smem:[#allocation102_spill]] }
 0x1f0   : > { %s6424_s9 = sld [smem:[#allocation120_spill]] }
 0x1f1   : > { %s6427_s5 = sld [smem:[#allocation41_spill]] }
 0x1f2   : > { %s6551_s13 = sld [smem:[#allocation141_spill]] }
 0x1f3   : > { %2531 = vrot.lane.b32.xlu0 %v2314_v33, %s6201_s2 }
 0x1fb   : > { %2431 = vrot.lane.b32.xlu0 %v4786_v38, %s6201_s2 }
 0x205   : > { %v2338_v34 = vpop.f32.mrf.mxu3 }
 0x206   : > { %2779 = vrot.lane.b32.xlu2 %v2338_v34, %s6201_s2 }
 0x217   : > { %v2317_v37 = vpop.f32.mrf.mxu1 }
 0x22d   : > { %v2305_v35 = vpop.f32.mrf.mxu0  ;;  %v2470_v46 = vpop.permute.xlu2 %2469 }
 0x22e   : > { %2438 = vrot.lane.b32.xlu1 %v2305_v35, %s6201_s2  ;;  %v2472_v51 = vadd.f32 %v2470_v46, %v5099_v48 }
 0x230   : > { %v3397_v55 = vmul.f32 -1.442695, %v2472_v51 }
 0x232   : > { %3743 = vpow2.f32 %v3397_v55 }
 0x235   : > { %v2687_v57 = vpop.permute.xlu2 %2686 }
 0x236   : > { %2562 = vrot.lane.b32.xlu1 %v2317_v37, %s6201_s2  ;;  %v2678_v37 = vadd.f32 %v2647_v25, %v4573_v20 }
 0x238   : > { %v3744_v63 = vpop.eup %3743  ;;  %v2709_v51 = vadd.f32 %v2678_v37, %v4531_v5 }
 0x23d   : > { %v2501_v1 = vpop.permute.xlu2 %2500 }
 0x23e   : > { %2369 = vrot.lane.b32.xlu1 %v4403_v24, %s6201_s2  ;;  %v2689_v24 = vadd.f32 %v2687_v57, %v5099_v48 }
 0x240   : > { %v3404_v2 = vmul.f32 -1.442695, %v2689_v24 }
 0x242   : > { %v2320_v40 = vpop.f32.mrf.mxu1  ;;  %3745 = vpow2.f32 %v3404_v2 }
 0x243   : > { %2593 = vrot.lane.b32.xlu2 %v2320_v40, %s6201_s2 }
 0x245   : > { %v2346_v43 = vpop.permute.xlu0 %2345 }
 0x246   : > { %2462 = vrot.lane.b32.xlu1 %v4955_v45, %s6201_s2  ;;  %v5103_v58 = vpop.permute.xlu1 %2655  ;;  %v5112_v45 = vadd.f32 1.0, %v3744_v63 }
 0x248   : > { %v3746_v14 = vpop.eup %3745  ;;  %vm2482_vm10 = vweird.f32 %v5112_v45 }
 0x249   : > { %v5126_v23 = vadd.f32 1.0, %v3746_v14 }
 0x24b   : > { %2400 = vrot.lane.b32.xlu2 %v4658_v52, %s6201_s2  ;;  %v2348_v52 = vadd.f32 %v2346_v43, %v5099_v48  ;;  %v2705_v15 = vand.u32 2147483648, %v5126_v23  ;;  %vm2699_vm8 = vweird.f32 %v5126_v23 }
 0x24d   : > { %v2625_v49 = vpop.permute.xlu0 %2624  ;;  %v3393_v3 = vmul.f32 -1.442695, %v2348_v52 }
 0x24e   : > { %2555 = vrot.lane.b32.xlu1 %v4827_v56, %s6201_s2  ;;  %v2408_v50 = vpop.permute.xlu1 %2407  ;;  %v2627_v13 = vadd.f32 %v2625_v49, %v5099_v48 }
 0x24f   : > { %v2410_v8 = vadd.f32 %v2408_v50, %v5099_v48  ;;  %3747 = vpow2.f32 %v3393_v3  ;;  %v2740_v50 = vadd.f32 %v2709_v51, %v4616_v36  ;;  %v2486_v3 = vand.u32 2147483647, %v5112_v45 }
 0x250   : > { %3749 = vrcp.f32 %v5112_v45  ;;  %v3402_v19 = vmul.f32 -1.442695, %v2627_v13 }
 0x251   : > { %v3395_v56 = vmul.f32 -1.442695, %v2410_v8  ;;  %v5182_v11 = vadd.f32 %v2740_v50, %v4744_v21  ;;  %vm2487_vm12 = vcmp.eq.f32.partialorder %v2486_v3, 8.507059e+37 }
 0x253   : > { %2493 = vrot.lane.b32.xlu2 %v4445_v39, %s6201_s2  ;;  %v2503_v39 = vadd.f32 %v2501_v1, %v5099_v48 }
 0x255   : > { %v2377_v61 = vpop.permute.xlu0 %2376  ;;  %v3398_v12 = vmul.f32 -1.442695, %v2503_v39  ;;  %v3748_v17 = vpop.eup %3747  ;;  %v2488_v39 = vand.u32 2147483648, %v5112_v45 }
 0x256   : > { %2648 = vrot.lane.b32.xlu1 %v4489_v54, %s6201_s2  ;;  %v2379_v38 = vadd.f32 %v2377_v61, %v5099_v48  ;;  %v5124_v18 = vpop.eup %3749  ;;  %v5131_v31 = vadd.f32 1.0, %v3748_v17 }
 0x257   : > { %v2478_v33 = vmul.f32 %v5124_v18, %v5112_v45  ;;  %vm2483_vm9 = vweird.f32 %v5124_v18 }
 0x258   : > { %v3394_v7 = vmul.f32 -1.442695, %v2379_v38  ;;  %vm5187_vm11 = vmor %vm2482_vm10, %vm2483_vm9  ;;  %vm2358_vm15 = vweird.f32 %v5131_v31 }
 0x259   : > { %v2479_v44 = vsub.f32 1.0, %v2478_v33 }
 0x25a   : > { %3751 = vpow2.f32 %v3394_v7 }
 0x25b   : > { %2586 = vrot.lane.b32.xlu2 %v4914_v27, %s6201_s2  ;;  %3753 = vpow2.f32 %v3398_v12  ;;  %v2480_v60 = vmul.f32 %v5124_v18, %v2479_v44 }
 0x25c   : > { %3755 = vpow2.f32 %v3395_v56 }
 0x25d   : > { %v2341_v41 = vpop.f32.mrf.mxu3  ;;  %v5116_v10 = vpop.permute.xlu0 %2717  ;;  %3757 = vpow2.f32 %v3402_v19  ;;  %v2481_v2 = vadd.f32 %v5124_v18, %v2480_v60  ;;  %v2362_v60 = vand.u32 2147483647, %v5131_v31 }
 0x25e   : > { %2810 = vrot.lane.b32.xlu0 %v2341_v41, %s6201_s2  ;;  %2741 = vrot.lane.b32.xlu1 %v4616_v36, %s6201_s2  ;;  %3759 = vrcp.f32 %v5126_v23  ;;  %v2720_v17 = vadd.f32 %v5116_v10, %v5099_v48 }
 0x260   : > { %v2780_v16 = vpop.permute.xlu2 %2779  ;;  %v3752_v22 = vpop.eup %3751  ;;  %v3405_v37 = vmul.f32 -1.442695, %v2720_v17 }
 0x261   : > { %v2782_v26 = vadd.f32 %v2780_v16, %v5099_v48  ;;  %v5133_v32 = vadd.f32 1.0, %v3752_v22 }
 0x263   : > { %2679 = vrot.lane.b32.xlu2 %v4573_v20, %s6201_s2  ;;  %v3407_v40 = vmul.f32 -1.442695, %v2782_v26  ;;  %v2658_v20 = vadd.f32 %v5103_v58, %v5099_v48  ;;  %vm2389_vm9 = vweird.f32 %v5133_v32 }
 0x265   : > { %v2532_v29 = vpop.permute.xlu0 %2531  ;;  %v3403_v62 = vmul.f32 -1.442695, %v2658_v20 }
 0x266   : > { %2524 = vrot.lane.b32.xlu0 %v4699_v4, %s6201_s2  ;;  %2834 = vrot.lane.b32.xlu1 %v5041_v28, %s6201_s2  ;;  %v5118_v4 = vpop.permute.xlu1 %2748  ;;  %v2534_v54 = vadd.f32 %v2532_v29, %v5099_v48 }
 0x267   : > { %v2751_v29 = vadd.f32 %v5118_v4, %v5099_v48 }
 0x268   : > { %v3399_v46 = vmul.f32 -1.442695, %v2534_v54 }
 0x269   : > { %v3406_v20 = vmul.f32 -1.442695, %v2751_v29 }
 0x26b   : > { %2772 = vrot.lane.b32.xlu2 %v4744_v21, %s6201_s2  ;;  %v2485_v21 = vsel %vm5187_vm11, %v5124_v18, %v2481_v2  ;;  %v2703_v18 = vand.u32 2147483647, %v5126_v23  ;;  %v2395_v2 = vand.u32 2147483648, %v5133_v32  ;;  %vm5259_vm11 = vcmp.eq.f32.partialorder %v2362_v60, 8.507059e+37 }
 0x26e   : > { %2617 = vrot.lane.b32.xlu0 %v5001_v0, %s6201_s2  ;;  %2908 = vrot.lane.b32.xlu1 %v3813_v42, %s6201_s2  ;;  %v3754_v0 = vpop.eup %3753 }
 0x26f   : > { %v3756_v35 = vpop.eup %3755  ;;  %v5140_v41 = vadd.f32 1.0, %v3754_v0 }
 0x270   : > { %v5144_v43 = vadd.f32 1.0, %v3756_v35  ;;  %v3758_v49 = vpop.eup %3757  ;;  %v5216_v35 = vor.u32 1.1754944e-38, %v2705_v15 }
 0x271   : > { %v5150_v55 = vpop.eup %3759  ;;  %v2519_v51 = vand.u32 2147483648, %v5140_v41 }
 0x272   : > { %v2695_v1 = vmul.f32 %v5150_v55, %v5126_v23 }
 0x274   : > { %v2696_v14 = vsub.f32 1.0, %v2695_v1 }
 0x276   : > { %2710 = vrot.lane.b32.xlu0 %v4531_v5, %s6201_s2  ;;  %v5158_v5 = vadd.f32 1.0, %v3758_v49 }
 0x27e   : > { %2803 = vrot.lane.b32.xlu0 %v4871_v9, %s6201_s2  ;;  %s6403_s2 = sld [smem:[#allocation37_spill]] }
 0x284   : > { %s5602_s22 = sld [smem:[#allocation5 + %s6403_s2]] }
 0x29d   : > { %v2594_v42 = vpop.permute.xlu2 %2593 }
 0x29e   : > { %v2596_v57 = vadd.f32 %v2594_v42, %v5099_v48 }
 0x2a0   : > { %v2439_v27 = vpop.permute.xlu1 %2438  ;;  %v3401_v63 = vmul.f32 -1.442695, %v2596_v57 }
 0x2a1   : > { %v2441_v30 = vadd.f32 %v2439_v27, %v5099_v48  ;;  %v2489_v27 = vor.u32 1.1754944e-38, %v2488_v39 }
 0x2a3   : > { %v3396_v34 = vmul.f32 -1.442695, %v2441_v30  ;;  %v5213_v33 = vsel %vm2487_vm12, %v2489_v27, %v2485_v21  ;;  %v2643_v21 = vand.u32 2147483648, %v5158_v5  ;;  %v2396_v27 = vor.u32 1.1754944e-38, %v2395_v2 }
 0x2a5   : > { %3761 = vpow2.f32 %v3396_v34  ;;  %v2697_v34 = vmul.f32 %v5150_v55, %v2696_v14 }
 0x2a6   : > { %3763 = vrcp.f32 %v5131_v31 }
 0x2a7   : > { %3765 = vrcp.f32 %v5133_v32  ;;  %v5233_v50 = vadd.f32 %v5150_v55, %v2697_v34 }
 0x2a8   : > { %v2563_v47 = vpop.permute.xlu1 %2562  ;;  %3767 = vpow2.f32 %v3407_v40  ;;  %v2517_v40 = vand.u32 2147483647, %v5140_v41 }
 0x2a9   : > { %v2565_v53 = vadd.f32 %v2563_v47, %v5099_v48  ;;  %3769 = vrcp.f32 %v5140_v41 }
 0x2aa   : > { %3771 = vrcp.f32 %v5144_v43 }
 0x2ab   : > { %v3762_v59 = vpop.eup %3761  ;;  %v3400_v61 = vmul.f32 -1.442695, %v2565_v53  ;;  %3773 = vpow2.f32 %v3399_v46 }
 0x2ac   : > { %v5156_v24 = vpop.eup %3763  ;;  %v5160_v58 = vadd.f32 1.0, %v3762_v59 }
 0x2ad   : > { %v5162_v52 = vpop.eup %3765  ;;  %3775 = vpow2.f32 %v3400_v61  ;;  %v2354_v7 = vmul.f32 %v5156_v24, %v5131_v31  ;;  %v2364_v61 = vand.u32 2147483648, %v5131_v31  ;;  %vm2359_vm13 = vweird.f32 %v5156_v24 }
 0x2ae   : > { %3777 = vrcp.f32 %v5160_v58  ;;  %v3768_v38 = vpop.eup %3767  ;;  %v2385_v36 = vmul.f32 %v5162_v52, %v5133_v32  ;;  %vm2390_vm14 = vweird.f32 %v5162_v52  ;;  %vm5255_vm10 = vmor %vm2358_vm15, %vm2359_vm13  ;;  %vm2513_vm13 = vweird.f32 %v5140_v41 }
 0x2af   : > { %v5171_v6 = vpop.eup %3769  ;;  %3779 = vrcp.f32 %v5158_v5  ;;  %v5185_v56 = vadd.f32 1.0, %v3768_v38  ;;  %v2355_v26 = vsub.f32 1.0, %v2354_v7  ;;  %v2365_v31 = vor.u32 1.1754944e-38, %v2364_v61  ;;  %vm5268_vm12 = vmor %vm2389_vm9, %vm2390_vm14 }
 0x2b0   : > { %v5179_v8 = vpop.eup %3771  ;;  %3781 = vpow2.f32 %v3403_v62  ;;  %v2509_v45 = vmul.f32 %v5171_v6, %v5140_v41  ;;  %v2386_v22 = vsub.f32 1.0, %v2385_v36  ;;  %v5223_v47 = vpop.permute.xlu1 %2369  ;;  %vm2514_vm0 = vweird.f32 %v5171_v6 }
 0x2b1   : > { %v3774_v12 = vpop.eup %3773  ;;  %3783 = vpow2.f32 %v3401_v63  ;;  %v2416_v10 = vmul.f32 %v5179_v8, %v5144_v43  ;;  %v2356_v49 = vmul.f32 %v5156_v24, %v2355_v26  ;;  %vm2700_vm15 = vweird.f32 %v5150_v55 }
 0x2b2   : > { %v5205_v30 = vadd.f32 1.0, %v3774_v12  ;;  %3785 = vrcp.f32 %v5185_v56  ;;  %v2510_v4 = vsub.f32 1.0, %v2509_v45  ;;  %v2387_v46 = vmul.f32 %v5162_v52, %v2386_v22  ;;  %v2401_v45 = vpop.permute.xlu2 %2400 }
 0x2b3   : > { %v3776_v16 = vpop.eup %3775  ;;  %v2417_v53 = vsub.f32 1.0, %v2416_v10  ;;  %v2357_v3 = vadd.f32 %v5156_v24, %v2356_v49  ;;  %vm2421_vm14 = vweird.f32 %v5179_v8  ;;  %vm2451_vm6 = vweird.f32 %v5160_v58 }
 0x2b4   : > { %v5199_v19 = vpop.eup %3777  ;;  %v5201_v25 = vadd.f32 1.0, %v3776_v16  ;;  %v2511_v63 = vmul.f32 %v5171_v6, %v2510_v4  ;;  %v2388_v38 = vadd.f32 %v5162_v52, %v2387_v46  ;;  %v2393_v16 = vand.u32 2147483647, %v5133_v32 }
 0x2b5   : > { %v5210_v0 = vpop.eup %3779  ;;  %v2447_v42 = vmul.f32 %v5199_v19, %v5160_v58  ;;  %v2418_v36 = vmul.f32 %v5179_v8, %v2417_v53  ;;  %v2361_v32 = vsel %vm5255_vm10, %v5156_v24, %v2357_v3  ;;  %vm2452_vm9 = vweird.f32 %v5199_v19 }
 0x2b6   : > { %v3782_v54 = vpop.eup %3781  ;;  %3787 = vrcp.f32 %v5201_v25  ;;  %v5274_v17 = vadd.f32 %v5171_v6, %v2511_v63  ;;  %v2392_v22 = vsel %vm5268_vm12, %v5162_v52, %v2388_v38  ;;  %v2432_v52 = vpop.permute.xlu0 %2431  ;;  %vm2420_vm12 = vweird.f32 %v5144_v43 }
 0x2b7   : > { %v3784_v44 = vpop.eup %3783  ;;  %3789 = vrcp.f32 %v5205_v30  ;;  %v2448_v57 = vsub.f32 1.0, %v2447_v42  ;;  %v5228_v59 = vadd.f32 1.0, %v3782_v54  ;;  %v2419_v29 = vadd.f32 %v5179_v8, %v2418_v36  ;;  %vm5299_vm7 = vmor %vm2420_vm12, %vm2421_vm14 }
 0x2b8   : > { %v5235_v62 = vadd.f32 1.0, %v3784_v44  ;;  %3791 = vpow2.f32 %v3405_v37  ;;  %v5239_v1 = vpop.eup %3785  ;;  %v2426_v54 = vand.u32 2147483648, %v5144_v43  ;;  %v2463_v37 = vpop.permute.xlu1 %2462  ;;  %v2457_v24 = vand.u32 2147483648, %v5160_v58  ;;  %vm5314_vm14 = vmor %vm2451_vm6, %vm2452_vm9 }
 0x2b9   : > { %3793 = vpow2.f32 %v3406_v20  ;;  %v2449_v39 = vmul.f32 %v5199_v19, %v2448_v57  ;;  %vm2394_vm10 = vcmp.eq.f32.partialorder %v2393_v16, 8.507059e+37  ;;  %v2424_v46 = vand.u32 2147483647, %v5144_v43 }
 0x2ba   : > { %3795 = vrcp.f32 %v5228_v59  ;;  %v2455_v49 = vand.u32 2147483647, %v5160_v58  ;;  %v2397_v53 = vsel %vm2394_vm10, %v2396_v27, %v2392_v22  ;;  %v2366_v60 = vsel %vm5259_vm11, %v2365_v31, %v2361_v32  ;;  %v2494_v32 = vpop.permute.xlu2 %2493 }
 0x2bb   : > { %3797 = vrcp.f32 %v5235_v62  ;;  %v2450_v34 = vadd.f32 %v5199_v19, %v2449_v39  ;;  %v2633_v43 = vmul.f32 %v5210_v0, %v5158_v5  ;;  %v2423_v58 = vsel %vm5299_vm7, %v5179_v8, %v2419_v29  ;;  %vm5338_vm7 = vmor %vm2513_vm13, %vm2514_vm0 }
 0x2bc   : > { %v5249_v7 = vpop.eup %3787  ;;  %v2372_v2 = vmul.f32 %v5223_v47, %v2366_v60  ;;  %v2427_v39 = vor.u32 1.1754944e-38, %v2426_v54  ;;  %v2458_v12 = vor.u32 1.1754944e-38, %v2457_v24  ;;  %v2403_v31 = vmul.f32 %v2401_v45, %v2397_v53  ;;  %vm5359_vm0 = vmor %vm2699_vm8, %vm2700_vm15  ;;  %v2847_v53 = vld [vmem:[#allocation15 + $0x30] sm:$0xff] }
 0x2bd   : > { %v5263_v14 = vpop.eup %3789  ;;  %v2571_v10 = vmul.f32 %v5249_v7, %v5201_v25  ;;  %v2454_v3 = vsel %vm5314_vm14, %v5199_v19, %v2450_v34  ;;  %vm2425_vm6 = vcmp.eq.f32.partialorder %v2424_v46, 8.507059e+37  ;;  %vm2456_vm11 = vcmp.eq.f32.partialorder %v2455_v49, 8.507059e+37  ;;  %v2848_v49 = vld [vmem:[#allocation15 + $0x38] sm:$0xff] }
 0x2be   : > { %v3792_v26 = vpop.eup %3791  ;;  %v2540_v4 = vmul.f32 %v5263_v14, %v5205_v30  ;;  %v2428_v8 = vsel %vm2425_vm6, %v2427_v39, %v2423_v58  ;;  %v2459_v47 = vsel %vm2456_vm11, %v2458_v12, %v2454_v3  ;;  %v2404_v45 = vadd.f32 %v2403_v31, %v2372_v2  ;;  %2861 = vmatpush.msra.mxu2 %v2848_v49  ;;  %v2846_v3 = vld [vmem:[#allocation15 + $0x28] sm:$0xff] }
 0x2bf   : > { %v3794_v42 = vpop.eup %3793  ;;  %v5308_v57 = vadd.f32 1.0, %v3792_v26  ;;  %v2572_v38 = vsub.f32 1.0, %v2571_v10  ;;  %v2516_v22 = vsel %vm5338_vm7, %v5171_v6, %v5274_v17  ;;  %vm2518_vm9 = vcmp.eq.f32.partialorder %v2517_v40, 8.507059e+37 }
 0x2c0   : > { %v5306_v20 = vpop.eup %3795  ;;  %v5329_v36 = vadd.f32 1.0, %v3794_v42  ;;  %v2541_v13 = vsub.f32 1.0, %v2540_v4  ;;  %v2520_v26 = vor.u32 1.1754944e-38, %v2519_v51  ;;  %v2634_v6 = vsub.f32 1.0, %v2633_v43  ;;  %v5368_v42 = vpop.permute.xlu1 %2555  ;;  %2862 = vmatpush.msra.mxu2 %v2847_v53 }
 0x2c1   : > { %v5320_v63 = vpop.eup %3797  ;;  %v2664_v15 = vmul.f32 %v5306_v20, %v5228_v59  ;;  %3799 = vrcp.f32 %v5308_v57  ;;  %v2573_v27 = vmul.f32 %v5249_v7, %v2572_v38  ;;  %v2434_v40 = vmul.f32 %v2432_v52, %v2428_v8 }
 0x2c2   : > { %v2602_v16 = vmul.f32 %v5320_v63, %v5235_v62  ;;  %3801 = vrcp.f32 %v5329_v36  ;;  %v2542_v29 = vmul.f32 %v5263_v14, %v2541_v13  ;;  %v2465_v17 = vmul.f32 %v2463_v37, %v2459_v47  ;;  %2863 = vmatpush.msra.mxu2 %v2846_v3 }
 0x2c3   : > { %v2702_v34 = vsel %vm5359_vm0, %v5150_v55, %v5233_v50  ;;  %v2641_v41 = vand.u32 2147483647, %v5158_v5  ;;  %v2665_v51 = vsub.f32 1.0, %v2664_v15  ;;  %v2521_v24 = vsel %vm2518_vm9, %v2520_v26, %v2516_v22  ;;  %v2587_v26 = vpop.permute.xlu2 %2586 }
 0x2c4   : > { %v2603_v4 = vsub.f32 1.0, %v2602_v16  ;;  %v5372_v44 = vor.u32 1.1754944e-38, %v2643_v21  ;;  %v2435_v37 = vadd.f32 %v2434_v40, %v2404_v45  ;;  %v2574_v46 = vadd.f32 %v5249_v7, %v2573_v27 }
 0x2c5   : > { %vm2576_vm8 = vweird.f32 %v5249_v7  ;;  %v2543_v61 = vadd.f32 %v5263_v14, %v2542_v29  ;;  %vm2545_vm13 = vweird.f32 %v5263_v14  ;;  %v2581_v43 = vand.u32 2147483648, %v5201_v25 }
 0x2c6   : > { %v2635_v21 = vmul.f32 %v5210_v0, %v2634_v6  ;;  %v2466_v38 = vadd.f32 %v2465_v17, %v2435_v37  ;;  %vm2575_vm15 = vweird.f32 %v5201_v25  ;;  %v2579_v2 = vand.u32 2147483647, %v5201_v25 }
 0x2c7   : > { %v5377_v60 = vpop.eup %3799  ;;  %v2496_v12 = vmul.f32 %v2494_v32, %v5213_v33  ;;  %vm2544_vm12 = vweird.f32 %v5205_v30  ;;  %v2548_v13 = vand.u32 2147483647, %v5205_v30  ;;  %v2550_v31 = vand.u32 2147483648, %v5205_v30  ;;  %vm5393_vm10 = vmor %vm2575_vm15, %vm2576_vm8  ;;  %v2845_v30 = vld [vmem:[#allocation15 + $0x20] sm:$0xff]  ;;  %v2844_v32 = vld [vmem:[#allocation15 + $0x18] sm:$0xff] }
 0x2c8   : > { %v5385_v39 = vpop.eup %3801  ;;  %v2604_v25 = vmul.f32 %v5320_v63, %v2603_v4  ;;  %v2578_v33 = vsel %vm5393_vm10, %v5249_v7, %v2574_v46  ;;  %vm2637_vm14 = vweird.f32 %v5158_v5  ;;  %v2726_v8 = vmul.f32 %v5377_v60, %v5308_v57  ;;  %vm5407_vm6 = vmor %vm2544_vm12, %vm2545_vm13  ;;  %2864 = vmatpush.msra.mxu2 %v2845_v30  ;;  %v2649_v53 = vpop.permute.xlu1 %2648 }
 0x2c9   : > { %v2666_v19 = vmul.f32 %v5306_v20, %v2665_v51  ;;  %v2582_v16 = vor.u32 1.1754944e-38, %v2581_v43  ;;  %vm2638_vm11 = vweird.f32 %v5210_v0  ;;  %v5414_v7 = vmul.f32 %v5239_v1, %v5185_v56 }
 0x2ca   : > { %v2757_v45 = vmul.f32 %v5385_v39, %v5329_v36  ;;  %v2497_v22 = vadd.f32 %v2496_v12, %v2466_v38  ;;  %v2547_v27 = vsel %vm5407_vm6, %v5263_v14, %v2543_v61  ;;  %vm2580_vm7 = vcmp.eq.f32.partialorder %v2579_v2, 8.507059e+37  ;;  %2865 = vmatpush.msra.mxu2 %v2844_v32 }
 0x2cb   : > { %vm2607_vm9 = vweird.f32 %v5320_v63  ;;  %v2551_v6 = vor.u32 1.1754944e-38, %v2550_v31  ;;  %v2583_v40 = vsel %vm2580_vm7, %v2582_v16, %v2578_v33  ;;  %v2636_v17 = vadd.f32 %v5210_v0, %v2635_v21 }
 0x2cc   : > { %vm2549_vm8 = vcmp.eq.f32.partialorder %v2548_v13, 8.507059e+37  ;;  %vm5424_vm13 = vcmp.eq.f32.partialorder %v2641_v41, 8.507059e+37  ;;  %v2727_v14 = vsub.f32 1.0, %v2726_v8  ;;  %vm2606_vm15 = vweird.f32 %v5235_v62 }
 0x2cd   : > { %v2610_v37 = vand.u32 2147483647, %v5235_v62  ;;  %v2612_v46 = vand.u32 2147483648, %v5235_v62  ;;  %v2552_v49 = vsel %vm2549_vm8, %v2551_v6, %v2547_v27  ;;  %v2589_v41 = vmul.f32 %v2587_v26, %v2583_v40  ;;  %vm5441_vm10 = vmor %vm2606_vm15, %vm2607_vm9 }
 0x2ce   : > { %v2558_v21 = vmul.f32 %v5368_v42, %v2552_v49  ;;  %vm2669_vm12 = vweird.f32 %v5306_v20  ;;  %v2672_v38 = vand.u32 2147483647, %v5228_v59  ;;  %v2674_v2 = vand.u32 2147483648, %v5228_v59  ;;  %vm5462_vm9 = vmor %vm2637_vm14, %vm2638_vm11 }
 0x2cf   : > { %v2667_v42 = vadd.f32 %v5306_v20, %v2666_v19  ;;  %vm5451_vm6 = vcmp.eq.f32.partialorder %v2703_v18, 8.507059e+37  ;;  %v2728_v62 = vmul.f32 %v5377_v60, %v2727_v14  ;;  %vm2668_vm7 = vweird.f32 %v5228_v59 }
 0x2d0   : > { %v2811_v54 = vpop.permute.xlu0 %2810  ;;  %v2613_v33 = vor.u32 1.1754944e-38, %v2612_v46  ;;  %v2789_v23 = vsub.f32 1.0, %v5414_v7  ;;  %vm2611_vm8 = vcmp.eq.f32.partialorder %v2610_v37, 8.507059e+37  ;;  %v2640_v59 = vsel %vm5462_vm9, %v5210_v0, %v2636_v17  ;;  %vm5473_vm15 = vmor %vm2668_vm7, %vm2669_vm12  ;;  %v2742_v4 = vpop.permute.xlu1 %2741 }
 0x2d1   : > { %v2813_v52 = vadd.f32 %v2811_v54, %v5099_v48  ;;  %v2605_v54 = vadd.f32 %v5320_v63, %v2604_v25  ;;  %v2841_v25 = vld [vmem:[#allocation15] sm:$0xff]  ;;  %vm5477_vm14 = vcmp.eq.f32.partialorder %v2672_v38, 8.507059e+37  ;;  %v2675_v19 = vor.u32 1.1754944e-38, %v2674_v2 }
 0x2d2   : > { %vm2730_vm11 = vweird.f32 %v5308_v57  ;;  %v2671_v0 = vsel %vm5473_vm15, %v5306_v20, %v2667_v42  ;;  %vm2731_vm12 = vweird.f32 %v5377_v60  ;;  %v2645_v27 = vsel %vm5424_vm13, %v5372_v44, %v2640_v59 }
 0x2d3   : > { %v3408_v58 = vmul.f32 -1.442695, %v2813_v52  ;;  %v2843_v52 = vld [vmem:[#allocation15 + $0x10] sm:$0xff]  ;;  %v2609_v13 = vsel %vm5441_vm10, %v5320_v63, %v2605_v54  ;;  %v2790_v32 = vmul.f32 %v5239_v1, %v2789_v23  ;;  %v2734_v26 = vand.u32 2147483647, %v5308_v57  ;;  %vm5504_vm13 = vmor %vm2730_vm11, %vm2731_vm12 }
 0x2d4   : > { %2866 = vmatpush.msra.mxu2 %v2843_v52  ;;  %v2614_v16 = vsel %vm2611_vm8, %v2613_v33, %v2609_v13  ;;  %vm2762_vm10 = vweird.f32 %v5385_v39  ;;  %v2651_v40 = vmul.f32 %v2649_v53, %v2645_v27  ;;  %vm2761_vm7 = vweird.f32 %v5329_v36  ;;  %v3610_v27 = vld [vmem:[%s6416_s1] ss:$0 sm:$0xff]  ;;  %s6425_s1 = sld [smem:[#allocation131_spill]] }
 0x2d5   : > { %3803 = vpow2.f32 %v3408_v58  ;;  %v2842_v58 = vld [vmem:[#allocation15 + $0x8] sm:$0xff]  ;;  %v2765_v44 = vand.u32 2147483647, %v5329_v36  ;;  %v2767_v54 = vand.u32 2147483648, %v5329_v36  ;;  %vm5512_vm9 = vmor %vm2761_vm7, %vm2762_vm10  ;;  %vm2792_vm8 = vweird.f32 %v5185_v56 }
 0x2d6   : > { %2867 = vmatpush.msra.mxu2 %v2842_v58  ;;  %vm2793_vm15 = vweird.f32 %v5239_v1  ;;  %v2791_v55 = vadd.f32 %v5239_v1, %v2790_v32  ;;  %v2796_v38 = vand.u32 2147483647, %v5185_v56  ;;  %v2798_v2 = vand.u32 2147483648, %v5185_v56 }
 0x2d7   : > { %vm2766_vm11 = vcmp.eq.f32.partialorder %v2765_v44, 8.507059e+37  ;;  %v2768_v10 = vor.u32 1.1754944e-38, %v2767_v54 }
 0x2d8   : > { %v2525_v29 = vpop.permute.xlu0 %2524  ;;  %2868 = vmatpush.msra.mxu2 %v2841_v25  ;;  %v2799_v63 = vor.u32 1.1754944e-38, %v2798_v2  ;;  %v2835_v56 = vpop.permute.xlu1 %2834  ;;  %vm2797_vm7 = vcmp.eq.f32.partialorder %v2796_v38, 8.507059e+37 }
 0x2d9   : > { %v2527_v51 = vmul.f32 %v2525_v29, %v2521_v24  ;;  %v2758_v24 = vsub.f32 1.0, %v2757_v45  ;;  %v2729_v45 = vadd.f32 %v5377_v60, %v2728_v62  ;;  %v2736_v29 = vand.u32 2147483648, %v5308_v57 }
 0x2da   : > { %v2707_v57 = vsel %vm5451_vm6, %v5216_v35, %v2702_v34  ;;  %vm5537_vm6 = vmor %vm2792_vm8, %vm2793_vm15  ;;  %vm6456_vm8 = vcmask 1044480  }
 0x2db   : > { %v3804_v61 = vpop.eup %3803  ;;  %v2528_v43 = vadd.f32 %v2527_v51, %v2497_v22  ;;  %v2759_v18 = vmul.f32 %v5385_v39, %v2758_v24  ;;  %v2680_v22 = vpop.permute.xlu2 %2679  ;;  %v2676_v51 = vsel %vm5477_vm14, %v2675_v19, %v2671_v0  ;;  %v2733_v46 = vsel %vm5504_vm13, %v5377_v60, %v2729_v45  ;;  %v3609_v0 = vld [vmem:[%s6411_s15] ss:$0 sm:$0xff]  ;;  %s6422_s15 = sld [smem:[#allocation38_spill]]  ;;  %vm6457_vm15 = vmmov %vm6456_vm8 }
 0x2dc   : > { %v5435_v3 = vadd.f32 1.0, %v3804_v61  ;;  %v2682_v52 = vmul.f32 %v2680_v22, %v2676_v51  ;;  %v2737_v36 = vor.u32 1.1754944e-38, %v2736_v29  ;;  %vm2735_vm14 = vcmp.eq.f32.partialorder %v2734_v26, 8.507059e+37  ;;  %v581_v45 = vld [vmem:[%s580_s27] sm:$0x1]  ;;  %s6420_s27 = sld [smem:[#allocation105_spill]] }
 0x2dd   : > { %v2559_v31 = vadd.f32 %v2558_v21, %v2528_v43  ;;  %v2760_v6 = vadd.f32 %v5385_v39, %v2759_v18  ;;  %v2795_v62 = vsel %vm5537_vm6, %v5239_v1, %v2791_v55  ;;  %v2802_v18 = vadd.f32 %v5182_v11, %v4871_v9  ;;  %v3525_v11 = vld [vmem:[%s6409_s14] ss:$0 sm:$0xff]  ;;  %s6421_s14 = scalar_lea.vmem [#allocation2], %s6410_s23  ;;  %s6431_s23 = scalar_lea.vmem [#allocation2], %s6417_s21 }
 0x2de   : > { %3805 = vrcp.f32 %v5435_v3  ;;  %v2738_v50 = vsel %vm2735_vm14, %v2737_v36, %v2733_v46  ;;  %vm2823_vm12 = vweird.f32 %v5435_v3  ;;  %v2800_v59 = vsel %vm2797_vm7, %v2799_v63, %v2795_v62  ;;  %v3644_v29 = vld [vmem:[%s6418_s26] ss:$0 sm:$0xff]  ;;  %s6430_s26 = scalar_lea.vmem [#allocation2], %s6415_s16  ;;  %s6437_s16 = sld [smem:[#allocation42_spill]] }
 0x2df   : > { %v2590_v8 = vadd.f32 %v2589_v41, %v2559_v31  ;;  %v2764_v60 = vsel %vm5512_vm9, %v5385_v39, %v2760_v6  ;;  %v2744_v35 = vmul.f32 %v2742_v4, %v2738_v50  ;;  %v2829_v39 = vand.u32 2147483648, %v5435_v3  ;;  %v693_v6 = vld [vmem:[%s692_s28] sm:$0x1]  ;;  %s6432_s28 = sld [smem:[#allocation103_spill]] }
 0x2e0   : > { %v2618_v47 = vpop.permute.xlu0 %2617  ;;  %v2769_v58 = vsel %vm2766_vm11, %v2768_v10, %v2764_v60  ;;  %v2827_v31 = vand.u32 2147483647, %v5435_v3  ;;  %v5549_v19 = vadd.f32 %v2802_v18, %v5041_v28  ;;  %vm2849_vm9 = vcmask 523264   ;;  %v3693_v4 = vld [vmem:[%s6429_s20] ss:$0 sm:$0xff]  ;;  %s6438_s21 = sld [smem:[#allocation83_spill]] }
 0x2e1   : > { %v2620_v7 = vmul.f32 %v2618_v47, %v2614_v16  ;;  %v2830_v23 = vor.u32 1.1754944e-38, %v2829_v39  ;;  %v652_v26 = vsel %vm505_vm2, %v581_v45, %v3609_v0  ;;  %v764_v54 = vsel %vm505_vm2, %v693_v6, %v3644_v29  ;;  %v3528_v14 = vld [vmem:[%s6430_s26] ss:$0 sm:$0xff]  ;;  %s6435_s10 = scalar_lea.vmem [#allocation2], %s6422_s15  ;;  %s5641_s20 = sld [smem:[#allocation5 + %s6424_s9]] }
 0x2e2   : > { %vm2828_vm13 = vcmp.eq.f32.partialorder %v2827_v31, 8.507059e+37  ;;  %v653_v51 = vsel %vm507_vm3, %v652_v26, %v3610_v27  ;;  %s6440_s26 = sld [smem:[#allocation85_spill]]  ;;  %s916_s15 = scalar_lea.vmem [#allocation2], %s5602_s22  ;;  %vm6469_vm14 = vcmask 1045504   ;;  %vm6483_vm6 = vcmask 1046528  }
 0x2e3   : > { %v2621_v20 = vadd.f32 %v2620_v7, %v2590_v8  ;;  %v2773_v41 = vpop.permute.xlu2 %2772  ;;  %v462_v7 = vld [vmem:[%s461_s3] sm:$0x1]  ;;  %s6426_s3 = scalar_lea.vmem [#allocation2], %s6413_s29  ;;  %s6433_s29 = scalar_lea.vmem [#allocation2], %s6419_s11  ;;  %vm6471_vm11 = vmmov %vm6469_vm14 }
 0x2e4   : > { %v3806_v17 = vpop.eup %3805  ;;  %v2775_v15 = vmul.f32 %v2773_v41, %v2769_v58  ;;  %v540_v32 = vsel %vm505_vm2, %v462_v7, %v3525_v11  ;;  %v3645_v44 = vld [vmem:[%s6426_s3] ss:$0 sm:$0xff]  ;;  %s6436_s3 = sld [smem:[#allocation132_spill]]  ;;  %s6443_s11 = sadd.s32 8, %s4313_s30 }
 0x2e5   : > { %v2652_v37 = vadd.f32 %v2651_v40, %v2621_v20  ;;  %v2819_v49 = vmul.f32 %v3806_v17, %v5435_v3  ;;  %vm2824_vm0 = vweird.f32 %v3806_v17  ;;  %v3527_v20 = vld [vmem:[%s6421_s14] ss:$0 sm:$0xff]  ;;  %s6434_s14 = sld [smem:[#allocation39_spill]]  ;;  %v765_v36 = vsel %vm507_vm3, %v764_v54, %v3645_v44 }
 0x2e6   : > { %vm2825_vm10 = vmor %vm2823_vm12, %vm2824_vm0  ;;  %v3646_v53 = vld [vmem:[%s6433_s29] ss:$0 sm:$0xff]  ;;  %s5652_s29 = sld [smem:[#allocation5 + %s6443_s11]]  ;;  %s6453_s22 = scalar_lea.vmem [#allocation2], %s6438_s21 }
 0x2e7   : > { %v2683_v61 = vadd.f32 %v2682_v52, %v2652_v37  ;;  %v2820_v24 = vsub.f32 1.0, %v2819_v49  ;;  %v3612_v52 = vld [vmem:[%s6431_s23] ss:$0 sm:$0xff]  ;;  %s6441_s23 = scalar_lea.vmem [#allocation2], %s6427_s5  ;;  %s6445_s9 = sld [smem:[#allocation40_spill]]  ;;  %vm6477_vm0 = vmmov %vm6456_vm8 }
 0x2e8   : > { %v2711_v43 = vpop.permute.xlu0 %2710  ;;  %v917_v55 = vld [vmem:[%s916_s15] sm:$0x1]  ;;  %s6452_s11 = sld [smem:[#allocation84_spill]]  ;;  %s6455_s15 = scalar_lea.vmem [#allocation2], %s6440_s26  ;;  %vm6485_vm12 = vmmov %vm6483_vm6 }
 0x2e9   : > { %v2713_v21 = vmul.f32 %v2711_v43, %v2707_v57  ;;  %v2821_v34 = vmul.f32 %v3806_v17, %v2820_v24  ;;  %v3529_v57 = vld [vmem:[%s6435_s10] ss:$0 sm:$0xff]  ;;  %s6444_s10 = sld [smem:[#allocation104_spill]]  ;;  %vm6500_vm7 = vmmov %vm6477_vm0 }
 0x2ea   : > { %v3614_v38 = vld [vmem:[%s6453_s22] ss:$0 sm:$0xff]  ;;  %s6463_s26 = sld [smem:[#allocation87_spill]] }
 0x2eb   : > { %v2714_v42 = vadd.f32 %v2713_v21, %v2683_v61  ;;  %v2822_v13 = vadd.f32 %v3806_v17, %v2821_v34  ;;  %v3539_v61 = vld [vmem:[%s6441_s23] ss:$0 sm:$0xff]  ;;  %s6448_s5 = scalar_lea.vmem [#allocation2], %s6434_s14  ;;  %v766_v34 = vsel %vm509_vm4, %v765_v36, %v3646_v53  ;;  %s6450_s23 = scalar_lea.vmem [#allocation2], %s6436_s3 }
 0x2ec   : > { %v3695_v41 = vld [vmem:[%s6450_s23] ss:$0 sm:$0xff]  ;;  %s6458_s14 = sld [smem:[#allocation106_spill]] }
 0x2ed   : > { %v2745_v25 = vadd.f32 %v2744_v35, %v2714_v42  ;;  %v2826_v33 = vsel %vm2825_vm10, %v3806_v17, %v2822_v13  ;;  %v3530_v35 = vld [vmem:[%s6448_s5] ss:$0 sm:$0xff]  ;;  %v988_v42 = vsel %vm505_vm2, %v917_v55, %v3539_v61  ;;  %s6461_s21 = scalar_lea.vmem [#allocation2], %s6445_s9  ;;  %s6465_s23 = sld [smem:[#allocation107_spill]]  ;;  %vm6491_vm10 = vmmov %vm6471_vm11 }
 0x2ee   : > { %v2831_v1 = vsel %vm2828_vm13, %v2830_v23, %v2826_v33  ;;  %v3623_v2 = vld [vmem:[%s6455_s15] ss:$0 sm:$0xff]  ;;  %s6470_s9 = sadd.s32 11, %s4313_s30  ;;  %s6473_s15 = sld [smem:[#allocation123_spill]]  ;;  %vm6507_vm13 = vmmov %vm6483_vm6 }
 0x2ef   : > { %v2776_v8 = vadd.f32 %v2775_v15, %v2745_v25  ;;  %v2837_v5 = vmul.f32 %v2835_v56, %v2831_v1  ;;  %s6459_s3 = scalar_lea.vmem [#allocation2], %s6444_s10  ;;  %v3531_v62 = vld [vmem:[%s6461_s21] ss:$0 sm:$0xff] }
 0x2f0   : > { %v2804_v3 = vpop.permute.xlu0 %2803  ;;  %v3648_v15 = vld [vmem:[%s6459_s3] ss:$0 sm:$0xff]  ;;  %s6478_s3 = scalar_lea.vmem [#allocation2], %s4942_s18  ;;  %s6479_s21 = scalar_lea.vmem [#allocation2], %s6463_s26 }
 0x2f1   : > { %v2806_v30 = vmul.f32 %v2804_v3, %v2800_v59  ;;  %s6488_s26 = sld [smem:[#allocation109_spill]] }
 0x2f3   : > { %v2807_v47 = vadd.f32 %v2806_v30, %v2776_v8 }
 0x2f5   : > { %v2838_v16 = vadd.f32 %v2837_v5, %v2807_v47 }
 0x2f7   : > { %v2840_v9 = vsel %vm404_vm1, %v5549_v19, %v2838_v16  ;;  %v3697_v16 = vld [vmem:[%s6478_s3] ss:$0 sm:$0xff]  ;;  %s1364_s3 = scalar_lea.vmem [#allocation2], %s5652_s29  ;;  %s6502_s29 = scalar_lea.vmem [#allocation2], %s6488_s26 }
 0x2f8   : > { %3409 = vmatmul.msk.f32.vlgmr.msra.gmra.mxu2 %vm2849_vm9, %v2840_v9  ;;  %v3625_v9 = vld [vmem:[%s6479_s21] ss:$0 sm:$0xff] }
 0x37b   : > { %v5589_v28 = vpop.f32.mrf.mxu2 }
 0x37c   : > { %2894 = vrot.lane.b32.xlu2 %v5589_v28, %s6406_s0  ;;  %s6414_s0 = scalar_lea.vmem [#allocation2], %s6404_s7  ;;  %s6423_s7 = scalar_lea.vmem [#allocation2], %s6412_s6 }
 0x37d   : > { %v3526_v22 = vld [vmem:[%s6414_s0] ss:$0 sm:$0xff]  ;;  %s6428_s0 = sld [smem:[#allocation81_spill]]  ;;  %s804_s6 = scalar_lea.vmem [#allocation2], %s803_s12 }
 0x37e   : > { %v3611_v40 = vld [vmem:[%s6423_s7] ss:$0 sm:$0xff]  ;;  %v541_v17 = vsel %vm507_vm3, %v540_v32, %v3526_v22  ;;  %s5635_s7 = sld [smem:[#allocation5 + %s6420_s27]]  ;;  %s6439_s12 = scalar_lea.vmem [#allocation2], %s6425_s1 }
 0x37f   : > { %v805_v37 = vld [vmem:[%s804_s6] sm:$0x1]  ;;  %v542_v46 = vsel %vm509_vm4, %v541_v17, %v3527_v20  ;;  %v654_v49 = vsel %vm509_vm4, %v653_v51, %v3611_v40  ;;  %s6446_s1 = scalar_lea.vmem [#allocation2], %s6432_s28  ;;  %s6454_s27 = sld [smem:[#allocation86_spill]] }
 0x380   : > { %v3694_v60 = vld [vmem:[%s6439_s12] ss:$0 sm:$0xff]  ;;  %v876_v10 = vsel %vm505_vm2, %v805_v37, %v3693_v4  ;;  %v543_v43 = vsel %vm511_vm5, %v542_v46, %v3528_v14  ;;  %v655_v50 = vsel %vm511_vm5, %v654_v49, %v3612_v52  ;;  %s6447_s12 = sld [smem:[#allocation43_spill]]  ;;  %s1028_s28 = scalar_lea.vmem [#allocation2], %s5613_s24 }
 0x381   : > { %v3647_v21 = vld [vmem:[%s6446_s1] ss:$0 sm:$0xff]  ;;  %v877_v39 = vsel %vm507_vm3, %v876_v10, %v3694_v60  ;;  %v544_v12 = vsel %vm6456_vm8, %v543_v43, %v3529_v57  ;;  %s6467_s24 = scalar_lea.vmem [#allocation2], %s6452_s11  ;;  %s6475_s11 = sld [smem:[#allocation136_spill]]  ;;  %vm6515_vm8 = vmmov %vm6491_vm10 }
 0x382   : > { %v1029_v31 = vld [vmem:[%s1028_s28] sm:$0x1]  ;;  %v767_v33 = vsel %vm511_vm5, %v766_v34, %v3647_v21  ;;  %v878_v18 = vsel %vm509_vm4, %v877_v39, %v3695_v41  ;;  %v545_v8 = vsel %vm6469_vm14, %v544_v12, %v3530_v35  ;;  %s6474_s28 = scalar_lea.vmem [#allocation2], %s6458_s14  ;;  %s6484_s14 = sld [smem:[#allocation88_spill]]  ;;  %vm6527_vm14 = vmmov %vm6483_vm6 }
 0x383   : > { %s6442_s6 = scalar_lea.vmem [#allocation2], %s6428_s0  ;;  %s6449_s0 = sld [smem:[#allocation133_spill]]  ;;  %v3615_v56 = vld [vmem:[%s6467_s24] ss:$0 sm:$0xff]  ;;  %v1100_v1 = vsel %vm505_vm2, %v1029_v31, %v3623_v2  ;;  %v768_v47 = vsel %vm6477_vm0, %v767_v33, %v3648_v15  ;;  %v546_v45 = vsel %vm6483_vm6, %v545_v8, %v3531_v62 }
 0x384   : > { %v3613_v24 = vld [vmem:[%s6442_s6] ss:$0 sm:$0xff]  ;;  %s6451_s6 = scalar_lea.vmem [#allocation2], %s6437_s16  ;;  %s6460_s16 = sld [smem:[#allocation44_spill]] }
 0x385   : > { %v3540_v58 = vld [vmem:[%s6451_s6] ss:$0 sm:$0xff]  ;;  %v656_v13 = vsel %vm6457_vm15, %v655_v50, %v3613_v24  ;;  %s6466_s6 = sadd.s32 9, %s4313_s30  ;;  %s6468_s10 = scalar_lea.vmem [#allocation2], %s6454_s27  ;;  %vm6517_vm15 = vmmov %vm6477_vm0 }
 0x386   : > { %s6462_s1 = scalar_lea.vmem [#allocation2], %s6447_s12  ;;  %s5686_s22 = sld [smem:[#allocation5 + %s6466_s6]]  ;;  %v3624_v23 = vld [vmem:[%s6468_s10] ss:$0 sm:$0xff]  ;;  %v989_v3 = vsel %vm507_vm3, %v988_v42, %v3540_v58  ;;  %v657_v59 = vsel %vm6471_vm11, %v656_v13, %v3614_v38  ;;  %vm6528_vm11 = vmmov %vm6515_vm8 }
 0x387   : > { %v3541_v25 = vld [vmem:[%s6462_s1] ss:$0 sm:$0xff]  ;;  %s5697_s12 = sld [smem:[#allocation5 + %s6470_s9]]  ;;  %s1140_s6 = scalar_lea.vmem [#allocation2], %s5635_s7  ;;  %v658_v27 = vsel %vm6485_vm12, %v657_v59, %v3615_v56  ;;  %v1101_v32 = vsel %vm507_vm3, %v1100_v1, %v3624_v23  ;;  %vm6552_vm12 = vmmov %vm6515_vm8 }
 0x388   : > { %v3649_v30 = vld [vmem:[%s6474_s28] ss:$0 sm:$0xff]  ;;  %s6480_s1 = sld [smem:[#allocation134_spill]]  ;;  %v990_v22 = vsel %vm509_vm4, %v989_v3, %v3541_v25  ;;  %s6489_s7 = scalar_lea.vmem [#allocation2], %s6475_s11  ;;  %v2405_v52 = vadd.f32 %v658_v27, %v546_v45  ;;  %v1102_v37 = vsel %vm509_vm4, %v1101_v32, %v3625_v9 }
 0x389   : > { %s6464_s5 = scalar_lea.vmem [#allocation2], %s6449_s0  ;;  %s6472_s0 = sld [smem:[#allocation108_spill]]  ;;  %v1141_v0 = vld [vmem:[%s1140_s6] sm:$0x1]  ;;  %v769_v20 = vsel %vm6491_vm10, %v768_v47, %v3649_v30  ;;  %vm6575_vm10 = vmmov %vm6483_vm6 }
 0x38a   : > { %v3696_v63 = vld [vmem:[%s6464_s5] ss:$0 sm:$0xff]  ;;  %s6476_s27 = scalar_lea.vmem [#allocation2], %s6460_s16  ;;  %s6481_s5 = scalar_lea.vmem [#allocation2], %s6465_s23 }
 0x38b   : > { %v3542_v5 = vld [vmem:[%s6476_s27] ss:$0 sm:$0xff]  ;;  %s6482_s24 = sld [smem:[#allocation45_spill]]  ;;  %v879_v7 = vsel %vm511_vm5, %v878_v18, %v3696_v63  ;;  %s6487_s16 = scalar_lea.vmem [#allocation2], %s6473_s15 }
 0x38c   : > { %v3650_v11 = vld [vmem:[%s6481_s5] ss:$0 sm:$0xff]  ;;  %s6490_s23 = sld [smem:[#allocation124_spill]]  ;;  %s1252_s9 = scalar_lea.vmem [#allocation2], %s5641_s20  ;;  %v880_v4 = vsel %vm6500_vm7, %v879_v7, %v3697_v16  ;;  %v991_v14 = vsel %vm511_vm5, %v990_v22, %v3542_v5  ;;  %vm6577_vm7 = vmmov %vm6477_vm0 }
 0x38d   : > { %v3679_v29 = vld [vmem:[%s6487_s16] ss:$0 sm:$0xff]  ;;  %s6492_s10 = sld [smem:[#allocation137_spill]]  ;;  %s6498_s11 = scalar_lea.vmem [#allocation2], %s6484_s14  ;;  %v770_v57 = vsel %vm6507_vm13, %v769_v20, %v3650_v11  ;;  %vm6578_vm13 = vmmov %vm6477_vm0 }
 0x38e   : > { %v3707_v6 = vld [vmem:[%s6489_s7] ss:$0 sm:$0xff]  ;;  %s6493_s28 = scalar_lea.vmem [#allocation2], %s6480_s1  ;;  %s6494_s27 = sld [smem:[#allocation135_spill]]  ;;  %v2436_v58 = vadd.f32 %v2405_v52, %v770_v57 }
 0x38f   : > { %s6486_s18 = scalar_lea.vmem [#allocation2], %s6472_s0  ;;  %v1253_v40 = vld [vmem:[%s1252_s9] sm:$0x1]  ;;  %s6496_s5 = sld [smem:[#allocation46_spill]] }
 0x390   : > { %v3658_v26 = vld [vmem:[%s6486_s18] ss:$0 sm:$0xff]  ;;  %s6497_s0 = sadd.s32 10, %s4313_s30  ;;  %s6499_s6 = sld [smem:[#allocation89_spill]]  ;;  %v1324_v60 = vsel %vm505_vm2, %v1253_v40, %v3679_v29 }
 0x391   : > { %v3698_v17 = vld [vmem:[%s6493_s28] ss:$0 sm:$0xff]  ;;  %s6495_s21 = scalar_lea.vmem [#allocation2], %s6482_s24  ;;  %s5733_s15 = sld [smem:[#allocation5 + %s6497_s0]]  ;;  %v1212_v36 = vsel %vm505_vm2, %v1141_v0, %v3658_v26 }
 0x392   : > { %v1365_v51 = vld [vmem:[%s1364_s3] sm:$0x1]  ;;  %s6501_s20 = sld [smem:[#allocation110_spill]]  ;;  %s6504_s24 = scalar_lea.vmem [#allocation2], %s6490_s23  ;;  %v881_v55 = vsel %vm6515_vm8, %v880_v4, %v3698_v17  ;;  %vm6579_vm8 = vmmov %vm6477_vm0 }
 0x393   : > { %v3543_v44 = vld [vmem:[%s6495_s21] ss:$0 sm:$0xff]  ;;  %s6503_s1 = sld [smem:[#allocation125_spill]]  ;;  %s6506_s16 = scalar_lea.vmem [#allocation2], %s6492_s10  ;;  %v1436_v24 = vsel %vm505_vm2, %v1365_v51, %v3707_v6 }
 0x394   : > { %v3626_v54 = vld [vmem:[%s6498_s11] ss:$0 sm:$0xff]  ;;  %s6505_s18 = sld [smem:[#allocation138_spill]]  ;;  %s6508_s14 = scalar_lea.vmem [#allocation2], %s6494_s27  ;;  %v992_v50 = vsel %vm6517_vm15, %v991_v14, %v3543_v44  ;;  %vm6592_vm15 = vmmov %vm6528_vm11 }
 0x395   : > { %v3659_v46 = vld [vmem:[%s6502_s29] ss:$0 sm:$0xff]  ;;  %s6509_s7 = sld [smem:[#allocation47_spill]]  ;;  %s6511_s26 = scalar_lea.vmem [#allocation2], %s6496_s5  ;;  %v1103_v21 = vsel %vm511_vm5, %v1102_v37, %v3626_v54 }
 0x396   : > { %v3680_v49 = vld [vmem:[%s6504_s24] ss:$0 sm:$0xff]  ;;  %s6510_s9 = sld [smem:[#allocation90_spill]]  ;;  %s6512_s28 = sadd.s32 12, %s4313_s30  ;;  %v1213_v38 = vsel %vm507_vm3, %v1212_v36, %v3659_v46 }
 0x397   : > { %v3708_v53 = vld [vmem:[%s6506_s16] ss:$0 sm:$0xff]  ;;  %s5756_s23 = sld [smem:[#allocation5 + %s6512_s28]]  ;;  %s6513_s3 = scalar_lea.vmem [#allocation2], %s6499_s6  ;;  %v1325_v2 = vsel %vm507_vm3, %v1324_v60, %v3680_v49 }
 0x398   : > { %v3699_v61 = vld [vmem:[%s6508_s14] ss:$0 sm:$0xff]  ;;  %s6514_s10 = sld [smem:[#allocation111_spill]]  ;;  %s6519_s27 = scalar_lea.vmem [#allocation2], %s6501_s20  ;;  %v1437_v39 = vsel %vm507_vm3, %v1436_v24, %v3708_v53 }
 0x399   : > { %v3544_v10 = vld [vmem:[%s6511_s26] ss:$0 sm:$0xff]  ;;  %s6516_s21 = sld [smem:[#allocation126_spill]]  ;;  %s6520_s11 = scalar_lea.vmem [#allocation2], %s6503_s1  ;;  %v882_v13 = vsel %vm6527_vm14, %v881_v55, %v3699_v61  ;;  %vm6594_vm14 = vmmov %vm6528_vm11 }
 0x39a   : > { %v3627_v43 = vld [vmem:[%s6513_s3] ss:$0 sm:$0xff]  ;;  %s6518_s0 = sld [smem:[#allocation139_spill]]  ;;  %s6521_s5 = scalar_lea.vmem [#allocation2], %s6505_s18  ;;  %v993_v31 = vsel %vm6528_vm11, %v992_v50, %v3544_v10  ;;  %v2467_v59 = vadd.f32 %v2436_v58, %v882_v13 }
 0x39b   : > { %v3660_v35 = vld [vmem:[%s6519_s27] ss:$0 sm:$0xff]  ;;  %s6522_s6 = sld [smem:[#allocation48_spill]]  ;;  %s6525_s16 = scalar_lea.vmem [#allocation2], %s6509_s7  ;;  %v1104_v33 = vsel %vm6477_vm0, %v1103_v21, %v3627_v43  ;;  %vm6614_vm0 = vmmov %vm6483_vm6 }
 0x39c   : > { %v3681_v34 = vld [vmem:[%s6520_s11] ss:$0 sm:$0xff]  ;;  %s6523_s29 = sld [smem:[#allocation91_spill]]  ;;  %s6526_s14 = scalar_lea.vmem [#allocation2], %s6510_s9  ;;  %v1214_v63 = vsel %vm509_vm4, %v1213_v38, %v3660_v35 }
 0x39d   : > { %v3709_v41 = vld [vmem:[%s6521_s5] ss:$0 sm:$0xff]  ;;  %s6524_s24 = sld [smem:[#allocation112_spill]]  ;;  %s6534_s7 = sadd.s32 13, %s4313_s30  ;;  %v1326_v56 = vsel %vm509_vm4, %v1325_v2, %v3681_v34 }
 0x39e   : > { %v3545_v12 = vld [vmem:[%s6525_s16] ss:$0 sm:$0xff]  ;;  %s6529_s20 = scalar_lea.vmem [#allocation2], %s6514_s10  ;;  %s6531_s18 = sld [smem:[#allocation127_spill]]  ;;  %v1438_v23 = vsel %vm509_vm4, %v1437_v39, %v3709_v41 }
 0x39f   : > { %v3628_v42 = vld [vmem:[%s6526_s14] ss:$0 sm:$0xff]  ;;  %s6530_s1 = scalar_lea.vmem [#allocation2], %s6516_s21  ;;  %s6533_s28 = sld [smem:[#allocation140_spill]]  ;;  %v994_v1 = vsel %vm6483_vm6, %v993_v31, %v3545_v12  ;;  %vm6615_vm6 = vmmov %vm6577_vm7 }
 0x3a0   : > { %v3661_v15 = vld [vmem:[%s6529_s20] ss:$0 sm:$0xff]  ;;  %s6532_s26 = scalar_lea.vmem [#allocation2], %s6518_s0  ;;  %s5787_s9 = sld [smem:[#allocation5 + %s6534_s7]]  ;;  %v1105_v0 = vsel %vm6552_vm12, %v1104_v33, %v3628_v42  ;;  %v2498_v17 = vadd.f32 %v2467_v59, %v994_v1  ;;  %vm6619_vm12 = vmmov %vm6615_vm6 }
 0x3a1   : > { %v3682_v62 = vld [vmem:[%s6530_s1] ss:$0 sm:$0xff]  ;;  %s6535_s3 = sld [smem:[#allocation55_spill]]  ;;  %s6537_s10 = scalar_lea.vmem [#allocation2], %s6522_s6  ;;  %v1215_v7 = vsel %vm511_vm5, %v1214_v63, %v3661_v15 }
 0x3a2   : > { %v3710_v25 = vld [vmem:[%s6532_s26] ss:$0 sm:$0xff]  ;;  %s6536_s27 = sld [smem:[#allocation62_spill]]  ;;  %s6538_s21 = scalar_lea.vmem [#allocation2], %s6523_s29  ;;  %v1327_v45 = vsel %vm511_vm5, %v1326_v56, %v3682_v62 }
 0x3a3   : > { %v3553_v18 = vld [vmem:[%s6537_s10] ss:$0 sm:$0xff]  ;;  %s6539_s0 = scalar_lea.vmem [#allocation2], %s6524_s24  ;;  %s6540_s11 = sld [smem:[#allocation49_spill]]  ;;  %v1439_v22 = vsel %vm511_vm5, %v1438_v23, %v3710_v25 }
 0x3a4   : > { %v3629_v8 = vld [vmem:[%s6538_s21] ss:$0 sm:$0xff]  ;;  %s6541_s5 = sld [smem:[#allocation56_spill]]  ;;  %s1476_s16 = scalar_lea.vmem [#allocation2], %s5686_s22 }
 0x3a5   : > { %v3662_v3 = vld [vmem:[%s6539_s0] ss:$0 sm:$0xff]  ;;  %s6542_s14 = sadd.s32 14, %s4313_s30  ;;  %s6543_s1 = scalar_lea.vmem [#allocation2], %s6531_s18  ;;  %v1106_v52 = vsel %vm6575_vm10, %v1105_v0, %v3629_v8  ;;  %vm6624_vm10 = vmmov %vm6614_vm0 }
 0x3a6   : > { %v1477_v30 = vld [vmem:[%s1476_s16] sm:$0x1]  ;;  %s5802_s20 = sld [smem:[#allocation5 + %s6542_s14]]  ;;  %s6545_s6 = scalar_lea.vmem [#allocation2], %s6533_s28  ;;  %v1216_v37 = vsel %vm6577_vm7, %v1215_v7, %v3662_v3  ;;  %v2529_v41 = vadd.f32 %v2498_v17, %v1106_v52  ;;  %vm6626_vm7 = vmmov %vm6614_vm0 }
 0x3a7   : > { %s6544_s26 = sld [smem:[#allocation50_spill]]  ;;  %v3683_v5 = vld [vmem:[%s6543_s1] ss:$0 sm:$0xff]  ;;  %s1700_s7 = scalar_lea.vmem [#allocation2], %s5697_s12  ;;  %v1548_v53 = vsel %vm505_vm2, %v1477_v30, %v3553_v18 }
 0x3a8   : > { %s6546_s29 = sld [smem:[#allocation57_spill]]  ;;  %v3711_v47 = vld [vmem:[%s6545_s6] ss:$0 sm:$0xff]  ;;  %s6549_s21 = scalar_lea.vmem [#allocation2], %s6535_s3  ;;  %v1328_v46 = vsel %vm6578_vm13, %v1327_v45, %v3683_v5  ;;  %vm6627_vm13 = vmmov %vm6615_vm6 }
 0x3a9   : > { %s6547_s24 = sld [smem:[#allocation113_spill]]  ;;  %v1701_v16 = vld [vmem:[%s1700_s7] sm:$0x1]  ;;  %s6550_s0 = scalar_lea.vmem [#allocation2], %s6536_s27  ;;  %v1440_v49 = vsel %vm6579_vm8, %v1439_v22, %v3711_v47  ;;  %vm6633_vm8 = vmmov %vm6528_vm11 }
 0x3aa   : > { %s6548_s10 = sld [smem:[#allocation129_spill]]  ;;  %v3567_v9 = vld [vmem:[%s6549_s21] ss:$0 sm:$0xff]  ;;  %s6557_s12 = scalar_lea.vmem [#allocation2], %s6540_s11 }
 0x3ab   : > { %v3581_v11 = vld [vmem:[%s6550_s0] ss:$0 sm:$0xff]  ;;  %s6553_s22 = sld [smem:[#allocation51_spill]]  ;;  %s6558_s14 = scalar_lea.vmem [#allocation2], %s6541_s5  ;;  %v1772_v57 = vsel %vm505_vm2, %v1701_v16, %v3567_v9 }
 0x3ac   : > { %s6554_s16 = sld [smem:[#allocation58_spill]]  ;;  %v3554_v27 = vld [vmem:[%s6557_s12] ss:$0 sm:$0xff]  ;;  %s1588_s3 = scalar_lea.vmem [#allocation2], %s5733_s15 }
 0x3ad   : > { %s6555_s18 = sld [smem:[#allocation63_spill]]  ;;  %v3568_v32 = vld [vmem:[%s6558_s14] ss:$0 sm:$0xff]  ;;  %s6559_s27 = sadd.s32 15, %s4313_s30  ;;  %v1549_v12 = vsel %vm507_vm3, %v1548_v53, %v3554_v27 }
 0x3ae   : > { %s6556_s28 = sld [smem:[#allocation69_spill]]  ;;  %v1589_v26 = vld [vmem:[%s1588_s3] sm:$0x1]  ;;  %s6560_s6 = scalar_lea.vmem [#allocation2], %s6544_s26  ;;  %v1773_v13 = vsel %vm507_vm3, %v1772_v57, %v3568_v32 }
 0x3af   : > { %s5824_s1 = sld [smem:[#allocation5 + %s6559_s27]]  ;;  %v3555_v29 = vld [vmem:[%s6560_s6] ss:$0 sm:$0xff]  ;;  %s6561_s7 = scalar_lea.vmem [#allocation2], %s6546_s29  ;;  %v1660_v60 = vsel %vm505_vm2, %v1589_v26, %v3581_v11 }
 0x3b0   : > { %s6562_s21 = sld [smem:[#allocation64_spill]]  ;;  %v3569_v6 = vld [vmem:[%s6561_s7] ss:$0 sm:$0xff]  ;;  %s6563_s0 = scalar_lea.vmem [#allocation2], %s6547_s24  ;;  %v1550_v63 = vsel %vm509_vm4, %v1549_v12, %v3555_v29 }
 0x3b1   : > { %v3663_v20 = vld [vmem:[%s6563_s0] ss:$0 sm:$0xff]  ;;  %s6564_s19 = scalar_lea.vmem [#allocation2], %s6548_s10  ;;  %s6565_s11 = scalar_lea.vmem [#allocation2], %s6551_s13  ;;  %v1774_v23 = vsel %vm509_vm4, %v1773_v13, %v3569_v6 }
 0x3b2   : > { %v3684_v40 = vld [vmem:[%s6564_s19] ss:$0 sm:$0xff]  ;;  %s6566_s12 = sld [smem:[#allocation70_spill]]  ;;  %s6567_s5 = scalar_lea.vmem [#allocation2], %s6553_s22  ;;  %v1217_v35 = vsel %vm6592_vm15, %v1216_v37, %v3663_v20  ;;  %vm6638_vm15 = vmmov %vm6633_vm8 }
 0x3b3   : > { %v3712_v51 = vld [vmem:[%s6565_s11] ss:$0 sm:$0xff]  ;;  %s6568_s15 = sld [smem:[#allocation65_spill]]  ;;  %s6569_s14 = scalar_lea.vmem [#allocation2], %s6554_s16  ;;  %v1329_v34 = vsel %vm6594_vm14, %v1328_v46, %v3684_v40  ;;  %vm6648_vm14 = vmmov %vm6614_vm0 }
 0x3b4   : > { %v3556_v44 = vld [vmem:[%s6567_s5] ss:$0 sm:$0xff]  ;;  %s6570_s3 = sld [smem:[#allocation71_spill]]  ;;  %s6571_s26 = scalar_lea.vmem [#allocation2], %s6555_s18  ;;  %v1441_v58 = vsel %vm6528_vm11, %v1440_v49, %v3712_v51  ;;  %vm6649_vm11 = vmmov %vm6615_vm6 }
 0x3b5   : > { %v3570_v54 = vld [vmem:[%s6569_s14] ss:$0 sm:$0xff]  ;;  %s6572_s27 = sld [smem:[#allocation52_spill]]  ;;  %s6573_s29 = scalar_lea.vmem [#allocation2], %s6556_s28  ;;  %v1551_v8 = vsel %vm511_vm5, %v1550_v63, %v3556_v44 }
 0x3b6   : > { %v3582_v4 = vld [vmem:[%s6571_s26] ss:$0 sm:$0xff]  ;;  %s6574_s6 = sld [smem:[#allocation59_spill]]  ;;  %s6581_s13 = scalar_lea.vmem [#allocation2], %s6562_s21  ;;  %v1775_v59 = vsel %vm511_vm5, %v1774_v23, %v3570_v54 }
 0x3b7   : > { %v3595_v14 = vld [vmem:[%s6573_s29] ss:$0 sm:$0xff]  ;;  %s6576_s24 = sld [smem:[#allocation114_spill]]  ;;  %s1812_s16 = scalar_lea.vmem [#allocation2], %s5756_s23  ;;  %v1661_v42 = vsel %vm507_vm3, %v1660_v60, %v3582_v4 }
 0x3b8   : > { %s6580_s19 = sld [smem:[#allocation53_spill]]  ;;  %v3583_v36 = vld [vmem:[%s6581_s13] ss:$0 sm:$0xff]  ;;  %s6584_s18 = scalar_lea.vmem [#allocation2], %s6566_s12 }
 0x3b9   : > { %s6582_s10 = sld [smem:[#allocation66_spill]]  ;;  %v1813_v61 = vld [vmem:[%s1812_s16] sm:$0x1]  ;;  %s6585_s28 = scalar_lea.vmem [#allocation2], %s6568_s15  ;;  %v1662_v56 = vsel %vm509_vm4, %v1661_v42, %v3583_v36 }
 0x3ba   : > { %s6583_s22 = sld [smem:[#allocation72_spill]]  ;;  %v3596_v24 = vld [vmem:[%s6584_s18] ss:$0 sm:$0xff]  ;;  %s6586_s7 = scalar_lea.vmem [#allocation2], %s6570_s3  ;;  %v1884_v31 = vsel %vm505_vm2, %v1813_v61, %v3595_v14 }
 0x3bb   : > { %v3584_v10 = vld [vmem:[%s6585_s28] ss:$0 sm:$0xff]  ;;  %s6587_s0 = sld [smem:[#allocation67_spill]]  ;;  %s6588_s11 = scalar_lea.vmem [#allocation2], %s6572_s27  ;;  %v1885_v18 = vsel %vm507_vm3, %v1884_v31, %v3596_v24 }
 0x3bc   : > { %v3597_v43 = vld [vmem:[%s6586_s7] ss:$0 sm:$0xff]  ;;  %s6589_s5 = scalar_lea.vmem [#allocation2], %s6574_s6  ;;  %s6591_s14 = sld [smem:[#allocation130_spill]]  ;;  %v1663_v3 = vsel %vm511_vm5, %v1662_v56, %v3584_v10 }
 0x3bd   : > { %v3557_v55 = vld [vmem:[%s6588_s11] ss:$0 sm:$0xff]  ;;  %s6590_s21 = scalar_lea.vmem [#allocation2], %s6576_s24  ;;  %s6593_s26 = sld [smem:[#allocation142_spill]]  ;;  %v1886_v1 = vsel %vm509_vm4, %v1885_v18, %v3597_v43 }
 0x3be   : > { %v3571_v50 = vld [vmem:[%s6589_s5] ss:$0 sm:$0xff]  ;;  %s6595_s23 = scalar_lea.vmem [#allocation2], %s6580_s19  ;;  %s6598_s3 = sld [smem:[#allocation92_spill]]  ;;  %v1552_v11 = vsel %vm6615_vm6, %v1551_v8, %v3557_v55 }
 0x3bf   : > { %v3664_v21 = vld [vmem:[%s6590_s21] ss:$0 sm:$0xff]  ;;  %s6596_s12 = scalar_lea.vmem [#allocation2], %s6582_s10  ;;  %s6599_s27 = sld [smem:[#allocation115_spill]]  ;;  %v1776_v20 = vsel %vm6627_vm13, %v1775_v59, %v3571_v50 }
 0x3c0   : > { %v3558_v38 = vld [vmem:[%s6595_s23] ss:$0 sm:$0xff]  ;;  %s6597_s15 = scalar_lea.vmem [#allocation2], %s6583_s22  ;;  %s6601_s6 = sld [smem:[#allocation54_spill]]  ;;  %v1218_v9 = vsel %vm6614_vm0, %v1217_v35, %v3664_v21 }
 0x3c1   : > { %v3585_v2 = vld [vmem:[%s6596_s12] ss:$0 sm:$0xff]  ;;  %s6600_s29 = scalar_lea.vmem [#allocation2], %s6587_s0  ;;  %s6602_s24 = sld [smem:[#allocation73_spill]]  ;;  %v1553_v4 = vsel %vm6633_vm8, %v1552_v11, %v3558_v38  ;;  %v2560_v49 = vadd.f32 %v2529_v41, %v1218_v9 }
 0x3c2   : > { %v3598_v39 = vld [vmem:[%s6597_s15] ss:$0 sm:$0xff]  ;;  %s1924_s19 = scalar_lea.vmem [#allocation2], %s5787_s9  ;;  %s6603_s13 = scalar_lea.vmem [#allocation2], %s6591_s14  ;;  %v1664_v22 = vsel %vm6619_vm12, %v1663_v3, %v3585_v2 }
 0x3c3   : > { %v3586_v15 = vld [vmem:[%s6600_s29] ss:$0 sm:$0xff]  ;;  %s6604_s10 = scalar_lea.vmem [#allocation2], %s6593_s26  ;;  %s6605_s22 = sld [smem:[#allocation93_spill]]  ;;  %v1887_v40 = vsel %vm511_vm5, %v1886_v1, %v3598_v39 }
 0x3c4   : > { %v1925_v62 = vld [vmem:[%s1924_s19] sm:$0x1]  ;;  %s6606_s16 = sld [smem:[#allocation116_spill]]  ;;  %s6610_s7 = scalar_lea.vmem [#allocation2], %s6598_s3  ;;  %v1665_v57 = vsel %vm6638_vm15, %v1664_v22, %v3586_v15 }
 0x3c5   : > { %v3685_v25 = vld [vmem:[%s6603_s13] ss:$0 sm:$0xff]  ;;  %s6607_s18 = sld [smem:[#allocation94_spill]]  ;;  %s6611_s0 = scalar_lea.vmem [#allocation2], %s6599_s27 }
 0x3c6   : > { %v3713_v33 = vld [vmem:[%s6604_s10] ss:$0 sm:$0xff]  ;;  %s6608_s9 = sld [smem:[#allocation95_spill]]  ;;  %s6612_s11 = scalar_lea.vmem [#allocation2], %s6601_s6  ;;  %v1330_v29 = vsel %vm6624_vm10, %v1329_v34, %v3685_v25 }
 0x3c7   : > { %s6609_s28 = sld [smem:[#allocation117_spill]]  ;;  %v3722_v30 = vld [vmem:[%s6610_s7] ss:$0 sm:$0xff]  ;;  %s6613_s5 = scalar_lea.vmem [#allocation2], %s6602_s24  ;;  %v1442_v6 = vsel %vm6626_vm7, %v1441_v58, %v3713_v33  ;;  %v2591_v35 = vadd.f32 %v2560_v49, %v1330_v29 }
 0x3c8   : > { %v3729_v5 = vld [vmem:[%s6611_s0] ss:$0 sm:$0xff]  ;;  %s6617_s14 = sld [smem:[#allocation60_spill]]  ;;  %s2036_s26 = scalar_lea.vmem [#allocation2], %s5802_s20  ;;  %v1996_v14 = vsel %vm505_vm2, %v1925_v62, %v3722_v30 }
 0x3c9   : > { %v3559_v47 = vld [vmem:[%s6612_s11] ss:$0 sm:$0xff]  ;;  %s6616_s21 = scalar_lea.vmem [#allocation2], %s6605_s22  ;;  %s6620_s12 = sld [smem:[#allocation118_spill]]  ;;  %v2622_v31 = vadd.f32 %v2591_v35, %v1442_v6 }
 0x3ca   : > { %v3599_v16 = vld [vmem:[%s6613_s5] ss:$0 sm:$0xff]  ;;  %s6618_s23 = scalar_lea.vmem [#allocation2], %s6606_s16  ;;  %s6625_s29 = sld [smem:[#allocation68_spill]]  ;;  %v1554_v41 = vsel %vm6648_vm14, %v1553_v4, %v3559_v47 }
 0x3cb   : > { %v3723_v0 = vld [vmem:[%s6616_s21] ss:$0 sm:$0xff]  ;;  %s6621_s15 = scalar_lea.vmem [#allocation2], %s6607_s18  ;;  %s6628_s20 = sld [smem:[#allocation96_spill]]  ;;  %v1888_v58 = vsel %vm6649_vm11, %v1887_v40, %v3599_v16  ;;  %v2653_v18 = vadd.f32 %v2622_v31, %v1554_v41 }
 0x3cc   : > { %v2037_v7 = vld [vmem:[%s2036_s26] sm:$0x1]  ;;  %s6622_s3 = scalar_lea.vmem [#allocation2], %s6608_s9  ;;  %s2148_s6 = scalar_lea.vmem [#allocation2], %s5824_s1  ;;  %v1997_v60 = vsel %vm507_vm3, %v1996_v14, %v3723_v0 }
 0x3cd   : > { %v3730_v45 = vld [vmem:[%s6618_s23] ss:$0 sm:$0xff]  ;;  %s6623_s27 = scalar_lea.vmem [#allocation2], %s6609_s28  ;;  %s6629_s24 = scalar_lea.vmem [#allocation2], %s5556_s8  ;;  %v2108_v37 = vsel %vm505_vm2, %v2037_v7, %v3729_v5 }
 0x3ce   : > { %v3724_v27 = vld [vmem:[%s6621_s15] ss:$0 sm:$0xff]  ;;  %s6630_s19 = sld [smem:[#allocation75_spill]]  ;;  %s6631_s13 = scalar_lea.vmem [#allocation2], %s5560_s25  ;;  %v2109_v61 = vsel %vm507_vm3, %v2108_v37, %v3730_v45 }
 0x3cf   : > { %v3725_v32 = vld [vmem:[%s6622_s3] ss:$0 sm:$0xff]  ;;  %s6632_s10 = scalar_lea.vmem [#allocation2], %s6617_s14  ;;  %s6634_s22 = scalar_lea.vmem [#allocation2], %s6620_s12  ;;  %v1998_v43 = vsel %vm509_vm4, %v1997_v60, %v3724_v27 }
 0x3d0   : > { %v3731_v26 = vld [vmem:[%s6623_s27] ss:$0 sm:$0xff]  ;;  %s6635_s16 = sld [smem:[#allocation61_spill]]  ;;  %s6636_s18 = scalar_lea.vmem [#allocation2], %s5564_s4  ;;  %v1999_v38 = vsel %vm511_vm5, %v1998_v43, %v3725_v32 }
 0x3d1   : > { %v2149_v17 = vld [vmem:[%s2148_s6] sm:$0x1]  ;;  %s6637_s8 = scalar_lea.vmem [#allocation2], %s6625_s29  ;;  %s6639_s25 = sld [smem:[#allocation119_spill]]  ;;  %v2110_v55 = vsel %vm509_vm4, %v2109_v61, %v3731_v26 }
 0x3d2   : > { %v3736_v51 = vld [vmem:[%s6629_s24] ss:$0 sm:$0xff]  ;;  %s6640_s1 = scalar_lea.vmem [#allocation2], %s6628_s20  ;;  %s6641_s9 = sld [smem:[#allocation98_spill]] }
 0x3d3   : > { %v3737_v44 = vld [vmem:[%s6631_s13] ss:$0 sm:$0xff]  ;;  %v2220_v24 = vsel %vm505_vm2, %v2149_v17, %v3736_v51  ;;  %s6643_s4 = sld [smem:[#allocation76_spill]]  ;;  %s6644_s7 = scalar_lea.vmem [#allocation2], %s5568_s17  ;;  %vm6652_vm2 = vmmov %vm6633_vm8 }
 0x3d4   : > { %v3572_v54 = vld [vmem:[%s6632_s10] ss:$0 sm:$0xff]  ;;  %s6642_s28 = scalar_lea.vmem [#allocation2], %s6630_s19  ;;  %s6645_s0 = sld [smem:[#allocation143_spill]]  ;;  %v2221_v21 = vsel %vm507_vm3, %v2220_v24, %v3737_v44  ;;  %vm6656_vm3 = vmmov %vm6614_vm0 }
 0x3d5   : > { %v3732_v52 = vld [vmem:[%s6634_s22] ss:$0 sm:$0xff]  ;;  %s6647_s5 = sld [smem:[#allocation121_spill]]  ;;  %v1777_v12 = vsel %vm6652_vm2, %v1776_v20, %v3572_v54  ;;  %vm6657_vm0 = vmmov %vm6615_vm6  ;;  %s4092_s13 = smov 64   ;;  %v2873_v54 = vadd.f32 %v5589_v28, %v5099_v48 }
 0x3d6   : > { %v3738_v46 = vld [vmem:[%s6636_s18] ss:$0 sm:$0xff]  ;;  %s6646_s11 = scalar_lea.vmem [#allocation2], %s6635_s16  ;;  %s6651_s14 = sld [smem:[#allocation99_spill]]  ;;  %v2111_v13 = vsel %vm511_vm5, %v2110_v55, %v3732_v52  ;;  %vm6660_vm6 = vmmov %vm6652_vm2  ;;  %v2895_v1 = vpop.permute.xlu2 %2894 }
 0x3d7   : > { %v3587_v53 = vld [vmem:[%s6637_s8] ss:$0 sm:$0xff]  ;;  %s6650_s21 = scalar_lea.vmem [#allocation2], %s6639_s25  ;;  %v2222_v39 = vsel %vm509_vm4, %v2221_v21, %v3738_v46  ;;  %s6654_s26 = sld [smem:[#allocation144_spill]]  ;;  %vm6662_vm4 = vmmov %vm6656_vm3  ;;  %v2897_v16 = vadd.f32 %v2895_v1, %v5099_v48  ;;  %v3410_v4 = vmul.f32 -1.442695, %v2873_v54  ;;  %v2909_v21 = vpop.permute.xlu1 %2908 }
 0x3d8   : > { %v3726_v36 = vld [vmem:[%s6640_s1] ss:$0 sm:$0xff]  ;;  %s6653_s17 = scalar_lea.vmem [#allocation2], %s6641_s9  ;;  %v1666_v62 = vsel %vm6656_vm3, %v1665_v57, %v3587_v53  ;;  %s6658_s12 = sld [smem:[#allocation122_spill]]  ;;  %vm6665_vm12 = vmmov %vm6657_vm0 }
 0x3d9   : > { %v3600_v10 = vld [vmem:[%s6642_s28] ss:$0 sm:$0xff]  ;;  %s6655_s23 = scalar_lea.vmem [#allocation2], %s6643_s4  ;;  %v2000_v25 = vsel %vm6657_vm0, %v1999_v38, %v3726_v36  ;;  %s6663_s27 = sld [smem:[#allocation77_spill]]  ;;  %vm6666_vm10 = vmmov %vm6652_vm2  ;;  %v2684_v47 = vadd.f32 %v2653_v18, %v1666_v62  ;;  %3807 = vtanh.f32 %v2897_v16 }
 0x3da   : > { %v3739_v50 = vld [vmem:[%s6644_s7] ss:$0 sm:$0xff]  ;;  %s6659_s15 = scalar_lea.vmem [#allocation2], %s6645_s0  ;;  %v1889_v63 = vsel %vm6660_vm6, %v1888_v58, %v3600_v10  ;;  %vm6668_vm7 = vmmov %vm6656_vm3  ;;  %s6672_s24 = sld [smem:[#allocation33_spill]]  ;;  %3809 = vpow2.f32 %v3410_v4 }
 0x3db   : > { %v3573_v34 = vld [vmem:[%s6646_s11] ss:$0 sm:$0xff]  ;;  %s6661_s3 = scalar_lea.vmem [#allocation2], %s6647_s5  ;;  %v2223_v23 = vsel %vm511_vm5, %v2222_v39, %v3739_v50  ;;  %vm6670_vm5 = vmmov %vm6657_vm0  ;;  %s4093_s22 = smov 96  }
 0x3dc   : > { %v3733_v2 = vld [vmem:[%s6650_s21] ss:$0 sm:$0xff]  ;;  %v1778_v8 = vsel %vm6662_vm4, %v1777_v12, %v3573_v34  ;;  %s6664_s29 = scalar_lea.vmem [#allocation2], %s6651_s14  ;;  %vm6671_vm13 = vmmov %vm6652_vm2  ;;  %s6679_s16 = sld [smem:[#allocation74_spill]]  ;;  %vm2926_vm4 = vcmask 253952  }
 0x3dd   : > { %v3727_v42 = vld [vmem:[%s6653_s17] ss:$0 sm:$0xff]  ;;  %v2112_v59 = vsel %vm6665_vm12, %v2111_v13, %v3733_v2  ;;  %s6667_s20 = scalar_lea.vmem [#allocation2], %s6654_s26  ;;  %v2715_v45 = vadd.f32 %v2684_v47, %v1778_v8  ;;  %vm6673_vm8 = vmmov %vm6656_vm3  ;;  %s6680_s18 = sld [smem:[#allocation97_spill]]  ;;  %vm2930_vm12 = vcmask 254977  }
 0x3de   : > { %v3601_v15 = vld [vmem:[%s6655_s23] ss:$0 sm:$0xff]  ;;  %v2001_v30 = vsel %vm6666_vm10, %v2000_v25, %v3727_v42  ;;  %s6669_s6 = scalar_lea.vmem [#allocation2], %s6658_s12  ;;  %vm6675_vm15 = vmmov %vm6652_vm2  ;;  %s6681_s8 = sld [smem:[#allocation128_spill]]  ;;  %vm2934_vm10 = vcmask 256002  }
 0x3df   : > { %v3740_v33 = vld [vmem:[%s6659_s15] ss:$0 sm:$0xff]  ;;  %v1890_v9 = vsel %vm6668_vm7, %v1889_v63, %v3601_v15  ;;  %s6674_s19 = scalar_lea.vmem [#allocation2], %s6663_s27  ;;  %vm6676_vm14 = vmmov %vm6656_vm3  ;;  %v3808_v17 = vpop.eup %3807  ;;  %s6682_s25 = sld [smem:[#allocation82_spill]]  ;;  %vm2938_vm7 = vcmask 257027  }
 0x3e0   : > { %v3734_v56 = vld [vmem:[%s6661_s3] ss:$0 sm:$0xff]  ;;  %v2224_v0 = vsel %vm6670_vm5, %v2223_v23, %v3740_v33  ;;  %v2746_v26 = vadd.f32 %v2715_v45, %v1890_v9  ;;  %vm6677_vm11 = vmmov %vm6656_vm3  ;;  %2902 = vrot.lane.b32.xlu0 %v3808_v17, %s4092_s13  ;;  %s6678_s10 = scalar_lea.vmem [#allocation10], %s6672_s24  ;;  %v3810_v14 = vpop.eup %3809  ;;  %s6683_s1 = sld [smem:[#allocation105_spill]]  ;;  %vm2942_vm5 = vcmask 258052  }
 0x3e1   : > { %v3728_v3 = vld [vmem:[%s6664_s29] ss:$0 sm:$0xff]  ;;  %v2113_v7 = vsel %vm6671_vm13, %v2112_v59, %v3734_v56  ;;  %v2877_v52 = vadd.f32 1.0, %v3810_v14  ;;  %s6684_s9 = sld [smem:[#allocation120_spill]]  ;;  %vm2946_vm13 = vcmask 259077  }
 0x3e2   : > { %v3741_v5 = vld [vmem:[%s6667_s20] ss:$0 sm:$0xff]  ;;  %v2002_v22 = vsel %vm6673_vm8, %v2001_v30, %v3728_v3  ;;  %s6685_s28 = sld [smem:[#allocation27_spill]]  ;;  %vm2921_vm8 = vcmask 785408   ;;  %s6687_s20 = scalar_lea.vmem [#allocation16], %s6672_s24 }
 0x3e3   : > { %v3735_v11 = vld [vmem:[%s6669_s6] ss:$0 sm:$0xff]  ;;  %v2225_v32 = vsel %vm6675_vm15, %v2224_v0, %v3741_v5  ;;  %v2777_v6 = vadd.f32 %v2746_v26, %v2002_v22  ;;  %3811 = vrcp.f32 %v2877_v52  ;;  %v2889_v36 = vand.u32 2147483648, %v2877_v52  ;;  %s5995_s4 = sld [smem:[#allocation6 + %s6403_s2]]  ;;  %s6021_s6 = sshll.u32 %s6687_s20, 4  ;;  %s2970_s6 = int_to_ptr.vmem [resolvable:$true] %s6021_s6 }
 0x3e4   : > { %v3742_v27 = vld [vmem:[%s6674_s19] ss:$0 sm:$0xff]  ;;  %v2114_v29 = vsel %vm6676_vm14, %v2113_v7, %v3735_v11  ;;  %vm2883_vm3 = vweird.f32 %v2877_v52  ;;  %v2887_v48 = vand.u32 2147483647, %v2877_v52  ;;  %s2924_s7 = sld [smem:[#allocation6 + %s4313_s30]]  ;;  %vm2950_vm15 = vcmask 260102  }
 0x3e5   : > { %v2226_v20 = vsel %vm6677_vm11, %v2225_v32, %v3742_v27  ;;  %v2808_v40 = vadd.f32 %v2777_v6, %v2114_v29  ;;  %v2907_v44 = vld [vmem:[%s6678_s10] sm:$0xff]  ;;  %v2890_v60 = vor.u32 1.1754944e-38, %v2889_v36  ;;  %s2928_s0 = sld [smem:[#allocation6 + %s6679_s16]] }
 0x3e6   : > { %vm2888_vm6 = vcmp.eq.f32.partialorder %v2887_v48, 8.507059e+37  ;;  %s2932_s11 = sld [smem:[#allocation6 + %s6680_s18]] }
 0x3e7   : > { %v2839_v51 = vadd.f32 %v2808_v40, %v2226_v20  ;;  %s6001_s5 = sld [smem:[#allocation6 + %s6681_s8]] }
 0x3e8   : > { %2916 = vrot.lane.b32.xlu0 %v2907_v44, %s4093_s22  ;;  %s6004_s21 = sld [smem:[#allocation6 + %s6682_s25]]  ;;  %s3412_s2 = sshll.u32 %s6685_s28, 3 }
 0x3e9   : > { %2912 = vrot.lane.b32.xlu2 %v2839_v51, %s4092_s13  ;;  %v3812_v37 = vpop.eup %3811  ;;  %s6007_s14 = sld [smem:[#allocation6 + %s6683_s1]]  ;;  %s2941_s10 = scalar_lea.vmem [#allocation2], %s5995_s4 }
 0x3ea   : > { %v2879_v46 = vmul.f32 %v3812_v37, %v2877_v52  ;;  %vm2884_vm2 = vweird.f32 %v3812_v37  ;;  %s6010_s17 = sld [smem:[#allocation6 + %s6684_s9]]  ;;  %s2925_s30 = scalar_lea.vmem [#allocation2], %s2924_s7 }
 0x3eb   : > { %vm2885_vm0 = vmor %vm2883_vm3, %vm2884_vm2  ;;  %s6686_s12 = sld [smem:[#allocation151_spill]]  ;;  %s2929_s3 = scalar_lea.vmem [#allocation2], %s2928_s0 }
 0x3ec   : > { %v2880_v49 = vsub.f32 1.0, %v2879_v46  ;;  %s2933_s27 = scalar_lea.vmem [#allocation2], %s2932_s11  ;;  %s6688_s19 = sld [smem:[#allocation32_spill]] }
 0x3ed   : > { %s2937_s29 = scalar_lea.vmem [#allocation2], %s6001_s5  ;;  %s6690_s25 = smov %s6687_s20 }
 0x3ee   : > { %v2881_v53 = vmul.f32 %v3812_v37, %v2880_v49  ;;  %s2945_s16 = scalar_lea.vmem [#allocation2], %s6004_s21 }
 0x3ef   : > { %s2949_s18 = scalar_lea.vmem [#allocation2], %s6007_s14 }
 0x3f0   : > { %v2882_v57 = vadd.f32 %v3812_v37, %v2881_v53  ;;  %s2953_s8 = scalar_lea.vmem [#allocation2], %s6010_s17 }
 0x3f1   : > { %s2967_s15 = scalar_lea.hbm %s6686_s12, %s3412_s2  ;;  %s4020_s0 = scalar_lea.hbm %s6686_s12, 56 }
 0x3f2   : > { %v2886_v28 = vsel %vm2885_vm0, %v3812_v37, %v2882_v57  ;;  %s2971_s13 = sshll.u32 %s2967_s15, 4  ;;  %s2957_s1 = scalar_lea.sflag [#allocation9], %s6688_s19  ;;  %s2972_s13 = int_to_ptr.hbm [resolvable:$true] %s2971_s13 }
 0x3f3   : > { %v2891_v61 = vsel %vm2888_vm6, %v2890_v60, %v2886_v28  ;;  %s4014_s9 = sshra.s32 %s2972_s13, 4  ;;  %s4015_s9 = int_to_ptr.hbm [resolvable:$true] %s4014_s9 }
 0x3f4   : > { %v2899_v24 = vsub.f32 1.0, %v2891_v61  ;;  %s4016_s28 = scalar_lea.hbm %s4015_s9, 8  ;;  %p4021_p9 = scmp.lt.s32.totalorder %s4015_s9, %s6686_s12 }
 0x3f5   : > { %p4017_p1 = scmp.ne.s32.totalorder %s4015_s9, %s4016_s28  ;;  %p4022_p8 = scmp.lt.s32.totalorder %s4020_s0, %s4016_s28 }
 0x3f6   : > { %v2900_v43 = vmul.f32 %v2899_v24, %v5549_v19 }
 0x3f7   : > { %p4018_p13 = pnand %p4017_p1, %p4233_p0  ;;  %p4023_p10 = por %p4022_p8, %p4021_p9 }
 0x3f9   : > { %p4019_p7 = pneg %p4018_p13 }
 0x3fb   : > { %p4024_p12 = pnand %p4023_p10, %p4019_p7 }
 0x443   : > { %v2913_v35 = vpop.permute.xlu2 %2912 }
 0x452   : > { %v2903_v10 = vpop.permute.xlu0 %2902 }
 0x453   : > { %v2905_v55 = vmul.f32 %v2903_v10, %v2891_v61 }
 0x455   : > { %v2906_v50 = vadd.f32 %v2905_v55, %v2900_v43 }
 0x457   : > { %2927 = vst.msk [vmem:[%s2925_s30] sm:$0x1] %vm2926_vm4, %v2906_v50  ;;  %v2919_v19 = vsel %vm404_vm1, %v2906_v50, %v2909_v21  ;;  %vm2954_vm1 = vcmask 261127  }
 0x458   : > { %2931 = vst.msk [vmem:[%s2929_s3 - $0x1] sm:$0x2] %vm2930_vm12, %v2906_v50  ;;  %v2920_v41 = vsel %vm2849_vm9, %v2919_v19, %v2913_v35 }
 0x459   : > { %2935 = vst.msk [vmem:[%s2933_s27 - $0x2] sm:$0x4] %vm2934_vm10, %v2906_v50 }
 0x45a   : > { %2939 = vst.msk [vmem:[%s2937_s29 - $0x3] sm:$0x8] %vm2938_vm7, %v2906_v50  ;;  %v2917_v34 = vpop.permute.xlu0 %2916 }
 0x45b   : > { %2943 = vst.msk [vmem:[%s2941_s10 - $0x4] sm:$0x10] %vm2942_vm5, %v2906_v50  ;;  %v2922_v58 = vsel %vm2921_vm8, %v2920_v41, %v2917_v34 }
 0x45c   : > { %2947 = vst.msk [vmem:[%s2945_s16 - $0x5] sm:$0x20] %vm2946_vm13, %v2906_v50 }
 0x45d   : > { %2951 = vst.msk [vmem:[%s2949_s18 - $0x6] sm:$0x40] %vm2950_vm15, %v2906_v50 }
 0x45e   : > { %2955 = vst.msk [vmem:[%s2953_s8 - $0x7] sm:$0x80] %vm2954_vm1, %v2906_v50 }
 0x45f   : > { %2923 = vst [vmem:[%s6690_s25] sm:$0xff] %v2922_v58 }
 0x460   : > { %4027 = shalt.err (!%p4024_p12)
}
 0x461   : > { %3443 = dma.vmem_to_hbm [thread:$0]  (%p4233_p0), %s2970_s6, 128, %s2972_s13, %s2957_s1  }
 0x462 PF: > { %s6691_s24 = sld [smem:[#allocation26_spill]] }
 0x463   : > { %s6692_s21 = sld [smem:[#allocation23_spill]] }
 0x468   : > { %p3473_p3 = scmp.ge.s32.totalorder %s6691_s24, 2 }
 0x469   : > { %s2983_s17 = sand.u32 1, %s6692_s21  }
 0x46a   : > { %p3463_p11 = pnand %p3473_p3, %p4239_p6  ;;  %s2984_s2 = scalar_lea.sflag [#allocation9], %s2983_s17 }
 0x46c   : > { %p3464_p2 = pneg %p3463_p11 }
 0x46e   : > { %4063 = dma.done.wait (%p3464_p2), %s2984_s2, 128  }
 0x46f   : > { %4065 = vsyncadd (%p3464_p2), %s2984_s2, 4294967168  ;;  %s6694_s2 = sld [smem:[#allocation28_spill]] }
 0x470   : > { %s6695_s0 = sld [smem:[#allocation24_spill]] }
 0x471   : > { %s6696_s1 = sld [smem:[#allocation25_spill]] }
 0x472   : > { %s6697_s21 = sld [smem:[#allocation29_spill]] }
 0x475   : > { %p44_p5 = scmp.ge.s32.totalorder %s6694_s2, 9  }
 0x477   :  { %46 = sbr.rel (!%p44_p5) target bundleno = 22 (0x16), region = 382 }
 0x47c   :  { %2990 = vsyncpa [#allocation8], 1 }
 0x47d   :  { %2992 = vsyncpa [#allocation8 + $0x1], 1 }
 0x47e   :  { %2993 = vsyncpa [#allocation11], 1 }
 0x47f   :  { %2995 = vsyncpa [#allocation11 + $0x1], 1 }
 0x480   :  { %2996 = vsyncpa [#allocation14], 1 }
 0x481   :  { %2997 = vsyncpa [#allocation9], 1 }
 0x482   :  { %2999 = vsyncpa [#allocation9 + $0x1], 1 }

</bundles_post_ra>
